<compile_context>
chip_gen: v7x
topology: tpu7x:2x2x1
jax: 0.10.0
libtpu: 0.0.40
codegen_flags: <defaults>
</compile_context>

<pallas_src>
import functools

import jax
import jax.numpy as jnp
from jax.experimental import pallas as pl
from jax.experimental.pallas import tpu as pltpu


_SQRT_HALF = 0.7071067811865476


def _erf(z):
    # Abramowitz & Stegun 7.1.26 (|abs err| <= 1.5e-7).  Built only from ops
    # with guaranteed Mosaic lowerings (exp, mul/add, div, select, abs),
    # since lax.erf itself may not lower inside a TPU Pallas kernel.
    a1, a2, a3 = 0.254829592, -0.284496736, 1.421413741
    a4, a5, p = -1.453152027, 1.061405429, 0.3275911
    sgn = jnp.where(z < 0.0, -1.0, 1.0)
    az = jnp.abs(z)
    t = 1.0 / (1.0 + p * az)
    poly = ((((a5 * t + a4) * t + a3) * t + a2) * t + a1) * t
    return sgn * (1.0 - poly * jnp.exp(-az * az))


def _gelu_exact(x):
    # PyTorch nn.GELU() default (erf formulation).
    return 0.5 * x * (1.0 + _erf(x * _SQRT_HALF))


def _simple_reasoning_kernel(x_ref, w1_ref, b1_ref, w2_ref, b2_ref, o_ref, *,
                             part_len):
    L = part_len
    x = x_ref[...]                                  # (TB, P*L) f32, lane-dense

    # Segmented max over every group of L consecutive lanes (one "part").
    # After the doubling loop, y[i] = max(x[i-L+1 .. i]); the exact per-part
    # max sits at the last lane of each L-lane group.  Lanes whose window
    # wraps across group / array boundaries are never read: fc1's
    # zero-expanded weights only touch the anchor lanes.
    y = x
    w = 1
    while w < L:
        s = min(w, L - w)
        y = jnp.maximum(y, pltpu.roll(y, s, axis=1))
        w += s

    # fc1 (anchor extraction fused with the weights) -> exact GELU -> fc2 with
    # the per-part gate broadcast folded in (w2 pre-expanded to (H, P*L)).
    # bf16 operands, f32 accumulation: single MXU pass per dot.
    h = jnp.dot(y.astype(jnp.bfloat16), w1_ref[...],
                preferred_element_type=jnp.float32) + b1_ref[...]
    h = _gelu_exact(h)
    logits = jnp.dot(h.astype(jnp.bfloat16), w2_ref[...],
                     preferred_element_type=jnp.float32) + b2_ref[...]
    g1 = jax.nn.sigmoid(logits) + 1.0               # residual folded: (1 + gate)
    o_ref[...] = (g1 * x).astype(o_ref.dtype)


def _round_up(n, m):
    return ((n + m - 1) // m) * m


def simple_reasoning(x, w1, b1, w2, b2, *, block_b=256):
    """Fused SimpleReasoning forward.

    x : (B, P, L) float32 (PyTorch NCL layout: batch x parts x length)
    w1: (P, H), b1: (1, H)   -- fc1, stored transposed (row-vector matmul)
    w2: (H, P), b2: (1, P)   -- fc2, stored transposed
    block_b: batch rows per grid step.  256 keeps >= 4 steps at B=1024 so both
      v7x TensorCores stay busy; on v5e/v6e larger blocks (512-1024) amortize
      the ~0.35us/step overhead better as long as the grid keeps >= 2-3 steps.
    """
    B, P, L = x.shape
    H = w1.shape[1]
    PL = P * L
    dtype = x.dtype

    # fc1 zero-expanded to the lane-dense layout: only the anchor lane (last
    # lane of each L-lane group, where the in-kernel rolling max lands) of
    # each part carries weight.  Stored bf16 for single-pass MXU dots.
    w1e = (jnp.zeros((PL, H), jnp.bfloat16)
           .at[L - 1::L, :].set(w1.astype(jnp.bfloat16)))
    b1r = jnp.asarray(b1, jnp.float32).reshape(1, H)
    # fc2 expanded so the gate is produced directly in the lane-dense layout
    # (each part's output column repeated across its L lanes) -> no separate
    # gate-broadcast matmul inside the kernel.
    w2e = jnp.repeat(w2.astype(jnp.bfloat16), L, axis=1)               # (H, P*L)
    b2e = jnp.repeat(jnp.asarray(b2, jnp.float32).reshape(1, P), L, axis=1)

    x2 = x.reshape(B, PL)                      # free reshape, lane-dense view
    tb = max(8, min(_round_up(block_b, 8), _round_up(B, 8)))
    grid = pl.cdiv(B, tb)                      # no pad copy; Pallas clamps the
                                               # partial last block.

    kernel = functools.partial(_simple_reasoning_kernel, part_len=L)
    out2 = pl.pallas_call(
        kernel,
        out_shape=jax.ShapeDtypeStruct((B, PL), dtype),
        grid_spec=pltpu.PrefetchScalarGridSpec(
            num_scalar_prefetch=0,
            grid=(grid,),
            in_specs=[
                pl.BlockSpec((tb, PL), lambda i: (i, 0)),   # x (lane-dense)
                pl.BlockSpec((PL, H), lambda i: (0, 0)),    # fc1, zero-expanded bf16
                pl.BlockSpec((1, H), lambda i: (0, 0)),     # b1
                pl.BlockSpec((H, PL), lambda i: (0, 0)),    # fc2, lane-expanded bf16
                pl.BlockSpec((1, PL), lambda i: (0, 0)),    # b2, lane-expanded
            ],
            out_specs=pl.BlockSpec((tb, PL), lambda i: (i, 0)),
        ),
        compiler_params=pltpu.CompilerParams(
            dimension_semantics=("parallel",),
            vmem_limit_bytes=32 * 1024 * 1024,
        ),
    )(x2, w1e, b1r, w2e, b2e)

    return out2.reshape(B, P, L)


def init_params(key, num_parts, num_groups):
    """nn.Linear-style init (uniform +/- 1/sqrt(fan_in)); weights stored
    transposed for row-vector matmuls: w1 (P, H), w2 (H, P)."""
    hidden = num_parts // num_groups
    k1, k2, k3, k4 = jax.random.split(key, 4)
    bound1 = 1.0 / jnp.sqrt(num_parts)
    bound2 = 1.0 / jnp.sqrt(hidden)
    w1 = jax.random.uniform(k1, (num_parts, hidden), jnp.float32, -bound1, bound1)
    b1 = jax.random.uniform(k2, (1, hidden), jnp.float32, -bound1, bound1)
    w2 = jax.random.uniform(k3, (hidden, num_parts), jnp.float32, -bound2, bound2)
    b2 = jax.random.uniform(k4, (1, num_parts), jnp.float32, -bound2, bound2)
    return w1, b1, w2, b2


def reference(x, w1, b1, w2, b2):
    pooled = jnp.max(x, axis=-1)                                # (B, P)
    h = jax.nn.gelu(jnp.dot(pooled, w1) + b1, approximate=False)
    g = jax.nn.sigmoid(jnp.dot(h, w2) + b2)                     # (B, P)
    return g[..., None] * x + x


if __name__ == "__main__":
    B, P, NG, L = 512, 32, 4, 16         # np=32 parts, ng=4 groups -> hidden=8
    key = jax.random.PRNGKey(0)
    kx, kp = jax.random.split(key)
    x = jax.random.normal(kx, (B, P, L), jnp.float32)
    w1, b1, w2, b2 = init_params(kp, P, NG)

    out = jax.block_until_ready(simple_reasoning(x, w1, b1, w2, b2, block_b=256))
    ref = reference(x, w1, b1, w2, b2)

    assert out.shape == (B, P, L)
    # Tolerance absorbs bf16 MXU operand rounding (fc1/fc2 run as single-pass
    # bf16 matmuls with f32 accumulation); logic errors (wrong pooling / gate /
    # residual) would be orders of magnitude larger.
    err = float(jnp.max(jnp.abs(out - ref)))
    assert jnp.allclose(out, ref, atol=5e-3, rtol=3e-2), err
    print("KERNEL_OK")
</pallas_src>

<mosaic_0001>
module attributes {stable_mosaic.version = 11 : i64} {
  func.func @_simple_reasoning_kernel(%arg0: i32, %arg1: memref<256x512xf32, #tpu.memory_space<vmem>>, %arg2: memref<512x8xbf16, #tpu.memory_space<vmem>>, %arg3: memref<1x8xf32, #tpu.memory_space<vmem>>, %arg4: memref<8x512xbf16, #tpu.memory_space<vmem>>, %arg5: memref<1x512xf32, #tpu.memory_space<vmem>>, %arg6: memref<256x512xf32, #tpu.memory_space<vmem>>) attributes {dimension_semantics = [#tpu.dimension_semantics<parallel>], iteration_bounds = array<i64: 2>, scalar_prefetch = 0 : i64, scratch_operands = 0 : i64, tpu.core_type = #tpu.core_type<tc>, window_params = [{transform_indices = @transform_0, window_bounds = array<i64: 256, 512>}, {pipeline_mode = #tpu.pipeline_mode<synchronous>, transform_indices = @transform_1, window_bounds = array<i64: 512, 8>}, {pipeline_mode = #tpu.pipeline_mode<synchronous>, transform_indices = @transform_2, window_bounds = array<i64: 1, 8>}, {pipeline_mode = #tpu.pipeline_mode<synchronous>, transform_indices = @transform_3, window_bounds = array<i64: 8, 512>}, {pipeline_mode = #tpu.pipeline_mode<synchronous>, transform_indices = @transform_4, window_bounds = array<i64: 1, 512>}, {transform_indices = @transform_5, window_bounds = array<i64: 256, 512>}]} {
    %c0 = arith.constant 0 : index
    %c0_0 = arith.constant 0 : index
    %0 = vector.load %arg1[%c0, %c0_0] : memref<256x512xf32, #tpu.memory_space<vmem>>, vector<256x512xf32>
    %c1_i32 = arith.constant 1 : i32
    %1 = tpu.dynamic_rotate %0 by %c1_i32 dim 1 : vector<256x512xf32>, i32 -> vector<256x512xf32>
    %2 = arith.maximumf %0, %1 : vector<256x512xf32>
    %c2_i32 = arith.constant 2 : i32
    %3 = tpu.dynamic_rotate %2 by %c2_i32 dim 1 : vector<256x512xf32>, i32 -> vector<256x512xf32>
    %4 = arith.maximumf %2, %3 : vector<256x512xf32>
    %c4_i32 = arith.constant 4 : i32
    %5 = tpu.dynamic_rotate %4 by %c4_i32 dim 1 : vector<256x512xf32>, i32 -> vector<256x512xf32>
    %6 = arith.maximumf %4, %5 : vector<256x512xf32>
    %c8_i32 = arith.constant 8 : i32
    %7 = tpu.dynamic_rotate %6 by %c8_i32 dim 1 : vector<256x512xf32>, i32 -> vector<256x512xf32>
    %8 = arith.maximumf %6, %7 : vector<256x512xf32>
    %9 = arith.truncf %8 : vector<256x512xf32> to vector<256x512xbf16>
    %c0_1 = arith.constant 0 : index
    %c0_2 = arith.constant 0 : index
    %10 = vector.load %arg2[%c0_1, %c0_2] : memref<512x8xbf16, #tpu.memory_space<vmem>>, vector<512x8xbf16>
    %cst = arith.constant dense<0.000000e+00> : vector<256x8xf32>
    %11 = tpu.matmul %9, %10, %cst {dimension_numbers = #tpu.dot_dimension_numbers<[1], [0], [0], [1], [0, 0, 1, 1], [], []>} : vector<256x512xbf16>, vector<512x8xbf16>, vector<256x8xf32> -> vector<256x8xf32>
    %c0_3 = arith.constant 0 : index
    %c0_4 = arith.constant 0 : index
    %12 = vector.load %arg3[%c0_3, %c0_4] : memref<1x8xf32, #tpu.memory_space<vmem>>, vector<1x8xf32>
    %13 = vector.broadcast %12 : vector<1x8xf32> to vector<256x8xf32>
    %14 = arith.addf %11, %13 : vector<256x8xf32>
    %cst_5 = arith.constant 5.000000e-01 : f32
    %15 = vector.broadcast %cst_5 : f32 to vector<256x8xf32>
    %16 = arith.mulf %15, %14 : vector<256x8xf32>
    %cst_6 = arith.constant 0.707106769 : f32
    %17 = vector.broadcast %cst_6 : f32 to vector<256x8xf32>
    %18 = arith.mulf %14, %17 : vector<256x8xf32>
    %cst_7 = arith.constant 0.000000e+00 : f32
    %19 = vector.broadcast %cst_7 : f32 to vector<256x8xf32>
    %20 = arith.cmpf olt, %18, %19 : vector<256x8xf32>
    %cst_8 = arith.constant -1.000000e+00 : f32
    %cst_9 = arith.constant 1.000000e+00 : f32
    %21 = vector.broadcast %cst_8 : f32 to vector<256x8xf32>
    %22 = vector.broadcast %cst_9 : f32 to vector<256x8xf32>
    %23 = arith.select %20, %21, %22 : vector<256x8xi1>, vector<256x8xf32>
    %24 = math.absf %18 : vector<256x8xf32>
    %cst_10 = arith.constant 0.327591091 : f32
    %25 = vector.broadcast %cst_10 : f32 to vector<256x8xf32>
    %26 = arith.mulf %25, %24 : vector<256x8xf32>
    %cst_11 = arith.constant 1.000000e+00 : f32
    %27 = vector.broadcast %cst_11 : f32 to vector<256x8xf32>
    %28 = arith.addf %27, %26 : vector<256x8xf32>
    %cst_12 = arith.constant 1.000000e+00 : f32
    %29 = vector.broadcast %cst_12 : f32 to vector<256x8xf32>
    %30 = arith.divf %29, %28 : vector<256x8xf32>
    %cst_13 = arith.constant 1.06140542 : f32
    %31 = vector.broadcast %cst_13 : f32 to vector<256x8xf32>
    %32 = arith.mulf %31, %30 : vector<256x8xf32>
    %cst_14 = arith.constant -1.45315206 : f32
    %33 = vector.broadcast %cst_14 : f32 to vector<256x8xf32>
    %34 = arith.addf %32, %33 : vector<256x8xf32>
    %35 = arith.mulf %34, %30 : vector<256x8xf32>
    %cst_15 = arith.constant 1.42141378 : f32
    %36 = vector.broadcast %cst_15 : f32 to vector<256x8xf32>
    %37 = arith.addf %35, %36 : vector<256x8xf32>
    %38 = arith.mulf %37, %30 : vector<256x8xf32>
    %cst_16 = arith.constant -0.284496725 : f32
    %39 = vector.broadcast %cst_16 : f32 to vector<256x8xf32>
    %40 = arith.addf %38, %39 : vector<256x8xf32>
    %41 = arith.mulf %40, %30 : vector<256x8xf32>
    %cst_17 = arith.constant 0.254829586 : f32
    %42 = vector.broadcast %cst_17 : f32 to vector<256x8xf32>
    %43 = arith.addf %41, %42 : vector<256x8xf32>
    %44 = arith.mulf %43, %30 : vector<256x8xf32>
    %cst_18 = arith.constant 0.000000e+00 : f32
    %45 = vector.broadcast %cst_18 : f32 to vector<256x8xf32>
    %46 = arith.subf %45, %24 : vector<256x8xf32>
    %47 = arith.mulf %46, %24 : vector<256x8xf32>
    %48 = math.exp %47 : vector<256x8xf32>
    %49 = arith.mulf %44, %48 : vector<256x8xf32>
    %cst_19 = arith.constant 1.000000e+00 : f32
    %50 = vector.broadcast %cst_19 : f32 to vector<256x8xf32>
    %51 = arith.subf %50, %49 : vector<256x8xf32>
    %52 = arith.mulf %23, %51 : vector<256x8xf32>
    %cst_20 = arith.constant 1.000000e+00 : f32
    %53 = vector.broadcast %cst_20 : f32 to vector<256x8xf32>
    %54 = arith.addf %53, %52 : vector<256x8xf32>
    %55 = arith.mulf %16, %54 : vector<256x8xf32>
    %56 = arith.truncf %55 : vector<256x8xf32> to vector<256x8xbf16>
    %c0_21 = arith.constant 0 : index
    %c0_22 = arith.constant 0 : index
    %57 = vector.load %arg4[%c0_21, %c0_22] : memref<8x512xbf16, #tpu.memory_space<vmem>>, vector<8x512xbf16>
    %cst_23 = arith.constant dense<0.000000e+00> : vector<256x512xf32>
    %58 = tpu.matmul %56, %57, %cst_23 {dimension_numbers = #tpu.dot_dimension_numbers<[1], [0], [0], [1], [0, 0, 1, 1], [], []>} : vector<256x8xbf16>, vector<8x512xbf16>, vector<256x512xf32> -> vector<256x512xf32>
    %c0_24 = arith.constant 0 : index
    %c0_25 = arith.constant 0 : index
    %59 = vector.load %arg5[%c0_24, %c0_25] : memref<1x512xf32, #tpu.memory_space<vmem>>, vector<1x512xf32>
    %60 = vector.broadcast %59 : vector<1x512xf32> to vector<256x512xf32>
    %61 = arith.addf %58, %60 : vector<256x512xf32>
    %62 = arith.negf %61 : vector<256x512xf32>
    %63 = math.exp %62 : vector<256x512xf32>
    %cst_26 = arith.constant 1.000000e+00 : f32
    %64 = vector.broadcast %cst_26 : f32 to vector<256x512xf32>
    %65 = arith.addf %64, %63 : vector<256x512xf32>
    %66 = arith.divf %64, %65 : vector<256x512xf32>
    %cst_27 = arith.constant 1.000000e+00 : f32
    %67 = vector.broadcast %cst_27 : f32 to vector<256x512xf32>
    %68 = arith.addf %66, %67 : vector<256x512xf32>
    %69 = arith.mulf %68, %0 : vector<256x512xf32>
    %c0_28 = arith.constant 0 : index
    %c0_29 = arith.constant 0 : index
    %70 = vector.load %arg6[%c0_28, %c0_29] : memref<256x512xf32, #tpu.memory_space<vmem>>, vector<256x512xf32>
    tpu.vector_store %arg6[%c0_28, %c0_29], %69 {strides = array<i32>} : memref<256x512xf32, #tpu.memory_space<vmem>>, vector<256x512xf32>,
    return
  }
  func.func @transform_0(%arg0: i32) -> (i32, i32) {
    %c0_i32 = arith.constant 0 : i32
    %c0_i32_0 = arith.constant 0 : i32
    return %arg0, %c0_i32 : i32, i32
  }
  func.func @transform_1(%arg0: i32) -> (i32, i32) {
    %c0_i32 = arith.constant 0 : i32
    %c0_i32_0 = arith.constant 0 : i32
    %c0_i32_1 = arith.constant 0 : i32
    return %c0_i32, %c0_i32_0 : i32, i32
  }
  func.func @transform_2(%arg0: i32) -> (i32, i32) {
    %c0_i32 = arith.constant 0 : i32
    %c0_i32_0 = arith.constant 0 : i32
    %c0_i32_1 = arith.constant 0 : i32
    return %c0_i32, %c0_i32_0 : i32, i32
  }
  func.func @transform_3(%arg0: i32) -> (i32, i32) {
    %c0_i32 = arith.constant 0 : i32
    %c0_i32_0 = arith.constant 0 : i32
    %c0_i32_1 = arith.constant 0 : i32
    return %c0_i32, %c0_i32_0 : i32, i32
  }
  func.func @transform_4(%arg0: i32) -> (i32, i32) {
    %c0_i32 = arith.constant 0 : i32
    %c0_i32_0 = arith.constant 0 : i32
    %c0_i32_1 = arith.constant 0 : i32
    return %c0_i32, %c0_i32_0 : i32, i32
  }
  func.func @transform_5(%arg0: i32) -> (i32, i32) {
    %c0_i32 = arith.constant 0 : i32
    %c0_i32_0 = arith.constant 0 : i32
    return %arg0, %c0_i32 : i32, i32
  }
}

</mosaic_0001>

<bundles_post_ra>
// kernel: tpu_custom_call.1
= control target key start
LH: loop header
LB: loop body
LE: loop exit
PB: predicated region body
PF: predicated region fallthrough
CT: control target
= control target key end

     0   :  { %10 = vsyncpa [#allocation3], 0  ;;  %s13779_s0 = inlined_call_operand.hbm [shape: f32[512,512], index: 0, kind: input, shape index: {}]   ;;  %s13780_s1 = inlined_call_operand.vmem [shape: bf16[512,8], index: 1, kind: input, shape index: {}]   ;;  %s13781_s2 = inlined_call_operand.vmem [shape: f32[1,8], index: 2, kind: input, shape index: {}]   ;;  %s13782_s3 = inlined_call_operand.vmem [shape: bf16[8,512], index: 3, kind: input, shape index: {}]   ;;  %s13783_s4 = inlined_call_operand.vmem [shape: f32[1,512], index: 4, kind: input, shape index: {}]   ;;  %s13784_s5 = inlined_call_operand.hbm [shape: f32[512,512], index: 5, kind: output, shape index: {}]  }
   0x1   :  { %12 = vsyncpa [#allocation3 + $0x1], 0 }
   0x2   :  { %13 = vsyncpa [#allocation4], 0 }
   0x3   :  { %15 = vsyncpa [#allocation4 + $0x1], 0  ;;  %s8449_s18 = smov 0   ;;  %s8451_s19 = smov 0  }
   0x4   :  { %s8453_s20 = smov 0   ;;  %s8455_s21 = smov 0  }
   0x5 LB: > { %s8470_s22 = sadd.s32 4294967295, %s8405_s21   ;;  %s5680_s23 = sadd.s32 4294967294, %s8405_s21   ;;  %s8405_s21 = sphi %s8455_s21, %s14785_s21   ;;  %s8401_s20 = sphi %s8453_s20, %s14784_s20   ;;  %s8397_s19 = sphi %s8451_s19, %s14783_s19   ;;  %s8393_s18 = sphi %s8449_s18, %s14782_s18  }
   0x6   : > { %s8474_s24 = sadd.s32 1, %s8405_s21   ;;  %s28_s25 = sadd.s32 1, %s8401_s20 }
   0x7   : > { %s25_s26 = ssub.s32 %s8405_s21, %s8474_s24  ;;  %p35_p0 = scmp.ne.s32.totalorder %s8401_s20, %s8397_s19 }
   0x8   : > { %p26_p1 = scmp.eq.s32.totalorder %s25_s26, 0  ;;  %p36_p2 = scmp.eq.s32.totalorder %s8405_s21, 0 }
   0x9   : > { %p41_p3 = scmp.ne.s32.totalorder %s8397_s19, %s8393_s18  ;;  %p42_p4 = scmp.eq.s32.totalorder %s8470_s22, 0 }
   0xa   : > { %s8486_s27 = scalar_select %p26_p1, %s8401_s20, %s28_s25  }
   0xb   : > { %p8488_p5 = por %p36_p2, %p35_p0  ;;  %p8492_p6 = por %p42_p4, %p41_p3 }
   0xc   : > { %p149_p7 = scmp.eq.s32.totalorder %s8470_s22, 1  ;;  %p155_p8 = scmp.eq.s32.totalorder %s5680_s23, 1 }
   0xd   : > { %p6135_p10 = scmp.lt.s32.totalorder %s8405_s21, 2  ;;  %s187_s7 = sand.u32 1, %s8401_s20  }
   0xe   : > { %p8499_p11 = por %p149_p7, %p35_p0  ;;  %p8503_p12 = por %p155_p8, %p41_p3 }
   0xf   : > { %s5896_s8 = sshll.u32 %s8405_s21, 14  ;;  %s5683_s9 = sshll.u32 %s187_s7, 10 }
  0x10   : > { %s14113_s30 = scalar_select %p8499_p11, 1, 0 }
  0x11   : > { %s14114_s6 = scalar_select %p8503_p12, 1, 0 }
  0x12   : > { %s8512_s12 = scalar_lea.hbm %s13779_s0, %s5896_s8  ;;  %s191_s13 = scalar_lea.vmem [#allocation2], %s5683_s9 }
  0x13   : > { %s199_s14 = sshll.u32 %s191_s13, 4  ;;  %p8516_p13 = pnand %p6135_p10, %p8488_p5  ;;  %s8520_s14 = int_to_ptr.vmem [resolvable:$true] %s199_s14 }
  0x14   : > { %s8522_s16 = scalar_lea.sflag [#allocation3], %s187_s7  ;;  %s8309_s17 = scalar_lea.hbm %s8512_s12, 16384 }
  0x15   : > { %p8310_p0 = scmp.ne.s32.totalorder %s8512_s12, %s8309_s17  ;;  %p8311_p1 = pneg %p8516_p13 }
  0x16   : > { %s8314_s26 = scalar_lea.hbm %s13779_s0, 32768  ;;  %p8315_p4 = scmp.lt.u32.totalorder %s8512_s12, %s13779_s0 }
  0x17   : > { %p8312_p2 = pnand %p8311_p1, %p8310_p0  ;;  %p8316_p5 = scmp.lt.u32.totalorder %s8314_s26, %s8309_s17 }
  0x18   : > { %p8318_p8 = scmp.lt.u32.totalorder %s8309_s17, %s8512_s12 }
  0x19   : > { %p8313_p3 = pneg %p8312_p2  ;;  %p8317_p7 = por %p8316_p5, %p8315_p4 }
  0x1b   : > { %p8319_p10 = por %p8318_p8, %p8317_p7 }
  0x1d   : > { %p8320_p9 = pnand %p8319_p10, %p8313_p3 }
  0x1f   : > { %8323 = shalt.err (!%p8320_p9)
}
  0x20   : > { %s8324_s7 = scalar_lea.vmem %s8520_s14, 16384  ;;  %s8407_s9 = smov [#allocation2]  }
  0x21   : > { %p8325_p0 = scmp.ne.s32.totalorder %s8520_s14, %s8324_s7  ;;  %s8329_s10 = sshll.u32 %s8407_s9, 4  ;;  %s8330_s10 = int_to_ptr.vmem [resolvable:$false] %s8329_s10 }
  0x22   : > { %s8331_s11 = scalar_lea.vmem %s8330_s10, 32768  ;;  %p8332_p11 = scmp.lt.s32.totalorder %s8520_s14, %s8330_s10 }
  0x23   : > { %p8327_p2 = pnand %p8325_p0, %p8311_p1  ;;  %p8333_p4 = scmp.lt.s32.totalorder %s8331_s11, %s8324_s7 }
  0x25   : > { %p8328_p12 = pneg %p8327_p2  ;;  %p8334_p5 = por %p8333_p4, %p8332_p11 }
  0x27   : > { %p8335_p7 = pnand %p8334_p5, %p8328_p12 }
  0x29   : > { %8338 = shalt.err (!%p8335_p7)
}
  0x2a   : > { %s8408_s13 = smov 512   ;;  %s8409_s17 = smov 32  }
  0x2b   : > { %6130 = dma.hbm_to_vmem [thread:$0]  (!%p8516_p13), %s8512_s12, 16384, %s8520_s14, %s8522_s16, %s8408_s13, %s8408_s13, %s8409_s17  }
  0x2c   : > { %p5687_p9 = scmp.ge.s32.totalorder %s8405_s21, 1  ;;  %p207_p1 = scmp.lt.s32.totalorder %s8405_s21, 3 }
  0x2e   : > { %p208_p3 = pnand %p5687_p9, %p207_p1 }
  0x30   : > { %211 = sbr.rel (%p208_p3) target bundleno = 1447 (0x5a7), region = 40 }
  0x37   : > { %s8553_s23 = sand.u32 1, %s8397_s19  }
  0x38   : > { %s5688_s25 = sshll.u32 %s8553_s23, 10  ;;  %s214_s26 = scalar_lea.sflag [#allocation3], %s8553_s23 }
  0x39   : > { %s8559_s28 = scalar_lea.vmem [#allocation2], %s5688_s25 }
  0x3a   : > { %8384 = dma.done.wait (%p8492_p6), %s214_s26, 16384  }
  0x3b   : > { %8386 = vsyncadd (%p8492_p6), %s214_s26, 4294950912  ;;  %v8566_v0 = vld [vmem:[%s8559_s28 + $0x80] sm:$0xff]  ;;  %s8410_s29 = smov 1   ;;  %v8648_v48 = vld [vmem:[%s8559_s28 + $0x48] sm:$0xff]  ;;  %s8411_s12 = smov 2   ;;  %vm4041_vm4 = vcmask 1043456  }
  0x3c   : > { %v8569_v1 = vld [vmem:[%s8559_s28 + $0xa0] sm:$0xff]  ;;  %v8651_v49 = vld [vmem:[%s8559_s28 + $0x68] sm:$0xff]  ;;  %s8412_s14 = smov 4   ;;  %vm3992_vm7 = vcmask 64512   ;;  %s5593_s13 = scalar_lea.sflag [#allocation4], %s8553_s23 }
  0x3d   : > { %v8572_v2 = vld [vmem:[%s8559_s28] sm:$0xff]  ;;  %v6189_v3 = vpack.i.bf16 %v8569_v1, %v8566_v0  ;;  %v8654_v50 = vld [vmem:[%s8559_s28 + $0x8] sm:$0xff]  ;;  %v6264_v52 = vpack.i.bf16 %v8651_v49, %v8648_v48  ;;  %p14779_p11 = scmp.ne.s32.totalorder %s14113_s30, 0  ;;  %s8416_s26 = smov [#allocation5]  }
  0x3e   : > { %v8577_v4 = vld [vmem:[%s8559_s28 + $0x20] sm:$0xff]  ;;  %v8657_v51 = vld [vmem:[%s8559_s28 + $0x28] sm:$0xff] }
  0x3f   : > { %v8580_v5 = vld [vmem:[%s8559_s28 + $0xc0] sm:$0xff]  ;;  %v6179_v7 = vpack.i.bf16 %v8577_v4, %v8572_v2  ;;  %6190 = vrot.lane.b32.xlu1 %v6189_v3, %s8410_s29  ;;  %v6259_v53 = vpack.i.bf16 %v8657_v51, %v8654_v50  ;;  %v8666_v54 = vld [vmem:[%s8559_s28 + $0xc8] sm:$0xff] }
  0x40   : > { %v8583_v6 = vld [vmem:[%s8559_s28 + $0xe0] sm:$0xff]  ;;  %v8669_v55 = vld [vmem:[%s8559_s28 + $0xe8] sm:$0xff] }
  0x41   : > { %v8588_v8 = vld [vmem:[%s8559_s28 + $0x40] sm:$0xff]  ;;  %v6194_v10 = vpack.i.bf16 %v8583_v6, %v8580_v5  ;;  %6180 = vrot.lane.b32.xlu0 %v6179_v7, %s8410_s29  ;;  %v8672_v56 = vld [vmem:[%s8559_s28 + $0x88] sm:$0xff]  ;;  %v6274_v60 = vpack.i.bf16 %v8669_v55, %v8666_v54 }
  0x42   : > { %v8591_v9 = vld [vmem:[%s8559_s28 + $0x60] sm:$0xff]  ;;  %v8675_v57 = vld [vmem:[%s8559_s28 + $0xa8] sm:$0xff] }
  0x43   : > { %v6184_v11 = vpack.i.bf16 %v8591_v9, %v8588_v8  ;;  %v8600_v12 = vld [vmem:[%s8559_s28 + $0x140] sm:$0xff]  ;;  %6195 = vrot.lane.b32.xlu1 %v6194_v10, %s8410_s29  ;;  %v8678_v58 = vld [vmem:[%s8559_s28 + $0x148] sm:$0xff]  ;;  %v6269_v63 = vpack.i.bf16 %v8675_v57, %v8672_v56 }
  0x44   : > { %14116 = vst [vmem:[#allocation8_spill] sm:$0xff] %v8600_v12  ;;  %v8603_v13 = vld [vmem:[%s8559_s28 + $0x160] sm:$0xff]  ;;  %14120 = vst [vmem:[#allocation12_spill] sm:$0xff] %v8678_v58  ;;  %v8681_v59 = vld [vmem:[%s8559_s28 + $0x168] sm:$0xff] }
  0x45   : > { %14117 = vst [vmem:[#allocation9_spill] sm:$0xff] %v8603_v13  ;;  %v8606_v14 = vld [vmem:[%s8559_s28 + $0x100] sm:$0xff]  ;;  %v6204_v16 = vpack.i.bf16 %v8603_v13, %v8600_v12  ;;  %6185 = vrot.lane.b32.xlu0 %v6184_v11, %s8410_s29  ;;  %14121 = vst [vmem:[#allocation13_spill] sm:$0xff] %v8681_v59  ;;  %v8687_v61 = vld [vmem:[%s8559_s28 + $0x108] sm:$0xff]  ;;  %v6284_v10 = vpack.i.bf16 %v8681_v59, %v8678_v58 }
  0x46   : > { %14118 = vst [vmem:[#allocation10_spill] sm:$0xff] %v8606_v14  ;;  %v8609_v15 = vld [vmem:[%s8559_s28 + $0x120] sm:$0xff]  ;;  %v8690_v62 = vld [vmem:[%s8559_s28 + $0x128] sm:$0xff] }
  0x47   : > { %14119 = vst [vmem:[#allocation11_spill] sm:$0xff] %v8609_v15  ;;  %v6199_v17 = vpack.i.bf16 %v8609_v15, %v8606_v14  ;;  %v303_v18 = vld [vmem:[%s8559_s28 + $0x1c0] sm:$0xff]  ;;  %6205 = vrot.lane.b32.xlu1 %v6204_v16, %s8410_s29  ;;  %v8696_v3 = vld [vmem:[%s8559_s28 + $0x1c8] sm:$0xff] }
  0x48   : > { %v307_v19 = vld [vmem:[%s8559_s28 + $0x1e0] sm:$0xff]  ;;  %14122 = vst [vmem:[#allocation14_spill] sm:$0xff] %v8696_v3  ;;  %v8699_v7 = vld [vmem:[%s8559_s28 + $0x1e8] sm:$0xff] }
  0x49   : > { %v295_v20 = vld [vmem:[%s8559_s28 + $0x180] sm:$0xff]  ;;  %v6214_v22 = vpack.i.bf16 %v307_v19, %v303_v18  ;;  %6200 = vrot.lane.b32.xlu0 %v6199_v17, %s8410_s29  ;;  %14123 = vst [vmem:[#allocation15_spill] sm:$0xff] %v8699_v7  ;;  %v8705_v11 = vld [vmem:[%s8559_s28 + $0x188] sm:$0xff]  ;;  %v6279_v17 = vpack.i.bf16 %v8690_v62, %v8687_v61 }
  0x4a   : > { %v299_v21 = vld [vmem:[%s8559_s28 + $0x1a0] sm:$0xff]  ;;  %14124 = vst [vmem:[#allocation16_spill] sm:$0xff] %v8705_v11  ;;  %v8708_v16 = vld [vmem:[%s8559_s28 + $0x1a8] sm:$0xff] }
  0x4b   : > { %v6209_v23 = vpack.i.bf16 %v299_v21, %v295_v20  ;;  %v319_v24 = vld [vmem:[%s8559_s28 + $0x240] sm:$0xff]  ;;  %6215 = vrot.lane.b32.xlu1 %v6214_v22, %s8410_s29  ;;  %14125 = vst [vmem:[#allocation17_spill] sm:$0xff] %v8708_v16  ;;  %v320_v18 = vld [vmem:[%s8559_s28 + $0x248] sm:$0xff]  ;;  %v6294_v20 = vpack.i.bf16 %v8699_v7, %v8696_v3  ;;  %v8894_v7 = vld [vmem:[%s8559_s28 + $0x250] sm:$0xff] }
  0x4c   : > { %v323_v25 = vld [vmem:[%s8559_s28 + $0x260] sm:$0xff]  ;;  %v324_v19 = vld [vmem:[%s8559_s28 + $0x268] sm:$0xff]  ;;  %14144 = vst [vmem:[#allocation36_spill] sm:$0xff] %v8894_v7  ;;  %v8897_v3 = vld [vmem:[%s8559_s28 + $0x270] sm:$0xff] }
  0x4d   : > { %v311_v26 = vld [vmem:[%s8559_s28 + $0x200] sm:$0xff]  ;;  %v6224_v28 = vpack.i.bf16 %v323_v25, %v319_v24  ;;  %6210 = vrot.lane.b32.xlu0 %v6209_v23, %s8410_s29  ;;  %v312_v21 = vld [vmem:[%s8559_s28 + $0x208] sm:$0xff]  ;;  %v6289_v23 = vpack.i.bf16 %v8708_v16, %v8705_v11  ;;  %14145 = vst [vmem:[#allocation37_spill] sm:$0xff] %v8897_v3  ;;  %v13817_v16 = vlaneseq }
  0x4e   : > { %v315_v27 = vld [vmem:[%s8559_s28 + $0x220] sm:$0xff]  ;;  %v316_v22 = vld [vmem:[%s8559_s28 + $0x228] sm:$0xff] }
  0x4f   : > { %v6219_v29 = vpack.i.bf16 %v315_v27, %v311_v26  ;;  %v335_v30 = vld [vmem:[%s8559_s28 + $0x2c0] sm:$0xff]  ;;  %6225 = vrot.lane.b32.xlu1 %v6224_v28, %s8410_s29  ;;  %v336_v24 = vld [vmem:[%s8559_s28 + $0x2c8] sm:$0xff]  ;;  %v6304_v26 = vpack.i.bf16 %v324_v19, %v320_v18 }
  0x50   : > { %v339_v31 = vld [vmem:[%s8559_s28 + $0x2e0] sm:$0xff]  ;;  %v340_v25 = vld [vmem:[%s8559_s28 + $0x2e8] sm:$0xff] }
  0x51   : > { %v327_v32 = vld [vmem:[%s8559_s28 + $0x280] sm:$0xff]  ;;  %v6234_v34 = vpack.i.bf16 %v339_v31, %v335_v30  ;;  %6220 = vrot.lane.b32.xlu0 %v6219_v29, %s8410_s29  ;;  %v328_v27 = vld [vmem:[%s8559_s28 + $0x288] sm:$0xff]  ;;  %v6299_v29 = vpack.i.bf16 %v316_v22, %v312_v21  ;;  %v8783_v21 = vld [vmem:[%s8559_s28 + $0x78] sm:$0xff] }
  0x52   : > { %v331_v33 = vld [vmem:[%s8559_s28 + $0x2a0] sm:$0xff]  ;;  %v332_v28 = vld [vmem:[%s8559_s28 + $0x2a8] sm:$0xff]  ;;  %v8786_v22 = vld [vmem:[%s8559_s28 + $0xd0] sm:$0xff] }
  0x53   : > { %v6229_v35 = vpack.i.bf16 %v331_v33, %v327_v32  ;;  %v351_v36 = vld [vmem:[%s8559_s28 + $0x340] sm:$0xff]  ;;  %6235 = vrot.lane.b32.xlu1 %v6234_v34, %s8410_s29  ;;  %v352_v30 = vld [vmem:[%s8559_s28 + $0x348] sm:$0xff]  ;;  %v6314_v32 = vpack.i.bf16 %v340_v25, %v336_v24 }
  0x54   : > { %v355_v37 = vld [vmem:[%s8559_s28 + $0x360] sm:$0xff]  ;;  %v356_v31 = vld [vmem:[%s8559_s28 + $0x368] sm:$0xff] }
  0x55   : > { %v343_v38 = vld [vmem:[%s8559_s28 + $0x300] sm:$0xff]  ;;  %v6244_v40 = vpack.i.bf16 %v355_v37, %v351_v36  ;;  %6230 = vrot.lane.b32.xlu0 %v6229_v35, %s8410_s29  ;;  %v344_v33 = vld [vmem:[%s8559_s28 + $0x308] sm:$0xff]  ;;  %v6309_v35 = vpack.i.bf16 %v332_v28, %v328_v27  ;;  %v6324_v36 = vpack.i.bf16 %v356_v31, %v352_v30  ;;  %v8801_v27 = vld [vmem:[%s8559_s28 + $0xb8] sm:$0xff] }
  0x56   : > { %v347_v39 = vld [vmem:[%s8559_s28 + $0x320] sm:$0xff]  ;;  %v348_v34 = vld [vmem:[%s8559_s28 + $0x328] sm:$0xff]  ;;  %v8804_v28 = vld [vmem:[%s8559_s28 + $0x110] sm:$0xff] }
  0x57   : > { %v6239_v41 = vpack.i.bf16 %v347_v39, %v343_v38  ;;  %v367_v42 = vld [vmem:[%s8559_s28 + $0x3c0] sm:$0xff]  ;;  %6245 = vrot.lane.b32.xlu1 %v6244_v40, %s8410_s29  ;;  %v6319_v37 = vpack.i.bf16 %v348_v34, %v344_v33  ;;  %v368_v38 = vld [vmem:[%s8559_s28 + $0x3c8] sm:$0xff]  ;;  %14126 = vst [vmem:[#allocation18_spill] sm:$0xff] %v8804_v28  ;;  %v8819_v33 = vld [vmem:[%s8559_s28 + $0xf8] sm:$0xff] }
  0x58   : > { %v371_v43 = vld [vmem:[%s8559_s28 + $0x3e0] sm:$0xff]  ;;  %v372_v39 = vld [vmem:[%s8559_s28 + $0x3e8] sm:$0xff]  ;;  %v8822_v34 = vld [vmem:[%s8559_s28 + $0x150] sm:$0xff] }
  0x59   : > { %v359_v44 = vld [vmem:[%s8559_s28 + $0x380] sm:$0xff]  ;;  %v6254_v46 = vpack.i.bf16 %v371_v43, %v367_v42  ;;  %6240 = vrot.lane.b32.xlu0 %v6239_v41, %s8410_s29  ;;  %v360_v40 = vld [vmem:[%s8559_s28 + $0x388] sm:$0xff]  ;;  %v6334_v42 = vpack.i.bf16 %v372_v39, %v368_v38  ;;  %14128 = vst [vmem:[#allocation20_spill] sm:$0xff] %v8822_v34  ;;  %v8834_v38 = vld [vmem:[%s8559_s28 + $0x118] sm:$0xff] }
  0x5a   : > { %v363_v45 = vld [vmem:[%s8559_s28 + $0x3a0] sm:$0xff]  ;;  %v364_v41 = vld [vmem:[%s8559_s28 + $0x3a8] sm:$0xff]  ;;  %14130 = vst [vmem:[#allocation22_spill] sm:$0xff] %v8834_v38  ;;  %v8837_v39 = vld [vmem:[%s8559_s28 + $0x138] sm:$0xff] }
  0x5b   : > { %v6249_v47 = vpack.i.bf16 %v363_v45, %v359_v44  ;;  %6255 = vrot.lane.b32.xlu1 %v6254_v46, %s8410_s29  ;;  %v6329_v43 = vpack.i.bf16 %v364_v41, %v360_v40  ;;  %v8744_v44 = vld [vmem:[%s8559_s28 + $0x50] sm:$0xff]  ;;  %14131 = vst [vmem:[#allocation23_spill] sm:$0xff] %v8837_v39 }
  0x5c   : > { %v8747_v45 = vld [vmem:[%s8559_s28 + $0x70] sm:$0xff] }
  0x5d   : > { %6250 = vrot.lane.b32.xlu0 %v6249_v47, %s8410_s29  ;;  %v8750_v46 = vld [vmem:[%s8559_s28 + $0x10] sm:$0xff] }
  0x5e   : > { %v8753_v47 = vld [vmem:[%s8559_s28 + $0x30] sm:$0xff] }
  0x5f   : > { %6265 = vrot.lane.b32.xlu1 %v6264_v52, %s8410_s29  ;;  %v6344_v52 = vpack.i.bf16 %v8747_v45, %v8744_v44  ;;  %v8840_v40 = vld [vmem:[%s8559_s28 + $0x190] sm:$0xff] }
  0x60   : > { %14132 = vst [vmem:[#allocation24_spill] sm:$0xff] %v8840_v40  ;;  %v8843_v41 = vld [vmem:[%s8559_s28 + $0x1b0] sm:$0xff] }
  0x61   : > { %6260 = vrot.lane.b32.xlu0 %v6259_v53, %s8410_s29  ;;  %v6339_v53 = vpack.i.bf16 %v8753_v47, %v8750_v46  ;;  %14133 = vst [vmem:[#allocation25_spill] sm:$0xff] %v8843_v41 }
  0x63   : > { %6275 = vrot.lane.b32.xlu1 %v6274_v60, %s8410_s29  ;;  %v8762_v60 = vld [vmem:[%s8559_s28 + $0x18] sm:$0xff] }
  0x65   : > { %6270 = vrot.lane.b32.xlu0 %v6269_v63, %s8410_s29  ;;  %v8765_v63 = vld [vmem:[%s8559_s28 + $0x38] sm:$0xff] }
  0x66   : > { %v6354_v18 = vpack.i.bf16 %v8765_v63, %v8762_v60 }
  0x67   : > { %6285 = vrot.lane.b32.xlu1 %v6284_v10, %s8410_s29  ;;  %v8768_v10 = vld [vmem:[%s8559_s28 + $0x90] sm:$0xff] }
  0x69   : > { %6280 = vrot.lane.b32.xlu0 %v6279_v17, %s8410_s29  ;;  %v8771_v17 = vld [vmem:[%s8559_s28 + $0xb0] sm:$0xff] }
  0x6a   : > { %v6349_v19 = vpack.i.bf16 %v8771_v17, %v8768_v10 }
  0x6b   : > { %6295 = vrot.lane.b32.xlu1 %v6294_v20, %s8410_s29  ;;  %v8780_v20 = vld [vmem:[%s8559_s28 + $0x58] sm:$0xff] }
  0x6c   : > { %v6364_v24 = vpack.i.bf16 %v8783_v21, %v8780_v20 }
  0x6d   : > { %6290 = vrot.lane.b32.xlu0 %v6289_v23, %s8410_s29  ;;  %v8789_v23 = vld [vmem:[%s8559_s28 + $0xf0] sm:$0xff] }
  0x6e   : > { %v6359_v25 = vpack.i.bf16 %v8789_v23, %v8786_v22 }
  0x6f   : > { %6305 = vrot.lane.b32.xlu1 %v6304_v26, %s8410_s29  ;;  %v8798_v26 = vld [vmem:[%s8559_s28 + $0x98] sm:$0xff] }
  0x70   : > { %v6374_v30 = vpack.i.bf16 %v8801_v27, %v8798_v26 }
  0x71   : > { %6300 = vrot.lane.b32.xlu0 %v6299_v29, %s8410_s29  ;;  %v8807_v29 = vld [vmem:[%s8559_s28 + $0x130] sm:$0xff] }
  0x72   : > { %14127 = vst [vmem:[#allocation19_spill] sm:$0xff] %v8807_v29  ;;  %v6369_v31 = vpack.i.bf16 %v8807_v29, %v8804_v28 }
  0x73   : > { %6315 = vrot.lane.b32.xlu1 %v6314_v32, %s8410_s29  ;;  %v8816_v32 = vld [vmem:[%s8559_s28 + $0xd8] sm:$0xff] }
  0x75   : > { %6310 = vrot.lane.b32.xlu0 %v6309_v35, %s8410_s29  ;;  %v8825_v35 = vld [vmem:[%s8559_s28 + $0x170] sm:$0xff] }
  0x76   : > { %14129 = vst [vmem:[#allocation21_spill] sm:$0xff] %v8825_v35 }
  0x77   : > { %6325 = vrot.lane.b32.xlu1 %v6324_v36, %s8410_s29  ;;  %v6384_v36 = vpack.i.bf16 %v8819_v33, %v8816_v32 }
  0x79   : > { %6320 = vrot.lane.b32.xlu0 %v6319_v37, %s8410_s29  ;;  %v6379_v37 = vpack.i.bf16 %v8825_v35, %v8822_v34 }
  0x7b   : > { %6335 = vrot.lane.b32.xlu1 %v6334_v42, %s8410_s29  ;;  %v6394_v42 = vpack.i.bf16 %v8837_v39, %v8834_v38 }
  0x7d   : > { %6330 = vrot.lane.b32.xlu0 %v6329_v43, %s8410_s29  ;;  %v6389_v43 = vpack.i.bf16 %v8843_v41, %v8840_v40  ;;  %v8906_v41 = vld [vmem:[%s8559_s28 + $0x258] sm:$0xff] }
  0x7e   : > { %14146 = vst [vmem:[#allocation38_spill] sm:$0xff] %v8906_v41  ;;  %v8915_v40 = vld [vmem:[%s8559_s28 + $0x238] sm:$0xff] }
  0x7f   : > { %6345 = vrot.lane.b32.xlu1 %v6344_v52, %s8410_s29  ;;  %v8852_v52 = vld [vmem:[%s8559_s28 + $0x158] sm:$0xff]  ;;  %14149 = vst [vmem:[#allocation41_spill] sm:$0xff] %v8915_v40 }
  0x80   : > { %14134 = vst [vmem:[#allocation26_spill] sm:$0xff] %v8852_v52 }
  0x81   : > { %6340 = vrot.lane.b32.xlu0 %v6339_v53, %s8410_s29  ;;  %v8855_v53 = vld [vmem:[%s8559_s28 + $0x178] sm:$0xff] }
  0x82   : > { %14135 = vst [vmem:[#allocation27_spill] sm:$0xff] %v8855_v53 }
  0x83   : > { %6355 = vrot.lane.b32.xlu1 %v6354_v18, %s8410_s29  ;;  %v8858_v18 = vld [vmem:[%s8559_s28 + $0x1d0] sm:$0xff] }
  0x84   : > { %14136 = vst [vmem:[#allocation28_spill] sm:$0xff] %v8858_v18 }
  0x85   : > { %6350 = vrot.lane.b32.xlu0 %v6349_v19, %s8410_s29  ;;  %v8861_v19 = vld [vmem:[%s8559_s28 + $0x1f0] sm:$0xff] }
  0x86   : > { %14137 = vst [vmem:[#allocation29_spill] sm:$0xff] %v8861_v19 }
  0x87   : > { %6365 = vrot.lane.b32.xlu1 %v6364_v24, %s8410_s29  ;;  %v6404_v24 = vpack.i.bf16 %v8855_v53, %v8852_v52 }
  0x89   : > { %6360 = vrot.lane.b32.xlu0 %v6359_v25, %s8410_s29  ;;  %v6399_v25 = vpack.i.bf16 %v8861_v19, %v8858_v18  ;;  %v8888_v19 = vld [vmem:[%s8559_s28 + $0x1d8] sm:$0xff] }
  0x8a   : > { %14142 = vst [vmem:[#allocation34_spill] sm:$0xff] %v8888_v19  ;;  %v8891_v18 = vld [vmem:[%s8559_s28 + $0x1f8] sm:$0xff] }
  0x8b   : > { %6375 = vrot.lane.b32.xlu1 %v6374_v30, %s8410_s29  ;;  %v8870_v30 = vld [vmem:[%s8559_s28 + $0x198] sm:$0xff]  ;;  %14143 = vst [vmem:[#allocation35_spill] sm:$0xff] %v8891_v18 }
  0x8c   : > { %14138 = vst [vmem:[#allocation30_spill] sm:$0xff] %v8870_v30 }
  0x8d   : > { %6370 = vrot.lane.b32.xlu0 %v6369_v31, %s8410_s29  ;;  %v8873_v31 = vld [vmem:[%s8559_s28 + $0x1b8] sm:$0xff] }
  0x8e   : > { %14139 = vst [vmem:[#allocation31_spill] sm:$0xff] %v8873_v31 }
  0x8f   : > { %6385 = vrot.lane.b32.xlu1 %v6384_v36, %s8410_s29  ;;  %v8876_v36 = vld [vmem:[%s8559_s28 + $0x210] sm:$0xff] }
  0x90   : > { %14140 = vst [vmem:[#allocation32_spill] sm:$0xff] %v8876_v36 }
  0x91   : > { %6380 = vrot.lane.b32.xlu0 %v6379_v37, %s8410_s29  ;;  %v8879_v37 = vld [vmem:[%s8559_s28 + $0x230] sm:$0xff] }
  0x92   : > { %14141 = vst [vmem:[#allocation33_spill] sm:$0xff] %v8879_v37 }
  0x93   : > { %6395 = vrot.lane.b32.xlu1 %v6394_v42, %s8410_s29  ;;  %v6414_v42 = vpack.i.bf16 %v8873_v31, %v8870_v30 }
  0x95   : > { %6390 = vrot.lane.b32.xlu0 %v6389_v43, %s8410_s29  ;;  %v6409_v43 = vpack.i.bf16 %v8879_v37, %v8876_v36  ;;  %v8909_v37 = vld [vmem:[%s8559_s28 + $0x278] sm:$0xff] }
  0x96   : > { %14147 = vst [vmem:[#allocation39_spill] sm:$0xff] %v8909_v37  ;;  %v8912_v36 = vld [vmem:[%s8559_s28 + $0x218] sm:$0xff] }
  0x97   : > { %6405 = vrot.lane.b32.xlu1 %v6404_v24, %s8410_s29  ;;  %v6424_v24 = vpack.i.bf16 %v8891_v18, %v8888_v19  ;;  %14148 = vst [vmem:[#allocation40_spill] sm:$0xff] %v8912_v36 }
  0x99   : > { %6400 = vrot.lane.b32.xlu0 %v6399_v25, %s8410_s29  ;;  %v6419_v25 = vpack.i.bf16 %v8897_v3, %v8894_v7 }
  0x9b   : > { %6415 = vrot.lane.b32.xlu1 %v6414_v42, %s8410_s29  ;;  %v6434_v42 = vpack.i.bf16 %v8909_v37, %v8906_v41 }
  0x9d   : > { %6410 = vrot.lane.b32.xlu0 %v6409_v43, %s8410_s29  ;;  %v6429_v43 = vpack.i.bf16 %v8915_v40, %v8912_v36 }
  0x9f   : > { %6425 = vrot.lane.b32.xlu1 %v6424_v24, %s8410_s29 }
  0xa1   : > { %6420 = vrot.lane.b32.xlu0 %v6419_v25, %s8410_s29 }
  0xa3   : > { %6435 = vrot.lane.b32.xlu1 %v6434_v42, %s8410_s29 }
  0xa5   : > { %6430 = vrot.lane.b32.xlu0 %v6429_v43, %s8410_s29 }
  0xb1   : > { %v8925_v7 = vpop.permute.xlu1 %6190 }
  0xb3   : > { %v8927_v3 = vpop.permute.xlu0 %6180 }
  0xb5   : > { %v8929_v18 = vpop.permute.xlu1 %6195 }
  0xb7   : > { %v8931_v19 = vpop.permute.xlu0 %6185 }
  0xb9   : > { %v8933_v24 = vpop.permute.xlu1 %6205 }
  0xba   : > { %14150 = vst [vmem:[#allocation42_spill] sm:$0xff] %v8933_v24 }
  0xbb   : > { %v8935_v37 = vpop.permute.xlu0 %6200 }
  0xbd   : > { %v8937_v25 = vpop.permute.xlu1 %6215 }
  0xbe   : > { %14151 = vst [vmem:[#allocation43_spill] sm:$0xff] %v8937_v25  ;;  %v8958_v25 = vand.u32 127, %v13817_v16 }
  0xbf   : > { %v8939_v41 = vpop.permute.xlu0 %6210 }
  0xc0   : > { %14152 = vst [vmem:[#allocation44_spill] sm:$0xff] %v8939_v41  ;;  %vm633_vm0 = vcmp.lt.s32.totalorder %v8958_v25, 1  ;;  %vm1146_vm1 = vcmp.lt.s32.totalorder %v8958_v25, 2  ;;  %vm1659_vm2 = vcmp.lt.s32.totalorder %v8958_v25, 4  ;;  %vm2172_vm3 = vcmp.lt.s32.totalorder %v8958_v25, 8 }
  0xc1   : > { %v8941_v40 = vpop.permute.xlu1 %6225 }
  0xc2   : > { %14153 = vst [vmem:[#allocation45_spill] sm:$0xff] %v8941_v40 }
  0xc3   : > { %v8943_v42 = vpop.permute.xlu0 %6220 }
  0xc4   : > { %14154 = vst [vmem:[#allocation46_spill] sm:$0xff] %v8943_v42 }
  0xc5   : > { %v8945_v43 = vpop.permute.xlu1 %6235 }
  0xc6   : > { %14155 = vst [vmem:[#allocation47_spill] sm:$0xff] %v8945_v43  ;;  %v6183_v43 = vunpack.i.h.bf16 %v8927_v3 }
  0xc7   : > { %v8947_v36 = vpop.permute.xlu0 %6230 }
  0xc8   : > { %14156 = vst [vmem:[#allocation48_spill] sm:$0xff] %v8947_v36  ;;  %v6182_v36 = vunpack.i.l.bf16 %v8927_v3 }
  0xc9   : > { %v8949_v31 = vpop.permute.xlu1 %6245 }
  0xca   : > { %14157 = vst [vmem:[#allocation49_spill] sm:$0xff] %v8949_v31 }
  0xcb   : > { %v8951_v30 = vpop.permute.xlu0 %6240 }
  0xcc   : > { %14158 = vst [vmem:[#allocation50_spill] sm:$0xff] %v8951_v30 }
  0xcd   : > { %v8953_v11 = vpop.permute.xlu1 %6255 }
  0xce   : > { %14159 = vst [vmem:[#allocation51_spill] sm:$0xff] %v8953_v11 }
  0xcf   : > { %v8955_v35 = vpop.permute.xlu0 %6250 }
  0xd0   : > { %14160 = vst [vmem:[#allocation52_spill] sm:$0xff] %v8955_v35 }
  0xd1   : > { %v6266_v34 = vpop.permute.xlu1 %6265 }
  0xd3   : > { %v6261_v40 = vpop.permute.xlu0 %6260 }
  0xd4   : > { %v6263_v42 = vunpack.i.h.bf16 %v6261_v40  ;;  %v6262_v31 = vunpack.i.l.bf16 %v6261_v40 }
  0xd5   : > { %v8963_v41 = vpop.permute.xlu1 %6275 }
  0xd6   : > { %v698_v11 = vsel %vm633_vm0, %v6182_v36, %v6262_v31  ;;  %v699_v35 = vsel %vm633_vm0, %v6183_v43, %v6263_v42 }
  0xd7   : > { %v8969_v16 = vpop.permute.xlu0 %6270  ;;  %v8972_v30 = vmax.f32 %v8654_v50, %v698_v11  ;;  %v8975_v13 = vmax.f32 %v8657_v51, %v699_v35 }
  0xd9   : > { %14161 = vst [vmem:[#allocation53_spill] sm:$0xff] %v8972_v30  ;;  %14162 = vst [vmem:[#allocation54_spill] sm:$0xff] %v8975_v13  ;;  %v6444_v3 = vpack.i.bf16 %v8975_v13, %v8972_v30  ;;  %v8979_v40 = vpop.permute.xlu1 %6285 }
  0xda   : > { %14163 = vst [vmem:[#allocation55_spill] sm:$0xff] %v8979_v40 }
  0xdb   : > { %v8981_v12 = vpop.permute.xlu0 %6280  ;;  %6445 = vrot.lane.b32.xlu1 %v6444_v3, %s8411_s12  ;;  %v6268_v3 = vunpack.i.h.bf16 %v6266_v34 }
  0xdd   : > { %v8984_v53 = vpop.permute.xlu1 %6295 }
  0xde   : > { %14164 = vst [vmem:[#allocation56_spill] sm:$0xff] %v8984_v53  ;;  %v6267_v53 = vunpack.i.l.bf16 %v6266_v34 }
  0xdf   : > { %v8986_v52 = vpop.permute.xlu0 %6290 }
  0xe0   : > { %14165 = vst [vmem:[#allocation57_spill] sm:$0xff] %v8986_v52 }
  0xe1   : > { %v8988_v59 = vpop.permute.xlu1 %6305 }
  0xe2   : > { %14166 = vst [vmem:[#allocation58_spill] sm:$0xff] %v8988_v59  ;;  %v6188_v59 = vunpack.i.h.bf16 %v8931_v19 }
  0xe3   : > { %v8990_v50 = vpop.permute.xlu0 %6300 }
  0xe4   : > { %14167 = vst [vmem:[#allocation59_spill] sm:$0xff] %v8990_v50  ;;  %v6187_v50 = vunpack.i.l.bf16 %v8931_v19 }
  0xe5   : > { %v8992_v51 = vpop.permute.xlu1 %6315 }
  0xe6   : > { %14168 = vst [vmem:[#allocation60_spill] sm:$0xff] %v8992_v51 }
  0xe7   : > { %v8994_v11 = vpop.permute.xlu0 %6310 }
  0xe8   : > { %14169 = vst [vmem:[#allocation61_spill] sm:$0xff] %v8994_v11 }
  0xe9   : > { %v8996_v35 = vpop.permute.xlu1 %6325 }
  0xea   : > { %14170 = vst [vmem:[#allocation62_spill] sm:$0xff] %v8996_v35  ;;  %v700_v35 = vsel %vm633_vm0, %v6187_v50, %v6267_v53 }
  0xeb   : > { %v8998_v13 = vpop.permute.xlu0 %6320 }
  0xec   : > { %14171 = vst [vmem:[#allocation63_spill] sm:$0xff] %v8998_v13 }
  0xed   : > { %v9000_v30 = vpop.permute.xlu1 %6335 }
  0xee   : > { %14172 = vst [vmem:[#allocation64_spill] sm:$0xff] %v9000_v30  ;;  %v701_v30 = vsel %vm633_vm0, %v6188_v59, %v6268_v3 }
  0xef   : > { %v9002_v58 = vpop.permute.xlu0 %6330 }
  0xf0   : > { %14173 = vst [vmem:[#allocation65_spill] sm:$0xff] %v9002_v58 }
  0xf1   : > { %v6346_v29 = vpop.permute.xlu1 %6345 }
  0xf2   : > { %v6348_v58 = vunpack.i.h.bf16 %v6346_v29  ;;  %v6347_v13 = vunpack.i.l.bf16 %v6346_v29 }
  0xf3   : > { %v6341_v52 = vpop.permute.xlu0 %6340 }
  0xf4   : > { %v6343_v28 = vunpack.i.h.bf16 %v6341_v52  ;;  %v6342_v51 = vunpack.i.l.bf16 %v6341_v52 }
  0xf5   : > { %v6356_v24 = vpop.permute.xlu1 %6355 }
  0xf6   : > { %v6358_v34 = vunpack.i.h.bf16 %v6356_v24  ;;  %v6357_v40 = vunpack.i.l.bf16 %v6356_v24  ;;  %v666_v52 = vsel %vm633_vm0, %v6262_v31, %v6342_v51  ;;  %v667_v19 = vsel %vm633_vm0, %v6263_v42, %v6343_v28 }
  0xf8   : > { %v730_v11 = vsel %vm633_vm0, %v6357_v40, %v6182_v36  ;;  %v731_v39 = vsel %vm633_vm0, %v6358_v34, %v6183_v43  ;;  %v634_v29 = vsel %vm633_vm0, %v6342_v51, %v6357_v40  ;;  %v635_v24 = vsel %vm633_vm0, %v6343_v28, %v6358_v34 }
  0xf9   : > { %v6366_v15 = vpop.permute.xlu1 %6365  ;;  %v9026_v14 = vmax.f32 %v8572_v2, %v730_v11  ;;  %v9029_v31 = vmax.f32 %v8577_v4, %v731_v39  ;;  %v9032_v42 = vmax.f32 %v8762_v60, %v634_v29  ;;  %v9035_v36 = vmax.f32 %v8765_v63, %v635_v24  ;;  %v6351_v39 = vpop.permute.xlu0 %6350 }
  0xfa   : > { %v6368_v43 = vunpack.i.h.bf16 %v6366_v15  ;;  %v6367_v38 = vunpack.i.l.bf16 %v6366_v15  ;;  %v668_v40 = vsel %vm633_vm0, %v6267_v53, %v6347_v13  ;;  %v669_v28 = vsel %vm633_vm0, %v6268_v3, %v6348_v58 }
  0xfb   : > { %v6439_v2 = vpack.i.bf16 %v9029_v31, %v9026_v14  ;;  %v6454_v4 = vpack.i.bf16 %v9035_v36, %v9032_v42  ;;  %v9046_v60 = vmax.f32 %v8750_v46, %v666_v52  ;;  %v9049_v63 = vmax.f32 %v8753_v47, %v667_v19 }
  0xfc   : > { %v6192_v15 = vunpack.i.l.bf16 %v8925_v7  ;;  %v732_v53 = vsel %vm633_vm0, %v6367_v38, %v6187_v50  ;;  %v733_v51 = vsel %vm633_vm0, %v6368_v43, %v6188_v59  ;;  %v9057_v11 = vmax.f32 %v8648_v48, %v700_v35 }
  0xfd   : > { %v6376_v3 = vpop.permute.xlu1 %6375  ;;  %6440 = vrot.lane.b32.xlu0 %v6439_v2, %s8411_s12  ;;  %6455 = vrot.lane.b32.xlu1 %v6454_v4, %s8411_s12  ;;  %v9062_v46 = vmax.f32 %v8588_v8, %v732_v53  ;;  %v9065_v47 = vmax.f32 %v8591_v9, %v733_v51  ;;  %v9068_v34 = vmax.f32 %v8651_v49, %v701_v30  ;;  %v14174_v59 = vunpack.i.l.bf16 %v8969_v16 }
  0xfe   : > { %v9071_v50 = vmax.f32 %v8744_v44, %v668_v40  ;;  %v9074_v48 = vmax.f32 %v8747_v45, %v669_v28  ;;  %v14175_v8 = vunpack.i.h.bf16 %v8969_v16  ;;  %v14176_v52 = vunpack.i.h.bf16 %v8925_v7 }
  0xff   : > { %v702_v35 = vsel %vm633_vm0, %v6192_v15, %v14174_v59  ;;  %v6353_v49 = vunpack.i.h.bf16 %v6351_v39  ;;  %v6352_v30 = vunpack.i.l.bf16 %v6351_v39  ;;  %v6449_v44 = vpack.i.bf16 %v9049_v63, %v9046_v60 }
 0x100   : > { %v703_v9 = vsel %vm633_vm0, %v14176_v52, %v14175_v8  ;;  %v6459_v45 = vpack.i.bf16 %v9065_v47, %v9062_v46  ;;  %v6378_v19 = vunpack.i.h.bf16 %v6376_v3  ;;  %v6377_v29 = vunpack.i.l.bf16 %v6376_v3 }
 0x101   : > { %v636_v24 = vsel %vm633_vm0, %v6347_v13, %v6367_v38  ;;  %v637_v40 = vsel %vm633_vm0, %v6348_v58, %v6368_v43  ;;  %6450 = vrot.lane.b32.xlu0 %v6449_v44, %s8411_s12  ;;  %v6464_v28 = vpack.i.bf16 %v9068_v34, %v9057_v11  ;;  %v9099_v2 = vmax.f32 %v8672_v56, %v702_v35  ;;  %v6386_v44 = vpop.permute.xlu1 %6385 }
 0x102   : > { %6460 = vrot.lane.b32.xlu1 %v6459_v45, %s8411_s12  ;;  %v638_v4 = vsel %vm633_vm0, %v6352_v30, %v6377_v29  ;;  %v639_v39 = vsel %vm633_vm0, %v6353_v49, %v6378_v19  ;;  %v6469_v13 = vpack.i.bf16 %v9074_v48, %v9071_v50  ;;  %v9108_v58 = vmax.f32 %v8780_v20, %v636_v24 }
 0x103   : > { %v9111_v38 = vmax.f32 %v8783_v21, %v637_v40  ;;  %v9114_v43 = vmax.f32 %v8675_v57, %v703_v9  ;;  %v734_v56 = vsel %vm633_vm0, %v6377_v29, %v6192_v15  ;;  %v14177_v53 = vmov %v14176_v52 }
 0x104   : > { %v735_v51 = vsel %vm633_vm0, %v6378_v19, %v14177_v53  ;;  %v9125_v20 = vmax.f32 %v8798_v26, %v638_v4  ;;  %v9128_v21 = vmax.f32 %v8801_v27, %v639_v39  ;;  %v6277_v57 = vunpack.i.l.bf16 %v8963_v41  ;;  %v9179_v39 = vld [vmem:[%s8559_s28 + $0x290] sm:$0xff] }
 0x105   : > { %6465 = vrot.lane.b32.xlu0 %v6464_v28, %s8411_s12  ;;  %v6474_v7 = vpack.i.bf16 %v9111_v38, %v9108_v58  ;;  %v6484_v15 = vpack.i.bf16 %v9114_v43, %v9099_v2  ;;  %v9136_v3 = vmax.f32 %v8566_v0, %v734_v56  ;;  %v9139_v59 = vmax.f32 %v8569_v1, %v735_v51 }
 0x106   : > { %6470 = vrot.lane.b32.xlu1 %v6469_v13, %s8411_s12  ;;  %v6278_v26 = vunpack.i.h.bf16 %v8963_v41  ;;  %v14178_v27 = vunpack.i.l.bf16 %v8969_v16  ;;  %v671_v52 = vsel %vm633_vm0, %v14175_v8, %v6353_v49  ;;  %v6197_v9 = vunpack.i.l.bf16 %v8929_v18  ;;  %v6361_v41 = vpop.permute.xlu0 %6360  ;;  %v9160_v16 = vld [vmem:[%s8559_s28 + $0x2b8] sm:$0xff] }
 0x107   : > { %v6499_v0 = vpack.i.bf16 %v9128_v21, %v9125_v20  ;;  %v6198_v1 = vunpack.i.h.bf16 %v8929_v18  ;;  %v6479_v49 = vpack.i.bf16 %v9139_v59, %v9136_v3  ;;  %v9168_v19 = vmax.f32 %v8771_v17, %v671_v52  ;;  %v9182_v17 = vld [vmem:[%s8559_s28 + $0x2b0] sm:$0xff] }
 0x108   : > { %v670_v35 = vsel %vm633_vm0, %v14178_v27, %v6352_v30  ;;  %v9157_v30 = vld [vmem:[%s8559_s28 + $0x298] sm:$0xff]  ;;  %v704_v29 = vsel %vm633_vm0, %v6197_v9, %v6277_v57  ;;  %v6388_v18 = vunpack.i.h.bf16 %v6386_v44  ;;  %v6387_v24 = vunpack.i.l.bf16 %v6386_v44 }
 0x109   : > { %6475 = vrot.lane.b32.xlu0 %v6474_v7, %s8411_s12  ;;  %v9165_v45 = vmax.f32 %v8768_v10, %v670_v35  ;;  %v705_v40 = vsel %vm633_vm0, %v6198_v1, %v6278_v26  ;;  %v6363_v28 = vunpack.i.h.bf16 %v6361_v41  ;;  %v6362_v4 = vunpack.i.l.bf16 %v6361_v41 }
 0x10a   : > { %6485 = vrot.lane.b32.xlu1 %v6484_v15, %s8411_s12  ;;  %v6504_v10 = vpack.i.bf16 %v9160_v16, %v9157_v30  ;;  %v9185_v13 = vmax.f32 %v8666_v54, %v704_v29  ;;  %v9190_v53 = vmax.f32 %v8669_v55, %v705_v40  ;;  %v736_v15 = vsel %vm633_vm0, %v6387_v24, %v6197_v9  ;;  %v9239_v29 = vld [vmem:[%s8559_s28 + $0x2d8] sm:$0xff] }
 0x10b   : > { %v6489_v56 = vpack.i.bf16 %v9168_v19, %v9165_v45  ;;  %v640_v51 = vsel %vm633_vm0, %v6362_v4, %v6387_v24  ;;  %v641_v7 = vsel %vm633_vm0, %v6363_v28, %v6388_v18  ;;  %v737_v27 = vsel %vm633_vm0, %v6388_v18, %v6198_v1  ;;  %v6396_v1 = vpop.permute.xlu1 %6395  ;;  %14186 = vst [vmem:[#allocation73_spill] sm:$0xff] %v9239_v29  ;;  %v9242_v18 = vld [vmem:[%s8559_s28 + $0x2f8] sm:$0xff] }
 0x10c   : > { %14179 = vst [vmem:[#allocation66_spill] sm:$0xff] %v9190_v53  ;;  %v6494_v54 = vpack.i.bf16 %v9182_v17, %v9179_v39  ;;  %v9205_v55 = vmax.f32 %v8816_v32, %v640_v51  ;;  %v9208_v35 = vmax.f32 %v8819_v33, %v641_v7  ;;  %v6514_v8 = vpack.i.bf16 %v9190_v53, %v9185_v13 }
 0x10d   : > { %6480 = vrot.lane.b32.xlu0 %v6479_v49, %s8411_s12  ;;  %v9213_v52 = vmax.f32 %v8580_v5, %v736_v15  ;;  %v9216_v9 = vmax.f32 %v8583_v6, %v737_v27  ;;  %v672_v44 = vsel %vm633_vm0, %v6277_v57, %v6362_v4  ;;  %v673_v32 = vsel %vm633_vm0, %v6278_v26, %v6363_v28  ;;  %v6371_v6 = vpop.permute.xlu0 %6370 }
 0x10e   : > { %6500 = vrot.lane.b32.xlu1 %v6499_v0, %s8411_s12  ;;  %14180 = vst [vmem:[#allocation67_spill] sm:$0xff] %v9205_v55  ;;  %14181 = vst [vmem:[#allocation68_spill] sm:$0xff] %v9208_v35  ;;  %v6283_v33 = vunpack.i.h.bf16 %v8981_v12  ;;  %v6282_v0 = vunpack.i.l.bf16 %v8981_v12  ;;  %v6203_v5 = vunpack.i.h.bf16 %v8935_v37  ;;  %v6524_v41 = vpack.i.bf16 %v9208_v35, %v9205_v55 }
 0x10f   : > { %14182 = vst [vmem:[#allocation69_spill] sm:$0xff] %v9213_v52  ;;  %14183 = vst [vmem:[#allocation70_spill] sm:$0xff] %v9216_v9  ;;  %v6202_v57 = vunpack.i.l.bf16 %v8935_v37  ;;  %v6509_v26 = vpack.i.bf16 %v9216_v9, %v9213_v52  ;;  %v9233_v12 = vmax.f32 %v8786_v22, %v672_v44  ;;  %v9236_v49 = vmax.f32 %v8789_v23, %v673_v32  ;;  %v8150_v52 = vld [vmem:[%s8559_s28 + $0x280] sm:$0xff] }
 0x110   : > { %14187 = vst [vmem:[#allocation74_spill] sm:$0xff] %v9242_v18  ;;  %v6398_v24 = vunpack.i.h.bf16 %v6396_v1  ;;  %v6397_v40 = vunpack.i.l.bf16 %v6396_v1  ;;  %v6373_v28 = vunpack.i.h.bf16 %v6371_v6  ;;  %v6372_v4 = vunpack.i.l.bf16 %v6371_v6  ;;  %v14192_v1 = vld [vmem:[#allocation22_spill] sm:$0xff] }
 0x111   : > { %6490 = vrot.lane.b32.xlu0 %v6489_v56, %s8411_s12  ;;  %14184 = vst [vmem:[#allocation71_spill] sm:$0xff] %v9233_v12  ;;  %14185 = vst [vmem:[#allocation72_spill] sm:$0xff] %v9236_v49  ;;  %v706_v37 = vsel %vm633_vm0, %v6202_v57, %v6282_v0  ;;  %v707_v22 = vsel %vm633_vm0, %v6203_v5, %v6283_v33  ;;  %v6534_v23 = vpack.i.bf16 %v9242_v18, %v9239_v29  ;;  %v9256_v56 = vld [vmem:[%s8559_s28 + $0x2f0] sm:$0xff]  ;;  %v14254_v18 = vld [vmem:[#allocation35_spill] sm:$0xff] }
 0x112   : > { %6505 = vrot.lane.b32.xlu1 %v6504_v10, %s8410_s29  ;;  %v9253_v10 = vld [vmem:[%s8559_s28 + $0x2d0] sm:$0xff]  ;;  %14189 = vst [vmem:[#allocation76_spill] sm:$0xff] %v9256_v56  ;;  %v6519_v51 = vpack.i.bf16 %v9236_v49, %v9233_v12  ;;  %v642_v7 = vsel %vm633_vm0, %v6372_v4, %v6397_v40  ;;  %v643_v15 = vsel %vm633_vm0, %v6373_v28, %v6398_v24  ;;  %v8149_v49 = vld [vmem:[%s8559_s28 + $0x2a0] sm:$0xff] }
 0x113   : > { %14188 = vst [vmem:[#allocation75_spill] sm:$0xff] %v9253_v10  ;;  %v9265_v27 = vmax.f32 %v8687_v61, %v706_v37  ;;  %v739_v44 = vsel %vm633_vm0, %v6398_v24, %v6203_v5  ;;  %v6529_v32 = vpack.i.bf16 %v9256_v56, %v9253_v10  ;;  %v9279_v6 = vmax.f32 %v14192_v1, %v642_v7  ;;  %v14194_v61 = vld [vmem:[#allocation23_spill] sm:$0xff]  ;;  %v6406_v7 = vpop.permute.xlu1 %6405 }
 0x114   : > { %v674_v24 = vsel %vm633_vm0, %v6282_v0, %v6372_v4  ;;  %v675_v37 = vsel %vm633_vm0, %v6283_v33, %v6373_v28  ;;  %v14202_v28 = vld [vmem:[#allocation18_spill] sm:$0xff] }
 0x115   : > { %6495 = vrot.lane.b32.xlu0 %v6494_v54, %s8410_s29  ;;  %14190 = vst [vmem:[#allocation77_spill] sm:$0xff] %v9265_v27  ;;  %v9268_v54 = vmax.f32 %v8690_v62, %v707_v22  ;;  %14193 = vst [vmem:[#allocation22_spill] sm:$0xff] %v9279_v6  ;;  %v14196_v62 = vld [vmem:[#allocation10_spill] sm:$0xff]  ;;  %v14200_v22 = vld [vmem:[#allocation55_spill] sm:$0xff]  ;;  %v9307_v4 = vmax.f32 %v14202_v28, %v674_v24 }
 0x116   : > { %6515 = vrot.lane.b32.xlu1 %v6514_v8, %s8411_s12  ;;  %v738_v8 = vsel %vm633_vm0, %v6397_v40, %v6202_v57  ;;  %v14198_v57 = vld [vmem:[#allocation11_spill] sm:$0xff]  ;;  %v9327_v28 = vld [vmem:[%s8559_s28 + $0x310] sm:$0xff] }
 0x117   : > { %14191 = vst [vmem:[#allocation78_spill] sm:$0xff] %v9268_v54  ;;  %v9288_v40 = vmax.f32 %v14198_v57, %v739_v44  ;;  %v6544_v5 = vpack.i.bf16 %v9268_v54, %v9265_v27  ;;  %v6381_v44 = vpop.permute.xlu0 %6380  ;;  %14203 = vst [vmem:[#allocation55_spill] sm:$0xff] %v9307_v4  ;;  %v9316_v57 = vld [vmem:[%s8559_s28 + $0x338] sm:$0xff] }
 0x118   : > { %14208 = vst [vmem:[#allocation79_spill] sm:$0xff] %v9327_v28 }
 0x119   : > { %6510 = vrot.lane.b32.xlu0 %v6509_v26, %s8411_s12  ;;  %v9285_v26 = vmax.f32 %v14196_v62, %v738_v8  ;;  %14199 = vst [vmem:[#allocation11_spill] sm:$0xff] %v9288_v40  ;;  %v9313_v62 = vld [vmem:[%s8559_s28 + $0x318] sm:$0xff] }
 0x11a   : > { %6525 = vrot.lane.b32.xlu1 %v6524_v41, %s8411_s12  ;;  %v9282_v41 = vmax.f32 %v14194_v61, %v643_v15  ;;  %v14201_v15 = vld [vmem:[#allocation42_spill] sm:$0xff]  ;;  %v14204_v61 = vld [vmem:[#allocation19_spill] sm:$0xff]  ;;  %14206 = vst [vmem:[#allocation18_spill] sm:$0xff] %v9313_v62 }
 0x11b   : > { %14197 = vst [vmem:[#allocation10_spill] sm:$0xff] %v9285_v26  ;;  %v6208_v8 = vunpack.i.h.bf16 %v14201_v15  ;;  %v6207_v0 = vunpack.i.l.bf16 %v14201_v15  ;;  %v6539_v33 = vpack.i.bf16 %v9288_v40, %v9285_v26  ;;  %14207 = vst [vmem:[#allocation19_spill] sm:$0xff] %v9316_v57  ;;  %v14210_v26 = vld [vmem:[#allocation12_spill] sm:$0xff] }
 0x11c   : > { %14195 = vst [vmem:[#allocation23_spill] sm:$0xff] %v9282_v41  ;;  %v6554_v1 = vpack.i.bf16 %v9282_v41, %v9279_v6  ;;  %v6383_v41 = vunpack.i.h.bf16 %v6381_v44  ;;  %v6382_v6 = vunpack.i.l.bf16 %v6381_v44 }
 0x11d   : > { %6520 = vrot.lane.b32.xlu0 %v6519_v51, %s8411_s12  ;;  %v6287_v51 = vunpack.i.l.bf16 %v14200_v22 }
 0x11e   : > { %6535 = vrot.lane.b32.xlu1 %v6534_v23, %s8410_s29  ;;  %v6288_v23 = vunpack.i.h.bf16 %v14200_v22  ;;  %v6407_v22 = vunpack.i.l.bf16 %v6406_v7 }
 0x11f   : > { %v708_v15 = vsel %vm633_vm0, %v6207_v0, %v6287_v51 }
 0x120   : > { %v709_v24 = vsel %vm633_vm0, %v6208_v8, %v6288_v23  ;;  %v644_v44 = vsel %vm633_vm0, %v6382_v6, %v6407_v22  ;;  %v9339_v40 = vmax.f32 %v14210_v26, %v708_v15  ;;  %v14216_v26 = vld [vmem:[#allocation27_spill] sm:$0xff] }
 0x121   : > { %6530 = vrot.lane.b32.xlu0 %v6529_v32, %s8410_s29  ;;  %v9310_v32 = vmax.f32 %v14204_v61, %v675_v37  ;;  %v6564_v37 = vpack.i.bf16 %v9316_v57, %v9313_v62  ;;  %v9330_v61 = vld [vmem:[%s8559_s28 + $0x330] sm:$0xff]  ;;  %v740_v57 = vsel %vm633_vm0, %v6407_v22, %v6207_v0  ;;  %v14220_v0 = vld [vmem:[#allocation9_spill] sm:$0xff] }
 0x122   : > { %6545 = vrot.lane.b32.xlu1 %v6544_v5, %s8411_s12  ;;  %v6408_v5 = vunpack.i.h.bf16 %v6406_v7  ;;  %14209 = vst [vmem:[#allocation80_spill] sm:$0xff] %v9330_v61  ;;  %14211 = vst [vmem:[#allocation12_spill] sm:$0xff] %v9339_v40 }
 0x123   : > { %14205 = vst [vmem:[#allocation42_spill] sm:$0xff] %v9310_v32  ;;  %v6549_v7 = vpack.i.bf16 %v9310_v32, %v9307_v4  ;;  %v6559_v32 = vpack.i.bf16 %v9330_v61, %v9327_v28  ;;  %v14214_v4 = vld [vmem:[#allocation26_spill] sm:$0xff] }
 0x124   : > { %v741_v62 = vsel %vm633_vm0, %v6408_v5, %v6208_v8  ;;  %v9353_v27 = vmax.f32 %v14214_v4, %v644_v44  ;;  %v677_v4 = vsel %vm633_vm0, %v6288_v23, %v6383_v41  ;;  %v14224_v23 = vld [vmem:[#allocation20_spill] sm:$0xff] }
 0x125   : > { %6540 = vrot.lane.b32.xlu0 %v6539_v33, %s8411_s12  ;;  %v645_v33 = vsel %vm633_vm0, %v6383_v41, %v6408_v5  ;;  %v9362_v22 = vmax.f32 %v14220_v0, %v741_v62  ;;  %v676_v5 = vsel %vm633_vm0, %v6287_v51, %v6382_v6  ;;  %v14223_v62 = vld [vmem:[#allocation44_spill] sm:$0xff]  ;;  %v14226_v0 = vld [vmem:[#allocation21_spill] sm:$0xff] }
 0x126   : > { %6555 = vrot.lane.b32.xlu1 %v6554_v1, %s8411_s12  ;;  %v14212_v1 = vld [vmem:[#allocation13_spill] sm:$0xff]  ;;  %14215 = vst [vmem:[#allocation26_spill] sm:$0xff] %v9353_v27  ;;  %v9356_v15 = vmax.f32 %v14216_v26, %v645_v33  ;;  %v6416_v33 = vpop.permute.xlu1 %6415  ;;  %v6213_v26 = vunpack.i.h.bf16 %v14223_v62  ;;  %v6212_v6 = vunpack.i.l.bf16 %v14223_v62  ;;  %v9381_v51 = vmax.f32 %v14224_v23, %v676_v5  ;;  %v9401_v23 = vld [vmem:[%s8559_s28 + $0x350] sm:$0xff] }
 0x127   : > { %v9342_v54 = vmax.f32 %v14212_v1, %v709_v24  ;;  %v14218_v24 = vld [vmem:[#allocation8_spill] sm:$0xff]  ;;  %14221 = vst [vmem:[#allocation9_spill] sm:$0xff] %v9362_v22  ;;  %14230 = vst [vmem:[#allocation81_spill] sm:$0xff] %v9401_v23 }
 0x128   : > { %14217 = vst [vmem:[#allocation27_spill] sm:$0xff] %v9356_v15  ;;  %v9359_v1 = vmax.f32 %v14218_v24, %v740_v57  ;;  %v6391_v57 = vpop.permute.xlu0 %6390  ;;  %v6584_v24 = vpack.i.bf16 %v9356_v15, %v9353_v27 }
 0x129   : > { %14213 = vst [vmem:[#allocation13_spill] sm:$0xff] %v9342_v54  ;;  %6550 = vrot.lane.b32.xlu0 %v6549_v7, %s8411_s12  ;;  %v6574_v8 = vpack.i.bf16 %v9342_v54, %v9339_v40  ;;  %v9390_v54 = vld [vmem:[%s8559_s28 + $0x378] sm:$0xff]  ;;  %v6417_v40 = vunpack.i.l.bf16 %v6416_v33  ;;  %v6393_v15 = vunpack.i.h.bf16 %v6391_v57  ;;  %v6392_v27 = vunpack.i.l.bf16 %v6391_v57 }
 0x12a   : > { %6565 = vrot.lane.b32.xlu1 %v6564_v37, %s8410_s29  ;;  %14219 = vst [vmem:[#allocation8_spill] sm:$0xff] %v9359_v1  ;;  %v14222_v37 = vld [vmem:[#allocation57_spill] sm:$0xff]  ;;  %v6569_v41 = vpack.i.bf16 %v9362_v22, %v9359_v1  ;;  %14229 = vst [vmem:[#allocation21_spill] sm:$0xff] %v9390_v54  ;;  %v14232_v1 = vld [vmem:[#allocation16_spill] sm:$0xff] }
 0x12b   : > { %v6293_v7 = vunpack.i.h.bf16 %v14222_v37  ;;  %v6292_v44 = vunpack.i.l.bf16 %v14222_v37  ;;  %14225 = vst [vmem:[#allocation57_spill] sm:$0xff] %v9381_v51  ;;  %v9384_v37 = vmax.f32 %v14226_v0, %v677_v4  ;;  %v9404_v0 = vld [vmem:[%s8559_s28 + $0x370] sm:$0xff]  ;;  %v742_v28 = vsel %vm633_vm0, %v6417_v40, %v6212_v6 }
 0x12c   : > { %14231 = vst [vmem:[#allocation82_spill] sm:$0xff] %v9404_v0  ;;  %v9406_v57 = vpop.permute.xlu0 %6400 }
 0x12d   : > { %6560 = vrot.lane.b32.xlu0 %v6559_v32, %s8410_s29  ;;  %14227 = vst [vmem:[#allocation44_spill] sm:$0xff] %v9384_v37  ;;  %v9387_v32 = vld [vmem:[%s8559_s28 + $0x358] sm:$0xff]  ;;  %v710_v62 = vsel %vm633_vm0, %v6212_v6, %v6292_v44  ;;  %v711_v5 = vsel %vm633_vm0, %v6213_v26, %v6293_v7 }
 0x12e   : > { %6575 = vrot.lane.b32.xlu1 %v6574_v8, %s8411_s12  ;;  %14228 = vst [vmem:[#allocation20_spill] sm:$0xff] %v9387_v32  ;;  %v6418_v8 = vunpack.i.h.bf16 %v6416_v33  ;;  %v6594_v4 = vpack.i.bf16 %v9390_v54, %v9387_v32  ;;  %v6579_v33 = vpack.i.bf16 %v9384_v37, %v9381_v51  ;;  %v9415_v22 = vmax.f32 %v14232_v1, %v710_v62  ;;  %v14234_v54 = vld [vmem:[#allocation17_spill] sm:$0xff]  ;;  %v14236_v51 = vld [vmem:[#allocation30_spill] sm:$0xff]  ;;  %v14238_v1 = vld [vmem:[#allocation31_spill] sm:$0xff] }
 0x12f   : > { %v9418_v32 = vmax.f32 %v14234_v54, %v711_v5  ;;  %v6589_v37 = vpack.i.bf16 %v9404_v0, %v9401_v23  ;;  %v8135_v54 = vld [vmem:[%s8559_s28 + $0x180] sm:$0xff]  ;;  %v6403_v23 = vunpack.i.h.bf16 %v9406_v57 }
 0x130   : > { %14233 = vst [vmem:[#allocation16_spill] sm:$0xff] %v9415_v22  ;;  %v743_v61 = vsel %vm633_vm0, %v6418_v8, %v6213_v26  ;;  %v9435_v5 = vmax.f32 %v8135_v54, %v742_v28  ;;  %v9448_v28 = vpop.permute.xlu0 %6410 }
 0x131   : > { %6570 = vrot.lane.b32.xlu0 %v6569_v41, %s8411_s12  ;;  %v646_v41 = vsel %vm633_vm0, %v6392_v27, %v6417_v40  ;;  %14235 = vst [vmem:[#allocation17_spill] sm:$0xff] %v9418_v32  ;;  %v8136_v40 = vld [vmem:[%s8559_s28 + $0x1a0] sm:$0xff]  ;;  %v6604_v26 = vpack.i.bf16 %v9418_v32, %v9415_v22  ;;  %v366_v32 = vld [vmem:[%s8559_s28 + $0x3b8] sm:$0xff] }
 0x132   : > { %6585 = vrot.lane.b32.xlu1 %v6584_v24, %s8411_s12  ;;  %v647_v24 = vsel %vm633_vm0, %v6393_v15, %v6418_v8  ;;  %v9429_v10 = vmax.f32 %v14236_v51, %v646_v41  ;;  %14240 = vst [vmem:[#allocation83_spill] sm:$0xff] %v9435_v5  ;;  %v9438_v6 = vmax.f32 %v8136_v40, %v743_v61  ;;  %v14243_v61 = vld [vmem:[#allocation43_spill] sm:$0xff]  ;;  %v14246_v40 = vld [vmem:[#allocation25_spill] sm:$0xff] }
 0x133   : > { %v9432_v62 = vmax.f32 %v14238_v1, %v647_v24  ;;  %v678_v8 = vsel %vm633_vm0, %v6292_v44, %v6392_v27  ;;  %v679_v51 = vsel %vm633_vm0, %v6293_v7, %v6393_v15  ;;  %v6426_v24 = vpop.permute.xlu1 %6425  ;;  %v6218_v1 = vunpack.i.h.bf16 %v14243_v61  ;;  %v14244_v7 = vld [vmem:[#allocation24_spill] sm:$0xff] }
 0x134   : > { %14237 = vst [vmem:[#allocation30_spill] sm:$0xff] %v9429_v10  ;;  %14241 = vst [vmem:[#allocation84_spill] sm:$0xff] %v9438_v6  ;;  %v6217_v27 = vunpack.i.l.bf16 %v14243_v61  ;;  %v6599_v15 = vpack.i.bf16 %v9438_v6, %v9435_v5  ;;  %v9459_v44 = vmax.f32 %v14244_v7, %v678_v8  ;;  %v6428_v22 = vunpack.i.h.bf16 %v6426_v24  ;;  %v361_v7 = vld [vmem:[%s8559_s28 + $0x390] sm:$0xff] }
 0x135   : > { %6580 = vrot.lane.b32.xlu0 %v6579_v33, %s8411_s12  ;;  %14239 = vst [vmem:[#allocation31_spill] sm:$0xff] %v9432_v62  ;;  %v6614_v54 = vpack.i.bf16 %v9432_v62, %v9429_v10  ;;  %v6402_v62 = vunpack.i.l.bf16 %v9406_v57  ;;  %v14248_v5 = vld [vmem:[#allocation14_spill] sm:$0xff] }
 0x136   : > { %6595 = vrot.lane.b32.xlu1 %v6594_v4, %s8410_s29  ;;  %v14242_v4 = vld [vmem:[#allocation56_spill] sm:$0xff]  ;;  %v649_v10 = vsel %vm633_vm0, %v6403_v23, %v6428_v22  ;;  %v745_v0 = vsel %vm633_vm0, %v6428_v22, %v6218_v1 }
 0x137   : > { %v6298_v33 = vunpack.i.h.bf16 %v14242_v4  ;;  %v6297_v41 = vunpack.i.l.bf16 %v14242_v4  ;;  %14245 = vst [vmem:[#allocation56_spill] sm:$0xff] %v9459_v44  ;;  %v9462_v4 = vmax.f32 %v14246_v40, %v679_v51  ;;  %v365_v40 = vld [vmem:[%s8559_s28 + $0x3b0] sm:$0xff]  ;;  %v6436_v29 = vpop.permute.xlu1 %6435 }
 0x139   : > { %6590 = vrot.lane.b32.xlu0 %v6589_v37, %s8410_s29  ;;  %14247 = vst [vmem:[#allocation43_spill] sm:$0xff] %v9462_v4  ;;  %v362_v37 = vld [vmem:[%s8559_s28 + $0x398] sm:$0xff]  ;;  %v712_v61 = vsel %vm633_vm0, %v6217_v27, %v6297_v41  ;;  %v713_v8 = vsel %vm633_vm0, %v6218_v1, %v6298_v33  ;;  %v6609_v57 = vpack.i.bf16 %v9462_v4, %v9459_v44  ;;  %v14252_v44 = vld [vmem:[#allocation34_spill] sm:$0xff] }
 0x13a   : > { %6605 = vrot.lane.b32.xlu1 %v6604_v26, %s8411_s12  ;;  %v6427_v26 = vunpack.i.l.bf16 %v6426_v24  ;;  %v6624_v51 = vpack.i.bf16 %v366_v32, %v362_v37  ;;  %v9476_v24 = vpop.permute.xlu0 %6420  ;;  %v9485_v6 = vmax.f32 %v14248_v5, %v712_v61  ;;  %v6619_v4 = vpack.i.bf16 %v365_v40, %v361_v7  ;;  %v8137_v61 = vld [vmem:[%s8559_s28 + $0x1c0] sm:$0xff]  ;;  %v14259_v7 = vld [vmem:[#allocation46_spill] sm:$0xff] }
 0x13b   : > { %v9500_v5 = vmax.f32 %v14254_v18, %v649_v10  ;;  %v680_v1 = vsel %vm633_vm0, %v6297_v41, %v6402_v62 }
 0x13c   : > { %14249 = vst [vmem:[#allocation24_spill] sm:$0xff] %v9485_v6  ;;  %v744_v37 = vsel %vm633_vm0, %v6427_v26, %v6217_v27 }
 0x13d   : > { %6600 = vrot.lane.b32.xlu0 %v6599_v15, %s8411_s12  ;;  %v648_v15 = vsel %vm633_vm0, %v6402_v62, %v6427_v26  ;;  %v14258_v26 = vld [vmem:[#allocation59_spill] sm:$0xff]  ;;  %v6222_v62 = vunpack.i.l.bf16 %v14259_v7 }
 0x13e   : > { %6615 = vrot.lane.b32.xlu1 %v6614_v54, %s8411_s12  ;;  %v14250_v54 = vld [vmem:[#allocation15_spill] sm:$0xff]  ;;  %v9497_v56 = vmax.f32 %v14252_v44, %v648_v15  ;;  %v681_v44 = vsel %vm633_vm0, %v6298_v33, %v6403_v23  ;;  %v6303_v18 = vunpack.i.h.bf16 %v14258_v26  ;;  %v6302_v10 = vunpack.i.l.bf16 %v14258_v26  ;;  %v14260_v33 = vld [vmem:[#allocation28_spill] sm:$0xff] }
 0x13f   : > { %v9488_v32 = vmax.f32 %v14250_v54, %v713_v8  ;;  %14255 = vst [vmem:[#allocation15_spill] sm:$0xff] %v9500_v5  ;;  %v9503_v8 = vmax.f32 %v8137_v61, %v744_v37  ;;  %v8138_v54 = vld [vmem:[%s8559_s28 + $0x1e0] sm:$0xff]  ;;  %v9525_v41 = vmax.f32 %v14260_v33, %v680_v1  ;;  %v374_v37 = vld [vmem:[%s8559_s28 + $0x3f8] sm:$0xff]  ;;  %v6412_v26 = vunpack.i.l.bf16 %v9448_v28  ;;  %v369_v33 = vld [vmem:[%s8559_s28 + $0x3d0] sm:$0xff] }
 0x140   : > { %14253 = vst [vmem:[#allocation14_spill] sm:$0xff] %v9497_v56  ;;  %v9506_v27 = vmax.f32 %v8138_v54, %v745_v0  ;;  %v6223_v0 = vunpack.i.h.bf16 %v14259_v7  ;;  %v6644_v40 = vpack.i.bf16 %v9500_v5, %v9497_v56  ;;  %v714_v7 = vsel %vm633_vm0, %v6222_v62, %v6302_v10 }
 0x141   : > { %14251 = vst [vmem:[#allocation25_spill] sm:$0xff] %v9488_v32  ;;  %6610 = vrot.lane.b32.xlu0 %v6609_v57, %s8411_s12  ;;  %14256 = vst [vmem:[#allocation34_spill] sm:$0xff] %v9503_v8  ;;  %v6634_v22 = vpack.i.bf16 %v9488_v32, %v9485_v6  ;;  %v14262_v57 = vld [vmem:[#allocation29_spill] sm:$0xff] }
 0x142   : > { %6625 = vrot.lane.b32.xlu1 %v6624_v51, %s8410_s29  ;;  %14257 = vst [vmem:[#allocation35_spill] sm:$0xff] %v9506_v27  ;;  %v6431_v51 = vpop.permute.xlu0 %6430  ;;  %v6629_v23 = vpack.i.bf16 %v9506_v27, %v9503_v8  ;;  %14261 = vst [vmem:[#allocation59_spill] sm:$0xff] %v9525_v41  ;;  %v9528_v15 = vmax.f32 %v14262_v57, %v681_v44  ;;  %v715_v1 = vsel %vm633_vm0, %v6223_v0, %v6303_v18  ;;  %v373_v57 = vld [vmem:[%s8559_s28 + $0x3f0] sm:$0xff]  ;;  %v8140_v8 = vld [vmem:[%s8559_s28 + $0x228] sm:$0xff] }
 0x143   : > { %v6433_v61 = vunpack.i.h.bf16 %v6431_v51  ;;  %v6432_v54 = vunpack.i.l.bf16 %v6431_v51  ;;  %v9552_v27 = vmax.f32 %v8140_v8, %v715_v1  ;;  %v14270_v1 = vld [vmem:[#allocation41_spill] sm:$0xff] }
 0x144   : > { %14263 = vst [vmem:[#allocation46_spill] sm:$0xff] %v9528_v15 }
 0x145   : > { %6620 = vrot.lane.b32.xlu0 %v6619_v4, %s8410_s29  ;;  %v370_v4 = vld [vmem:[%s8559_s28 + $0x3d8] sm:$0xff]  ;;  %v650_v51 = vsel %vm633_vm0, %v6412_v26, %v6432_v54  ;;  %14265 = vst [vmem:[#allocation29_spill] sm:$0xff] %v9552_v27 }
 0x146   : > { %6635 = vrot.lane.b32.xlu1 %v6634_v22, %s8411_s12  ;;  %v6413_v22 = vunpack.i.h.bf16 %v9448_v28  ;;  %v6654_v44 = vpack.i.bf16 %v374_v37, %v370_v4  ;;  %v6639_v28 = vpack.i.bf16 %v9528_v15, %v9525_v41  ;;  %v747_v4 = vsel %vm633_vm0, %v6433_v61, %v6223_v0  ;;  %v14266_v37 = vld [vmem:[#allocation58_spill] sm:$0xff]  ;;  %v14268_v41 = vld [vmem:[#allocation40_spill] sm:$0xff] }
 0x147   : > { %v6308_v32 = vunpack.i.h.bf16 %v14266_v37  ;;  %v6307_v6 = vunpack.i.l.bf16 %v14266_v37  ;;  %v9563_v8 = vmax.f32 %v14268_v41, %v650_v51 }
 0x148   : > { %v651_v5 = vsel %vm633_vm0, %v6413_v22, %v6433_v61  ;;  %v8141_v61 = vld [vmem:[%s8559_s28 + $0x200] sm:$0xff]  ;;  %v683_v41 = vsel %vm633_vm0, %v6303_v18, %v6413_v22 }
 0x149   : > { %6630 = vrot.lane.b32.xlu0 %v6629_v23, %s8411_s12  ;;  %v8139_v23 = vld [vmem:[%s8559_s28 + $0x208] sm:$0xff]  ;;  %14269 = vst [vmem:[#allocation58_spill] sm:$0xff] %v9563_v8  ;;  %v9566_v35 = vmax.f32 %v14270_v1, %v651_v5  ;;  %v6437_v5 = vunpack.i.l.bf16 %v6436_v29  ;;  %v14274_v18 = vld [vmem:[#allocation32_spill] sm:$0xff] }
 0x14a   : > { %6645 = vrot.lane.b32.xlu1 %v6644_v40, %s8411_s12  ;;  %v9549_v56 = vmax.f32 %v8139_v23, %v714_v7  ;;  %v746_v40 = vsel %vm633_vm0, %v6432_v54, %v6222_v62  ;;  %v6649_v7 = vpack.i.bf16 %v373_v57, %v369_v33  ;;  %v14267_v23 = vld [vmem:[#allocation45_spill] sm:$0xff]  ;;  %v682_v62 = vsel %vm633_vm0, %v6302_v10, %v6412_v26 }
 0x14b   : > { %v6228_v15 = vunpack.i.h.bf16 %v14267_v23  ;;  %14271 = vst [vmem:[#allocation45_spill] sm:$0xff] %v9566_v35  ;;  %v6227_v0 = vunpack.i.l.bf16 %v14267_v23  ;;  %v9573_v54 = vmax.f32 %v8141_v61, %v746_v40  ;;  %v6438_v57 = vunpack.i.h.bf16 %v6436_v29  ;;  %v8144_v61 = vld [vmem:[%s8559_s28 + $0x248] sm:$0xff] }
 0x14c   : > { %14264 = vst [vmem:[#allocation28_spill] sm:$0xff] %v9549_v56  ;;  %v6423_v26 = vunpack.i.h.bf16 %v9476_v24  ;;  %v6422_v40 = vunpack.i.l.bf16 %v9476_v24  ;;  %v9590_v22 = vmax.f32 %v14274_v18, %v682_v62  ;;  %v6674_v29 = vpack.i.bf16 %v9566_v35, %v9563_v8  ;;  %v14280_v18 = vld [vmem:[#allocation61_spill] sm:$0xff]  ;;  %v14281_v8 = vld [vmem:[#allocation48_spill] sm:$0xff] }
 0x14d   : > { %6640 = vrot.lane.b32.xlu0 %v6639_v28, %s8411_s12  ;;  %14272 = vst [vmem:[#allocation40_spill] sm:$0xff] %v9573_v54  ;;  %v8142_v28 = vld [vmem:[%s8559_s28 + $0x220] sm:$0xff]  ;;  %v717_v51 = vsel %vm633_vm0, %v6228_v15, %v6308_v32  ;;  %v716_v10 = vsel %vm633_vm0, %v6227_v0, %v6307_v6  ;;  %v13894_v35 = vunpack.i.l.bf16 %v14280_v18  ;;  %v14294_v53 = vunpack.i.h.bf16 %v14280_v18 }
 0x14e   : > { %6655 = vrot.lane.b32.xlu1 %v6654_v44, %s8410_s29  ;;  %v9576_v33 = vmax.f32 %v8142_v28, %v747_v4  ;;  %v6664_v44 = vpack.i.bf16 %v9552_v27, %v9549_v56  ;;  %14275 = vst [vmem:[#allocation32_spill] sm:$0xff] %v9590_v22  ;;  %v14276_v4 = vld [vmem:[#allocation33_spill] sm:$0xff]  ;;  %v652_v23 = vsel %vm633_vm0, %v6422_v40, %v6437_v5 }
 0x14f   : > { %v9596_v37 = vmax.f32 %v14276_v4, %v683_v41  ;;  %v653_v1 = vsel %vm633_vm0, %v6423_v26, %v6438_v57  ;;  %v9608_v28 = vmax.f32 %v8144_v61, %v716_v10  ;;  %v749_v41 = vsel %vm633_vm0, %v6438_v57, %v6228_v15  ;;  %v8145_v57 = vld [vmem:[%s8559_s28 + $0x260] sm:$0xff] }
 0x150   : > { %14273 = vst [vmem:[#allocation41_spill] sm:$0xff] %v9576_v33  ;;  %v6659_v24 = vpack.i.bf16 %v9576_v33, %v9573_v54  ;;  %v13895_v4 = vunpack.i.h.bf16 %v14280_v18  ;;  %v6233_v54 = vunpack.i.h.bf16 %v14281_v8  ;;  %v14282_v33 = vld [vmem:[#allocation38_spill] sm:$0xff]  ;;  %v6232_v15 = vunpack.i.l.bf16 %v14281_v8 }
 0x151   : > { %6650 = vrot.lane.b32.xlu0 %v6649_v7, %s8410_s29  ;;  %14277 = vst [vmem:[#allocation33_spill] sm:$0xff] %v9596_v37  ;;  %v8143_v7 = vld [vmem:[%s8559_s28 + $0x268] sm:$0xff]  ;;  %14279 = vst [vmem:[#allocation86_spill] sm:$0xff] %v9608_v28  ;;  %s8413_s29 = smov 8  }
 0x152   : > { %6665 = vrot.lane.b32.xlu1 %v6664_v44, %s8411_s12  ;;  %v9605_v62 = vmax.f32 %v8143_v7, %v717_v51  ;;  %v748_v44 = vsel %vm633_vm0, %v6437_v5, %v6227_v0  ;;  %v9619_v51 = vmax.f32 %v14282_v33, %v652_v23  ;;  %v14284_v7 = vld [vmem:[#allocation39_spill] sm:$0xff]  ;;  %v9627_v0 = vmax.f32 %v8145_v57, %v749_v41  ;;  %v8146_v5 = vld [vmem:[%s8559_s28 + $0x240] sm:$0xff] }
 0x153   : > { %v9622_v10 = vmax.f32 %v14284_v7, %v653_v1  ;;  %v9630_v61 = vmax.f32 %v8146_v5, %v748_v44  ;;  %v685_v33 = vsel %vm633_vm0, %v6308_v32, %v6423_v26  ;;  %v684_v23 = vsel %vm633_vm0, %v6307_v6, %v6422_v40  ;;  %v14288_v32 = vld [vmem:[#allocation37_spill] sm:$0xff]  ;;  %v14290_v40 = vld [vmem:[#allocation36_spill] sm:$0xff] }
 0x154   : > { %14278 = vst [vmem:[#allocation85_spill] sm:$0xff] %v9605_v62  ;;  %14283 = vst [vmem:[#allocation61_spill] sm:$0xff] %v9619_v51  ;;  %v6684_v8 = vpack.i.bf16 %v9605_v62, %v9608_v28  ;;  %v719_v1 = vsel %vm633_vm0, %v6233_v54, %v13895_v4  ;;  %v9653_v26 = vmax.f32 %v14288_v32, %v685_v33  ;;  %v8147_v7 = vld [vmem:[%s8559_s28 + $0x288] sm:$0xff] }
 0x155   : > { %6660 = vrot.lane.b32.xlu0 %v6659_v24, %s8411_s12  ;;  %14285 = vst [vmem:[#allocation48_spill] sm:$0xff] %v9622_v10  ;;  %14286 = vst [vmem:[#allocation38_spill] sm:$0xff] %v9627_v0  ;;  %v6669_v24 = vpack.i.bf16 %v9596_v37, %v9590_v22  ;;  %v6694_v6 = vpack.i.bf16 %v9622_v10, %v9619_v51  ;;  %v9656_v41 = vmax.f32 %v14290_v40, %v684_v23  ;;  %v8148_v5 = vld [vmem:[%s8559_s28 + $0x2a8] sm:$0xff]  ;;  %v6446_v23 = vpop.permute.xlu1 %6445 }
 0x156   : > { %6675 = vrot.lane.b32.xlu1 %v6674_v29, %s8411_s12  ;;  %14287 = vst [vmem:[#allocation39_spill] sm:$0xff] %v9630_v61  ;;  %v718_v29 = vsel %vm633_vm0, %v6232_v15, %v13894_v35  ;;  %14289 = vst [vmem:[#allocation37_spill] sm:$0xff] %v9653_v26  ;;  %v6679_v44 = vpack.i.bf16 %v9627_v0, %v9630_v61  ;;  %v9664_v35 = vmax.f32 %v8148_v5, %v719_v1 }
 0x157   : > { %14291 = vst [vmem:[#allocation36_spill] sm:$0xff] %v9656_v41  ;;  %v9661_v57 = vmax.f32 %v8147_v7, %v718_v29  ;;  %v6447_v61 = vunpack.i.l.bf16 %v6446_v23 }
 0x158   : > { %14293 = vst [vmem:[#allocation88_spill] sm:$0xff] %v9664_v35 }
 0x159   : > { %6670 = vrot.lane.b32.xlu0 %v6669_v24, %s8411_s12  ;;  %14292 = vst [vmem:[#allocation87_spill] sm:$0xff] %v9661_v57  ;;  %v6689_v24 = vpack.i.bf16 %v9653_v26, %v9656_v41  ;;  %v6704_v33 = vpack.i.bf16 %v9664_v35, %v9661_v57  ;;  %v6448_v41 = vunpack.i.h.bf16 %v6446_v23 }
 0x15a   : > { %6685 = vrot.lane.b32.xlu1 %v6684_v8, %s8411_s12 }
 0x15d   : > { %6680 = vrot.lane.b32.xlu0 %v6679_v44, %s8411_s12 }
 0x15e   : > { %6695 = vrot.lane.b32.xlu1 %v6694_v6, %s8411_s12 }
 0x161   : > { %6690 = vrot.lane.b32.xlu0 %v6689_v24, %s8411_s12 }
 0x162   : > { %6705 = vrot.lane.b32.xlu1 %v6704_v33, %s8411_s12 }
 0x16f   : > { %v6441_v8 = vpop.permute.xlu0 %6440  ;;  %v6456_v29 = vpop.permute.xlu1 %6455 }
 0x170   : > { %v6443_v24 = vunpack.i.h.bf16 %v6441_v8  ;;  %v6442_v33 = vunpack.i.l.bf16 %v6441_v8  ;;  %v6458_v57 = vunpack.i.h.bf16 %v6456_v29  ;;  %v6457_v0 = vunpack.i.l.bf16 %v6456_v29 }
 0x172   : > { %v1211_v62 = vsel %vm1146_vm1, %v6442_v33, %v6447_v61  ;;  %v1212_v28 = vsel %vm1146_vm1, %v6443_v24, %v6448_v41  ;;  %v1244_v8 = vsel %vm1146_vm1, %v6458_v57, %v6443_v24  ;;  %v1243_v29 = vsel %vm1146_vm1, %v6457_v0, %v6442_v33 }
 0x173   : > { %v6451_v32 = vpop.permute.xlu0 %6450 }
 0x174   : > { %v9674_v1 = vpop.permute.xlu1 %6460  ;;  %v6452_v37 = vunpack.i.l.bf16 %v6451_v32  ;;  %v6453_v55 = vunpack.i.h.bf16 %v6451_v32  ;;  %v14295_v32 = vunpack.i.l.bf16 %v14280_v18  ;;  %v14298_v18 = vld [vmem:[#allocation54_spill] sm:$0xff] }
 0x177   : > { %v9676_v40 = vpop.permute.xlu0 %6465 }
 0x178   : > { %v9678_v44 = vpop.permute.xlu1 %6470 }
 0x17b   : > { %v9680_v6 = vpop.permute.xlu0 %6475 }
 0x17c   : > { %v9682_v7 = vpop.permute.xlu1 %6485 }
 0x17f   : > { %v9684_v5 = vpop.permute.xlu0 %6480 }
 0x180   : > { %v9686_v4 = vpop.permute.xlu1 %6500 }
 0x183   : > { %v9688_v35 = vpop.permute.xlu0 %6490 }
 0x184   : > { %v6506_v10 = vpop.permute.xlu1 %6505 }
 0x185   : > { %v6508_v51 = vunpack.i.h.bf16 %v6506_v10  ;;  %v6507_v26 = vunpack.i.l.bf16 %v6506_v10 }
 0x187   : > { %v6496_v22 = vpop.permute.xlu0 %6495  ;;  %v751_v27 = vsel %vm633_vm0, %v6508_v51, %v6233_v54  ;;  %v750_v10 = vsel %vm633_vm0, %v6507_v26, %v6232_v15 }
 0x188   : > { %v6498_v56 = vunpack.i.h.bf16 %v6496_v22  ;;  %v6497_v23 = vunpack.i.l.bf16 %v6496_v22  ;;  %v9704_v12 = vmax.f32 %v8149_v49, %v751_v27  ;;  %v9707_v9 = vmax.f32 %v8150_v52, %v750_v10  ;;  %v9709_v24 = vpop.permute.xlu1 %6515 }
 0x189   : > { %v9741_v10 = vmax.f32 %v14298_v18, %v1212_v28  ;;  %v6468_v28 = vunpack.i.h.bf16 %v9676_v40 }
 0x18a   : > { %v687_v54 = vsel %vm633_vm0, %v14294_v53, %v6498_v56  ;;  %v654_v22 = vsel %vm633_vm0, %v6497_v23, %v6507_v26  ;;  %v655_v15 = vsel %vm633_vm0, %v6498_v56, %v6508_v51  ;;  %v686_v49 = vsel %vm633_vm0, %v14295_v32, %v6497_v23  ;;  %v14297_v56 = vld [vmem:[#allocation53_spill] sm:$0xff] }
 0x18b   : > { %v9724_v52 = vmax.f32 %v9182_v17, %v687_v54  ;;  %v9727_v27 = vmax.f32 %v9179_v39, %v686_v49  ;;  %v9730_v33 = vmax.f32 %v9157_v30, %v654_v22  ;;  %v9733_v53 = vmax.f32 %v9160_v16, %v655_v15  ;;  %v9735_v26 = vpop.permute.xlu0 %6510 }
 0x18c   : > { %v9738_v51 = vmax.f32 %v14297_v56, %v1211_v62  ;;  %v1147_v17 = vsel %vm1146_vm1, %v6452_v37, %v6457_v0  ;;  %v6699_v39 = vpack.i.bf16 %v9704_v12, %v9707_v9  ;;  %v1148_v30 = vsel %vm1146_vm1, %v6453_v55, %v6458_v57 }
 0x18d   : > { %14296 = vst [vmem:[#allocation89_spill] sm:$0xff] %v9730_v33  ;;  %v1179_v16 = vsel %vm1146_vm1, %v6447_v61, %v6452_v37  ;;  %v1180_v23 = vsel %vm1146_vm1, %v6448_v41, %v6453_v55  ;;  %v6714_v62 = vpack.i.bf16 %v9733_v53, %v9730_v33  ;;  %v6467_v54 = vunpack.i.l.bf16 %v9676_v40  ;;  %v9768_v41 = vpop.permute.xlu1 %6525 }
 0x18e   : > { %6700 = vrot.lane.b32.xlu0 %v6699_v39, %s8411_s12  ;;  %v6709_v0 = vpack.i.bf16 %v9724_v52, %v9727_v27  ;;  %v9761_v57 = vmax.f32 %v9029_v31, %v1244_v8  ;;  %v9764_v37 = vmax.f32 %v9026_v14, %v1243_v29  ;;  %v6463_v55 = vunpack.i.h.bf16 %v9674_v1 }
 0x18f   : > { %v6462_v61 = vunpack.i.l.bf16 %v9674_v1  ;;  %6715 = vrot.lane.b32.xlu1 %v6714_v62, %s8411_s12  ;;  %v9772_v40 = vmax.f32 %v9046_v60, %v1179_v16  ;;  %v9775_v22 = vmax.f32 %v9032_v42, %v1147_v17  ;;  %v9778_v31 = vmax.f32 %v9049_v63, %v1180_v23  ;;  %v9785_v29 = vpop.permute.xlu0 %6520 }
 0x190   : > { %v9781_v14 = vmax.f32 %v9035_v36, %v1148_v30  ;;  %v6478_v8 = vunpack.i.h.bf16 %v9680_v6  ;;  %v6477_v1 = vunpack.i.l.bf16 %v9680_v6  ;;  %v6724_v15 = vpack.i.bf16 %v9741_v10, %v9738_v51 }
 0x191   : > { %v1213_v60 = vsel %vm1146_vm1, %v6462_v61, %v6467_v54  ;;  %v1214_v42 = vsel %vm1146_vm1, %v6463_v55, %v6468_v28  ;;  %v6473_v63 = vunpack.i.h.bf16 %v9678_v44  ;;  %v6472_v36 = vunpack.i.l.bf16 %v9678_v44  ;;  %v9813_v39 = vpop.permute.xlu1 %6535 }
 0x192   : > { %6710 = vrot.lane.b32.xlu0 %v6709_v0, %s8411_s12  ;;  %v6719_v6 = vpack.i.bf16 %v9761_v57, %v9764_v37  ;;  %v6729_v32 = vpack.i.bf16 %v9781_v14, %v9775_v22  ;;  %v6734_v49 = vpack.i.bf16 %v9778_v31, %v9772_v40  ;;  %v9804_v56 = vmax.f32 %v9057_v11, %v1213_v60 }
 0x193   : > { %6725 = vrot.lane.b32.xlu1 %v6724_v15, %s8412_s14  ;;  %v9807_v18 = vmax.f32 %v9068_v34, %v1214_v42  ;;  %v1245_v44 = vsel %vm1146_vm1, %v6477_v1, %v6462_v61  ;;  %v1246_v17 = vsel %vm1146_vm1, %v6478_v8, %v6463_v55  ;;  %v1182_v30 = vsel %vm1146_vm1, %v6468_v28, %v6473_v63  ;;  %v9828_v28 = vpop.permute.xlu0 %6530 }
 0x194   : > { %v1181_v16 = vsel %vm1146_vm1, %v6467_v54, %v6472_v36  ;;  %v6483_v11 = vunpack.i.h.bf16 %v9684_v5  ;;  %v6482_v23 = vunpack.i.l.bf16 %v9684_v5  ;;  %v1149_v34 = vsel %vm1146_vm1, %v6472_v36, %v6477_v1 }
 0x195   : > { %v1150_v62 = vsel %vm1146_vm1, %v6473_v63, %v6478_v8  ;;  %v6488_v0 = vunpack.i.h.bf16 %v9682_v7  ;;  %v6487_v55 = vunpack.i.l.bf16 %v9682_v7  ;;  %v9832_v54 = vmax.f32 %v9062_v46, %v1245_v44 }
 0x196   : > { %6720 = vrot.lane.b32.xlu0 %v6719_v6, %s8412_s14  ;;  %v9835_v5 = vmax.f32 %v9065_v47, %v1246_v17  ;;  %v6503_v61 = vunpack.i.h.bf16 %v9686_v4  ;;  %v6502_v1 = vunpack.i.l.bf16 %v9686_v4  ;;  %v9840_v8 = vmax.f32 %v9074_v48, %v1182_v30  ;;  %v9860_v4 = vpop.permute.xlu1 %6545 }
 0x197   : > { %6735 = vrot.lane.b32.xlu1 %v6734_v49, %s8412_s14  ;;  %v9843_v15 = vmax.f32 %v9071_v50, %v1181_v16  ;;  %v6744_v7 = vpack.i.bf16 %v9807_v18, %v9804_v56  ;;  %v1215_v46 = vsel %vm1146_vm1, %v6482_v23, %v6487_v55  ;;  %v1216_v47 = vsel %vm1146_vm1, %v6483_v11, %v6488_v0 }
 0x198   : > { %v6493_v60 = vunpack.i.h.bf16 %v9688_v35  ;;  %v6492_v42 = vunpack.i.l.bf16 %v9688_v35  ;;  %v9855_v48 = vmax.f32 %v9108_v58, %v1149_v34  ;;  %v9858_v50 = vmax.f32 %v9111_v38, %v1150_v62  ;;  %v9875_v38 = vpop.permute.xlu0 %6540 }
 0x199   : > { %v1248_v63 = vsel %vm1146_vm1, %v6503_v61, %v6483_v11  ;;  %v1247_v36 = vsel %vm1146_vm1, %v6502_v1, %v6482_v23  ;;  %v6739_v35 = vpack.i.bf16 %v9835_v5, %v9832_v54  ;;  %v9870_v6 = vmax.f32 %v9099_v2, %v1215_v46 }
 0x19a   : > { %6730 = vrot.lane.b32.xlu0 %v6729_v32, %s8412_s14  ;;  %v9873_v58 = vmax.f32 %v9114_v43, %v1216_v47  ;;  %v6754_v32 = vpack.i.bf16 %v9840_v8, %v9843_v15  ;;  %v1183_v49 = vsel %vm1146_vm1, %v6487_v55, %v6492_v42  ;;  %v1184_v44 = vsel %vm1146_vm1, %v6488_v0, %v6493_v60  ;;  %v9909_v55 = vpop.permute.xlu1 %6555  ;;  %v14299_v47 = vld [vmem:[#allocation47_spill] sm:$0xff] }
 0x19b   : > { %6745 = vrot.lane.b32.xlu1 %v6744_v7, %s8412_s14  ;;  %v6513_v17 = vunpack.i.h.bf16 %v9735_v26  ;;  %v6512_v30 = vunpack.i.l.bf16 %v9735_v26  ;;  %v9887_v2 = vmax.f32 %v9139_v59, %v1248_v63  ;;  %v9890_v43 = vmax.f32 %v9136_v3, %v1247_v36 }
 0x19c   : > { %v1151_v16 = vsel %vm1146_vm1, %v6492_v42, %v6502_v1  ;;  %v6749_v11 = vpack.i.bf16 %v9858_v50, %v9855_v48  ;;  %v1152_v23 = vsel %vm1146_vm1, %v6493_v60, %v6503_v61  ;;  %v6518_v26 = vunpack.i.h.bf16 %v9709_v24  ;;  %v9926_v46 = vpop.permute.xlu0 %6550 }
 0x19d   : > { %v6517_v34 = vunpack.i.l.bf16 %v9709_v24  ;;  %v6528_v59 = vunpack.i.h.bf16 %v9768_v41  ;;  %v9903_v3 = vmax.f32 %v9165_v45, %v1183_v49  ;;  %v9906_v62 = vmax.f32 %v9168_v19, %v1184_v44 }
 0x19e   : > { %6740 = vrot.lane.b32.xlu0 %v6739_v35, %s8412_s14  ;;  %v6527_v0 = vunpack.i.l.bf16 %v9768_v41  ;;  %v6764_v1 = vpack.i.bf16 %v9873_v58, %v9870_v6  ;;  %v1218_v24 = vsel %vm1146_vm1, %v6513_v17, %v6518_v26  ;;  %v6523_v7 = vunpack.i.h.bf16 %v9785_v29 }
 0x19f   : > { %6755 = vrot.lane.b32.xlu1 %v6754_v32, %s8412_s14  ;;  %v1217_v61 = vsel %vm1146_vm1, %v6512_v30, %v6517_v34  ;;  %v6522_v45 = vunpack.i.l.bf16 %v9785_v29  ;;  %v9921_v19 = vmax.f32 %v9125_v20, %v1151_v16  ;;  %v9924_v41 = vmax.f32 %v9128_v21, %v1152_v23  ;;  %v14301_v20 = vld [vmem:[#allocation66_spill] sm:$0xff]  ;;  %v14303_v32 = vld [vmem:[#allocation60_spill] sm:$0xff] }
 0x1a0   : > { %v6238_v60 = vunpack.i.h.bf16 %v14299_v47  ;;  %v1250_v42 = vsel %vm1146_vm1, %v6528_v59, %v6513_v17  ;;  %v6759_v29 = vpack.i.bf16 %v9887_v2, %v9890_v43  ;;  %v9935_v63 = vmax.f32 %v9185_v13, %v1217_v61 }
 0x1a1   : > { %v9938_v36 = vmax.f32 %v14301_v20, %v1218_v24  ;;  %v1249_v21 = vsel %vm1146_vm1, %v6527_v0, %v6512_v30  ;;  %v6774_v35 = vpack.i.bf16 %v9906_v62, %v9903_v3  ;;  %v6318_v49 = vunpack.i.h.bf16 %v14303_v32 }
 0x1a2   : > { %6750 = vrot.lane.b32.xlu0 %v6749_v11, %s8412_s14  ;;  %14300 = vst [vmem:[#allocation53_spill] sm:$0xff] %v9935_v63  ;;  %v6317_v44 = vunpack.i.l.bf16 %v14303_v32  ;;  %v1185_v17 = vsel %vm1146_vm1, %v6517_v34, %v6522_v45  ;;  %v1186_v13 = vsel %vm1146_vm1, %v6518_v26, %v6523_v7  ;;  %v6237_v16 = vunpack.i.l.bf16 %v14299_v47  ;;  %v14304_v11 = vld [vmem:[#allocation70_spill] sm:$0xff]  ;;  %v14306_v34 = vld [vmem:[#allocation69_spill] sm:$0xff]  ;;  %v14310_v32 = vld [vmem:[#allocation72_spill] sm:$0xff] }
 0x1a3   : > { %6765 = vrot.lane.b32.xlu1 %v6764_v1, %s8412_s14  ;;  %14302 = vst [vmem:[#allocation54_spill] sm:$0xff] %v9938_v36  ;;  %v9953_v23 = vmax.f32 %v14304_v11, %v1250_v42  ;;  %v6538_v30 = vunpack.i.h.bf16 %v9813_v39  ;;  %v9956_v1 = vpop.permute.xlu1 %6565  ;;  %v6769_v61 = vpack.i.bf16 %v9924_v41, %v9921_v19  ;;  %v9962_v24 = vmax.f32 %v14306_v34, %v1249_v21 }
 0x1a4   : > { %v1153_v26 = vsel %vm1146_vm1, %v6522_v45, %v6527_v0  ;;  %v1154_v47 = vsel %vm1146_vm1, %v6523_v7, %v6528_v59  ;;  %v6537_v42 = vunpack.i.l.bf16 %v9813_v39  ;;  %v9973_v11 = vmax.f32 %v14310_v32, %v1186_v13  ;;  %v14312_v39 = vld [vmem:[#allocation67_spill] sm:$0xff]  ;;  %v14314_v45 = vld [vmem:[#allocation68_spill] sm:$0xff]  ;;  %v8151_v32 = vld [vmem:[%s8559_s28 + $0x2e8] sm:$0xff] }
 0x1a5   : > { %14305 = vst [vmem:[#allocation47_spill] sm:$0xff] %v9953_v23  ;;  %14307 = vst [vmem:[#allocation66_spill] sm:$0xff] %v9962_v24  ;;  %v6784_v21 = vpack.i.bf16 %v9938_v36, %v9935_v63  ;;  %v721_v0 = vsel %vm633_vm0, %v6238_v60, %v6318_v49  ;;  %v720_v59 = vsel %vm633_vm0, %v6237_v16, %v6317_v44  ;;  %v6543_v63 = vunpack.i.h.bf16 %v9875_v38  ;;  %v14333_v36 = vld [vmem:[#allocation63_spill] sm:$0xff] }
 0x1a6   : > { %6760 = vrot.lane.b32.xlu0 %v6759_v29, %s8412_s14  ;;  %v14308_v29 = vld [vmem:[#allocation71_spill] sm:$0xff]  ;;  %14311 = vst [vmem:[#allocation70_spill] sm:$0xff] %v9973_v11  ;;  %v9985_v7 = vmax.f32 %v14312_v39, %v1153_v26  ;;  %v753_v13 = vsel %vm633_vm0, %v6538_v30, %v6238_v60  ;;  %v752_v34 = vsel %vm633_vm0, %v6537_v42, %v6237_v16  ;;  %v8152_v39 = vld [vmem:[%s8559_s28 + $0x2c8] sm:$0xff]  ;;  %v6323_v33 = vunpack.i.h.bf16 %v14333_v36 }
 0x1a7   : > { %6775 = vrot.lane.b32.xlu1 %v6774_v35, %s8412_s14  ;;  %v9970_v20 = vmax.f32 %v14308_v29, %v1185_v17  ;;  %v9975_v35 = vpop.permute.xlu0 %6560  ;;  %v9988_v17 = vmax.f32 %v14314_v45, %v1154_v47  ;;  %v6533_v29 = vunpack.i.h.bf16 %v9828_v28  ;;  %v6779_v26 = vpack.i.bf16 %v9953_v23, %v9962_v24  ;;  %v10005_v60 = vpop.permute.xlu1 %6575 }
 0x1a8   : > { %14313 = vst [vmem:[#allocation69_spill] sm:$0xff] %v9985_v7  ;;  %v10000_v47 = vmax.f32 %v8151_v32, %v721_v0  ;;  %v10003_v45 = vmax.f32 %v8152_v39, %v720_v59  ;;  %v6542_v23 = vunpack.i.l.bf16 %v9875_v38  ;;  %v8153_v0 = vld [vmem:[%s8559_s28 + $0x2e0] sm:$0xff]  ;;  %v6548_v24 = vunpack.i.h.bf16 %v9860_v4 }
 0x1a9   : > { %14309 = vst [vmem:[#allocation60_spill] sm:$0xff] %v9970_v20  ;;  %14315 = vst [vmem:[#allocation71_spill] sm:$0xff] %v9988_v17  ;;  %v10017_v59 = vmax.f32 %v8153_v0, %v753_v13  ;;  %v8154_v32 = vld [vmem:[%s8559_s28 + $0x2c0] sm:$0xff]  ;;  %v6558_v13 = vunpack.i.h.bf16 %v9909_v55 }
 0x1aa   : > { %6770 = vrot.lane.b32.xlu0 %v6769_v61, %s8412_s14  ;;  %v6532_v61 = vunpack.i.l.bf16 %v9828_v28  ;;  %14316 = vst [vmem:[#allocation72_spill] sm:$0xff] %v10000_v47  ;;  %14317 = vst [vmem:[#allocation67_spill] sm:$0xff] %v10003_v45  ;;  %v657_v28 = vsel %vm633_vm0, %v6533_v29, %v6538_v30  ;;  %v10020_v39 = vmax.f32 %v8154_v32, %v752_v34  ;;  %v14322_v32 = vld [vmem:[#allocation74_spill] sm:$0xff] }
 0x1ab   : > { %6785 = vrot.lane.b32.xlu1 %v6784_v21, %s8412_s14  ;;  %v6799_v21 = vpack.i.bf16 %v9973_v11, %v9970_v20  ;;  %14318 = vst [vmem:[#allocation68_spill] sm:$0xff] %v10017_v59  ;;  %v6547_v11 = vunpack.i.l.bf16 %v9860_v4  ;;  %v689_v30 = vsel %vm633_vm0, %v6318_v49, %v6533_v29  ;;  %v6789_v34 = vpack.i.bf16 %v9988_v17, %v9985_v7  ;;  %v14329_v17 = vld [vmem:[#allocation77_spill] sm:$0xff] }
 0x1ac   : > { %v656_v16 = vsel %vm633_vm0, %v6532_v61, %v6537_v42  ;;  %14319 = vst [vmem:[#allocation90_spill] sm:$0xff] %v10020_v39  ;;  %v10024_v42 = vpop.permute.xlu0 %6570  ;;  %v688_v38 = vsel %vm633_vm0, %v6317_v44, %v6532_v61  ;;  %v10038_v4 = vmax.f32 %v14322_v32, %v657_v28  ;;  %v6557_v20 = vunpack.i.l.bf16 %v9909_v55  ;;  %v10056_v32 = vpop.permute.xlu1 %6585 }
 0x1ad   : > { %v1219_v49 = vsel %vm1146_vm1, %v6542_v23, %v6547_v11  ;;  %v1220_v44 = vsel %vm1146_vm1, %v6543_v63, %v6548_v24  ;;  %v6553_v29 = vunpack.i.h.bf16 %v9926_v46  ;;  %v6552_v61 = vunpack.i.l.bf16 %v9926_v46 }
 0x1ae   : > { %6780 = vrot.lane.b32.xlu0 %v6779_v26, %s8412_s14  ;;  %v14320_v26 = vld [vmem:[#allocation73_spill] sm:$0xff]  ;;  %14323 = vst [vmem:[#allocation74_spill] sm:$0xff] %v10038_v4  ;;  %v1252_v7 = vsel %vm1146_vm1, %v6558_v13, %v6543_v63  ;;  %v6794_v46 = vpack.i.bf16 %v10017_v59, %v10020_v39  ;;  %v6322_v63 = vunpack.i.l.bf16 %v14333_v36  ;;  %v14336_v36 = vld [vmem:[#allocation10_spill] sm:$0xff] }
 0x1af   : > { %6800 = vrot.lane.b32.xlu1 %v6799_v21, %s8412_s14  ;;  %v10035_v0 = vmax.f32 %v14320_v26, %v656_v16  ;;  %v6804_v21 = vpack.i.bf16 %v10000_v47, %v10003_v45  ;;  %v14324_v16 = vld [vmem:[#allocation76_spill] sm:$0xff]  ;;  %v14326_v26 = vld [vmem:[#allocation75_spill] sm:$0xff]  ;;  %v14328_v45 = vld [vmem:[#allocation50_spill] sm:$0xff]  ;;  %v1187_v39 = vsel %vm1146_vm1, %v6547_v11, %v6552_v61  ;;  %v1156_v11 = vsel %vm1146_vm1, %v6553_v29, %v6558_v13 }
 0x1b0   : > { %v10051_v28 = vmax.f32 %v14324_v16, %v689_v30  ;;  %v10054_v55 = vmax.f32 %v14326_v26, %v688_v38  ;;  %v6243_v47 = vunpack.i.h.bf16 %v14328_v45  ;;  %v14331_v30 = vld [vmem:[#allocation78_spill] sm:$0xff]  ;;  %v1251_v38 = vsel %vm1146_vm1, %v6557_v20, %v6542_v23  ;;  %v10072_v26 = vpop.permute.xlu0 %6580  ;;  %v14334_v23 = vld [vmem:[#allocation11_spill] sm:$0xff] }
 0x1b1   : > { %14321 = vst [vmem:[#allocation73_spill] sm:$0xff] %v10035_v0  ;;  %v10068_v16 = vmax.f32 %v14331_v30, %v1220_v44  ;;  %v10085_v44 = vmax.f32 %v14334_v23, %v1252_v7  ;;  %v6568_v30 = vunpack.i.h.bf16 %v9956_v1  ;;  %v14338_v7 = vld [vmem:[#allocation55_spill] sm:$0xff]  ;;  %v14340_v23 = vld [vmem:[#allocation42_spill] sm:$0xff] }
 0x1b2   : > { %6790 = vrot.lane.b32.xlu0 %v6789_v34, %s8412_s14  ;;  %14325 = vst [vmem:[#allocation76_spill] sm:$0xff] %v10051_v28  ;;  %14327 = vst [vmem:[#allocation75_spill] sm:$0xff] %v10054_v55  ;;  %v10065_v34 = vmax.f32 %v14329_v17, %v1219_v49  ;;  %v1188_v17 = vsel %vm1146_vm1, %v6548_v24, %v6553_v29  ;;  %v6242_v49 = vunpack.i.l.bf16 %v14328_v45  ;;  %v6567_v45 = vunpack.i.l.bf16 %v9956_v1  ;;  %v14342_v1 = vld [vmem:[#allocation22_spill] sm:$0xff]  ;;  %v14344_v29 = vld [vmem:[#allocation23_spill] sm:$0xff] }
 0x1b3   : > { %6805 = vrot.lane.b32.xlu1 %v6804_v21, %s8411_s12  ;;  %14332 = vst [vmem:[#allocation77_spill] sm:$0xff] %v10068_v16  ;;  %v6814_v21 = vpack.i.bf16 %v10038_v4, %v10035_v0  ;;  %14335 = vst [vmem:[#allocation78_spill] sm:$0xff] %v10085_v44  ;;  %v6809_v0 = vpack.i.bf16 %v10051_v28, %v10054_v55  ;;  %v10092_v4 = vmax.f32 %v14336_v36, %v1251_v38  ;;  %v10105_v28 = vpop.permute.xlu1 %6595 }
 0x1b4   : > { %14330 = vst [vmem:[#allocation50_spill] sm:$0xff] %v10065_v34  ;;  %v1155_v24 = vsel %vm1146_vm1, %v6552_v61, %v6557_v20  ;;  %v10103_v59 = vmax.f32 %v14340_v23, %v1188_v17  ;;  %v6824_v38 = vpack.i.bf16 %v10068_v16, %v10065_v34  ;;  %v722_v20 = vsel %vm633_vm0, %v6242_v49, %v6322_v63  ;;  %v10122_v17 = vpop.permute.xlu0 %6590 }
 0x1b5   : > { %14337 = vst [vmem:[#allocation63_spill] sm:$0xff] %v10092_v4  ;;  %v723_v13 = vsel %vm633_vm0, %v6243_v47, %v6323_v33  ;;  %v10118_v61 = vmax.f32 %v14344_v29, %v1156_v11  ;;  %v754_v36 = vsel %vm633_vm0, %v6567_v45, %v6242_v49  ;;  %v6819_v11 = vpack.i.bf16 %v10085_v44, %v10092_v4 }
 0x1b6   : > { %6795 = vrot.lane.b32.xlu0 %v6794_v46, %s8411_s12  ;;  %v10100_v46 = vmax.f32 %v14338_v7, %v1187_v39  ;;  %14341 = vst [vmem:[#allocation10_spill] sm:$0xff] %v10103_v59  ;;  %v10115_v39 = vmax.f32 %v14342_v1, %v1155_v24  ;;  %v6562_v24 = vunpack.i.l.bf16 %v9975_v35  ;;  %v8155_v7 = vld [vmem:[%s8559_s28 + $0x308] sm:$0xff]  ;;  %v6572_v34 = vunpack.i.l.bf16 %v10024_v42 }
 0x1b7   : > { %6815 = vrot.lane.b32.xlu1 %v6814_v21, %s8411_s12  ;;  %14345 = vst [vmem:[#allocation42_spill] sm:$0xff] %v10118_v61  ;;  %v755_v21 = vsel %vm633_vm0, %v6568_v30, %v6243_v47  ;;  %v10132_v23 = vmax.f32 %v8155_v7, %v722_v20  ;;  %v8156_v47 = vld [vmem:[%s8559_s28 + $0x328] sm:$0xff]  ;;  %v8157_v20 = vld [vmem:[%s8559_s28 + $0x320] sm:$0xff]  ;;  %v6578_v44 = vunpack.i.h.bf16 %v10005_v60  ;;  %v6577_v4 = vunpack.i.l.bf16 %v10005_v60 }
 0x1b8   : > { %14339 = vst [vmem:[#allocation11_spill] sm:$0xff] %v10100_v46  ;;  %14343 = vst [vmem:[#allocation55_spill] sm:$0xff] %v10115_v39  ;;  %v10135_v1 = vmax.f32 %v8156_v47, %v723_v13  ;;  %v658_v49 = vsel %vm633_vm0, %v6562_v24, %v6567_v45  ;;  %v10147_v7 = vmax.f32 %v8157_v20, %v755_v21  ;;  %v8158_v13 = vld [vmem:[%s8559_s28 + $0x300] sm:$0xff]  ;;  %v10154_v45 = vpop.permute.xlu1 %6605  ;;  %v6588_v21 = vunpack.i.h.bf16 %v10056_v32 }
 0x1b9   : > { %14346 = vst [vmem:[#allocation22_spill] sm:$0xff] %v10132_v23  ;;  %v10150_v47 = vmax.f32 %v8158_v13, %v754_v36  ;;  %v6829_v36 = vpack.i.bf16 %v10118_v61, %v10115_v39  ;;  %v14352_v13 = vld [vmem:[#allocation19_spill] sm:$0xff] }
 0x1ba   : > { %6810 = vrot.lane.b32.xlu0 %v6809_v0, %s8411_s12  ;;  %v6563_v0 = vunpack.i.h.bf16 %v9975_v35  ;;  %14347 = vst [vmem:[#allocation23_spill] sm:$0xff] %v10135_v1  ;;  %v6573_v35 = vunpack.i.h.bf16 %v10024_v42  ;;  %14348 = vst [vmem:[#allocation91_spill] sm:$0xff] %v10147_v7  ;;  %v690_v42 = vsel %vm633_vm0, %v6322_v63, %v6562_v24  ;;  %v1221_v63 = vsel %vm1146_vm1, %v6572_v34, %v6577_v4 }
 0x1bb   : > { %6825 = vrot.lane.b32.xlu1 %v6824_v38, %s8412_s14  ;;  %v6834_v38 = vpack.i.bf16 %v10103_v59, %v10100_v46  ;;  %14349 = vst [vmem:[#allocation92_spill] sm:$0xff] %v10150_v47  ;;  %v6587_v59 = vunpack.i.l.bf16 %v10056_v32  ;;  %v6583_v24 = vunpack.i.h.bf16 %v10072_v26  ;;  %v14356_v32 = vld [vmem:[#allocation79_spill] sm:$0xff]  ;;  %v6839_v61 = vpack.i.bf16 %v10147_v7, %v10150_v47  ;;  %v14359_v46 = vld [vmem:[#allocation12_spill] sm:$0xff] }
 0x1bc   : > { %v659_v29 = vsel %vm633_vm0, %v6563_v0, %v6568_v30  ;;  %v691_v30 = vsel %vm633_vm0, %v6323_v33, %v6563_v0  ;;  %v6844_v33 = vpack.i.bf16 %v10135_v1, %v10132_v23  ;;  %v1222_v0 = vsel %vm1146_vm1, %v6573_v35, %v6578_v44  ;;  %v14358_v23 = vld [vmem:[#allocation49_spill] sm:$0xff]  ;;  %v14370_v7 = vld [vmem:[#allocation44_spill] sm:$0xff] }
 0x1bd   : > { %v10168_v60 = vmax.f32 %v14352_v13, %v659_v29  ;;  %v14354_v29 = vld [vmem:[#allocation80_spill] sm:$0xff]  ;;  %v10186_v13 = vmax.f32 %v14356_v32, %v690_v42  ;;  %v6248_v1 = vunpack.i.h.bf16 %v14358_v23  ;;  %v1254_v39 = vsel %vm1146_vm1, %v6588_v21, %v6573_v35  ;;  %v10202_v42 = vpop.permute.xlu1 %6615 }
 0x1be   : > { %6820 = vrot.lane.b32.xlu0 %v6819_v11, %s8412_s14  ;;  %v14350_v11 = vld [vmem:[#allocation18_spill] sm:$0xff] }
 0x1bf   : > { %6835 = vrot.lane.b32.xlu1 %v6834_v38, %s8412_s14  ;;  %v10165_v20 = vmax.f32 %v14350_v11, %v658_v49  ;;  %14353 = vst [vmem:[#allocation19_spill] sm:$0xff] %v10168_v60  ;;  %v10171_v38 = vpop.permute.xlu0 %6600  ;;  %v6582_v49 = vunpack.i.l.bf16 %v10072_v26  ;;  %v10183_v11 = vmax.f32 %v14354_v29, %v691_v30  ;;  %14357 = vst [vmem:[#allocation79_spill] sm:$0xff] %v10186_v13  ;;  %v14363_v29 = vld [vmem:[#allocation62_spill] sm:$0xff] }
 0x1c0   : > { %v10195_v26 = vmax.f32 %v14359_v46, %v1221_v63  ;;  %v1253_v30 = vsel %vm1146_vm1, %v6587_v59, %v6572_v34  ;;  %v6328_v32 = vunpack.i.h.bf16 %v14363_v29  ;;  %v6327_v35 = vunpack.i.l.bf16 %v14363_v29  ;;  %v14364_v34 = vld [vmem:[#allocation9_spill] sm:$0xff] }
 0x1c1   : > { %14351 = vst [vmem:[#allocation18_spill] sm:$0xff] %v10165_v20  ;;  %14355 = vst [vmem:[#allocation80_spill] sm:$0xff] %v10183_v11  ;;  %v1189_v47 = vsel %vm1146_vm1, %v6577_v4, %v6582_v49  ;;  %v1190_v46 = vsel %vm1146_vm1, %v6578_v44, %v6583_v24  ;;  %v6247_v63 = vunpack.i.l.bf16 %v14358_v23  ;;  %v6849_v29 = vpack.i.bf16 %v10183_v11, %v10186_v13  ;;  %v14366_v4 = vld [vmem:[#allocation8_spill] sm:$0xff]  ;;  %v14368_v23 = vld [vmem:[#allocation57_spill] sm:$0xff] }
 0x1c2   : > { %6830 = vrot.lane.b32.xlu0 %v6829_v36, %s8412_s14  ;;  %14360 = vst [vmem:[#allocation49_spill] sm:$0xff] %v10195_v26  ;;  %v14361_v36 = vld [vmem:[#allocation13_spill] sm:$0xff]  ;;  %v1157_v44 = vsel %vm1146_vm1, %v6582_v49, %v6587_v59  ;;  %v10235_v55 = vmax.f32 %v14370_v7, %v1190_v46  ;;  %v10252_v49 = vpop.permute.xlu1 %6625 }
 0x1c3   : > { %6845 = vrot.lane.b32.xlu1 %v6844_v33, %s8411_s12  ;;  %v10198_v16 = vmax.f32 %v14361_v36, %v1222_v0  ;;  %v6854_v33 = vpack.i.bf16 %v10168_v60, %v10165_v20  ;;  %v10215_v0 = vmax.f32 %v14364_v34, %v1254_v39  ;;  %v6598_v36 = vunpack.i.h.bf16 %v10105_v28  ;;  %v10218_v20 = vpop.permute.xlu0 %6610 }
 0x1c4   : > { %v10224_v60 = vmax.f32 %v14366_v4, %v1253_v30  ;;  %v6597_v39 = vunpack.i.l.bf16 %v10105_v28  ;;  %v10232_v34 = vmax.f32 %v14368_v23, %v1189_v47  ;;  %14371 = vst [vmem:[#allocation8_spill] sm:$0xff] %v10235_v55  ;;  %v724_v59 = vsel %vm633_vm0, %v6247_v63, %v6327_v35  ;;  %v14372_v28 = vld [vmem:[#allocation26_spill] sm:$0xff]  ;;  %v14374_v47 = vld [vmem:[#allocation27_spill] sm:$0xff] }
 0x1c5   : > { %14362 = vst [vmem:[#allocation12_spill] sm:$0xff] %v10198_v16  ;;  %14365 = vst [vmem:[#allocation13_spill] sm:$0xff] %v10215_v0  ;;  %v6864_v30 = vpack.i.bf16 %v10198_v16, %v10195_v26  ;;  %v757_v7 = vsel %vm633_vm0, %v6598_v36, %v6248_v1  ;;  %v6593_v4 = vunpack.i.h.bf16 %v10122_v17  ;;  %v6603_v26 = vunpack.i.h.bf16 %v10171_v38 }
 0x1c6   : > { %6840 = vrot.lane.b32.xlu0 %v6839_v61, %s8411_s12  ;;  %14367 = vst [vmem:[#allocation62_spill] sm:$0xff] %v10224_v60  ;;  %v1158_v61 = vsel %vm1146_vm1, %v6583_v24, %v6588_v21  ;;  %14369 = vst [vmem:[#allocation9_spill] sm:$0xff] %v10232_v34  ;;  %v10245_v21 = vmax.f32 %v14372_v28, %v1157_v44  ;;  %v756_v46 = vsel %vm633_vm0, %v6597_v39, %v6247_v63 }
 0x1c7   : > { %6855 = vrot.lane.b32.xlu1 %v6854_v33, %s8411_s12  ;;  %v725_v33 = vsel %vm633_vm0, %v6248_v1, %v6328_v32  ;;  %v10248_v24 = vmax.f32 %v14374_v47, %v1158_v61  ;;  %v6859_v44 = vpack.i.bf16 %v10215_v0, %v10224_v60  ;;  %v8159_v61 = vld [vmem:[%s8559_s28 + $0x368] sm:$0xff]  ;;  %v10267_v47 = vpop.permute.xlu0 %6620  ;;  %v6602_v0 = vunpack.i.l.bf16 %v10171_v38 }
 0x1c8   : > { %14373 = vst [vmem:[#allocation57_spill] sm:$0xff] %v10245_v21  ;;  %v10262_v23 = vmax.f32 %v8159_v61, %v725_v33  ;;  %v8160_v1 = vld [vmem:[%s8559_s28 + $0x348] sm:$0xff]  ;;  %v8161_v33 = vld [vmem:[%s8559_s28 + $0x360] sm:$0xff]  ;;  %v6608_v60 = vunpack.i.h.bf16 %v10154_v45 }
 0x1c9   : > { %14375 = vst [vmem:[#allocation44_spill] sm:$0xff] %v10248_v24  ;;  %v10265_v28 = vmax.f32 %v8160_v1, %v724_v59  ;;  %v10279_v59 = vmax.f32 %v8161_v33, %v757_v7  ;;  %v8162_v61 = vld [vmem:[%s8559_s28 + $0x340] sm:$0xff]  ;;  %v6869_v7 = vpack.i.bf16 %v10248_v24, %v10245_v21  ;;  %v14382_v33 = vld [vmem:[#allocation21_spill] sm:$0xff] }
 0x1ca   : > { %6850 = vrot.lane.b32.xlu0 %v6849_v29, %s8411_s12  ;;  %v6592_v29 = vunpack.i.l.bf16 %v10122_v17  ;;  %14376 = vst [vmem:[#allocation26_spill] sm:$0xff] %v10262_v23  ;;  %v661_v17 = vsel %vm633_vm0, %v6593_v4, %v6598_v36  ;;  %v10282_v1 = vmax.f32 %v8162_v61, %v756_v46  ;;  %v693_v36 = vsel %vm633_vm0, %v6328_v32, %v6593_v4 }
 0x1cb   : > { %6865 = vrot.lane.b32.xlu1 %v6864_v30, %s8412_s14  ;;  %14377 = vst [vmem:[#allocation27_spill] sm:$0xff] %v10265_v28  ;;  %v6874_v30 = vpack.i.bf16 %v10235_v55, %v10232_v34  ;;  %14378 = vst [vmem:[#allocation93_spill] sm:$0xff] %v10279_v59  ;;  %v6607_v55 = vunpack.i.l.bf16 %v10154_v45  ;;  %v10298_v61 = vmax.f32 %v14382_v33, %v661_v17  ;;  %v6617_v45 = vunpack.i.l.bf16 %v10202_v42  ;;  %v14384_v17 = vld [vmem:[#allocation82_spill] sm:$0xff]  ;;  %v10318_v21 = vpop.permute.xlu0 %6630  ;;  %v14389_v34 = vld [vmem:[#allocation16_spill] sm:$0xff] }
 0x1cc   : > { %v660_v63 = vsel %vm633_vm0, %v6592_v29, %v6597_v39  ;;  %14379 = vst [vmem:[#allocation94_spill] sm:$0xff] %v10282_v1  ;;  %v692_v38 = vsel %vm633_vm0, %v6327_v35, %v6592_v29  ;;  %v6618_v39 = vunpack.i.h.bf16 %v10202_v42  ;;  %v6884_v32 = vpack.i.bf16 %v10262_v23, %v10265_v28  ;;  %v14386_v42 = vld [vmem:[#allocation81_spill] sm:$0xff]  ;;  %v14388_v28 = vld [vmem:[#allocation52_spill] sm:$0xff] }
 0x1cd   : > { %14383 = vst [vmem:[#allocation21_spill] sm:$0xff] %v10298_v61  ;;  %v1223_v35 = vsel %vm1146_vm1, %v6602_v0, %v6607_v55  ;;  %v1224_v4 = vsel %vm1146_vm1, %v6603_v26, %v6608_v60  ;;  %v6613_v29 = vunpack.i.h.bf16 %v10218_v20  ;;  %v10316_v33 = vmax.f32 %v14386_v42, %v692_v38  ;;  %v14393_v42 = vld [vmem:[#allocation65_spill] sm:$0xff] }
 0x1ce   : > { %6860 = vrot.lane.b32.xlu0 %v6859_v44, %s8412_s14  ;;  %v14380_v44 = vld [vmem:[#allocation20_spill] sm:$0xff]  ;;  %v6253_v23 = vunpack.i.h.bf16 %v14388_v28  ;;  %v1256_v24 = vsel %vm1146_vm1, %v6618_v39, %v6603_v26  ;;  %v1255_v38 = vsel %vm1146_vm1, %v6617_v45, %v6602_v0  ;;  %v6333_v16 = vunpack.i.h.bf16 %v14393_v42 }
 0x1cf   : > { %6875 = vrot.lane.b32.xlu1 %v6874_v30, %s8412_s14  ;;  %v10295_v46 = vmax.f32 %v14380_v44, %v660_v63  ;;  %v10301_v30 = vpop.permute.xlu1 %6635  ;;  %v6612_v63 = vunpack.i.l.bf16 %v10218_v20  ;;  %v10313_v44 = vmax.f32 %v14384_v17, %v693_v36  ;;  %14387 = vst [vmem:[#allocation81_spill] sm:$0xff] %v10316_v33  ;;  %v6879_v20 = vpack.i.bf16 %v10279_v59, %v10282_v1  ;;  %v14391_v36 = vld [vmem:[#allocation17_spill] sm:$0xff]  ;;  %v14400_v1 = vld [vmem:[#allocation43_spill] sm:$0xff] }
 0x1d0   : > { %v10330_v17 = vmax.f32 %v14391_v36, %v1224_v4  ;;  %v6332_v11 = vunpack.i.l.bf16 %v14393_v42  ;;  %v14394_v4 = vld [vmem:[#allocation84_spill] sm:$0xff]  ;;  %v6628_v0 = vunpack.i.h.bf16 %v10252_v49 }
 0x1d1   : > { %14381 = vst [vmem:[#allocation20_spill] sm:$0xff] %v10295_v46  ;;  %14385 = vst [vmem:[#allocation82_spill] sm:$0xff] %v10313_v44  ;;  %v1191_v26 = vsel %vm1146_vm1, %v6607_v55, %v6612_v63  ;;  %v10345_v36 = vmax.f32 %v14394_v4, %v1256_v24  ;;  %v6889_v42 = vpack.i.bf16 %v10313_v44, %v10316_v33  ;;  %v14396_v55 = vld [vmem:[#allocation83_spill] sm:$0xff]  ;;  %v6627_v24 = vunpack.i.l.bf16 %v10252_v49  ;;  %v10367_v44 = vpop.permute.xlu0 %6640  ;;  %v14402_v49 = vld [vmem:[#allocation30_spill] sm:$0xff] }
 0x1d2   : > { %6870 = vrot.lane.b32.xlu0 %v6869_v7, %s8412_s14  ;;  %v10327_v7 = vmax.f32 %v14389_v34, %v1223_v35  ;;  %14392 = vst [vmem:[#allocation16_spill] sm:$0xff] %v10330_v17  ;;  %v1192_v34 = vsel %vm1146_vm1, %v6608_v60, %v6613_v29  ;;  %v6252_v35 = vunpack.i.l.bf16 %v14388_v28  ;;  %v1159_v60 = vsel %vm1146_vm1, %v6612_v63, %v6617_v45  ;;  %v14404_v63 = vld [vmem:[#allocation31_spill] sm:$0xff] }
 0x1d3   : > { %6885 = vrot.lane.b32.xlu1 %v6884_v32, %s8411_s12  ;;  %v6894_v32 = vpack.i.bf16 %v10298_v61, %v10295_v46  ;;  %14395 = vst [vmem:[#allocation17_spill] sm:$0xff] %v10345_v36  ;;  %v10348_v46 = vpop.permute.xlu1 %6645  ;;  %v10354_v61 = vmax.f32 %v14396_v55, %v1255_v38  ;;  %v1160_v28 = vsel %vm1146_vm1, %v6613_v29, %v6618_v39  ;;  %v6622_v55 = vunpack.i.l.bf16 %v10267_v47 }
 0x1d4   : > { %14390 = vst [vmem:[#allocation52_spill] sm:$0xff] %v10327_v7  ;;  %v10365_v59 = vmax.f32 %v14400_v1, %v1192_v34  ;;  %v6904_v38 = vpack.i.bf16 %v10330_v17, %v10327_v7  ;;  %v726_v45 = vsel %vm633_vm0, %v6252_v35, %v6332_v11  ;;  %v727_v39 = vsel %vm633_vm0, %v6253_v23, %v6333_v16  ;;  %v14415_v17 = vld [vmem:[#allocation24_spill] sm:$0xff] }
 0x1d5   : > { %14397 = vst [vmem:[#allocation65_spill] sm:$0xff] %v10354_v61  ;;  %v10377_v29 = vmax.f32 %v14402_v49, %v1159_v60  ;;  %v10380_v1 = vmax.f32 %v14404_v63, %v1160_v28  ;;  %v6623_v34 = vunpack.i.h.bf16 %v10267_v47  ;;  %v14406_v60 = vld [vmem:[#allocation64_spill] sm:$0xff]  ;;  %v662_v47 = vsel %vm633_vm0, %v6622_v55, %v6627_v24 }
 0x1d6   : > { %6880 = vrot.lane.b32.xlu0 %v6879_v20, %s8411_s12  ;;  %v14398_v20 = vld [vmem:[#allocation56_spill] sm:$0xff]  ;;  %14401 = vst [vmem:[#allocation83_spill] sm:$0xff] %v10365_v59  ;;  %v6633_v28 = vunpack.i.h.bf16 %v10318_v21  ;;  %v14417_v33 = vunpack.i.h.bf16 %v14406_v60 }
 0x1d7   : > { %6895 = vrot.lane.b32.xlu1 %v6894_v32, %s8411_s12  ;;  %v10362_v4 = vmax.f32 %v14398_v20, %v1191_v26  ;;  %14403 = vst [vmem:[#allocation56_spill] sm:$0xff] %v10377_v29  ;;  %14405 = vst [vmem:[#allocation43_spill] sm:$0xff] %v10380_v1  ;;  %v759_v32 = vsel %vm633_vm0, %v6628_v0, %v6253_v23  ;;  %v758_v26 = vsel %vm633_vm0, %v6627_v24, %v6252_v35  ;;  %v8163_v20 = vld [vmem:[%s8559_s28 + $0x388] sm:$0xff] }
 0x1d8   : > { %v10393_v49 = vmax.f32 %v8163_v20, %v726_v45  ;;  %v8164_v23 = vld [vmem:[%s8559_s28 + $0x3a8] sm:$0xff]  ;;  %v663_v7 = vsel %vm633_vm0, %v6623_v34, %v6628_v0  ;;  %v6632_v45 = vunpack.i.l.bf16 %v10318_v21  ;;  %v6637_v24 = vunpack.i.l.bf16 %v10301_v30 }
 0x1d9   : > { %14399 = vst [vmem:[#allocation84_spill] sm:$0xff] %v10362_v4  ;;  %v10396_v63 = vmax.f32 %v8164_v23, %v727_v39  ;;  %v6914_v35 = vpack.i.bf16 %v10365_v59, %v10362_v4  ;;  %v8165_v39 = vld [vmem:[%s8559_s28 + $0x3a0] sm:$0xff]  ;;  %v10417_v59 = vpop.permute.xlu0 %6650  ;;  %v695_v21 = vsel %vm633_vm0, %v6333_v16, %v6623_v34  ;;  %v694_v0 = vsel %vm633_vm0, %v6332_v11, %v6622_v55 }
 0x1da   : > { %6890 = vrot.lane.b32.xlu0 %v6889_v42, %s8411_s12  ;;  %v6899_v42 = vpack.i.bf16 %v10345_v36, %v10354_v61  ;;  %14407 = vst [vmem:[#allocation30_spill] sm:$0xff] %v10393_v49  ;;  %v10410_v20 = vmax.f32 %v8165_v39, %v759_v32  ;;  %v8166_v23 = vld [vmem:[%s8559_s28 + $0x380] sm:$0xff]  ;;  %v6638_v61 = vunpack.i.h.bf16 %v10301_v30  ;;  %v6648_v32 = vunpack.i.h.bf16 %v10348_v46  ;;  %v8168_v30 = vld [vmem:[%s8559_s28 + $0x3b8] sm:$0xff] }
 0x1db   : > { %6905 = vrot.lane.b32.xlu1 %v6904_v38, %s8412_s14  ;;  %14408 = vst [vmem:[#allocation31_spill] sm:$0xff] %v10396_v63  ;;  %v10398_v38 = vpop.permute.xlu1 %6655  ;;  %v10413_v36 = vmax.f32 %v8166_v23, %v758_v26  ;;  %v6909_v26 = vpack.i.bf16 %v10380_v1, %v10377_v29  ;;  %v10431_v23 = vmax.f32 %v8168_v30, %v663_v7  ;;  %v6643_v55 = vunpack.i.h.bf16 %v10367_v44 }
 0x1dc   : > { %14409 = vst [vmem:[#allocation64_spill] sm:$0xff] %v10410_v20  ;;  %v6924_v16 = vpack.i.bf16 %v10396_v63, %v10393_v49  ;;  %v1225_v11 = vsel %vm1146_vm1, %v6632_v45, %v6637_v24  ;;  %v1226_v34 = vsel %vm1146_vm1, %v6633_v28, %v6638_v61  ;;  %v6642_v29 = vunpack.i.l.bf16 %v10367_v44  ;;  %v14414_v63 = vld [vmem:[#allocation51_spill] sm:$0xff] }
 0x1dd   : > { %14410 = vst [vmem:[#allocation95_spill] sm:$0xff] %v10413_v36  ;;  %14412 = vst [vmem:[#allocation97_spill] sm:$0xff] %v10431_v23  ;;  %v6337_v7 = vunpack.i.l.bf16 %v14406_v60  ;;  %v6258_v1 = vunpack.i.h.bf16 %v14414_v63  ;;  %v6257_v4 = vunpack.i.l.bf16 %v14414_v63  ;;  %v1258_v44 = vsel %vm1146_vm1, %v6648_v32, %v6633_v28 }
 0x1de   : > { %6900 = vrot.lane.b32.xlu0 %v6899_v42, %s8412_s14  ;;  %v8167_v42 = vld [vmem:[%s8559_s28 + $0x398] sm:$0xff] }
 0x1df   : > { %6915 = vrot.lane.b32.xlu1 %v6914_v35, %s8412_s14  ;;  %v10428_v39 = vmax.f32 %v8167_v42, %v662_v47  ;;  %v6647_v35 = vunpack.i.l.bf16 %v10348_v46  ;;  %v8169_v47 = vld [vmem:[%s8559_s28 + $0x3b0] sm:$0xff]  ;;  %v10450_v49 = vpop.permute.xlu1 %6665  ;;  %v729_v28 = vsel %vm633_vm0, %v6258_v1, %v14417_v33 }
 0x1e0   : > { %v10445_v42 = vmax.f32 %v8169_v47, %v695_v21  ;;  %v8170_v46 = vld [vmem:[%s8559_s28 + $0x390] sm:$0xff]  ;;  %v10460_v21 = vmax.f32 %v14415_v17, %v1225_v11  ;;  %v14416_v47 = vld [vmem:[#allocation25_spill] sm:$0xff]  ;;  %v1193_v17 = vsel %vm1146_vm1, %v6637_v24, %v6642_v29  ;;  %v1194_v11 = vsel %vm1146_vm1, %v6638_v61, %v6643_v55 }
 0x1e1   : > { %14411 = vst [vmem:[#allocation96_spill] sm:$0xff] %v10428_v39  ;;  %v10448_v30 = vmax.f32 %v8170_v46, %v694_v0  ;;  %v10463_v0 = vmax.f32 %v14416_v47, %v1226_v34  ;;  %v1257_v46 = vsel %vm1146_vm1, %v6647_v35, %v6632_v45  ;;  %v6934_v63 = vpack.i.bf16 %v10431_v23, %v10428_v39  ;;  %v14418_v34 = vld [vmem:[#allocation35_spill] sm:$0xff]  ;;  %v14420_v24 = vld [vmem:[#allocation34_spill] sm:$0xff] }
 0x1e2   : > { %6910 = vrot.lane.b32.xlu0 %v6909_v26, %s8412_s14  ;;  %14413 = vst [vmem:[#allocation98_spill] sm:$0xff] %v10445_v42  ;;  %v6919_v26 = vpack.i.bf16 %v10410_v20, %v10413_v36  ;;  %v728_v45 = vsel %vm633_vm0, %v6257_v4, %v6337_v7  ;;  %v10483_v47 = vmax.f32 %v14418_v34, %v1258_v44  ;;  %v6658_v39 = vunpack.i.h.bf16 %v10398_v38  ;;  %v14422_v34 = vld [vmem:[#allocation59_spill] sm:$0xff]  ;;  %v14424_v20 = vld [vmem:[#allocation46_spill] sm:$0xff] }
 0x1e3   : > { %6925 = vrot.lane.b32.xlu1 %v6924_v16, %s8411_s12  ;;  %v10467_v16 = vpop.permute.xlu0 %6660  ;;  %v6929_v33 = vpack.i.bf16 %v10445_v42, %v10448_v30  ;;  %v10490_v23 = vmax.f32 %v14420_v24, %v1257_v46  ;;  %v1161_v61 = vsel %vm1146_vm1, %v6642_v29, %v6647_v35  ;;  %v6657_v44 = vunpack.i.l.bf16 %v10398_v38  ;;  %v10503_v42 = vpop.permute.xlu1 %6675  ;;  %v8172_v38 = vld [vmem:[%s8559_s28 + $0x3c8] sm:$0xff] }
 0x1e4   : > { %14419 = vst [vmem:[#allocation51_spill] sm:$0xff] %v10483_v47  ;;  %v10498_v36 = vmax.f32 %v14422_v34, %v1193_v17  ;;  %v10501_v13 = vmax.f32 %v14424_v20, %v1194_v11  ;;  %v6944_v46 = vpack.i.bf16 %v10463_v0, %v10460_v21  ;;  %v6653_v29 = vunpack.i.h.bf16 %v10417_v59  ;;  %v14430_v17 = vld [vmem:[#allocation15_spill] sm:$0xff] }
 0x1e5   : > { %14421 = vst [vmem:[#allocation24_spill] sm:$0xff] %v10490_v23  ;;  %v10514_v35 = vmax.f32 %v8172_v38, %v728_v45  ;;  %v6663_v45 = vunpack.i.h.bf16 %v10467_v16  ;;  %v14432_v38 = vunpack.i.h.bf16 %v14406_v60  ;;  %v8174_v60 = vld [vmem:[%s8559_s28 + $0x3c0] sm:$0xff] }
 0x1e6   : > { %6920 = vrot.lane.b32.xlu0 %v6919_v26, %s8411_s12  ;;  %v1162_v26 = vsel %vm1146_vm1, %v6643_v55, %v6648_v32  ;;  %14423 = vst [vmem:[#allocation25_spill] sm:$0xff] %v10498_v36  ;;  %14425 = vst [vmem:[#allocation35_spill] sm:$0xff] %v10501_v13  ;;  %v6652_v32 = vunpack.i.l.bf16 %v10417_v59  ;;  %v14428_v55 = vld [vmem:[#allocation14_spill] sm:$0xff]  ;;  %v760_v59 = vsel %vm633_vm0, %v6657_v44, %v6257_v4 }
 0x1e7   : > { %6935 = vrot.lane.b32.xlu1 %v6934_v63, %s8411_s12  ;;  %v8171_v63 = vld [vmem:[%s8559_s28 + $0x3e8] sm:$0xff]  ;;  %14427 = vst [vmem:[#allocation59_spill] sm:$0xff] %v10514_v35  ;;  %v10517_v20 = vmax.f32 %v14428_v55, %v1161_v61  ;;  %v10520_v11 = vmax.f32 %v14430_v17, %v1162_v26  ;;  %v10524_v34 = vpop.permute.xlu0 %6670  ;;  %v6939_v61 = vpack.i.bf16 %v10483_v47, %v10490_v23  ;;  %v6668_v26 = vunpack.i.h.bf16 %v10450_v49  ;;  %v10555_v47 = vpop.permute.xlu1 %6685 }
 0x1e8   : > { %v10508_v24 = vmax.f32 %v8171_v63, %v729_v28  ;;  %v761_v28 = vsel %vm633_vm0, %v6658_v39, %v6258_v1  ;;  %v6667_v63 = vunpack.i.l.bf16 %v10450_v49  ;;  %v6954_v1 = vpack.i.bf16 %v10501_v13, %v10498_v36  ;;  %v8173_v49 = vld [vmem:[%s8559_s28 + $0x3e0] sm:$0xff] }
 0x1e9   : > { %14429 = vst [vmem:[#allocation46_spill] sm:$0xff] %v10517_v20  ;;  %14431 = vst [vmem:[#allocation14_spill] sm:$0xff] %v10520_v11  ;;  %v664_v4 = vsel %vm633_vm0, %v6652_v32, %v6657_v44  ;;  %v696_v55 = vsel %vm633_vm0, %v6337_v7, %v6652_v32  ;;  %v10549_v17 = vmax.f32 %v8173_v49, %v761_v28  ;;  %v6678_v44 = vunpack.i.h.bf16 %v10503_v42  ;;  %v8176_v49 = vld [vmem:[%s8559_s28 + $0x3d0] sm:$0xff] }
 0x1ea   : > { %14426 = vst [vmem:[#allocation34_spill] sm:$0xff] %v10508_v24  ;;  %6930 = vrot.lane.b32.xlu0 %v6929_v33, %s8411_s12  ;;  %v6662_v33 = vunpack.i.l.bf16 %v10467_v16  ;;  %v665_v16 = vsel %vm633_vm0, %v6653_v29, %v6658_v39  ;;  %v6964_v39 = vpack.i.bf16 %v10508_v24, %v10514_v35  ;;  %v6677_v32 = vunpack.i.l.bf16 %v10503_v42  ;;  %v8178_v35 = vld [vmem:[%s8559_s28 + $0x3f8] sm:$0xff] }
 0x1eb   : > { %6945 = vrot.lane.b32.xlu1 %v6944_v46, %s8412_s14  ;;  %v697_v46 = vsel %vm633_vm0, %v14432_v38, %v6653_v29  ;;  %14433 = vst [vmem:[#allocation15_spill] sm:$0xff] %v10549_v17  ;;  %v10552_v38 = vmax.f32 %v8174_v60, %v760_v59  ;;  %v1228_v29 = vsel %vm1146_vm1, %v6663_v45, %v6668_v26  ;;  %v8175_v59 = vld [vmem:[%s8559_s28 + $0x3f0] sm:$0xff]  ;;  %v6681_v13 = vpop.permute.xlu0 %6680  ;;  %v6673_v36 = vunpack.i.h.bf16 %v10524_v34 }
 0x1ec   : > { %v1227_v7 = vsel %vm1146_vm1, %v6662_v33, %v6667_v63  ;;  %v6949_v28 = vpack.i.bf16 %v10520_v11, %v10517_v20  ;;  %v10571_v60 = vmax.f32 %v8176_v49, %v696_v55  ;;  %v10577_v24 = vmax.f32 %v8178_v35, %v665_v16  ;;  %v14439_v20 = vld [vmem:[#allocation28_spill] sm:$0xff]  ;;  %v14443_v49 = vld [vmem:[#allocation41_spill] sm:$0xff] }
 0x1ed   : > { %14434 = vst [vmem:[#allocation99_spill] sm:$0xff] %v10552_v38  ;;  %v6672_v42 = vunpack.i.l.bf16 %v10524_v34  ;;  %v10583_v11 = vmax.f32 %v14439_v20, %v1227_v7  ;;  %v1259_v35 = vsel %vm1146_vm1, %v6677_v32, %v6662_v33  ;;  %v6959_v16 = vpack.i.bf16 %v10549_v17, %v10552_v38  ;;  %v7459_v34 = vld [vmem:[%s13780_s1 + $0x40] sm:$0xff]   ;;  %v10604_v7 = vpop.permute.xlu1 %6695  ;;  %v14451_v17 = vld [vmem:[#allocation85_spill] sm:$0xff] }
 0x1ee   : > { %6940 = vrot.lane.b32.xlu0 %v6939_v61, %s8412_s14  ;;  %v10568_v61 = vmax.f32 %v8175_v59, %v697_v46  ;;  %14436 = vst [vmem:[#allocation101_spill] sm:$0xff] %v10571_v60  ;;  %14438 = vst [vmem:[#allocation103_spill] sm:$0xff] %v10577_v24  ;;  %v14441_v46 = vld [vmem:[#allocation29_spill] sm:$0xff]  ;;  %v7460_v20 = vld [vmem:[%s13780_s1] sm:$0xff]   ;;  %v6683_v55 = vunpack.i.h.bf16 %v6681_v13  ;;  %5899 = vmatprep.subr.bf16.mxu0 %v7459_v34 }
 0x1ef   : > { %6955 = vrot.lane.b32.xlu1 %v6954_v1, %s8412_s14  ;;  %v8177_v1 = vld [vmem:[%s8559_s28 + $0x3d8] sm:$0xff]  ;;  %14440 = vst [vmem:[#allocation28_spill] sm:$0xff] %v10583_v11  ;;  %v10586_v59 = vmax.f32 %v14441_v46, %v1228_v29  ;;  %v1195_v46 = vsel %vm1146_vm1, %v6667_v63, %v6672_v42  ;;  %v6691_v38 = vpop.permute.xlu0 %6690  ;;  %5900 = vmatpush3.bf16.msra.mxu0 %v7460_v20 }
 0x1f0   : > { %14435 = vst [vmem:[#allocation100_spill] sm:$0xff] %v10568_v61  ;;  %v10574_v23 = vmax.f32 %v8177_v1, %v664_v4  ;;  %v1260_v4 = vsel %vm1146_vm1, %v6678_v44, %v6663_v45  ;;  %v7461_v45 = vld [vmem:[%s13780_s1 + $0xc0] sm:$0xff]   ;;  %v6969_v33 = vpack.i.bf16 %v10568_v61, %v10571_v60  ;;  %v1164_v63 = vsel %vm1146_vm1, %v6673_v36, %v6678_v44 }
 0x1f1   : > { %14442 = vst [vmem:[#allocation29_spill] sm:$0xff] %v10586_v59  ;;  %v10614_v1 = vmax.f32 %v14443_v49, %v1260_v4  ;;  %v14444_v61 = vld [vmem:[#allocation40_spill] sm:$0xff]  ;;  %v6984_v4 = vpack.i.bf16 %v10586_v59, %v10583_v11  ;;  %6011 = vmatprep.subr.bf16.mxu1 %v7461_v45  ;;  %v6692_v49 = vunpack.i.l.bf16 %v6691_v38 }
 0x1f2   : > { %14437 = vst [vmem:[#allocation102_spill] sm:$0xff] %v10574_v23  ;;  %6950 = vrot.lane.b32.xlu0 %v6949_v28, %s8412_s14  ;;  %v6974_v29 = vpack.i.bf16 %v10577_v24, %v10574_v23  ;;  %v7462_v28 = vld [vmem:[%s13780_s1 + $0x80] sm:$0xff]   ;;  %v10622_v60 = vmax.f32 %v14444_v61, %v1259_v35  ;;  %v6688_v23 = vunpack.i.h.bf16 %v10555_v47  ;;  %v6687_v24 = vunpack.i.l.bf16 %v10555_v47  ;;  %v7463_v47 = vld [vmem:[%s13780_s1 + $0x48] sm:$0xff]  }
 0x1f3   : > { %6965 = vrot.lane.b32.xlu1 %v6964_v39, %s8411_s12  ;;  %v6682_v39 = vunpack.i.l.bf16 %v6681_v13  ;;  %v1196_v13 = vsel %vm1146_vm1, %v6668_v26, %v6673_v36  ;;  %v1163_v26 = vsel %vm1146_vm1, %v6672_v42, %v6677_v32  ;;  %v6698_v61 = vunpack.i.h.bf16 %v10604_v7  ;;  %v7465_v32 = vld [vmem:[%s13780_s1 + $0xc8] sm:$0xff]   ;;  %v14445_v42 = vld [vmem:[#allocation32_spill] sm:$0xff]  ;;  %6012 = vmatpush3.bf16.msra.mxu1 %v7462_v28  ;;  %v14449_v28 = vld [vmem:[#allocation86_spill] sm:$0xff] }
 0x1f4   : > { %v6697_v35 = vunpack.i.l.bf16 %v10604_v7  ;;  %v10645_v34 = vmax.f32 %v14445_v42, %v1195_v46  ;;  %v14446_v36 = vld [vmem:[#allocation33_spill] sm:$0xff]  ;;  %v1230_v45 = vsel %vm1146_vm1, %v6683_v55, %v6688_v23  ;;  %5901 = vmatprep.subr.bf16.mxu0 %v7463_v47  ;;  %v14447_v46 = vld [vmem:[#allocation58_spill] sm:$0xff]  ;;  %v6979_v11 = vpack.i.bf16 %v10614_v1, %v10622_v60  ;;  %6013 = vmatprep.subr.bf16.mxu1 %v7465_v32 }
 0x1f5   : > { %v10648_v44 = vmax.f32 %v14446_v36, %v1196_v13  ;;  %v1229_v20 = vsel %vm1146_vm1, %v6682_v39, %v6687_v24  ;;  %v7466_v7 = vld [vmem:[%s13780_s1 + $0x88] sm:$0xff]   ;;  %v10659_v42 = vmax.f32 %v14447_v46, %v1163_v26  ;;  %v7468_v47 = vld [vmem:[%s13780_s1 + $0x10] sm:$0xff]   ;;  %v14455_v46 = vld [vmem:[#allocation39_spill] sm:$0xff] }
 0x1f6   : > { %6960 = vrot.lane.b32.xlu0 %v6959_v16, %s8411_s12  ;;  %v7464_v16 = vld [vmem:[%s13780_s1 + $0x8] sm:$0xff]   ;;  %v10668_v59 = vmax.f32 %v14449_v28, %v1229_v20  ;;  %v1261_v26 = vsel %vm1146_vm1, %v6697_v35, %v6682_v39  ;;  %v7470_v39 = vld [vmem:[%s13780_s1 + $0x90] sm:$0xff]  }
 0x1f7   : > { %6975 = vrot.lane.b32.xlu1 %v6974_v29, %s8411_s12  ;;  %v6693_v29 = vunpack.i.h.bf16 %v6691_v38  ;;  %v14448_v13 = vld [vmem:[#allocation45_spill] sm:$0xff]  ;;  %5902 = vmatpush3.bf16.msra.mxu0 %v7464_v16  ;;  %v10671_v38 = vmax.f32 %v14451_v17, %v1230_v45  ;;  %v7469_v17 = vld [vmem:[%s13780_s1 + $0xd0] sm:$0xff]   ;;  %v1197_v16 = vsel %vm1146_vm1, %v6687_v24, %v6692_v49 }
 0x1f8   : > { %v10662_v36 = vmax.f32 %v14448_v13, %v1164_v63  ;;  %14450 = vst [vmem:[#allocation41_spill] sm:$0xff] %v10668_v59  ;;  %v10677_v63 = vpop.permute.xlu1 %6705  ;;  %6014 = vmatpush3.bf16.msra.mxu1 %v7466_v7  ;;  %v14453_v20 = vld [vmem:[#allocation38_spill] sm:$0xff]  ;;  %v10702_v13 = vmax.f32 %v14455_v46, %v1261_v26 }
 0x1f9   : > { %14452 = vst [vmem:[#allocation40_spill] sm:$0xff] %v10671_v38  ;;  %v1198_v32 = vsel %vm1146_vm1, %v6688_v23, %v6693_v29  ;;  %v1165_v23 = vsel %vm1146_vm1, %v6692_v49, %v6697_v35  ;;  %v1166_v24 = vsel %vm1146_vm1, %v6693_v29, %v6698_v61  ;;  %v7004_v26 = vpack.i.bf16 %v10671_v38, %v10668_v59  ;;  %v7473_v35 = vld [vmem:[%s13780_s1 + $0xd8] sm:$0xff]   ;;  %v14458_v49 = vld [vmem:[#allocation37_spill] sm:$0xff] }
 0x1fa   : > { %6970 = vrot.lane.b32.xlu0 %v6969_v33, %s8411_s12  ;;  %v1262_v33 = vsel %vm1146_vm1, %v6698_v61, %v6683_v55  ;;  %v6994_v55 = vpack.i.bf16 %v10648_v44, %v10645_v34  ;;  %14456 = vst [vmem:[#allocation33_spill] sm:$0xff] %v10702_v13  ;;  %v6989_v28 = vpack.i.bf16 %v10662_v36, %v10659_v42  ;;  %v14457_v61 = vld [vmem:[#allocation36_spill] sm:$0xff]  ;;  %s13257_s12 = scalar_lea.vmem [#allocation5], %s5688_s25  ;;  %s5898_s25 = sshll.u32 %s8470_s22, 14 }
 0x1fb   : > { %6985 = vrot.lane.b32.xlu1 %v6984_v4, %s8412_s14  ;;  %v7467_v4 = vld [vmem:[%s13780_s1 + $0x50] sm:$0xff]   ;;  %v10699_v45 = vmax.f32 %v14453_v20, %v1262_v33  ;;  %6015 = vmatprep.subr.bf16.mxu1 %v7469_v17  ;;  %v10725_v29 = vmax.f32 %v14457_v61, %v1197_v16  ;;  %v14460_v16 = vld [vmem:[#allocation61_spill] sm:$0xff]  ;;  %s13729_s11 = scalar_lea.hbm %s13784_s5, %s5898_s25 }
 0x1fc   : > { %5903 = vmatprep.subr.bf16.mxu0 %v7467_v4  ;;  %v7471_v4 = vld [vmem:[%s13780_s1 + $0x58] sm:$0xff]   ;;  %6016 = vmatpush3.bf16.msra.mxu1 %v7470_v39  ;;  %v10739_v61 = vmax.f32 %v14460_v16, %v1165_v23  ;;  %v14463_v39 = vunpack.i.l.bf16 %v10677_v63 }
 0x1fd   : > { %14454 = vst [vmem:[#allocation32_spill] sm:$0xff] %v10699_v45  ;;  %5904 = vmatpush3.bf16.msra.mxu0 %v7468_v47  ;;  %v7472_v47 = vld [vmem:[%s13780_s1 + $0x18] sm:$0xff]   ;;  %6017 = vmatprep.subr.bf16.mxu1 %v7473_v35  ;;  %v7477_v35 = vld [vmem:[%s13780_s1 + $0xe0] sm:$0xff]  }
 0x1fe   : > { %6980 = vrot.lane.b32.xlu0 %v6979_v11, %s8412_s14  ;;  %v7474_v11 = vld [vmem:[%s13780_s1 + $0x98] sm:$0xff]   ;;  %5905 = vmatprep.subr.bf16.mxu0 %v7471_v4  ;;  %14461 = vst [vmem:[#allocation45_spill] sm:$0xff] %v10739_v61 }
 0x1ff   : > { %6995 = vrot.lane.b32.xlu1 %v6994_v55, %s8412_s14  ;;  %v10728_v55 = vmax.f32 %v14458_v49, %v1198_v32  ;;  %v14462_v32 = vunpack.i.h.bf16 %v10677_v63 }
 0x200   : > { %v6701_v33 = vpop.permute.xlu0 %6700  ;;  %6018 = vmatpush3.bf16.msra.mxu1 %v7474_v11 }
 0x201   : > { %14459 = vst [vmem:[#allocation58_spill] sm:$0xff] %v10728_v55  ;;  %v6703_v20 = vunpack.i.h.bf16 %v6701_v33  ;;  %v6702_v17 = vunpack.i.l.bf16 %v6701_v33  ;;  %v10730_v46 = vpop.permute.xlu1 %6715  ;;  %5906 = vmatpush3.bf16.msra.mxu0 %v7472_v47  ;;  %v14467_v47 = vld [vmem:[#allocation88_spill] sm:$0xff]  ;;  %6019 = vmatprep.subr.bf16.mxu1 %v7477_v35 }
 0x202   : > { %6990 = vrot.lane.b32.xlu0 %v6989_v28, %s8412_s14  ;;  %v13998_v59 = vunpack.i.l.bf16 %v10730_v46  ;;  %v14464_v28 = vld [vmem:[#allocation48_spill] sm:$0xff]  ;;  %v14466_v23 = vunpack.i.h.bf16 %v10730_v46 }
 0x203   : > { %v1232_v33 = vsel %vm1146_vm1, %v6703_v20, %v14462_v32  ;;  %v1231_v49 = vsel %vm1146_vm1, %v6702_v17, %v14463_v39  ;;  %7005 = vrot.lane.b32.xlu1 %v7004_v26, %s8412_s14  ;;  %v10751_v7 = vmax.f32 %v14464_v28, %v1166_v24  ;;  %v6999_v39 = vpack.i.bf16 %v10699_v45, %v10702_v13  ;;  %v7475_v24 = vld [vmem:[%s13780_s1 + $0x60] sm:$0xff]   ;;  %v7481_v45 = vld [vmem:[%s13780_s1 + $0xe8] sm:$0xff]  }
 0x204   : > { %v10753_v4 = vpop.permute.xlu0 %6710  ;;  %v1264_v16 = vsel %vm1146_vm1, %v14466_v23, %v6703_v20  ;;  %v1263_v32 = vsel %vm1146_vm1, %v13998_v59, %v6702_v17  ;;  %v7476_v26 = vld [vmem:[%s13780_s1 + $0x20] sm:$0xff]   ;;  %v10772_v28 = vmax.f32 %v14467_v47, %v1232_v33  ;;  %v14469_v20 = vld [vmem:[#allocation87_spill] sm:$0xff]  ;;  %v7014_v17 = vpack.i.bf16 %v10728_v55, %v10725_v29  ;;  %v7479_v59 = vld [vmem:[%s13780_s1 + $0x68] sm:$0xff]   ;;  %5907 = vmatprep.subr.bf16.mxu0 %v7475_v24 }
 0x205   : > { %14465 = vst [vmem:[#allocation86_spill] sm:$0xff] %v10751_v7  ;;  %v10775_v23 = vmax.f32 %v14469_v20, %v1231_v49  ;;  %v6726_v38 = vpop.permute.xlu1 %6725  ;;  %v7478_v33 = vld [vmem:[%s13780_s1 + $0xa0] sm:$0xff]   ;;  %v10790_v49 = vmax.f32 %v9704_v12, %v1264_v16  ;;  %v10793_v11 = vmax.f32 %v9707_v9, %v1263_v32  ;;  %v7009_v24 = vpack.i.bf16 %v10751_v7, %v10739_v61  ;;  %v7480_v9 = vld [vmem:[%s13780_s1 + $0x28] sm:$0xff]   ;;  %v7483_v61 = vld [vmem:[%s13780_s1 + $0x70] sm:$0xff]  }
 0x206   : > { %14468 = vst [vmem:[#allocation85_spill] sm:$0xff] %v10772_v28  ;;  %7000 = vrot.lane.b32.xlu0 %v6999_v39, %s8412_s14  ;;  %v6728_v47 = vunpack.i.h.bf16 %v6726_v38  ;;  %v6727_v20 = vunpack.i.l.bf16 %v6726_v38  ;;  %5908 = vmatpush3.bf16.msra.mxu0 %v7476_v26  ;;  %v7482_v26 = vld [vmem:[%s13780_s1 + $0xa8] sm:$0xff]  }
 0x207   : > { %14470 = vst [vmem:[#allocation38_spill] sm:$0xff] %v10775_v23  ;;  %14471 = vst [vmem:[#allocation39_spill] sm:$0xff] %v10790_v49  ;;  %7015 = vrot.lane.b32.xlu1 %v7014_v17, %s8412_s14  ;;  %v7024_v32 = vpack.i.bf16 %v10772_v28, %v10775_v23  ;;  %5909 = vmatprep.subr.bf16.mxu0 %v7479_v59  ;;  %v7019_v59 = vpack.i.bf16 %v10790_v49, %v10793_v11 }
 0x208   : > { %14472 = vst [vmem:[#allocation36_spill] sm:$0xff] %v10793_v11  ;;  %v6721_v39 = vpop.permute.xlu0 %6720  ;;  %6020 = vmatpush3.bf16.msra.mxu1 %v7478_v33 }
 0x209   : > { %v6723_v12 = vunpack.i.h.bf16 %v6721_v39  ;;  %v6722_v16 = vunpack.i.l.bf16 %v6721_v39  ;;  %v6736_v38 = vpop.permute.xlu1 %6735  ;;  %6021 = vmatprep.subr.bf16.mxu1 %v7481_v45 }
 0x20a   : > { %7010 = vrot.lane.b32.xlu0 %v7009_v24, %s8412_s14  ;;  %v6738_v17 = vunpack.i.h.bf16 %v6736_v38  ;;  %v6737_v13 = vunpack.i.l.bf16 %v6736_v38  ;;  %5910 = vmatpush3.bf16.msra.mxu0 %v7480_v9 }
 0x20b   : > { %v1725_v39 = vsel %vm1659_vm2, %v6723_v12, %v6728_v47  ;;  %v1724_v35 = vsel %vm1659_vm2, %v6722_v16, %v6727_v20  ;;  %7025 = vrot.lane.b32.xlu1 %v7024_v32, %s8412_s14  ;;  %5911 = vmatprep.subr.bf16.mxu0 %v7483_v61  ;;  %v7486_v61 = vld [vmem:[%s13780_s1 + $0xb0] sm:$0xff]  }
 0x20c   : > { %v10822_v33 = vmax.f32 %v9741_v10, %v1725_v39  ;;  %v10825_v24 = vmax.f32 %v9738_v51, %v1724_v35  ;;  %v6731_v38 = vpop.permute.xlu0 %6730  ;;  %v1693_v23 = vsel %vm1659_vm2, %v6728_v47, %v6738_v17  ;;  %v1692_v28 = vsel %vm1659_vm2, %v6727_v20, %v6737_v13  ;;  %v7484_v51 = vld [vmem:[%s13780_s1 + $0x30] sm:$0xff]   ;;  %6022 = vmatpush3.bf16.msra.mxu1 %v7482_v26 }
 0x20d   : > { %v6733_v7 = vunpack.i.h.bf16 %v6731_v38  ;;  %v6732_v55 = vunpack.i.l.bf16 %v6731_v38  ;;  %v10832_v11 = vmax.f32 %v9778_v31, %v1693_v23  ;;  %v6746_v45 = vpop.permute.xlu1 %6745  ;;  %v7485_v10 = vld [vmem:[%s13780_s1 + $0xf0] sm:$0xff]   ;;  %v10841_v47 = vmax.f32 %v9772_v40, %v1692_v28  ;;  %v7487_v23 = vld [vmem:[%s13780_s1 + $0x78] sm:$0xff]  }
 0x20e   : > { %7020 = vrot.lane.b32.xlu0 %v7019_v59, %s8412_s14  ;;  %v6748_v20 = vunpack.i.h.bf16 %v6746_v45  ;;  %v6747_v9 = vunpack.i.l.bf16 %v6746_v45  ;;  %v7034_v31 = vpack.i.bf16 %v10822_v33, %v10825_v24  ;;  %6023 = vmatprep.subr.bf16.mxu1 %v7485_v10  ;;  %v7490_v45 = vld [vmem:[%s13780_s1 + $0xb8] sm:$0xff]  }
 0x20f   : > { %v1757_v40 = vsel %vm1659_vm2, %v6733_v7, %v6723_v12  ;;  %v1756_v28 = vsel %vm1659_vm2, %v6732_v55, %v6722_v16  ;;  %v1661_v32 = vsel %vm1659_vm2, %v6738_v17, %v6733_v7  ;;  %v1660_v26 = vsel %vm1659_vm2, %v6737_v13, %v6732_v55  ;;  %5912 = vmatpush3.bf16.msra.mxu0 %v7484_v51 }
 0x210   : > { %v10861_v39 = vmax.f32 %v9761_v57, %v1757_v40  ;;  %v10864_v35 = vmax.f32 %v9764_v37, %v1756_v28  ;;  %v6741_v59 = vpop.permute.xlu0 %6740  ;;  %7035 = vrot.lane.b32.xlu1 %v7034_v31, %s8413_s29  ;;  %v10868_v12 = vmax.f32 %v9781_v14, %v1661_v32  ;;  %v10871_v16 = vmax.f32 %v9775_v22, %v1660_v26  ;;  %v7488_v57 = vld [vmem:[%s13780_s1 + $0x38] sm:$0xff]  }
 0x211   : > { %v6743_v7 = vunpack.i.h.bf16 %v6741_v59  ;;  %v6742_v17 = vunpack.i.l.bf16 %v6741_v59  ;;  %v6756_v13 = vpop.permute.xlu1 %6755  ;;  %v7489_v37 = vld [vmem:[%s13780_s1 + $0xf8] sm:$0xff]   ;;  %v6713_v55 = vunpack.i.h.bf16 %v10753_v4  ;;  %6024 = vmatpush3.bf16.msra.mxu1 %v7486_v61  ;;  %5913 = vmatprep.subr.bf16.mxu0 %v7487_v23  ;;  %v7044_v40 = vpack.i.bf16 %v10832_v11, %v10841_v47 }
 0x212   : > { %v7029_v14 = vpack.i.bf16 %v10861_v39, %v10864_v35  ;;  %v6758_v38 = vunpack.i.h.bf16 %v6756_v13  ;;  %v6757_v22 = vunpack.i.l.bf16 %v6756_v13  ;;  %6025 = vmatprep.subr.bf16.mxu1 %v7489_v37 }
 0x213   : > { %v1727_v10 = vsel %vm1659_vm2, %v6743_v7, %v6748_v20  ;;  %v1726_v31 = vsel %vm1659_vm2, %v6742_v17, %v6747_v9  ;;  %5914 = vmatpush3.bf16.msra.mxu0 %v7488_v57 }
 0x214   : > { %v10893_v28 = vmax.f32 %v9807_v18, %v1727_v10  ;;  %v10896_v61 = vmax.f32 %v9804_v56, %v1726_v31  ;;  %v6751_v23 = vpop.permute.xlu0 %6750  ;;  %7030 = vrot.lane.b32.xlu0 %v7029_v14, %s8413_s29  ;;  %v1694_v32 = vsel %vm1659_vm2, %v6747_v9, %v6757_v22  ;;  %v1695_v26 = vsel %vm1659_vm2, %v6748_v20, %v6758_v38 }
 0x215   : > { %v6753_v59 = vunpack.i.h.bf16 %v6751_v23  ;;  %v6752_v13 = vunpack.i.l.bf16 %v6751_v23  ;;  %v10904_v51 = vmax.f32 %v9843_v15, %v1694_v32  ;;  %7045 = vrot.lane.b32.xlu1 %v7044_v40, %s8413_s29  ;;  %v6766_v18 = vpop.permute.xlu1 %6765  ;;  %v7039_v56 = vpack.i.bf16 %v10868_v12, %v10871_v16  ;;  %6026 = vmatpush3.bf16.msra.mxu1 %v7490_v45 }
 0x216   : > { %v10910_v37 = vmax.f32 %v9840_v8, %v1695_v26  ;;  %v6768_v14 = vunpack.i.h.bf16 %v6766_v18  ;;  %v6767_v9 = vunpack.i.l.bf16 %v6766_v18  ;;  %v7054_v20 = vpack.i.bf16 %v10893_v28, %v10896_v61 }
 0x217   : > { %v1758_v15 = vsel %vm1659_vm2, %v6752_v13, %v6742_v17  ;;  %v1759_v10 = vsel %vm1659_vm2, %v6753_v59, %v6743_v7  ;;  %v1663_v31 = vsel %vm1659_vm2, %v6758_v38, %v6753_v59  ;;  %v1662_v57 = vsel %vm1659_vm2, %v6757_v22, %v6752_v13 }
 0x218   : > { %v14473_v8 = vunpack.i.h.bf16 %v10677_v63  ;;  %v10927_v23 = vmax.f32 %v9832_v54, %v1758_v15  ;;  %v10930_v45 = vmax.f32 %v9835_v5, %v1759_v10  ;;  %v6761_v17 = vpop.permute.xlu0 %6760  ;;  %7040 = vrot.lane.b32.xlu0 %v7039_v56, %s8413_s29  ;;  %v10934_v7 = vmax.f32 %v9858_v50, %v1663_v31 }
 0x219   : > { %v10937_v38 = vmax.f32 %v9855_v48, %v1662_v57  ;;  %v6763_v22 = vunpack.i.h.bf16 %v6761_v17  ;;  %v6762_v32 = vunpack.i.l.bf16 %v6761_v17  ;;  %7055 = vrot.lane.b32.xlu1 %v7054_v20, %s8413_s29  ;;  %v6776_v26 = vpop.permute.xlu1 %6775  ;;  %v14474_v54 = vunpack.i.l.bf16 %v10753_v4 }
 0x21a   : > { %v1200_v40 = vsel %vm1146_vm1, %v14473_v8, %v6713_v55  ;;  %v14475_v59 = vunpack.i.l.bf16 %v10677_v63  ;;  %v6778_v13 = vunpack.i.h.bf16 %v6776_v26  ;;  %v6777_v18 = vunpack.i.l.bf16 %v6776_v26 }
 0x21b   : > { %v7049_v50 = vpack.i.bf16 %v10930_v45, %v10927_v23  ;;  %v14476_v48 = vunpack.i.h.bf16 %v10730_v46  ;;  %v1729_v20 = vsel %vm1659_vm2, %v6763_v22, %v6768_v14  ;;  %v1728_v15 = vsel %vm1659_vm2, %v6762_v32, %v6767_v9 }
 0x21c   : > { %v1199_v5 = vsel %vm1146_vm1, %v14475_v59, %v14474_v54  ;;  %v7064_v63 = vpack.i.bf16 %v10910_v37, %v10904_v51  ;;  %v10959_v10 = vmax.f32 %v9873_v58, %v1729_v20  ;;  %v10962_v31 = vmax.f32 %v9870_v6, %v1728_v15  ;;  %v6771_v57 = vpop.permute.xlu0 %6770 }
 0x21d   : > { %v1168_v56 = vsel %vm1146_vm1, %v6713_v55, %v14476_v48  ;;  %v1696_v8 = vsel %vm1659_vm2, %v6767_v9, %v6777_v18  ;;  %v1697_v55 = vsel %vm1659_vm2, %v6768_v14, %v6778_v13  ;;  %7050 = vrot.lane.b32.xlu0 %v7049_v50, %s8413_s29  ;;  %v6773_v17 = vunpack.i.h.bf16 %v6771_v57  ;;  %v6786_v58 = vpop.permute.xlu1 %6785 }
 0x21e   : > { %v6772_v26 = vunpack.i.l.bf16 %v6771_v57  ;;  %v10970_v54 = vmax.f32 %v9903_v3, %v1696_v8  ;;  %7065 = vrot.lane.b32.xlu1 %v7064_v63, %s8413_s29  ;;  %v7059_v6 = vpack.i.bf16 %v10934_v7, %v10937_v38  ;;  %v10976_v59 = vmax.f32 %v9906_v62, %v1697_v55 }
 0x21f   : > { %v6788_v9 = vunpack.i.h.bf16 %v6786_v58  ;;  %v6787_v48 = vunpack.i.l.bf16 %v6786_v58  ;;  %v7074_v14 = vpack.i.bf16 %v10959_v10, %v10962_v31  ;;  %v1761_v3 = vsel %vm1659_vm2, %v6773_v17, %v6763_v22  ;;  %v14481_v58 = vld [vmem:[#allocation89_spill] sm:$0xff] }
 0x220   : > { %v1760_v50 = vsel %vm1659_vm2, %v6772_v26, %v6762_v32  ;;  %v1665_v20 = vsel %vm1659_vm2, %v6778_v13, %v6773_v17  ;;  %v1664_v15 = vsel %vm1659_vm2, %v6777_v18, %v6772_v26  ;;  %v10989_v62 = vmax.f32 %v9724_v52, %v1200_v40  ;;  %v6781_v13 = vpop.permute.xlu0 %6780 }
 0x221   : > { %v14477_v63 = vunpack.i.l.bf16 %v10730_v46  ;;  %v14478_v57 = vunpack.i.l.bf16 %v10753_v4  ;;  %v10998_v32 = vmax.f32 %v9890_v43, %v1760_v50  ;;  %v11001_v22 = vmax.f32 %v9887_v2, %v1761_v3  ;;  %7060 = vrot.lane.b32.xlu0 %v7059_v6, %s8413_s29  ;;  %v6801_v40 = vpop.permute.xlu1 %6800 }
 0x222   : > { %v11005_v18 = vmax.f32 %v9727_v27, %v1199_v5  ;;  %v11008_v52 = vmax.f32 %v9924_v41, %v1665_v20  ;;  %v6783_v46 = vunpack.i.h.bf16 %v6781_v13  ;;  %v6782_v4 = vunpack.i.l.bf16 %v6781_v13  ;;  %7075 = vrot.lane.b32.xlu1 %v7074_v14, %s8413_s29 }
 0x223   : > { %v1167_v8 = vsel %vm1146_vm1, %v14478_v57, %v14477_v63  ;;  %v11012_v43 = vmax.f32 %v9921_v19, %v1664_v15  ;;  %v6803_v55 = vunpack.i.h.bf16 %v6801_v40  ;;  %v6802_v2 = vunpack.i.l.bf16 %v6801_v40  ;;  %v14483_v63 = vld [vmem:[#allocation54_spill] sm:$0xff] }
 0x224   : > { %14479 = vst [vmem:[#allocation37_spill] sm:$0xff] %v11008_v52  ;;  %v7069_v17 = vpack.i.bf16 %v11001_v22, %v10998_v32  ;;  %v1731_v27 = vsel %vm1659_vm2, %v6783_v46, %v6788_v9  ;;  %v1730_v41 = vsel %vm1659_vm2, %v6782_v4, %v6787_v48  ;;  %v7089_v5 = vpack.i.bf16 %v10976_v59, %v10970_v54  ;;  %v6791_v6 = vpop.permute.xlu0 %6790 }
 0x225   : > { %v11023_v26 = vmax.f32 %v9733_v53, %v1168_v56  ;;  %v11026_v19 = vmax.f32 %v14481_v58, %v1167_v8  ;;  %v6793_v14 = vunpack.i.h.bf16 %v6791_v6  ;;  %v6792_v50 = vunpack.i.l.bf16 %v6791_v6  ;;  %v6806_v15 = vpop.permute.xlu1 %6805  ;;  %v14485_v56 = vld [vmem:[#allocation53_spill] sm:$0xff]  ;;  %v14489_v58 = vld [vmem:[#allocation70_spill] sm:$0xff] }
 0x226   : > { %7070 = vrot.lane.b32.xlu0 %v7069_v17, %s8413_s29  ;;  %v1698_v3 = vsel %vm1659_vm2, %v6787_v48, %v6802_v2  ;;  %v1699_v20 = vsel %vm1659_vm2, %v6788_v9, %v6803_v55  ;;  %7090 = vrot.lane.b32.xlu1 %v7089_v5, %s8413_s29  ;;  %v11035_v53 = vmax.f32 %v14483_v63, %v1731_v27  ;;  %v6808_v40 = vunpack.i.h.bf16 %v6806_v15  ;;  %v14487_v5 = vld [vmem:[#allocation60_spill] sm:$0xff] }
 0x227   : > { %14480 = vst [vmem:[#allocation61_spill] sm:$0xff] %v11023_v26  ;;  %14482 = vst [vmem:[#allocation48_spill] sm:$0xff] %v11026_v19  ;;  %v11038_v57 = vmax.f32 %v14485_v56, %v1730_v41  ;;  %v7079_v8 = vpack.i.bf16 %v11008_v52, %v11012_v43  ;;  %v7094_v13 = vpack.i.bf16 %v10989_v62, %v11005_v18  ;;  %v6807_v17 = vunpack.i.l.bf16 %v6806_v15 }
 0x228   : > { %14484 = vst [vmem:[#allocation88_spill] sm:$0xff] %v11035_v53  ;;  %v1762_v48 = vsel %vm1659_vm2, %v6792_v50, %v6782_v4  ;;  %v1763_v9 = vsel %vm1659_vm2, %v6793_v14, %v6783_v46  ;;  %v11049_v27 = vmax.f32 %v14487_v5, %v1698_v3  ;;  %v11052_v41 = vmax.f32 %v14489_v58, %v1699_v20  ;;  %v6796_v6 = vpop.permute.xlu0 %6795  ;;  %v14491_v5 = vld [vmem:[#allocation66_spill] sm:$0xff]  ;;  %v14493_v58 = vld [vmem:[#allocation47_spill] sm:$0xff] }
 0x229   : > { %14486 = vst [vmem:[#allocation87_spill] sm:$0xff] %v11038_v57  ;;  %v7084_v63 = vpack.i.bf16 %v11023_v26, %v11026_v19  ;;  %v1667_v4 = vsel %vm1659_vm2, %v6803_v55, %v6793_v14  ;;  %v1666_v46 = vsel %vm1659_vm2, %v6802_v2, %v6792_v50  ;;  %v6798_v56 = vunpack.i.h.bf16 %v6796_v6  ;;  %v6816_v3 = vpop.permute.xlu1 %6815  ;;  %v14495_v14 = vld [vmem:[#allocation71_spill] sm:$0xff]  ;;  %v14503_v26 = vld [vmem:[#allocation68_spill] sm:$0xff] }
 0x22a   : > { %14488 = vst [vmem:[#allocation89_spill] sm:$0xff] %v11049_v27  ;;  %14490 = vst [vmem:[#allocation54_spill] sm:$0xff] %v11052_v41  ;;  %7080 = vrot.lane.b32.xlu0 %v7079_v8, %s8413_s29  ;;  %v6797_v15 = vunpack.i.l.bf16 %v6796_v6  ;;  %7095 = vrot.lane.b32.xlu1 %v7094_v13, %s8412_s14  ;;  %v11063_v20 = vmax.f32 %v14491_v5, %v1762_v48  ;;  %v11066_v52 = vmax.f32 %v14493_v58, %v1763_v9  ;;  %v14497_v13 = vld [vmem:[#allocation69_spill] sm:$0xff] }
 0x22b   : > { %v6818_v8 = vunpack.i.h.bf16 %v6816_v3  ;;  %v6817_v49 = vunpack.i.l.bf16 %v6816_v3  ;;  %v1234_v19 = vsel %vm1146_vm1, %v6798_v56, %v6808_v40  ;;  %v7104_v2 = vpack.i.bf16 %v11035_v53, %v11038_v57  ;;  %v14499_v57 = vld [vmem:[#allocation72_spill] sm:$0xff] }
 0x22c   : > { %14492 = vst [vmem:[#allocation53_spill] sm:$0xff] %v11063_v20  ;;  %14494 = vst [vmem:[#allocation60_spill] sm:$0xff] %v11066_v52  ;;  %v1233_v55 = vsel %vm1146_vm1, %v6797_v15, %v6807_v17  ;;  %v11075_v50 = vmax.f32 %v14495_v14, %v1667_v4  ;;  %v11078_v48 = vmax.f32 %v14497_v13, %v1666_v46  ;;  %v6811_v6 = vpop.permute.xlu0 %6810  ;;  %v14501_v14 = vld [vmem:[#allocation67_spill] sm:$0xff] }
 0x22d   : > { %v6813_v9 = vunpack.i.h.bf16 %v6811_v6  ;;  %v6812_v3 = vunpack.i.l.bf16 %v6811_v6  ;;  %v1266_v5 = vsel %vm1146_vm1, %v6818_v8, %v6798_v56  ;;  %v1265_v58 = vsel %vm1146_vm1, %v6817_v49, %v6797_v15  ;;  %v6826_v53 = vpop.permute.xlu1 %6825 }
 0x22e   : > { %14496 = vst [vmem:[#allocation70_spill] sm:$0xff] %v11075_v50  ;;  %14498 = vst [vmem:[#allocation66_spill] sm:$0xff] %v11078_v48  ;;  %7085 = vrot.lane.b32.xlu0 %v7084_v63, %s8412_s14  ;;  %7105 = vrot.lane.b32.xlu1 %v7104_v2, %s8413_s29  ;;  %v11087_v4 = vmax.f32 %v14499_v57, %v1234_v19  ;;  %v11090_v46 = vmax.f32 %v14501_v14, %v1233_v55  ;;  %v6828_v2 = vunpack.i.h.bf16 %v6826_v53  ;;  %v14505_v57 = vld [vmem:[#allocation90_spill] sm:$0xff] }
 0x22f   : > { %v7099_v63 = vpack.i.bf16 %v11066_v52, %v11063_v20  ;;  %v7114_v13 = vpack.i.bf16 %v11052_v41, %v11049_v27  ;;  %v1201_v56 = vsel %vm1146_vm1, %v6807_v17, %v6812_v3  ;;  %v1202_v15 = vsel %vm1146_vm1, %v6808_v40, %v6813_v9 }
 0x230   : > { %14500 = vst [vmem:[#allocation47_spill] sm:$0xff] %v11087_v4  ;;  %14502 = vst [vmem:[#allocation71_spill] sm:$0xff] %v11090_v46  ;;  %v6827_v6 = vunpack.i.l.bf16 %v6826_v53  ;;  %v11101_v19 = vmax.f32 %v14503_v26, %v1266_v5  ;;  %v11104_v55 = vmax.f32 %v14505_v57, %v1265_v58  ;;  %v6821_v14 = vpop.permute.xlu0 %6820  ;;  %v7109_v52 = vpack.i.bf16 %v11075_v50, %v11078_v48  ;;  %v14507_v5 = vld [vmem:[#allocation75_spill] sm:$0xff]  ;;  %v14509_v57 = vld [vmem:[#allocation76_spill] sm:$0xff] }
 0x231   : > { %v1170_v17 = vsel %vm1146_vm1, %v6813_v9, %v6818_v8  ;;  %v1169_v40 = vsel %vm1146_vm1, %v6812_v3, %v6817_v49  ;;  %v6823_v20 = vunpack.i.h.bf16 %v6821_v14  ;;  %v6822_v53 = vunpack.i.l.bf16 %v6821_v14  ;;  %v6836_v26 = vpop.permute.xlu1 %6835  ;;  %v14511_v9 = vld [vmem:[#allocation74_spill] sm:$0xff]  ;;  %v14519_v48 = vld [vmem:[#allocation11_spill] sm:$0xff] }
 0x232   : > { %14504 = vst [vmem:[#allocation69_spill] sm:$0xff] %v11101_v19  ;;  %14506 = vst [vmem:[#allocation72_spill] sm:$0xff] %v11104_v55  ;;  %7100 = vrot.lane.b32.xlu0 %v7099_v63, %s8413_s29  ;;  %7115 = vrot.lane.b32.xlu1 %v7114_v13, %s8413_s29  ;;  %v11115_v58 = vmax.f32 %v14507_v5, %v1201_v56  ;;  %v11118_v41 = vmax.f32 %v14509_v57, %v1202_v15  ;;  %v6838_v63 = vunpack.i.h.bf16 %v6836_v26  ;;  %v14513_v13 = vld [vmem:[#allocation73_spill] sm:$0xff] }
 0x233   : > { %v6837_v27 = vunpack.i.l.bf16 %v6836_v26  ;;  %v1733_v50 = vsel %vm1659_vm2, %v6823_v20, %v6828_v2  ;;  %v1732_v8 = vsel %vm1659_vm2, %v6822_v53, %v6827_v6  ;;  %v7124_v49 = vpack.i.bf16 %v11087_v4, %v11090_v46  ;;  %v14515_v4 = vld [vmem:[#allocation77_spill] sm:$0xff] }
 0x234   : > { %14508 = vst [vmem:[#allocation67_spill] sm:$0xff] %v11115_v58  ;;  %14510 = vst [vmem:[#allocation68_spill] sm:$0xff] %v11118_v41  ;;  %v11127_v3 = vmax.f32 %v14511_v9, %v1170_v17  ;;  %v11130_v56 = vmax.f32 %v14513_v13, %v1169_v40  ;;  %v6831_v14 = vpop.permute.xlu0 %6830  ;;  %v1701_v57 = vsel %vm1659_vm2, %v6828_v2, %v6838_v63  ;;  %v14517_v9 = vld [vmem:[#allocation50_spill] sm:$0xff] }
 0x235   : > { %v6833_v15 = vunpack.i.h.bf16 %v6831_v14  ;;  %v6832_v26 = vunpack.i.l.bf16 %v6831_v14  ;;  %v1700_v5 = vsel %vm1659_vm2, %v6827_v6, %v6837_v27  ;;  %v6846_v46 = vpop.permute.xlu1 %6845  ;;  %v11139_v17 = vmax.f32 %v14515_v4, %v1733_v50  ;;  %v14521_v4 = vld [vmem:[#allocation10_spill] sm:$0xff] }
 0x236   : > { %14512 = vst [vmem:[#allocation90_spill] sm:$0xff] %v11127_v3  ;;  %14514 = vst [vmem:[#allocation75_spill] sm:$0xff] %v11130_v56  ;;  %7110 = vrot.lane.b32.xlu0 %v7109_v52, %s8413_s29  ;;  %7125 = vrot.lane.b32.xlu1 %v7124_v49, %s8412_s14  ;;  %v11142_v40 = vmax.f32 %v14517_v9, %v1732_v8  ;;  %v7119_v52 = vpack.i.bf16 %v11101_v19, %v11104_v55  ;;  %v6848_v49 = vunpack.i.h.bf16 %v6846_v46 }
 0x237   : > { %14516 = vst [vmem:[#allocation76_spill] sm:$0xff] %v11139_v17  ;;  %v7134_v13 = vpack.i.bf16 %v11118_v41, %v11115_v58  ;;  %v1764_v6 = vsel %vm1659_vm2, %v6832_v26, %v6822_v53  ;;  %v1765_v2 = vsel %vm1659_vm2, %v6833_v15, %v6823_v20  ;;  %v6847_v14 = vunpack.i.l.bf16 %v6846_v46 }
 0x238   : > { %14518 = vst [vmem:[#allocation74_spill] sm:$0xff] %v11142_v40  ;;  %v11153_v50 = vmax.f32 %v14519_v48, %v1700_v5  ;;  %v11156_v8 = vmax.f32 %v14521_v4, %v1701_v57  ;;  %v6841_v9 = vpop.permute.xlu0 %6840  ;;  %v7129_v19 = vpack.i.bf16 %v11127_v3, %v11130_v56  ;;  %v1669_v53 = vsel %vm1659_vm2, %v6838_v63, %v6833_v15  ;;  %v14523_v5 = vld [vmem:[#allocation63_spill] sm:$0xff]  ;;  %v14525_v4 = vld [vmem:[#allocation78_spill] sm:$0xff] }
 0x239   : > { %v1668_v20 = vsel %vm1659_vm2, %v6837_v27, %v6832_v26  ;;  %v6843_v55 = vunpack.i.h.bf16 %v6841_v9  ;;  %v6842_v46 = vunpack.i.l.bf16 %v6841_v9  ;;  %v6856_v48 = vpop.permute.xlu1 %6855  ;;  %v11167_v57 = vmax.f32 %v14523_v5, %v1764_v6  ;;  %v14527_v15 = vld [vmem:[#allocation42_spill] sm:$0xff]  ;;  %v14535_v3 = vld [vmem:[#allocation91_spill] sm:$0xff] }
 0x23a   : > { %14520 = vst [vmem:[#allocation73_spill] sm:$0xff] %v11153_v50  ;;  %14522 = vst [vmem:[#allocation77_spill] sm:$0xff] %v11156_v8  ;;  %7120 = vrot.lane.b32.xlu0 %v7119_v52, %s8412_s14  ;;  %7135 = vrot.lane.b32.xlu1 %v7134_v13, %s8412_s14  ;;  %v11170_v41 = vmax.f32 %v14525_v4, %v1765_v2  ;;  %v6858_v52 = vunpack.i.h.bf16 %v6856_v48  ;;  %v6857_v58 = vunpack.i.l.bf16 %v6856_v48  ;;  %v14529_v13 = vld [vmem:[#allocation55_spill] sm:$0xff] }
 0x23b   : > { %14524 = vst [vmem:[#allocation50_spill] sm:$0xff] %v11167_v57  ;;  %v1236_v56 = vsel %vm1146_vm1, %v6843_v55, %v6848_v49  ;;  %v1235_v63 = vsel %vm1146_vm1, %v6842_v46, %v6847_v14  ;;  %v7144_v27 = vpack.i.bf16 %v11139_v17, %v11142_v40  ;;  %v11179_v26 = vmax.f32 %v14527_v15, %v1669_v53  ;;  %v14531_v40 = vld [vmem:[#allocation23_spill] sm:$0xff]  ;;  %v14533_v15 = vld [vmem:[#allocation22_spill] sm:$0xff] }
 0x23c   : > { %14526 = vst [vmem:[#allocation11_spill] sm:$0xff] %v11170_v41  ;;  %v11182_v6 = vmax.f32 %v14529_v13, %v1668_v20  ;;  %v6851_v9 = vpop.permute.xlu0 %6850  ;;  %v1268_v5 = vsel %vm1146_vm1, %v6858_v52, %v6843_v55  ;;  %v1267_v4 = vsel %vm1146_vm1, %v6857_v58, %v6842_v46  ;;  %v11191_v53 = vmax.f32 %v14531_v40, %v1236_v56  ;;  %v14537_v40 = vld [vmem:[#allocation92_spill] sm:$0xff] }
 0x23d   : > { %14528 = vst [vmem:[#allocation10_spill] sm:$0xff] %v11179_v26  ;;  %v6853_v2 = vunpack.i.h.bf16 %v6851_v9  ;;  %v6852_v48 = vunpack.i.l.bf16 %v6851_v9  ;;  %v6866_v17 = vpop.permute.xlu1 %6865  ;;  %v11194_v20 = vmax.f32 %v14533_v15, %v1235_v63  ;;  %v7154_v13 = vpack.i.bf16 %v11156_v8, %v11153_v50 }
 0x23e   : > { %14530 = vst [vmem:[#allocation63_spill] sm:$0xff] %v11182_v6  ;;  %7130 = vrot.lane.b32.xlu0 %v7129_v19, %s8412_s14  ;;  %7145 = vrot.lane.b32.xlu1 %v7144_v27, %s8413_s29  ;;  %14532 = vst [vmem:[#allocation78_spill] sm:$0xff] %v11191_v53  ;;  %v7139_v19 = vpack.i.bf16 %v11170_v41, %v11167_v57  ;;  %v6868_v27 = vunpack.i.h.bf16 %v6866_v17  ;;  %v6867_v9 = vunpack.i.l.bf16 %v6866_v17 }
 0x23f   : > { %14534 = vst [vmem:[#allocation42_spill] sm:$0xff] %v11194_v20  ;;  %v1203_v55 = vsel %vm1146_vm1, %v6847_v14, %v6852_v48  ;;  %v1204_v46 = vsel %vm1146_vm1, %v6848_v49, %v6853_v2  ;;  %v11205_v56 = vmax.f32 %v14535_v3, %v1268_v5  ;;  %v11208_v63 = vmax.f32 %v14537_v40, %v1267_v4  ;;  %v14539_v5 = vld [vmem:[#allocation79_spill] sm:$0xff]  ;;  %v14541_v40 = vld [vmem:[#allocation80_spill] sm:$0xff] }
 0x240   : > { %v6861_v15 = vpop.permute.xlu0 %6860  ;;  %v7149_v41 = vpack.i.bf16 %v11179_v26, %v11182_v6  ;;  %v1172_v14 = vsel %vm1146_vm1, %v6853_v2, %v6858_v52  ;;  %v1171_v49 = vsel %vm1146_vm1, %v6852_v48, %v6857_v58  ;;  %v11219_v4 = vmax.f32 %v14539_v5, %v1203_v55  ;;  %v14543_v2 = vld [vmem:[#allocation19_spill] sm:$0xff]  ;;  %v14551_v6 = vld [vmem:[#allocation9_spill] sm:$0xff] }
 0x241   : > { %14536 = vst [vmem:[#allocation55_spill] sm:$0xff] %v11205_v56  ;;  %14538 = vst [vmem:[#allocation23_spill] sm:$0xff] %v11208_v63  ;;  %v6863_v57 = vunpack.i.h.bf16 %v6861_v15  ;;  %v6862_v17 = vunpack.i.l.bf16 %v6861_v15  ;;  %v6876_v3 = vpop.permute.xlu1 %6875  ;;  %v11222_v8 = vmax.f32 %v14541_v40, %v1204_v46  ;;  %v7164_v58 = vpack.i.bf16 %v11191_v53, %v11194_v20  ;;  %v14547_v53 = vld [vmem:[#allocation12_spill] sm:$0xff] }
 0x242   : > { %7140 = vrot.lane.b32.xlu0 %v7139_v19, %s8413_s29  ;;  %7155 = vrot.lane.b32.xlu1 %v7154_v13, %s8413_s29  ;;  %14540 = vst [vmem:[#allocation22_spill] sm:$0xff] %v11219_v4  ;;  %v6878_v19 = vunpack.i.h.bf16 %v6876_v3  ;;  %v6877_v50 = vunpack.i.l.bf16 %v6876_v3  ;;  %v11231_v48 = vmax.f32 %v14543_v2, %v1172_v14  ;;  %v14545_v13 = vld [vmem:[#allocation18_spill] sm:$0xff]  ;;  %v14549_v2 = vld [vmem:[#allocation49_spill] sm:$0xff] }
 0x243   : > { %14542 = vst [vmem:[#allocation91_spill] sm:$0xff] %v11222_v8  ;;  %v1735_v26 = vsel %vm1659_vm2, %v6863_v57, %v6868_v27  ;;  %v1734_v52 = vsel %vm1659_vm2, %v6862_v17, %v6867_v9  ;;  %v11234_v55 = vmax.f32 %v14545_v13, %v1171_v49  ;;  %v7174_v13 = vpack.i.bf16 %v11222_v8, %v11219_v4 }
 0x244   : > { %14544 = vst [vmem:[#allocation92_spill] sm:$0xff] %v11231_v48  ;;  %v6871_v15 = vpop.permute.xlu0 %6870  ;;  %v1702_v5 = vsel %vm1659_vm2, %v6867_v9, %v6877_v50  ;;  %v1703_v40 = vsel %vm1659_vm2, %v6868_v27, %v6878_v19  ;;  %v11243_v14 = vmax.f32 %v14547_v53, %v1735_v26  ;;  %v11246_v49 = vmax.f32 %v14549_v2, %v1734_v52  ;;  %v14553_v53 = vld [vmem:[#allocation8_spill] sm:$0xff] }
 0x245   : > { %14546 = vst [vmem:[#allocation79_spill] sm:$0xff] %v11234_v55  ;;  %v6873_v46 = vunpack.i.h.bf16 %v6871_v15  ;;  %v6872_v3 = vunpack.i.l.bf16 %v6871_v15  ;;  %v6886_v20 = vpop.permute.xlu1 %6885  ;;  %v11257_v26 = vmax.f32 %v14551_v6, %v1702_v5  ;;  %v11260_v52 = vmax.f32 %v14553_v53, %v1703_v40  ;;  %v14555_v5 = vld [vmem:[#allocation62_spill] sm:$0xff]  ;;  %v14557_v53 = vld [vmem:[#allocation13_spill] sm:$0xff] }
 0x246   : > { %7150 = vrot.lane.b32.xlu0 %v7149_v41, %s8413_s29  ;;  %7165 = vrot.lane.b32.xlu1 %v7164_v58, %s8412_s14  ;;  %14548 = vst [vmem:[#allocation80_spill] sm:$0xff] %v11243_v14  ;;  %14550 = vst [vmem:[#allocation19_spill] sm:$0xff] %v11246_v49  ;;  %v7159_v41 = vpack.i.bf16 %v11205_v56, %v11208_v63  ;;  %v6888_v58 = vunpack.i.h.bf16 %v6886_v20  ;;  %v6887_v15 = vunpack.i.l.bf16 %v6886_v20 }
 0x247   : > { %v1766_v9 = vsel %vm1659_vm2, %v6872_v3, %v6862_v17  ;;  %v1767_v27 = vsel %vm1659_vm2, %v6873_v46, %v6863_v57  ;;  %14552 = vst [vmem:[#allocation18_spill] sm:$0xff] %v11257_v26  ;;  %14554 = vst [vmem:[#allocation12_spill] sm:$0xff] %v11260_v52  ;;  %v7169_v56 = vpack.i.bf16 %v11231_v48, %v11234_v55  ;;  %v14567_v48 = vld [vmem:[#allocation93_spill] sm:$0xff] }
 0x248   : > { %v6881_v2 = vpop.permute.xlu0 %6880  ;;  %v1671_v17 = vsel %vm1659_vm2, %v6878_v19, %v6873_v46  ;;  %v1670_v57 = vsel %vm1659_vm2, %v6877_v50, %v6872_v3  ;;  %v11271_v40 = vmax.f32 %v14555_v5, %v1766_v9  ;;  %v11274_v8 = vmax.f32 %v14557_v53, %v1767_v27  ;;  %v14559_v46 = vld [vmem:[#allocation44_spill] sm:$0xff] }
 0x249   : > { %v6883_v63 = vunpack.i.h.bf16 %v6881_v2  ;;  %v6882_v20 = vunpack.i.l.bf16 %v6881_v2  ;;  %v6896_v6 = vpop.permute.xlu1 %6895  ;;  %v7184_v50 = vpack.i.bf16 %v11243_v14, %v11246_v49  ;;  %v11283_v3 = vmax.f32 %v14559_v46, %v1671_v17  ;;  %v14563_v49 = vld [vmem:[#allocation26_spill] sm:$0xff]  ;;  %v14565_v46 = vld [vmem:[#allocation27_spill] sm:$0xff] }
 0x24a   : > { %7160 = vrot.lane.b32.xlu0 %v7159_v41, %s8412_s14  ;;  %7175 = vrot.lane.b32.xlu1 %v7174_v13, %s8412_s14  ;;  %14556 = vst [vmem:[#allocation49_spill] sm:$0xff] %v11271_v40  ;;  %14558 = vst [vmem:[#allocation9_spill] sm:$0xff] %v11274_v8  ;;  %v6898_v41 = vunpack.i.h.bf16 %v6896_v6  ;;  %v6897_v4 = vunpack.i.l.bf16 %v6896_v6  ;;  %v14561_v13 = vld [vmem:[#allocation57_spill] sm:$0xff] }
 0x24b   : > { %v1238_v55 = vsel %vm1146_vm1, %v6883_v63, %v6888_v58  ;;  %v1237_v19 = vsel %vm1146_vm1, %v6882_v20, %v6887_v15  ;;  %14560 = vst [vmem:[#allocation8_spill] sm:$0xff] %v11283_v3  ;;  %v11286_v9 = vmax.f32 %v14561_v13, %v1670_v57  ;;  %v7194_v13 = vpack.i.bf16 %v11260_v52, %v11257_v26 }
 0x24c   : > { %v6891_v2 = vpop.permute.xlu0 %6890  ;;  %v1270_v5 = vsel %vm1146_vm1, %v6898_v41, %v6883_v63  ;;  %v1269_v53 = vsel %vm1146_vm1, %v6897_v4, %v6882_v20  ;;  %v11295_v17 = vmax.f32 %v14563_v49, %v1238_v55  ;;  %v11298_v57 = vmax.f32 %v14565_v46, %v1237_v19  ;;  %v14569_v49 = vld [vmem:[#allocation94_spill] sm:$0xff] }
 0x24d   : > { %14562 = vst [vmem:[#allocation62_spill] sm:$0xff] %v11286_v9  ;;  %v6893_v27 = vunpack.i.h.bf16 %v6891_v2  ;;  %v6892_v6 = vunpack.i.l.bf16 %v6891_v2  ;;  %v6906_v14 = vpop.permute.xlu1 %6905  ;;  %v11309_v55 = vmax.f32 %v14567_v48, %v1270_v5  ;;  %v11312_v19 = vmax.f32 %v14569_v49, %v1269_v53  ;;  %v14571_v5 = vld [vmem:[#allocation81_spill] sm:$0xff]  ;;  %v14573_v49 = vld [vmem:[#allocation82_spill] sm:$0xff] }
 0x24e   : > { %7170 = vrot.lane.b32.xlu0 %v7169_v56, %s8412_s14  ;;  %7185 = vrot.lane.b32.xlu1 %v7184_v50, %s8413_s29  ;;  %14564 = vst [vmem:[#allocation13_spill] sm:$0xff] %v11295_v17  ;;  %14566 = vst [vmem:[#allocation44_spill] sm:$0xff] %v11298_v57  ;;  %v7179_v56 = vpack.i.bf16 %v11274_v8, %v11271_v40  ;;  %v6908_v50 = vunpack.i.h.bf16 %v6906_v14  ;;  %v6907_v2 = vunpack.i.l.bf16 %v6906_v14 }
 0x24f   : > { %v1205_v63 = vsel %vm1146_vm1, %v6887_v15, %v6892_v6  ;;  %v1206_v20 = vsel %vm1146_vm1, %v6888_v58, %v6893_v27  ;;  %14568 = vst [vmem:[#allocation57_spill] sm:$0xff] %v11309_v55  ;;  %14570 = vst [vmem:[#allocation26_spill] sm:$0xff] %v11312_v19  ;;  %v7189_v8 = vpack.i.bf16 %v11283_v3, %v11286_v9  ;;  %v14583_v9 = vld [vmem:[#allocation84_spill] sm:$0xff] }
 0x250   : > { %v6901_v46 = vpop.permute.xlu0 %6900  ;;  %v1174_v15 = vsel %vm1146_vm1, %v6893_v27, %v6898_v41  ;;  %v1173_v58 = vsel %vm1146_vm1, %v6892_v6, %v6897_v4  ;;  %v11323_v53 = vmax.f32 %v14571_v5, %v1205_v63  ;;  %v11326_v52 = vmax.f32 %v14573_v49, %v1206_v20  ;;  %v14575_v27 = vld [vmem:[#allocation21_spill] sm:$0xff] }
 0x251   : > { %v6903_v40 = vunpack.i.h.bf16 %v6901_v46  ;;  %v6902_v14 = vunpack.i.l.bf16 %v6901_v46  ;;  %v6916_v48 = vpop.permute.xlu1 %6915  ;;  %v7204_v4 = vpack.i.bf16 %v11295_v17, %v11298_v57  ;;  %v11335_v6 = vmax.f32 %v14575_v27, %v1174_v15  ;;  %v14579_v17 = vld [vmem:[#allocation16_spill] sm:$0xff] }
 0x252   : > { %7180 = vrot.lane.b32.xlu0 %v7179_v56, %s8413_s29  ;;  %7195 = vrot.lane.b32.xlu1 %v7194_v13, %s8413_s29  ;;  %14572 = vst [vmem:[#allocation27_spill] sm:$0xff] %v11323_v53  ;;  %14574 = vst [vmem:[#allocation93_spill] sm:$0xff] %v11326_v52  ;;  %v6918_v56 = vunpack.i.h.bf16 %v6916_v48  ;;  %v6917_v26 = vunpack.i.l.bf16 %v6916_v48  ;;  %v14577_v13 = vld [vmem:[#allocation20_spill] sm:$0xff] }
 0x253   : > { %v1737_v3 = vsel %vm1659_vm2, %v6903_v40, %v6908_v50  ;;  %v1736_v41 = vsel %vm1659_vm2, %v6902_v14, %v6907_v2  ;;  %14576 = vst [vmem:[#allocation94_spill] sm:$0xff] %v11335_v6  ;;  %v11338_v63 = vmax.f32 %v14577_v13, %v1173_v58  ;;  %v14581_v27 = vld [vmem:[#allocation52_spill] sm:$0xff]  ;;  %v7214_v13 = vpack.i.bf16 %v11326_v52, %v11323_v53 }
 0x254   : > { %v6911_v46 = vpop.permute.xlu0 %6910  ;;  %v1704_v5 = vsel %vm1659_vm2, %v6907_v2, %v6917_v26  ;;  %v1705_v49 = vsel %vm1659_vm2, %v6908_v50, %v6918_v56  ;;  %v11347_v15 = vmax.f32 %v14579_v17, %v1737_v3  ;;  %v11350_v58 = vmax.f32 %v14581_v27, %v1736_v41  ;;  %v14584_v17 = vld [vmem:[#allocation83_spill] sm:$0xff] }
 0x255   : > { %14578 = vst [vmem:[#allocation81_spill] sm:$0xff] %v11338_v63  ;;  %v6913_v20 = vunpack.i.h.bf16 %v6911_v46  ;;  %v6912_v48 = vunpack.i.l.bf16 %v6911_v46  ;;  %v6926_v57 = vpop.permute.xlu1 %6925  ;;  %v11361_v3 = vmax.f32 %v14583_v9, %v1704_v5  ;;  %v11364_v41 = vmax.f32 %v14584_v17, %v1705_v49  ;;  %v14586_v5 = vld [vmem:[#allocation65_spill] sm:$0xff] }
 0x256   : > { %7190 = vrot.lane.b32.xlu0 %v7189_v8, %s8413_s29  ;;  %7205 = vrot.lane.b32.xlu1 %v7204_v4, %s8412_s14  ;;  %14580 = vst [vmem:[#allocation82_spill] sm:$0xff] %v11347_v15  ;;  %14582 = vst [vmem:[#allocation21_spill] sm:$0xff] %v11350_v58  ;;  %v7199_v8 = vpack.i.bf16 %v11309_v55, %v11312_v19  ;;  %v6928_v4 = vunpack.i.h.bf16 %v6926_v57  ;;  %v6927_v46 = vunpack.i.l.bf16 %v6926_v57  ;;  %v14588_v17 = vld [vmem:[#allocation17_spill] sm:$0xff] }
 0x257   : > { %v1768_v2 = vsel %vm1659_vm2, %v6912_v48, %v6902_v14  ;;  %v1769_v50 = vsel %vm1659_vm2, %v6913_v20, %v6903_v40  ;;  %14585 = vst [vmem:[#allocation20_spill] sm:$0xff] %v11364_v41  ;;  %v7209_v55 = vpack.i.bf16 %v11335_v6, %v11338_v63  ;;  %v1673_v14 = vsel %vm1659_vm2, %v6918_v56, %v6913_v20  ;;  %v14590_v20 = vld [vmem:[#allocation43_spill] sm:$0xff] }
 0x258   : > { %v6921_v27 = vpop.permute.xlu0 %6920  ;;  %v1672_v40 = vsel %vm1659_vm2, %v6917_v26, %v6912_v48  ;;  %v11375_v49 = vmax.f32 %v14586_v5, %v1768_v2  ;;  %v11378_v52 = vmax.f32 %v14588_v17, %v1769_v50  ;;  %v7224_v26 = vpack.i.bf16 %v11347_v15, %v11350_v58  ;;  %v14593_v58 = vld [vmem:[#allocation31_spill] sm:$0xff] }
 0x259   : > { %v6923_v19 = vunpack.i.h.bf16 %v6921_v27  ;;  %v6922_v57 = vunpack.i.l.bf16 %v6921_v27  ;;  %v6936_v9 = vpop.permute.xlu1 %6935  ;;  %v11387_v48 = vmax.f32 %v14590_v20, %v1673_v14  ;;  %v14594_v20 = vld [vmem:[#allocation30_spill] sm:$0xff] }
 0x25a   : > { %7200 = vrot.lane.b32.xlu0 %v7199_v8, %s8412_s14  ;;  %7215 = vrot.lane.b32.xlu1 %v7214_v13, %s8412_s14  ;;  %14587 = vst [vmem:[#allocation16_spill] sm:$0xff] %v11375_v49  ;;  %14589 = vst [vmem:[#allocation52_spill] sm:$0xff] %v11378_v52  ;;  %v6938_v8 = vunpack.i.h.bf16 %v6936_v9  ;;  %v6937_v53 = vunpack.i.l.bf16 %v6936_v9  ;;  %v14592_v13 = vld [vmem:[#allocation56_spill] sm:$0xff] }
 0x25b   : > { %v1240_v63 = vsel %vm1146_vm1, %v6923_v19, %v6928_v4  ;;  %v1239_v56 = vsel %vm1146_vm1, %v6922_v57, %v6927_v46  ;;  %14591 = vst [vmem:[#allocation84_spill] sm:$0xff] %v11387_v48  ;;  %v11390_v2 = vmax.f32 %v14592_v13, %v1672_v40  ;;  %v7234_v13 = vpack.i.bf16 %v11364_v41, %v11361_v3 }
 0x25c   : > { %v6931_v27 = vpop.permute.xlu0 %6930  ;;  %v1272_v5 = vsel %vm1146_vm1, %v6938_v8, %v6923_v19  ;;  %v1271_v17 = vsel %vm1146_vm1, %v6937_v53, %v6922_v57  ;;  %v11399_v14 = vmax.f32 %v14593_v58, %v1240_v63  ;;  %v11402_v40 = vmax.f32 %v14594_v20, %v1239_v56  ;;  %v14597_v58 = vld [vmem:[#allocation98_spill] sm:$0xff]  ;;  %v14599_v20 = vld [vmem:[#allocation64_spill] sm:$0xff] }
 0x25d   : > { %v6933_v50 = vunpack.i.h.bf16 %v6931_v27  ;;  %v6932_v9 = vunpack.i.l.bf16 %v6931_v27  ;;  %v6946_v15 = vpop.permute.xlu1 %6945  ;;  %v11419_v6 = vmax.f32 %v14599_v20, %v1272_v5 }
 0x25e   : > { %7210 = vrot.lane.b32.xlu0 %v7209_v55, %s8412_s14  ;;  %7225 = vrot.lane.b32.xlu1 %v7224_v26, %s8413_s29  ;;  %14595 = vst [vmem:[#allocation83_spill] sm:$0xff] %v11402_v40  ;;  %v7219_v55 = vpack.i.bf16 %v11378_v52, %v11375_v49  ;;  %v6948_v26 = vunpack.i.h.bf16 %v6946_v15  ;;  %v6947_v27 = vunpack.i.l.bf16 %v6946_v15  ;;  %v14601_v52 = vld [vmem:[#allocation95_spill] sm:$0xff] }
 0x25f   : > { %v1207_v19 = vsel %vm1146_vm1, %v6927_v46, %v6932_v9  ;;  %v1208_v57 = vsel %vm1146_vm1, %v6928_v4, %v6933_v50  ;;  %14600 = vst [vmem:[#allocation43_spill] sm:$0xff] %v11419_v6  ;;  %v11422_v49 = vmax.f32 %v14601_v52, %v1271_v17  ;;  %v1176_v4 = vsel %vm1146_vm1, %v6933_v50, %v6938_v8 }
 0x260   : > { %v11413_v63 = vmax.f32 %v10448_v30, %v1207_v19  ;;  %v11416_v56 = vmax.f32 %v14597_v58, %v1208_v57  ;;  %v6941_v41 = vpop.permute.xlu0 %6940  ;;  %v1175_v15 = vsel %vm1146_vm1, %v6932_v9, %v6937_v53  ;;  %v7229_v52 = vpack.i.bf16 %v11387_v48, %v11390_v2  ;;  %v14603_v53 = vld [vmem:[#allocation97_spill] sm:$0xff] }
 0x261   : > { %14602 = vst [vmem:[#allocation56_spill] sm:$0xff] %v11422_v49  ;;  %v6943_v30 = vunpack.i.h.bf16 %v6941_v41  ;;  %v6942_v46 = vunpack.i.l.bf16 %v6941_v41  ;;  %v6956_v19 = vpop.permute.xlu1 %6955  ;;  %v7244_v8 = vpack.i.bf16 %v11399_v14, %v11402_v40  ;;  %v11439_v50 = vmax.f32 %v14603_v53, %v1176_v4  ;;  %v14604_v41 = vld [vmem:[#allocation96_spill] sm:$0xff] }
 0x262   : > { %14596 = vst [vmem:[#allocation65_spill] sm:$0xff] %v11413_v63  ;;  %14598 = vst [vmem:[#allocation17_spill] sm:$0xff] %v11416_v56  ;;  %7220 = vrot.lane.b32.xlu0 %v7219_v55, %s8413_s29  ;;  %7235 = vrot.lane.b32.xlu1 %v7234_v13, %s8413_s29  ;;  %v6958_v57 = vunpack.i.h.bf16 %v6956_v19  ;;  %v6957_v5 = vunpack.i.l.bf16 %v6956_v19  ;;  %v11442_v9 = vmax.f32 %v14604_v41, %v1175_v15 }
 0x263   : > { %v1739_v17 = vsel %vm1659_vm2, %v6943_v30, %v6948_v26  ;;  %v1738_v55 = vsel %vm1659_vm2, %v6942_v46, %v6947_v27  ;;  %v7239_v58 = vpack.i.bf16 %v11419_v6, %v11422_v49  ;;  %v7254_v20 = vpack.i.bf16 %v11416_v56, %v11413_v63  ;;  %v14608_v49 = vld [vmem:[#allocation25_spill] sm:$0xff]  ;;  %v14614_v56 = vld [vmem:[#allocation51_spill] sm:$0xff] }
 0x264   : > { %14605 = vst [vmem:[#allocation31_spill] sm:$0xff] %v11442_v9  ;;  %v6951_v13 = vpop.permute.xlu0 %6950  ;;  %v1706_v40 = vsel %vm1659_vm2, %v6947_v27, %v6957_v5  ;;  %v1707_v4 = vsel %vm1659_vm2, %v6948_v26, %v6958_v57  ;;  %v11455_v53 = vmax.f32 %v10463_v0, %v1739_v17  ;;  %v14610_v17 = vld [vmem:[#allocation35_spill] sm:$0xff] }
 0x265   : > { %v6953_v19 = vunpack.i.h.bf16 %v6951_v13  ;;  %v6952_v48 = vunpack.i.l.bf16 %v6951_v13  ;;  %v6966_v15 = vpop.permute.xlu1 %6965  ;;  %v11469_v0 = vmax.f32 %v14608_v49, %v1706_v40  ;;  %v14616_v40 = vld [vmem:[#allocation14_spill] sm:$0xff] }
 0x266   : > { %7230 = vrot.lane.b32.xlu0 %v7229_v52, %s8413_s29  ;;  %7245 = vrot.lane.b32.xlu1 %v7244_v8, %s8412_s14  ;;  %14606 = vst [vmem:[#allocation30_spill] sm:$0xff] %v11455_v53  ;;  %v11458_v52 = vmax.f32 %v10460_v21, %v1738_v55  ;;  %v6968_v41 = vunpack.i.h.bf16 %v6966_v15  ;;  %v6967_v6 = vunpack.i.l.bf16 %v6966_v15  ;;  %v11472_v21 = vmax.f32 %v14610_v17, %v1707_v4  ;;  %v14612_v15 = vld [vmem:[#allocation24_spill] sm:$0xff]  ;;  %v14618_v4 = vld [vmem:[#allocation46_spill] sm:$0xff] }
 0x267   : > { %v1770_v13 = vsel %vm1659_vm2, %v6952_v48, %v6942_v46  ;;  %v1771_v27 = vsel %vm1659_vm2, %v6953_v19, %v6943_v30  ;;  %v1675_v26 = vsel %vm1659_vm2, %v6958_v57, %v6953_v19  ;;  %v1674_v8 = vsel %vm1659_vm2, %v6957_v5, %v6952_v48  ;;  %14609 = vst [vmem:[#allocation64_spill] sm:$0xff] %v11469_v0 }
 0x268   : > { %14607 = vst [vmem:[#allocation98_spill] sm:$0xff] %v11458_v52  ;;  %14611 = vst [vmem:[#allocation95_spill] sm:$0xff] %v11472_v21  ;;  %v6961_v55 = vpop.permute.xlu0 %6960  ;;  %v7249_v46 = vpack.i.bf16 %v11439_v50, %v11442_v9  ;;  %v11478_v30 = vmax.f32 %v14612_v15, %v1770_v13  ;;  %v11481_v57 = vmax.f32 %v14614_v56, %v1771_v27 }
 0x269   : > { %v6963_v19 = vunpack.i.h.bf16 %v6961_v55  ;;  %v6962_v48 = vunpack.i.l.bf16 %v6961_v55  ;;  %v6976_v49 = vpop.permute.xlu1 %6975  ;;  %v11485_v5 = vmax.f32 %v14616_v40, %v1675_v26  ;;  %v11488_v17 = vmax.f32 %v14618_v4, %v1674_v8  ;;  %v14620_v4 = vld [vmem:[#allocation34_spill] sm:$0xff] }
 0x26a   : > { %7240 = vrot.lane.b32.xlu0 %v7239_v58, %s8412_s14  ;;  %14613 = vst [vmem:[#allocation97_spill] sm:$0xff] %v11478_v30  ;;  %14615 = vst [vmem:[#allocation96_spill] sm:$0xff] %v11481_v57  ;;  %7255 = vrot.lane.b32.xlu1 %v7254_v20, %s8412_s14  ;;  %v6978_v58 = vunpack.i.h.bf16 %v6976_v49  ;;  %v6977_v63 = vunpack.i.l.bf16 %v6976_v49  ;;  %v7264_v27 = vpack.i.bf16 %v11455_v53, %v11458_v52  ;;  %v14621_v53 = vld [vmem:[#allocation59_spill] sm:$0xff] }
 0x26b   : > { %14617 = vst [vmem:[#allocation25_spill] sm:$0xff] %v11485_v5  ;;  %14619 = vst [vmem:[#allocation35_spill] sm:$0xff] %v11488_v17  ;;  %v1242_v13 = vsel %vm1146_vm1, %v6963_v19, %v6968_v41  ;;  %v1241_v56 = vsel %vm1146_vm1, %v6962_v48, %v6967_v6  ;;  %v7274_v20 = vpack.i.bf16 %v11472_v21, %v11469_v0 }
 0x26c   : > { %v6971_v55 = vpop.permute.xlu0 %6970  ;;  %v1274_v15 = vsel %vm1146_vm1, %v6978_v58, %v6963_v19  ;;  %v1273_v49 = vsel %vm1146_vm1, %v6977_v63, %v6962_v48  ;;  %v11505_v9 = vmax.f32 %v14620_v4, %v1242_v13  ;;  %v11508_v52 = vmax.f32 %v14621_v53, %v1241_v56  ;;  %v14623_v53 = vld [vmem:[#allocation15_spill] sm:$0xff] }
 0x26d   : > { %v6973_v26 = vunpack.i.h.bf16 %v6971_v55  ;;  %v6972_v8 = vunpack.i.l.bf16 %v6971_v55  ;;  %v6986_v40 = vpop.permute.xlu1 %6985  ;;  %v7269_v55 = vpack.i.bf16 %v11485_v5, %v11488_v17  ;;  %v11523_v56 = vmax.f32 %v14623_v53, %v1274_v15  ;;  %v14625_v4 = vld [vmem:[#allocation99_spill] sm:$0xff] }
 0x26e   : > { %7250 = vrot.lane.b32.xlu0 %v7249_v46, %s8412_s14  ;;  %7265 = vrot.lane.b32.xlu1 %v7264_v27, %s8413_s29  ;;  %14622 = vst [vmem:[#allocation24_spill] sm:$0xff] %v11508_v52  ;;  %v7259_v46 = vpack.i.bf16 %v11481_v57, %v11478_v30  ;;  %v11526_v57 = vmax.f32 %v14625_v4, %v1273_v49  ;;  %v6988_v5 = vunpack.i.h.bf16 %v6986_v40  ;;  %v6987_v17 = vunpack.i.l.bf16 %v6986_v40  ;;  %v14632_v49 = vld [vmem:[#allocation102_spill] sm:$0xff] }
 0x26f   : > { %v1209_v19 = vsel %vm1146_vm1, %v6967_v6, %v6972_v8  ;;  %v1210_v48 = vsel %vm1146_vm1, %v6968_v41, %v6973_v26  ;;  %v1178_v27 = vsel %vm1146_vm1, %v6973_v26, %v6978_v58  ;;  %v1177_v13 = vsel %vm1146_vm1, %v6972_v8, %v6977_v63  ;;  %14624 = vst [vmem:[#allocation51_spill] sm:$0xff] %v11523_v56  ;;  %v14627_v6 = vld [vmem:[#allocation101_spill] sm:$0xff]  ;;  %v14628_v41 = vld [vmem:[#allocation100_spill] sm:$0xff]  ;;  %v14630_v8 = vld [vmem:[#allocation103_spill] sm:$0xff] }
 0x270   : > { %14626 = vst [vmem:[#allocation14_spill] sm:$0xff] %v11526_v57  ;;  %v6981_v30 = vpop.permute.xlu0 %6980  ;;  %v11530_v21 = vmax.f32 %v14627_v6, %v1209_v19  ;;  %v11533_v0 = vmax.f32 %v14628_v41, %v1210_v48  ;;  %v11537_v15 = vmax.f32 %v14630_v8, %v1178_v27  ;;  %v11540_v53 = vmax.f32 %v14632_v49, %v1177_v13  ;;  %v14634_v49 = vld [vmem:[#allocation29_spill] sm:$0xff] }
 0x271   : > { %v6983_v58 = vunpack.i.h.bf16 %v6981_v30  ;;  %v6982_v26 = vunpack.i.l.bf16 %v6981_v30  ;;  %v6996_v63 = vpop.permute.xlu1 %6995 }
 0x272   : > { %7260 = vrot.lane.b32.xlu0 %v7259_v46, %s8413_s29  ;;  %14629 = vst [vmem:[#allocation46_spill] sm:$0xff] %v11533_v0  ;;  %7275 = vrot.lane.b32.xlu1 %v7274_v20, %s8413_s29  ;;  %14631 = vst [vmem:[#allocation34_spill] sm:$0xff] %v11537_v15  ;;  %v6998_v40 = vunpack.i.h.bf16 %v6996_v63  ;;  %v6997_v4 = vunpack.i.l.bf16 %v6996_v63  ;;  %v7284_v46 = vpack.i.bf16 %v11505_v9, %v11508_v52  ;;  %v14635_v52 = vld [vmem:[#allocation28_spill] sm:$0xff] }
 0x273   : > { %14633 = vst [vmem:[#allocation59_spill] sm:$0xff] %v11540_v53  ;;  %v1741_v19 = vsel %vm1659_vm2, %v6983_v58, %v6988_v5  ;;  %v1740_v30 = vsel %vm1659_vm2, %v6982_v26, %v6987_v17  ;;  %v7279_v63 = vpack.i.bf16 %v11523_v56, %v11526_v57  ;;  %v7294_v8 = vpack.i.bf16 %v11533_v0, %v11530_v21 }
 0x274   : > { %v6991_v48 = vpop.permute.xlu0 %6990  ;;  %v1708_v13 = vsel %vm1659_vm2, %v6987_v17, %v6997_v4  ;;  %v1709_v6 = vsel %vm1659_vm2, %v6988_v5, %v6998_v40  ;;  %v11564_v17 = vmax.f32 %v14635_v52, %v1740_v30 }
 0x275   : > { %v6993_v20 = vunpack.i.h.bf16 %v6991_v48  ;;  %v6992_v27 = vunpack.i.l.bf16 %v6991_v48  ;;  %v7006_v41 = vpop.permute.xlu1 %7005  ;;  %v11561_v48 = vmax.f32 %v14634_v49, %v1741_v19  ;;  %v11571_v56 = vmax.f32 %v10645_v34, %v1708_v13 }
 0x276   : > { %7270 = vrot.lane.b32.xlu0 %v7269_v55, %s8413_s29  ;;  %7285 = vrot.lane.b32.xlu1 %v7284_v46, %s8412_s14  ;;  %v7289_v55 = vpack.i.bf16 %v11537_v15, %v11540_v53  ;;  %v11574_v57 = vmax.f32 %v10648_v44, %v1709_v6  ;;  %v7008_v53 = vunpack.i.h.bf16 %v7006_v41  ;;  %v7007_v15 = vunpack.i.l.bf16 %v7006_v41 }
 0x277   : > { %v1772_v5 = vsel %vm1659_vm2, %v6992_v27, %v6982_v26  ;;  %v1773_v46 = vsel %vm1659_vm2, %v6993_v20, %v6983_v58  ;;  %v1677_v52 = vsel %vm1659_vm2, %v6998_v40, %v6993_v20  ;;  %v1676_v26 = vsel %vm1659_vm2, %v6997_v4, %v6992_v27 }
 0x278   : > { %v7001_v0 = vpop.permute.xlu0 %7000  ;;  %v11583_v58 = vmax.f32 %v10622_v60, %v1772_v5  ;;  %v11586_v44 = vmax.f32 %v10614_v1, %v1773_v46  ;;  %v7304_v41 = vpack.i.bf16 %v11561_v48, %v11564_v17  ;;  %v11591_v40 = vmax.f32 %v10662_v36, %v1677_v52  ;;  %v14637_v5 = vld [vmem:[#allocation40_spill] sm:$0xff]  ;;  %v14639_v46 = vld [vmem:[#allocation41_spill] sm:$0xff] }
 0x279   : > { %v7003_v19 = vunpack.i.h.bf16 %v7001_v0  ;;  %v7002_v30 = vunpack.i.l.bf16 %v7001_v0  ;;  %v7016_v34 = vpop.permute.xlu1 %7015  ;;  %v11594_v4 = vmax.f32 %v10659_v42, %v1676_v26  ;;  %v7314_v49 = vpack.i.bf16 %v11574_v57, %v11571_v56 }
 0x27a   : > { %7280 = vrot.lane.b32.xlu0 %v7279_v63, %s8412_s14  ;;  %7295 = vrot.lane.b32.xlu1 %v7294_v8, %s8412_s14  ;;  %v7018_v13 = vunpack.i.h.bf16 %v7016_v34  ;;  %v7017_v6 = vunpack.i.l.bf16 %v7016_v34  ;;  %14636 = vst [vmem:[#allocation15_spill] sm:$0xff] %v11591_v40  ;;  %v7299_v8 = vpack.i.bf16 %v11586_v44, %v11583_v58 }
 0x27b   : > { %v1743_v0 = vsel %vm1659_vm2, %v7003_v19, %v7008_v53  ;;  %v1742_v60 = vsel %vm1659_vm2, %v7002_v30, %v7007_v15 }
 0x27c   : > { %v7011_v20 = vpop.permute.xlu0 %7010  ;;  %v1710_v36 = vsel %vm1659_vm2, %v7007_v15, %v7017_v6  ;;  %v1711_v42 = vsel %vm1659_vm2, %v7008_v53, %v7018_v13  ;;  %v11616_v52 = vmax.f32 %v14639_v46, %v1742_v60  ;;  %v14643_v46 = vld [vmem:[#allocation33_spill] sm:$0xff] }
 0x27d   : > { %v7013_v1 = vunpack.i.h.bf16 %v7011_v20  ;;  %v7012_v27 = vunpack.i.l.bf16 %v7011_v20  ;;  %v11602_v63 = vpop.permute.xlu1 %7025  ;;  %v11630_v60 = vmax.f32 %v10725_v29, %v1710_v36  ;;  %v14641_v20 = vld [vmem:[#allocation58_spill] sm:$0xff] }
 0x27e   : > { %7290 = vrot.lane.b32.xlu0 %v7289_v55, %s8412_s14  ;;  %7305 = vrot.lane.b32.xlu1 %v7304_v41, %s8413_s29  ;;  %v11613_v55 = vmax.f32 %v14637_v5, %v1743_v0  ;;  %14640 = vst [vmem:[#allocation101_spill] sm:$0xff] %v11616_v52  ;;  %v7309_v0 = vpack.i.bf16 %v11591_v40, %v11594_v4  ;;  %v14645_v41 = vld [vmem:[#allocation32_spill] sm:$0xff]  ;;  %s5607_s14 = sshll.u32 %s13257_s12, 4  ;;  %s13731_s14 = int_to_ptr.vmem [resolvable:$true] %s5607_s14 }
 0x27f   : > { %v1774_v26 = vsel %vm1659_vm2, %v7012_v27, %v7002_v30  ;;  %v1775_v15 = vsel %vm1659_vm2, %v7013_v1, %v7003_v19  ;;  %v11633_v5 = vmax.f32 %v14641_v20, %v1711_v42  ;;  %v1679_v40 = vsel %vm1659_vm2, %v7018_v13, %v7013_v1  ;;  %s8339_s17 = scalar_lea.vmem %s13731_s14, 16384 }
 0x280   : > { %14638 = vst [vmem:[#allocation99_spill] sm:$0xff] %v11613_v55  ;;  %v11622_v34 = vpop.permute.xlu0 %7020  ;;  %v11639_v53 = vmax.f32 %v14643_v46, %v1774_v26  ;;  %v1678_v29 = vsel %vm1659_vm2, %v7017_v6, %v7012_v27  ;;  %v7324_v42 = vpack.i.bf16 %v11613_v55, %v11616_v52  ;;  %v14647_v20 = vunpack.i.h.bf16 %v11602_v63  ;;  %v14649_v6 = vld [vmem:[#allocation86_spill] sm:$0xff]  ;;  %v14651_v27 = vld [vmem:[#allocation45_spill] sm:$0xff]  ;;  %p8340_p6 = scmp.ne.s32.totalorder %s13731_s14, %s8339_s17 }
 0x281   : > { %14642 = vst [vmem:[#allocation100_spill] sm:$0xff] %v11633_v5  ;;  %v14086_v30 = vunpack.i.h.bf16 %v11622_v34  ;;  %v14087_v19 = vunpack.i.l.bf16 %v11622_v34  ;;  %v14648_v26 = vunpack.i.l.bf16 %v11602_v63  ;;  %v11664_v1 = vmax.f32 %v14649_v6, %v1679_v40  ;;  %v14654_v40 = vld [vmem:[#allocation38_spill] sm:$0xff] }
 0x282   : > { %7300 = vrot.lane.b32.xlu0 %v7299_v8, %s8413_s29  ;;  %7315 = vrot.lane.b32.xlu1 %v7314_v49, %s8413_s29  ;;  %14644 = vst [vmem:[#allocation103_spill] sm:$0xff] %v11639_v53  ;;  %v11642_v8 = vmax.f32 %v14645_v41, %v1775_v15  ;;  %v7036_v36 = vpop.permute.xlu1 %7035  ;;  %v11667_v15 = vmax.f32 %v14651_v27, %v1678_v29  ;;  %p8341_p12 = pnand %p8340_p6, %p14779_p11 }
 0x283   : > { %v1745_v49 = vsel %vm1659_vm2, %v14086_v30, %v14647_v20  ;;  %v1744_v13 = vsel %vm1659_vm2, %v14087_v19, %v14648_v26  ;;  %14650 = vst [vmem:[#allocation29_spill] sm:$0xff] %v11664_v1  ;;  %v7038_v41 = vunpack.i.h.bf16 %v7036_v36  ;;  %v7037_v46 = vunpack.i.l.bf16 %v7036_v36 }
 0x284   : > { %14646 = vst [vmem:[#allocation102_spill] sm:$0xff] %v11642_v8  ;;  %14652 = vst [vmem:[#allocation28_spill] sm:$0xff] %v11667_v15  ;;  %v7319_v30 = vpack.i.bf16 %v11642_v8, %v11639_v53  ;;  %v7334_v26 = vpack.i.bf16 %v11633_v5, %v11630_v60  ;;  %v11679_v6 = vmax.f32 %v14654_v40, %v1744_v13  ;;  %p8342_p13 = pneg %p8341_p12 }
 0x285   : > { %v7329_v36 = vpack.i.bf16 %v11664_v1, %v11667_v15 }
 0x286   : > { %7310 = vrot.lane.b32.xlu0 %v7309_v0, %s8413_s29  ;;  %7325 = vrot.lane.b32.xlu1 %v7324_v42, %s8413_s29  ;;  %v7031_v20 = vpop.permute.xlu0 %7030  ;;  %v14653_v0 = vld [vmem:[#allocation85_spill] sm:$0xff] }
 0x287   : > { %v11676_v19 = vmax.f32 %v14653_v0, %v1745_v49  ;;  %v7033_v29 = vunpack.i.h.bf16 %v7031_v20  ;;  %v7032_v27 = vunpack.i.l.bf16 %v7031_v20  ;;  %v7046_v42 = vpop.permute.xlu1 %7045 }
 0x288   : > { %v7048_v55 = vunpack.i.h.bf16 %v7046_v42  ;;  %v7047_v52 = vunpack.i.l.bf16 %v7046_v42 }
 0x289   : > { %v2237_v8 = vsel %vm2172_vm3, %v7032_v27, %v7037_v46  ;;  %v2238_v49 = vsel %vm2172_vm3, %v7033_v29, %v7038_v41  ;;  %v7344_v15 = vpack.i.bf16 %v11676_v19, %v11679_v6 }
 0x28a   : > { %7320 = vrot.lane.b32.xlu0 %v7319_v30, %s8413_s29  ;;  %7335 = vrot.lane.b32.xlu1 %v7334_v26, %s8413_s29  ;;  %v2206_v13 = vsel %vm2172_vm3, %v7038_v41, %v7048_v55  ;;  %v2205_v20 = vsel %vm2172_vm3, %v7037_v46, %v7047_v52  ;;  %v7041_v0 = vpop.permute.xlu0 %7040  ;;  %v2302_v30 = vmax.f32 %v10825_v24, %v2237_v8 }
 0x28b   : > { %v2306_v26 = vmax.f32 %v10822_v33, %v2238_v49  ;;  %v7043_v40 = vunpack.i.h.bf16 %v7041_v0  ;;  %v7042_v42 = vunpack.i.l.bf16 %v7041_v0  ;;  %v7056_v1 = vpop.permute.xlu1 %7055  ;;  %v2303_v5 = vmax.f32 %v10841_v47, %v2205_v20 }
 0x28c   : > { %v2307_v41 = vmax.f32 %v10832_v11, %v2206_v13  ;;  %v7058_v13 = vunpack.i.h.bf16 %v7056_v1 }
 0x28d   : > { %v2430_v53 = vpack.c.bf16 %v2306_v26, %v2302_v30  ;;  %v2270_v46 = vsel %vm2172_vm3, %v7043_v40, %v7033_v29  ;;  %v2269_v24 = vsel %vm2172_vm3, %v7042_v42, %v7032_v27  ;;  %v2173_v33 = vsel %vm2172_vm3, %v7047_v52, %v7042_v42 }
 0x28e   : > { %7330 = vrot.lane.b32.xlu0 %v7329_v36, %s8413_s29  ;;  %7345 = vrot.lane.b32.xlu1 %v7344_v15, %s8413_s29  ;;  %v2174_v8 = vsel %vm2172_vm3, %v7048_v55, %v7043_v40  ;;  %v2301_v47 = vmax.f32 %v10864_v35, %v2269_v24  ;;  %v2305_v11 = vmax.f32 %v10861_v39, %v2270_v46  ;;  %v7057_v27 = vunpack.i.l.bf16 %v7056_v1 }
 0x28f   : > { %2788 = vmatprep.mubr.bf16.mxu0 %v2430_v53  ;;  %v7051_v36 = vpop.permute.xlu0 %7050  ;;  %v2304_v49 = vmax.f32 %v10871_v16, %v2173_v33  ;;  %v2308_v29 = vmax.f32 %v10868_v12, %v2174_v8  ;;  %v2431_v39 = vpack.c.bf16 %v2307_v41, %v2303_v5 }
 0x290   : > { %v7053_v20 = vunpack.i.h.bf16 %v7051_v36  ;;  %v7052_v15 = vunpack.i.l.bf16 %v7051_v36  ;;  %v7066_v0 = vpop.permute.xlu1 %7065  ;;  %v2429_v26 = vpack.c.bf16 %v2305_v11, %v2301_v47 }
 0x291   : > { %v7068_v30 = vunpack.i.h.bf16 %v7066_v0  ;;  %v7067_v52 = vunpack.i.l.bf16 %v7066_v0  ;;  %v2432_v42 = vpack.c.bf16 %v2308_v29, %v2304_v49 }
 0x292   : > { %v2240_v55 = vsel %vm2172_vm3, %v7053_v20, %v7058_v13  ;;  %v2239_v35 = vsel %vm2172_vm3, %v7052_v15, %v7057_v27  ;;  %2789 = vmatmul.mubr.bf16.vlgmr.msra.gmra.mrb[0].mxu0 %v2429_v26 }
 0x293   : > { %v2207_v16 = vsel %vm2172_vm3, %v7057_v27, %v7067_v52  ;;  %v2208_v12 = vsel %vm2172_vm3, %v7058_v13, %v7068_v30  ;;  %v7061_v53 = vpop.permute.xlu0 %7060  ;;  %2949 = vmatprep.mubr.bf16.mxu1 %v2432_v42  ;;  %v2310_v1 = vmax.f32 %v10896_v61, %v2239_v35  ;;  %v2314_v33 = vmax.f32 %v10893_v28, %v2240_v55 }
 0x294   : > { %v7063_v40 = vunpack.i.h.bf16 %v7061_v53  ;;  %v7062_v46 = vunpack.i.l.bf16 %v7061_v53  ;;  %2950 = vmatmul.mubr.bf16.vlgmr.msra.gmra.mrb[0].mxu1 %v2431_v39  ;;  %v7076_v24 = vpop.permute.xlu1 %7075  ;;  %v2311_v5 = vmax.f32 %v10904_v51, %v2207_v16  ;;  %v2315_v41 = vmax.f32 %v10910_v37, %v2208_v12 }
 0x295   : > { %v7078_v8 = vunpack.i.h.bf16 %v7076_v24  ;;  %v2434_v29 = vpack.c.bf16 %v2314_v33, %v2310_v1  ;;  %v7077_v13 = vunpack.i.l.bf16 %v7076_v24 }
 0x296   : > { %v2176_v36 = vsel %vm2172_vm3, %v7068_v30, %v7063_v40  ;;  %v2175_v47 = vsel %vm2172_vm3, %v7067_v52, %v7062_v46  ;;  %v2271_v61 = vsel %vm2172_vm3, %v7062_v46, %v7052_v15  ;;  %v2272_v11 = vsel %vm2172_vm3, %v7063_v40, %v7053_v20 }
 0x297   : > { %v2309_v28 = vmax.f32 %v10927_v23, %v2271_v61  ;;  %v2313_v51 = vmax.f32 %v10930_v45, %v2272_v11  ;;  %v2312_v37 = vmax.f32 %v10937_v38, %v2175_v47  ;;  %v2316_v52 = vmax.f32 %v10934_v7, %v2176_v36  ;;  %2796 = vmatprep.mubr.bf16.mxu0 %v2434_v29 }
 0x298   : > { %v7071_v49 = vpop.permute.xlu0 %7070  ;;  %v7091_v30 = vpop.permute.xlu1 %7090  ;;  %v2435_v45 = vpack.c.bf16 %v2315_v41, %v2311_v5  ;;  %v14655_v41 = vunpack.i.h.bf16 %v11602_v63  ;;  %v14656_v47 = vunpack.i.l.bf16 %v11602_v63 }
 0x299   : > { %v7073_v27 = vunpack.i.h.bf16 %v7071_v49  ;;  %v7072_v0 = vunpack.i.l.bf16 %v7071_v49  ;;  %v7093_v26 = vunpack.i.h.bf16 %v7091_v30  ;;  %v7092_v15 = vunpack.i.l.bf16 %v7091_v30 }
 0x29a   : > { %v2433_v42 = vpack.c.bf16 %v2313_v51, %v2309_v28  ;;  %v2436_v55 = vpack.c.bf16 %v2316_v52, %v2312_v37  ;;  %v14658_v52 = vunpack.i.l.bf16 %v11622_v34 }
 0x29b   : > { %v2242_v20 = vsel %vm2172_vm3, %v7073_v27, %v7078_v8  ;;  %v2241_v23 = vsel %vm2172_vm3, %v7072_v0, %v7077_v13  ;;  %v2209_v38 = vsel %vm2172_vm3, %v7077_v13, %v7092_v15  ;;  %v2210_v35 = vsel %vm2172_vm3, %v7078_v8, %v7093_v26 }
 0x29c   : > { %v7081_v39 = vpop.permute.xlu0 %7080  ;;  %2797 = vmatmul.mubr.bf16.gmra.mrb[4].mxu0 %v2433_v42  ;;  %v2318_v7 = vmax.f32 %v10962_v31, %v2241_v23  ;;  %v2322_v16 = vmax.f32 %v10959_v10, %v2242_v20  ;;  %2957 = vmatprep.mubr.bf16.mxu1 %v2436_v55  ;;  %v7096_v1 = vpop.permute.xlu1 %7095  ;;  %v2319_v33 = vmax.f32 %v10970_v54, %v2209_v38  ;;  %v14661_v20 = vld [vmem:[#allocation36_spill] sm:$0xff] }
 0x29d   : > { %v7083_v12 = vunpack.i.h.bf16 %v7081_v39  ;;  %v7082_v53 = vunpack.i.l.bf16 %v7081_v39  ;;  %2958 = vmatmul.mubr.bf16.gmra.mrb[4].mxu1 %v2435_v45  ;;  %v7098_v40 = vunpack.i.h.bf16 %v7096_v1  ;;  %v7097_v46 = vunpack.i.l.bf16 %v7096_v1  ;;  %v14662_v38 = vld [vmem:[#allocation48_spill] sm:$0xff] }
 0x29e   : > { %v2438_v24 = vpack.c.bf16 %v2322_v16, %v2318_v7  ;;  %v2323_v10 = vmax.f32 %v10976_v59, %v2210_v35  ;;  %v14663_v7 = vld [vmem:[#allocation37_spill] sm:$0xff] }
 0x29f   : > { %v2177_v5 = vsel %vm2172_vm3, %v7092_v15, %v7082_v53  ;;  %v2273_v8 = vsel %vm2172_vm3, %v7082_v53, %v7072_v0  ;;  %v2274_v31 = vsel %vm2172_vm3, %v7083_v12, %v7073_v27  ;;  %v1713_v36 = vsel %vm1659_vm2, %v14655_v41, %v7098_v40 }
 0x2a0   : > { %v1712_v54 = vsel %vm1659_vm2, %v14656_v47, %v7097_v46  ;;  %v7086_v61 = vpop.permute.xlu0 %7085  ;;  %2804 = vmatprep.mubr.bf16.mxu0 %v2438_v24  ;;  %v2317_v11 = vmax.f32 %v10998_v32, %v2273_v8  ;;  %v2321_v49 = vmax.f32 %v11001_v22, %v2274_v31  ;;  %v2178_v29 = vsel %vm2172_vm3, %v7093_v26, %v7083_v12  ;;  %v7106_v37 = vpop.permute.xlu1 %7105  ;;  %v14659_v26 = vld [vmem:[#allocation39_spill] sm:$0xff] }
 0x2a1   : > { %v11768_v59 = vmax.f32 %v10989_v62, %v1713_v36  ;;  %v7088_v28 = vunpack.i.h.bf16 %v7086_v61  ;;  %v7087_v51 = vunpack.i.l.bf16 %v7086_v61  ;;  %v11771_v63 = vmax.f32 %v11005_v18, %v1712_v54  ;;  %v14664_v54 = vld [vmem:[#allocation87_spill] sm:$0xff] }
 0x2a2   : > { %v7108_v13 = vunpack.i.h.bf16 %v7106_v37  ;;  %v2437_v27 = vpack.c.bf16 %v2321_v49, %v2317_v11  ;;  %v2320_v0 = vmax.f32 %v11012_v43, %v2177_v5  ;;  %v14657_v22 = vunpack.i.h.bf16 %v11622_v34  ;;  %v14660_v43 = vld [vmem:[#allocation61_spill] sm:$0xff] }
 0x2a3   : > { %v1681_v32 = vsel %vm1659_vm2, %v7098_v40, %v7088_v28  ;;  %v1680_v62 = vsel %vm1659_vm2, %v7097_v46, %v7087_v51  ;;  %v1776_v18 = vsel %vm1659_vm2, %v7087_v51, %v14658_v52  ;;  %v7107_v55 = vunpack.i.l.bf16 %v7106_v37  ;;  %v14666_v37 = vld [vmem:[#allocation89_spill] sm:$0xff] }
 0x2a4   : > { %v1777_v30 = vsel %vm1659_vm2, %v7088_v28, %v14657_v22  ;;  %v11790_v42 = vmax.f32 %v14660_v43, %v1681_v32  ;;  %v11793_v23 = vmax.f32 %v14661_v20, %v1776_v18  ;;  %v7101_v45 = vpop.permute.xlu0 %7100  ;;  %2805 = vmatmul.mubr.bf16.gmra.mrb[8].mxu0 %v2437_v27  ;;  %v11796_v35 = vmax.f32 %v14662_v38, %v1680_v62  ;;  %v7116_v12 = vpop.permute.xlu1 %7115  ;;  %v14665_v28 = vld [vmem:[#allocation88_spill] sm:$0xff]  ;;  %v14667_v27 = vld [vmem:[#allocation54_spill] sm:$0xff] }
 0x2a5   : > { %v11787_v15 = vmax.f32 %v14659_v26, %v1777_v30  ;;  %v7103_v39 = vunpack.i.h.bf16 %v7101_v45  ;;  %v7102_v34 = vunpack.i.l.bf16 %v7101_v45  ;;  %v2324_v16 = vmax.f32 %v14663_v7, %v2178_v29  ;;  %v14668_v26 = vld [vmem:[#allocation53_spill] sm:$0xff]  ;;  %v14669_v20 = vld [vmem:[#allocation60_spill] sm:$0xff]  ;;  %v14670_v45 = vld [vmem:[#allocation66_spill] sm:$0xff] }
 0x2a6   : > { %v7118_v53 = vunpack.i.h.bf16 %v7116_v12  ;;  %v7117_v1 = vunpack.i.l.bf16 %v7116_v12  ;;  %v7354_v40 = vpack.i.bf16 %v11768_v59, %v11771_v63  ;;  %v2439_v31 = vpack.c.bf16 %v2323_v10, %v2319_v33 }
 0x2a7   : > { %v7339_v46 = vpack.i.bf16 %v11787_v15, %v11793_v23  ;;  %v2244_v24 = vsel %vm2172_vm3, %v7103_v39, %v7108_v13  ;;  %v2243_v5 = vsel %vm2172_vm3, %v7102_v34, %v7107_v55  ;;  %v2440_v8 = vpack.c.bf16 %v2324_v16, %v2320_v0 }
 0x2a8   : > { %v2211_v41 = vsel %vm2172_vm3, %v7107_v55, %v7117_v1  ;;  %v2212_v36 = vsel %vm2172_vm3, %v7108_v13, %v7118_v53  ;;  %7355 = vrot.lane.b32.xlu1 %v7354_v40, %s8413_s29  ;;  %v7111_v47 = vpop.permute.xlu0 %7110  ;;  %v2326_v61 = vmax.f32 %v14664_v54, %v2243_v5  ;;  %v7126_v29 = vpop.permute.xlu1 %7125  ;;  %v2330_v51 = vmax.f32 %v14665_v28, %v2244_v24 }
 0x2a9   : > { %7340 = vrot.lane.b32.xlu0 %v7339_v46, %s8413_s29  ;;  %2965 = vmatprep.mubr.bf16.mxu1 %v2440_v8  ;;  %v7113_v11 = vunpack.i.h.bf16 %v7111_v47  ;;  %v7112_v49 = vunpack.i.l.bf16 %v7111_v47  ;;  %v7128_v33 = vunpack.i.h.bf16 %v7126_v29  ;;  %v7349_v10 = vpack.i.bf16 %v11790_v42, %v11796_v35  ;;  %v14673_v47 = vld [vmem:[#allocation71_spill] sm:$0xff] }
 0x2aa   : > { %2966 = vmatmul.mubr.bf16.gmra.mrb[8].mxu1 %v2439_v31  ;;  %v2327_v13 = vmax.f32 %v14666_v37, %v2211_v41  ;;  %v2331_v0 = vmax.f32 %v14667_v27, %v2212_v36  ;;  %v2442_v18 = vpack.c.bf16 %v2330_v51, %v2326_v61  ;;  %v7127_v7 = vunpack.i.l.bf16 %v7126_v29  ;;  %v14672_v41 = vld [vmem:[#allocation47_spill] sm:$0xff] }
 0x2ab   : > { %v2180_v32 = vsel %vm2172_vm3, %v7118_v53, %v7113_v11  ;;  %v2179_v22 = vsel %vm2172_vm3, %v7117_v1, %v7112_v49  ;;  %v2275_v30 = vsel %vm2172_vm3, %v7112_v49, %v7102_v34  ;;  %v2276_v62 = vsel %vm2172_vm3, %v7113_v11, %v7103_v39  ;;  %v14671_v1 = vld [vmem:[#allocation70_spill] sm:$0xff] }
 0x2ac   : > { %v7121_v52 = vpop.permute.xlu0 %7120  ;;  %v2325_v43 = vmax.f32 %v14668_v26, %v2275_v30  ;;  %v2329_v55 = vmax.f32 %v14669_v20, %v2276_v62  ;;  %v2328_v38 = vmax.f32 %v14670_v45, %v2179_v22  ;;  %v7136_v53 = vpop.permute.xlu1 %7135  ;;  %v2332_v40 = vmax.f32 %v14671_v1, %v2180_v32  ;;  %2812 = vmatprep.mubr.bf16.mxu0 %v2442_v18  ;;  %v14676_v62 = vld [vmem:[#allocation72_spill] sm:$0xff]  ;;  %v14677_v18 = vld [vmem:[#allocation69_spill] sm:$0xff]  ;;  %v14678_v45 = vld [vmem:[#allocation90_spill] sm:$0xff] }
 0x2ad   : > { %7350 = vrot.lane.b32.xlu0 %v7349_v10, %s8413_s29  ;;  %v7123_v16 = vunpack.i.h.bf16 %v7121_v52  ;;  %v7122_v12 = vunpack.i.l.bf16 %v7121_v52  ;;  %v7138_v34 = vunpack.i.h.bf16 %v7136_v53  ;;  %v7137_v46 = vunpack.i.l.bf16 %v7136_v53  ;;  %v14674_v10 = vld [vmem:[#allocation67_spill] sm:$0xff] }
 0x2ae   : > { %v2441_v39 = vpack.c.bf16 %v2329_v55, %v2325_v43  ;;  %v2444_v8 = vpack.c.bf16 %v2332_v40, %v2328_v38  ;;  %v2443_v31 = vpack.c.bf16 %v2331_v0, %v2327_v13  ;;  %v14675_v13 = vld [vmem:[#allocation68_spill] sm:$0xff] }
 0x2af   : > { %v1747_v24 = vsel %vm1659_vm2, %v7123_v16, %v7128_v33  ;;  %v1746_v5 = vsel %vm1659_vm2, %v7122_v12, %v7127_v7  ;;  %v1714_v61 = vsel %vm1659_vm2, %v7127_v7, %v7137_v46  ;;  %v1715_v11 = vsel %vm1659_vm2, %v7128_v33, %v7138_v34  ;;  %v14679_v7 = vld [vmem:[#allocation75_spill] sm:$0xff] }
 0x2b0   : > { %v11837_v36 = vmax.f32 %v14672_v41, %v1747_v24  ;;  %v11840_v54 = vmax.f32 %v14673_v47, %v1746_v5  ;;  %v7131_v49 = vpop.permute.xlu0 %7130  ;;  %2813 = vmatmul.mubr.bf16.gmra.mrb[12].mxu0 %v2441_v39  ;;  %2973 = vmatprep.mubr.bf16.mxu1 %v2444_v8  ;;  %v7146_v51 = vpop.permute.xlu1 %7145  ;;  %v11847_v37 = vmax.f32 %v14674_v10, %v1714_v61  ;;  %v14680_v47 = vld [vmem:[#allocation74_spill] sm:$0xff] }
 0x2b1   : > { %v7133_v29 = vunpack.i.h.bf16 %v7131_v49  ;;  %v7132_v28 = vunpack.i.l.bf16 %v7131_v49  ;;  %v11850_v27 = vmax.f32 %v14675_v13, %v1715_v11  ;;  %v7148_v43 = vunpack.i.h.bf16 %v7146_v51 }
 0x2b2   : > { %2974 = vmatmul.mubr.bf16.gmra.mrb[12].mxu1 %v2443_v31  ;;  %v7364_v0 = vpack.i.bf16 %v11837_v36, %v11840_v54  ;;  %v7147_v20 = vunpack.i.l.bf16 %v7146_v51 }
 0x2b3   : > { %v1683_v32 = vsel %vm1659_vm2, %v7138_v34, %v7133_v29  ;;  %v1682_v33 = vsel %vm1659_vm2, %v7137_v46, %v7132_v28  ;;  %v1778_v22 = vsel %vm1659_vm2, %v7132_v28, %v7122_v12  ;;  %v1779_v30 = vsel %vm1659_vm2, %v7133_v29, %v7123_v16  ;;  %v14681_v28 = vld [vmem:[#allocation76_spill] sm:$0xff] }
 0x2b4   : > { %v11863_v52 = vmax.f32 %v14676_v62, %v1778_v22  ;;  %v11866_v26 = vmax.f32 %v14677_v18, %v1779_v30  ;;  %v7141_v55 = vpop.permute.xlu0 %7140  ;;  %7365 = vrot.lane.b32.xlu1 %v7364_v0, %s8413_s29  ;;  %v11870_v38 = vmax.f32 %v14678_v45, %v1683_v32  ;;  %v11873_v53 = vmax.f32 %v14679_v7, %v1682_v33  ;;  %v7156_v16 = vpop.permute.xlu1 %7155  ;;  %v14682_v0 = vld [vmem:[#allocation73_spill] sm:$0xff]  ;;  %v14684_v45 = vld [vmem:[#allocation50_spill] sm:$0xff] }
 0x2b5   : > { %v7143_v12 = vunpack.i.h.bf16 %v7141_v55  ;;  %v7142_v1 = vunpack.i.l.bf16 %v7141_v55  ;;  %v7158_v40 = vunpack.i.h.bf16 %v7156_v16  ;;  %v7157_v34 = vunpack.i.l.bf16 %v7156_v16  ;;  %v14683_v33 = vld [vmem:[#allocation77_spill] sm:$0xff]  ;;  %v14685_v16 = vld [vmem:[#allocation11_spill] sm:$0xff] }
 0x2b6   : > { %v7374_v46 = vpack.i.bf16 %v11850_v27, %v11847_v37  ;;  %v7359_v39 = vpack.i.bf16 %v11866_v26, %v11863_v52  ;;  %v7369_v13 = vpack.i.bf16 %v11870_v38, %v11873_v53 }
 0x2b7   : > { %v2246_v24 = vsel %vm2172_vm3, %v7143_v12, %v7148_v43  ;;  %v2245_v5 = vsel %vm2172_vm3, %v7142_v1, %v7147_v20  ;;  %v2213_v8 = vsel %vm2172_vm3, %v7147_v20, %v7157_v34  ;;  %v2214_v31 = vsel %vm2172_vm3, %v7148_v43, %v7158_v40 }
 0x2b8   : > { %v7151_v41 = vpop.permute.xlu0 %7150  ;;  %7375 = vrot.lane.b32.xlu1 %v7374_v46, %s8413_s29  ;;  %7360 = vrot.lane.b32.xlu0 %v7359_v39, %s8413_s29  ;;  %v2334_v61 = vmax.f32 %v14680_v47, %v2245_v5  ;;  %v7166_v29 = vpop.permute.xlu1 %7165  ;;  %v2338_v51 = vmax.f32 %v14681_v28, %v2246_v24  ;;  %v2335_v32 = vmax.f32 %v14682_v0, %v2213_v8  ;;  %v14686_v39 = vld [vmem:[#allocation63_spill] sm:$0xff] }
 0x2b9   : > { %v7153_v11 = vunpack.i.h.bf16 %v7151_v41  ;;  %v7152_v49 = vunpack.i.l.bf16 %v7151_v41  ;;  %v7168_v10 = vunpack.i.h.bf16 %v7166_v29  ;;  %v2339_v22 = vmax.f32 %v14683_v33, %v2214_v31  ;;  %v14687_v31 = vld [vmem:[#allocation10_spill] sm:$0xff] }
 0x2ba   : > { %v2446_v55 = vpack.c.bf16 %v2338_v51, %v2334_v61  ;;  %v14688_v51 = vld [vmem:[#allocation78_spill] sm:$0xff] }
 0x2bb   : > { %v2182_v30 = vsel %vm2172_vm3, %v7158_v40, %v7153_v11  ;;  %v2181_v62 = vsel %vm2172_vm3, %v7157_v34, %v7152_v49  ;;  %v2277_v18 = vsel %vm2172_vm3, %v7152_v49, %v7142_v1  ;;  %v2278_v43 = vsel %vm2172_vm3, %v7153_v11, %v7143_v12 }
 0x2bc   : > { %v7161_v20 = vpop.permute.xlu0 %7160  ;;  %7370 = vrot.lane.b32.xlu0 %v7369_v13, %s8413_s29  ;;  %v2333_v7 = vmax.f32 %v14684_v45, %v2277_v18  ;;  %v2337_v46 = vmax.f32 %v14685_v16, %v2278_v43  ;;  %v2336_v24 = vmax.f32 %v14686_v39, %v2181_v62  ;;  %v7167_v40 = vunpack.i.l.bf16 %v7166_v29  ;;  %v7176_v34 = vpop.permute.xlu1 %7175  ;;  %2820 = vmatprep.mubr.bf16.mxu0 %v2446_v55  ;;  %v14689_v29 = vld [vmem:[#allocation42_spill] sm:$0xff] }
 0x2bd   : > { %v7163_v5 = vunpack.i.h.bf16 %v7161_v20  ;;  %v7162_v8 = vunpack.i.l.bf16 %v7161_v20  ;;  %v2340_v41 = vmax.f32 %v14687_v31, %v2182_v30  ;;  %v7178_v1 = vunpack.i.h.bf16 %v7176_v34  ;;  %v14690_v55 = vld [vmem:[#allocation22_spill] sm:$0xff] }
 0x2be   : > { %v7177_v47 = vunpack.i.l.bf16 %v7176_v34  ;;  %v2445_v12 = vpack.c.bf16 %v2337_v46, %v2333_v7  ;;  %v2447_v28 = vpack.c.bf16 %v2339_v22, %v2335_v32  ;;  %v14691_v22 = vld [vmem:[#allocation91_spill] sm:$0xff] }
 0x2bf   : > { %v1749_v11 = vsel %vm1659_vm2, %v7163_v5, %v7168_v10  ;;  %v1748_v61 = vsel %vm1659_vm2, %v7162_v8, %v7167_v40  ;;  %v2448_v49 = vpack.c.bf16 %v2340_v41, %v2336_v24  ;;  %v1717_v30 = vsel %vm1659_vm2, %v7168_v10, %v7178_v1  ;;  %v14692_v24 = vld [vmem:[#allocation23_spill] sm:$0xff] }
 0x2c0   : > { %v11913_v13 = vmax.f32 %v14688_v51, %v1749_v11  ;;  %v11916_v0 = vmax.f32 %v14689_v29, %v1748_v61  ;;  %v1716_v33 = vsel %vm1659_vm2, %v7167_v40, %v7177_v47  ;;  %v7171_v62 = vpop.permute.xlu0 %7170  ;;  %2821 = vmatmul.mubr.bf16.gmra.mrb[16].mxu0 %v2445_v12  ;;  %v7186_v20 = vpop.permute.xlu1 %7185  ;;  %v11926_v45 = vmax.f32 %v14691_v22, %v1717_v30  ;;  %v14694_v34 = vld [vmem:[#allocation55_spill] sm:$0xff] }
 0x2c1   : > { %v7173_v18 = vunpack.i.h.bf16 %v7171_v62  ;;  %v7172_v43 = vunpack.i.l.bf16 %v7171_v62  ;;  %2981 = vmatprep.mubr.bf16.mxu1 %v2448_v49  ;;  %v11923_v32 = vmax.f32 %v14690_v55, %v1716_v33  ;;  %v7188_v41 = vunpack.i.h.bf16 %v7186_v20  ;;  %v14700_v22 = vld [vmem:[#allocation19_spill] sm:$0xff] }
 0x2c2   : > { %2982 = vmatmul.mubr.bf16.gmra.mrb[16].mxu1 %v2447_v28  ;;  %v7384_v7 = vpack.i.bf16 %v11913_v13, %v11916_v0  ;;  %v7187_v12 = vunpack.i.l.bf16 %v7186_v20 }
 0x2c3   : > { %v1685_v16 = vsel %vm1659_vm2, %v7178_v1, %v7173_v18  ;;  %v1684_v10 = vsel %vm1659_vm2, %v7177_v47, %v7172_v43  ;;  %v1780_v46 = vsel %vm1659_vm2, %v7172_v43, %v7162_v8  ;;  %v1781_v39 = vsel %vm1659_vm2, %v7173_v18, %v7163_v5  ;;  %v14696_v1 = vld [vmem:[#allocation92_spill] sm:$0xff]  ;;  %v14698_v47 = vld [vmem:[#allocation79_spill] sm:$0xff] }
 0x2c4   : > { %v11939_v40 = vmax.f32 %v14692_v24, %v1780_v46  ;;  %v11942_v31 = vmax.f32 %v14694_v34, %v1781_v39  ;;  %v7181_v11 = vpop.permute.xlu0 %7180  ;;  %7385 = vrot.lane.b32.xlu1 %v7384_v7, %s8413_s29  ;;  %v11946_v61 = vmax.f32 %v14696_v1, %v1685_v16  ;;  %v11949_v49 = vmax.f32 %v14698_v47, %v1684_v10  ;;  %v7196_v5 = vpop.permute.xlu1 %7195  ;;  %v14701_v39 = vld [vmem:[#allocation80_spill] sm:$0xff] }
 0x2c5   : > { %v7183_v8 = vunpack.i.h.bf16 %v7181_v11  ;;  %v7182_v28 = vunpack.i.l.bf16 %v7181_v11  ;;  %v7198_v51 = vunpack.i.h.bf16 %v7196_v5  ;;  %v7197_v29 = vunpack.i.l.bf16 %v7196_v5  ;;  %v14703_v47 = vld [vmem:[#allocation12_spill] sm:$0xff] }
 0x2c6   : > { %14693 = vst [vmem:[#allocation40_spill] sm:$0xff] %v11939_v40  ;;  %14695 = vst [vmem:[#allocation41_spill] sm:$0xff] %v11942_v31  ;;  %v7394_v33 = vpack.i.bf16 %v11926_v45, %v11923_v32  ;;  %v7379_v30 = vpack.i.bf16 %v11942_v31, %v11939_v40  ;;  %v7389_v11 = vpack.i.bf16 %v11946_v61, %v11949_v49  ;;  %v14707_v31 = vld [vmem:[#allocation8_spill] sm:$0xff] }
 0x2c7   : > { %14697 = vst [vmem:[#allocation58_spill] sm:$0xff] %v11946_v61  ;;  %14699 = vst [vmem:[#allocation33_spill] sm:$0xff] %v11949_v49  ;;  %v2248_v62 = vsel %vm2172_vm3, %v7183_v8, %v7188_v41  ;;  %v2247_v18 = vsel %vm2172_vm3, %v7182_v28, %v7187_v12  ;;  %v2215_v43 = vsel %vm2172_vm3, %v7187_v12, %v7197_v29  ;;  %v14702_v12 = vld [vmem:[#allocation18_spill] sm:$0xff] }
 0x2c8   : > { %v2216_v20 = vsel %vm2172_vm3, %v7188_v41, %v7198_v51  ;;  %v7191_v55 = vpop.permute.xlu0 %7190  ;;  %7395 = vrot.lane.b32.xlu1 %v7394_v33, %s8413_s29  ;;  %7380 = vrot.lane.b32.xlu0 %v7379_v30, %s8413_s29  ;;  %v2342_v7 = vmax.f32 %v14700_v22, %v2247_v18  ;;  %v7206_v46 = vpop.permute.xlu1 %7205  ;;  %v2346_v24 = vmax.f32 %v14701_v39, %v2248_v62  ;;  %v14704_v22 = vld [vmem:[#allocation49_spill] sm:$0xff] }
 0x2c9   : > { %v7193_v16 = vunpack.i.h.bf16 %v7191_v55  ;;  %v7192_v10 = vunpack.i.l.bf16 %v7191_v55  ;;  %v7208_v34 = vunpack.i.h.bf16 %v7206_v46  ;;  %v2343_v1 = vmax.f32 %v14702_v12, %v2215_v43  ;;  %v14705_v39 = vld [vmem:[#allocation9_spill] sm:$0xff]  ;;  %v14706_v12 = vld [vmem:[#allocation62_spill] sm:$0xff] }
 0x2ca   : > { %v2347_v41 = vmax.f32 %v14703_v47, %v2216_v20  ;;  %v2450_v55 = vpack.c.bf16 %v2346_v24, %v2342_v7 }
 0x2cb   : > { %v2184_v5 = vsel %vm2172_vm3, %v7198_v51, %v7193_v16  ;;  %v2183_v33 = vsel %vm2172_vm3, %v7197_v29, %v7192_v10  ;;  %v2279_v30 = vsel %vm2172_vm3, %v7192_v10, %v7182_v28  ;;  %v2280_v62 = vsel %vm2172_vm3, %v7193_v16, %v7183_v8 }
 0x2cc   : > { %v7201_v18 = vpop.permute.xlu0 %7200  ;;  %7390 = vrot.lane.b32.xlu0 %v7389_v11, %s8413_s29  ;;  %v2341_v43 = vmax.f32 %v14704_v22, %v2279_v30  ;;  %v2345_v20 = vmax.f32 %v14705_v39, %v2280_v62  ;;  %v2344_v47 = vmax.f32 %v14706_v12, %v2183_v33  ;;  %v7207_v51 = vunpack.i.l.bf16 %v7206_v46  ;;  %v7216_v29 = vpop.permute.xlu1 %7215  ;;  %2828 = vmatprep.mubr.bf16.mxu0 %v2450_v55  ;;  %v14708_v30 = vld [vmem:[#allocation13_spill] sm:$0xff]  ;;  %v14709_v46 = vld [vmem:[#allocation44_spill] sm:$0xff] }
 0x2cd   : > { %v7203_v61 = vunpack.i.h.bf16 %v7201_v18  ;;  %v7202_v49 = vunpack.i.l.bf16 %v7201_v18  ;;  %v2348_v40 = vmax.f32 %v14707_v31, %v2184_v5  ;;  %v7218_v28 = vunpack.i.h.bf16 %v7216_v29 }
 0x2ce   : > { %v7217_v10 = vunpack.i.l.bf16 %v7216_v29  ;;  %v2449_v8 = vpack.c.bf16 %v2345_v20, %v2341_v43  ;;  %v2451_v11 = vpack.c.bf16 %v2347_v41, %v2343_v1  ;;  %v14712_v41 = vld [vmem:[#allocation93_spill] sm:$0xff]  ;;  %v14714_v29 = vld [vmem:[#allocation26_spill] sm:$0xff] }
 0x2cf   : > { %v1751_v16 = vsel %vm1659_vm2, %v7203_v61, %v7208_v34  ;;  %v1750_v7 = vsel %vm1659_vm2, %v7202_v49, %v7207_v51  ;;  %v2452_v24 = vpack.c.bf16 %v2348_v40, %v2344_v47  ;;  %v1719_v5 = vsel %vm1659_vm2, %v7208_v34, %v7218_v28  ;;  %v14710_v40 = vld [vmem:[#allocation27_spill] sm:$0xff] }
 0x2d0   : > { %v11989_v33 = vmax.f32 %v14708_v30, %v1751_v16  ;;  %v11992_v62 = vmax.f32 %v14709_v46, %v1750_v7  ;;  %v1718_v31 = vsel %vm1659_vm2, %v7207_v51, %v7217_v10  ;;  %v7211_v18 = vpop.permute.xlu0 %7210  ;;  %2829 = vmatmul.mubr.bf16.gmra.mrb[20].mxu0 %v2449_v8  ;;  %v7226_v43 = vpop.permute.xlu1 %7225  ;;  %v12002_v39 = vmax.f32 %v14712_v41, %v1719_v5  ;;  %v14716_v16 = vld [vmem:[#allocation57_spill] sm:$0xff] }
 0x2d1   : > { %v7213_v55 = vunpack.i.h.bf16 %v7211_v18  ;;  %v7212_v22 = vunpack.i.l.bf16 %v7211_v18  ;;  %2989 = vmatprep.mubr.bf16.mxu1 %v2452_v24  ;;  %v11999_v1 = vmax.f32 %v14710_v40, %v1718_v31  ;;  %v7228_v24 = vunpack.i.h.bf16 %v7226_v43 }
 0x2d2   : > { %14713 = vst [vmem:[#allocation86_spill] sm:$0xff] %v12002_v39  ;;  %2990 = vmatmul.mubr.bf16.gmra.mrb[20].mxu1 %v2451_v11  ;;  %v7404_v20 = vpack.i.bf16 %v11989_v33, %v11992_v62  ;;  %v7227_v11 = vunpack.i.l.bf16 %v7226_v43 }
 0x2d3   : > { %14711 = vst [vmem:[#allocation32_spill] sm:$0xff] %v11999_v1  ;;  %v1687_v12 = vsel %vm1659_vm2, %v7218_v28, %v7213_v55  ;;  %v1686_v34 = vsel %vm1659_vm2, %v7217_v10, %v7212_v22  ;;  %v1782_v47 = vsel %vm1659_vm2, %v7212_v22, %v7202_v49  ;;  %v1783_v51 = vsel %vm1659_vm2, %v7213_v55, %v7203_v61  ;;  %v14718_v28 = vld [vmem:[#allocation94_spill] sm:$0xff]  ;;  %v14720_v10 = vld [vmem:[#allocation81_spill] sm:$0xff] }
 0x2d4   : > { %v12015_v8 = vmax.f32 %v14714_v29, %v1782_v47  ;;  %v12018_v7 = vmax.f32 %v14716_v16, %v1783_v51  ;;  %v7221_v30 = vpop.permute.xlu0 %7220  ;;  %7405 = vrot.lane.b32.xlu1 %v7404_v20, %s8413_s29  ;;  %v12022_v46 = vmax.f32 %v14718_v28, %v1687_v12  ;;  %v12025_v31 = vmax.f32 %v14720_v10, %v1686_v34  ;;  %v7236_v61 = vpop.permute.xlu1 %7235  ;;  %v14722_v47 = vld [vmem:[#allocation21_spill] sm:$0xff]  ;;  %v14723_v28 = vld [vmem:[#allocation82_spill] sm:$0xff] }
 0x2d5   : > { %v7223_v49 = vunpack.i.h.bf16 %v7221_v30  ;;  %v7222_v5 = vunpack.i.l.bf16 %v7221_v30  ;;  %v7238_v18 = vunpack.i.h.bf16 %v7236_v61  ;;  %v7237_v55 = vunpack.i.l.bf16 %v7236_v61 }
 0x2d6   : > { %14715 = vst [vmem:[#allocation45_spill] sm:$0xff] %v12015_v8  ;;  %14717 = vst [vmem:[#allocation85_spill] sm:$0xff] %v12018_v7  ;;  %v7414_v22 = vpack.i.bf16 %v12002_v39, %v11999_v1  ;;  %v7399_v43 = vpack.i.bf16 %v12018_v7, %v12015_v8  ;;  %v7409_v7 = vpack.i.bf16 %v12022_v46, %v12025_v31  ;;  %v14724_v8 = vld [vmem:[#allocation20_spill] sm:$0xff] }
 0x2d7   : > { %14719 = vst [vmem:[#allocation38_spill] sm:$0xff] %v12022_v46  ;;  %14721 = vst [vmem:[#allocation39_spill] sm:$0xff] %v12025_v31  ;;  %v2250_v40 = vsel %vm2172_vm3, %v7223_v49, %v7228_v24  ;;  %v2249_v41 = vsel %vm2172_vm3, %v7222_v5, %v7227_v11  ;;  %v2217_v20 = vsel %vm2172_vm3, %v7227_v11, %v7237_v55  ;;  %v14727_v39 = vld [vmem:[#allocation84_spill] sm:$0xff] }
 0x2d8   : > { %v2218_v12 = vsel %vm2172_vm3, %v7228_v24, %v7238_v18  ;;  %v7231_v34 = vpop.permute.xlu0 %7230  ;;  %7415 = vrot.lane.b32.xlu1 %v7414_v22, %s8413_s29  ;;  %7400 = vrot.lane.b32.xlu0 %v7399_v43, %s8413_s29  ;;  %v2350_v51 = vmax.f32 %v14722_v47, %v2249_v41  ;;  %v7246_v30 = vpop.permute.xlu1 %7245  ;;  %v2354_v10 = vmax.f32 %v14723_v28, %v2250_v40  ;;  %v14725_v28 = vld [vmem:[#allocation16_spill] sm:$0xff] }
 0x2d9   : > { %v7233_v29 = vunpack.i.h.bf16 %v7231_v34  ;;  %v7232_v16 = vunpack.i.l.bf16 %v7231_v34  ;;  %v7248_v61 = vunpack.i.h.bf16 %v7246_v30  ;;  %v2351_v11 = vmax.f32 %v11361_v3, %v2217_v20  ;;  %v14726_v20 = vld [vmem:[#allocation52_spill] sm:$0xff] }
 0x2da   : > { %v2355_v24 = vmax.f32 %v14724_v8, %v2218_v12  ;;  %v2454_v47 = vpack.c.bf16 %v2354_v10, %v2350_v51 }
 0x2db   : > { %v2186_v22 = vsel %vm2172_vm3, %v7238_v18, %v7233_v29  ;;  %v2185_v43 = vsel %vm2172_vm3, %v7237_v55, %v7232_v16  ;;  %v2281_v41 = vsel %vm2172_vm3, %v7232_v16, %v7222_v5  ;;  %v2282_v40 = vsel %vm2172_vm3, %v7233_v29, %v7223_v49 }
 0x2dc   : > { %v7241_v34 = vpop.permute.xlu0 %7240  ;;  %7410 = vrot.lane.b32.xlu0 %v7409_v7, %s8413_s29  ;;  %v2349_v3 = vmax.f32 %v14725_v28, %v2281_v41  ;;  %v2353_v8 = vmax.f32 %v14726_v20, %v2282_v40  ;;  %v2352_v12 = vmax.f32 %v11390_v2, %v2185_v43  ;;  %v7247_v18 = vunpack.i.l.bf16 %v7246_v30  ;;  %v7256_v55 = vpop.permute.xlu1 %7255  ;;  %2836 = vmatprep.mubr.bf16.mxu0 %v2454_v47  ;;  %v14728_v30 = vld [vmem:[#allocation83_spill] sm:$0xff] }
 0x2dd   : > { %v7243_v46 = vunpack.i.h.bf16 %v7241_v34  ;;  %v7242_v31 = vunpack.i.l.bf16 %v7241_v34  ;;  %v2356_v1 = vmax.f32 %v14727_v39, %v2186_v22  ;;  %v7258_v5 = vunpack.i.h.bf16 %v7256_v55 }
 0x2de   : > { %v7257_v16 = vunpack.i.l.bf16 %v7256_v55  ;;  %v2453_v49 = vpack.c.bf16 %v2353_v8, %v2349_v3  ;;  %v2455_v10 = vpack.c.bf16 %v2355_v24, %v2351_v11  ;;  %v14735_v55 = vld [vmem:[#allocation43_spill] sm:$0xff] }
 0x2df   : > { %v1753_v7 = vsel %vm1659_vm2, %v7243_v46, %v7248_v61  ;;  %v1752_v51 = vsel %vm1659_vm2, %v7242_v31, %v7247_v18  ;;  %v2456_v29 = vpack.c.bf16 %v2356_v1, %v2352_v12  ;;  %v1721_v22 = vsel %vm1659_vm2, %v7248_v61, %v7258_v5  ;;  %v14729_v1 = vld [vmem:[#allocation65_spill] sm:$0xff]  ;;  %v14733_v12 = vld [vmem:[#allocation56_spill] sm:$0xff] }
 0x2e0   : > { %v12065_v2 = vmax.f32 %v11399_v14, %v1753_v7  ;;  %v12068_v43 = vmax.f32 %v14728_v30, %v1752_v51  ;;  %v1720_v39 = vsel %vm1659_vm2, %v7247_v18, %v7257_v16  ;;  %v7251_v41 = vpop.permute.xlu0 %7250  ;;  %2837 = vmatmul.mubr.bf16.gmra.mrb[24].mxu0 %v2453_v49  ;;  %v7266_v47 = vpop.permute.xlu1 %7265  ;;  %v14731_v14 = vld [vmem:[#allocation17_spill] sm:$0xff] }
 0x2e1   : > { %v7253_v40 = vunpack.i.h.bf16 %v7251_v41  ;;  %v7252_v34 = vunpack.i.l.bf16 %v7251_v41  ;;  %2997 = vmatprep.mubr.bf16.mxu1 %v2456_v29  ;;  %v12075_v11 = vmax.f32 %v14729_v1, %v1720_v39  ;;  %v12078_v24 = vmax.f32 %v14731_v14, %v1721_v22 }
 0x2e2   : > { %2998 = vmatmul.mubr.bf16.gmra.mrb[24].mxu1 %v2455_v10  ;;  %v7424_v28 = vpack.i.bf16 %v12065_v2, %v12068_v43  ;;  %v7268_v7 = vunpack.i.h.bf16 %v7266_v47  ;;  %v7267_v51 = vunpack.i.l.bf16 %v7266_v47 }
 0x2e3   : > { %14730 = vst [vmem:[#allocation61_spill] sm:$0xff] %v12075_v11  ;;  %14732 = vst [vmem:[#allocation36_spill] sm:$0xff] %v12078_v24  ;;  %v1689_v3 = vsel %vm1659_vm2, %v7258_v5, %v7253_v40  ;;  %v1688_v61 = vsel %vm1659_vm2, %v7257_v16, %v7252_v34  ;;  %v1784_v20 = vsel %vm1659_vm2, %v7252_v34, %v7242_v31  ;;  %v14738_v16 = vld [vmem:[#allocation31_spill] sm:$0xff] }
 0x2e4   : > { %v1785_v8 = vsel %vm1659_vm2, %v7253_v40, %v7243_v46  ;;  %v12091_v18 = vmax.f32 %v14733_v12, %v1784_v20  ;;  %v7261_v29 = vpop.permute.xlu0 %7260  ;;  %7425 = vrot.lane.b32.xlu1 %v7424_v28, %s8413_s29  ;;  %v12098_v5 = vmax.f32 %v11439_v50, %v1689_v3  ;;  %v12101_v10 = vmax.f32 %v14738_v16, %v1688_v61  ;;  %v7276_v46 = vpop.permute.xlu1 %7275  ;;  %v14740_v28 = vld [vmem:[#allocation98_spill] sm:$0xff] }
 0x2e5   : > { %v12094_v49 = vmax.f32 %v14735_v55, %v1785_v8  ;;  %v7263_v31 = vunpack.i.h.bf16 %v7261_v29  ;;  %v7262_v30 = vunpack.i.l.bf16 %v7261_v29  ;;  %v7278_v39 = vunpack.i.h.bf16 %v7276_v46  ;;  %v14741_v12 = vld [vmem:[#allocation30_spill] sm:$0xff] }
 0x2e6   : > { %14734 = vst [vmem:[#allocation48_spill] sm:$0xff] %v12091_v18  ;;  %14737 = vst [vmem:[#allocation87_spill] sm:$0xff] %v12098_v5  ;;  %v7277_v22 = vunpack.i.l.bf16 %v7276_v46  ;;  %v7434_v41 = vpack.i.bf16 %v12078_v24, %v12075_v11  ;;  %v7429_v16 = vpack.i.bf16 %v12098_v5, %v12101_v10  ;;  %v14747_v24 = vld [vmem:[#allocation25_spill] sm:$0xff] }
 0x2e7   : > { %14736 = vst [vmem:[#allocation37_spill] sm:$0xff] %v12094_v49  ;;  %14739 = vst [vmem:[#allocation88_spill] sm:$0xff] %v12101_v10  ;;  %v7419_v40 = vpack.i.bf16 %v12094_v49, %v12091_v18  ;;  %v2252_v34 = vsel %vm2172_vm3, %v7263_v31, %v7268_v7  ;;  %v2251_v50 = vsel %vm2172_vm3, %v7262_v30, %v7267_v51  ;;  %v14743_v49 = vld [vmem:[#allocation95_spill] sm:$0xff] }
 0x2e8   : > { %v2219_v47 = vsel %vm2172_vm3, %v7267_v51, %v7277_v22  ;;  %v2220_v1 = vsel %vm2172_vm3, %v7268_v7, %v7278_v39  ;;  %v7271_v14 = vpop.permute.xlu0 %7270  ;;  %7435 = vrot.lane.b32.xlu1 %v7434_v41, %s8413_s29  ;;  %v2358_v3 = vmax.f32 %v14740_v28, %v2251_v50  ;;  %v7286_v8 = vpop.permute.xlu1 %7285  ;;  %v2362_v55 = vmax.f32 %v14741_v12, %v2252_v34  ;;  %v14742_v51 = vld [vmem:[#allocation64_spill] sm:$0xff]  ;;  %v14744_v12 = vld [vmem:[#allocation97_spill] sm:$0xff] }
 0x2e9   : > { %7420 = vrot.lane.b32.xlu0 %v7419_v40, %s8413_s29  ;;  %v7273_v61 = vunpack.i.h.bf16 %v7271_v14  ;;  %v7272_v20 = vunpack.i.l.bf16 %v7271_v14  ;;  %v7288_v29 = vunpack.i.h.bf16 %v7286_v8  ;;  %v2359_v46 = vmax.f32 %v14742_v51, %v2219_v47  ;;  %v14745_v51 = vld [vmem:[#allocation96_spill] sm:$0xff] }
 0x2ea   : > { %v2363_v7 = vmax.f32 %v14743_v49, %v2220_v1  ;;  %v2458_v28 = vpack.c.bf16 %v2362_v55, %v2358_v3  ;;  %v14746_v1 = vld [vmem:[#allocation35_spill] sm:$0xff] }
 0x2eb   : > { %v2188_v41 = vsel %vm2172_vm3, %v7278_v39, %v7273_v61  ;;  %v2187_v40 = vsel %vm2172_vm3, %v7277_v22, %v7272_v20  ;;  %v2283_v50 = vsel %vm2172_vm3, %v7272_v20, %v7262_v30  ;;  %v2284_v34 = vsel %vm2172_vm3, %v7273_v61, %v7263_v31 }
 0x2ec   : > { %v7281_v14 = vpop.permute.xlu0 %7280  ;;  %v2357_v47 = vmax.f32 %v14744_v12, %v2283_v50  ;;  %v2361_v49 = vmax.f32 %v14745_v51, %v2284_v34  ;;  %v2360_v5 = vmax.f32 %v14746_v1, %v2187_v40  ;;  %v7287_v39 = vunpack.i.l.bf16 %v7286_v8  ;;  %v7296_v22 = vpop.permute.xlu1 %7295  ;;  %2844 = vmatprep.mubr.bf16.mxu0 %v2458_v28  ;;  %v14748_v8 = vld [vmem:[#allocation24_spill] sm:$0xff]  ;;  %v14750_v51 = vld [vmem:[#allocation14_spill] sm:$0xff]  ;;  %v14751_v1 = vld [vmem:[#allocation51_spill] sm:$0xff] }
 0x2ed   : > { %7430 = vrot.lane.b32.xlu0 %v7429_v16, %s8413_s29  ;;  %v7283_v10 = vunpack.i.h.bf16 %v7281_v14  ;;  %v7282_v18 = vunpack.i.l.bf16 %v7281_v14  ;;  %v2364_v11 = vmax.f32 %v14747_v24, %v2188_v41  ;;  %v7298_v30 = vunpack.i.h.bf16 %v7296_v22 }
 0x2ee   : > { %v7297_v20 = vunpack.i.l.bf16 %v7296_v22  ;;  %v2457_v31 = vpack.c.bf16 %v2361_v49, %v2357_v47  ;;  %v2459_v16 = vpack.c.bf16 %v2363_v7, %v2359_v46 }
 0x2ef   : > { %v1755_v61 = vsel %vm1659_vm2, %v7283_v10, %v7288_v29  ;;  %v1754_v3 = vsel %vm1659_vm2, %v7282_v18, %v7287_v39  ;;  %v2460_v55 = vpack.c.bf16 %v2364_v11, %v2360_v5  ;;  %v1723_v41 = vsel %vm1659_vm2, %v7288_v29, %v7298_v30 }
 0x2f0   : > { %v12141_v40 = vmax.f32 %v11505_v9, %v1755_v61  ;;  %v12144_v50 = vmax.f32 %v14748_v8, %v1754_v3  ;;  %v1722_v24 = vsel %vm1659_vm2, %v7287_v39, %v7297_v20  ;;  %v7291_v34 = vpop.permute.xlu0 %7290  ;;  %2845 = vmatmul.mubr.bf16.gmra.mrb[28].mxu0 %v2457_v31  ;;  %v7306_v12 = vpop.permute.xlu1 %7305  ;;  %v14749_v9 = vld [vmem:[#allocation46_spill] sm:$0xff] }
 0x2f1   : > { %v7293_v14 = vunpack.i.h.bf16 %v7291_v34  ;;  %v7292_v28 = vunpack.i.l.bf16 %v7291_v34  ;;  %3005 = vmatprep.mubr.bf16.mxu1 %v2460_v55  ;;  %v12151_v11 = vmax.f32 %v11530_v21, %v1722_v24  ;;  %v12154_v5 = vmax.f32 %v14749_v9, %v1723_v41 }
 0x2f2   : > { %3006 = vmatmul.mubr.bf16.gmra.mrb[28].mxu1 %v2459_v16  ;;  %v7444_v46 = vpack.i.bf16 %v12141_v40, %v12144_v50  ;;  %v7308_v22 = vunpack.i.h.bf16 %v7306_v12  ;;  %v7307_v31 = vunpack.i.l.bf16 %v7306_v12 }
 0x2f3   : > { %v1691_v7 = vsel %vm1659_vm2, %v7298_v30, %v7293_v14  ;;  %v1690_v29 = vsel %vm1659_vm2, %v7297_v20, %v7292_v28  ;;  %v1786_v47 = vsel %vm1659_vm2, %v7292_v28, %v7282_v18  ;;  %v1787_v21 = vsel %vm1659_vm2, %v7293_v14, %v7283_v10  ;;  %v14752_v30 = vld [vmem:[#allocation34_spill] sm:$0xff]  ;;  %v14753_v20 = vld [vmem:[#allocation59_spill] sm:$0xff] }
 0x2f4   : > { %v12167_v49 = vmax.f32 %v14750_v51, %v1786_v47  ;;  %v12170_v39 = vmax.f32 %v14751_v1, %v1787_v21  ;;  %v7301_v61 = vpop.permute.xlu0 %7300  ;;  %7445 = vrot.lane.b32.xlu1 %v7444_v46, %s8413_s29  ;;  %v12174_v3 = vmax.f32 %v14752_v30, %v1691_v7  ;;  %v12177_v55 = vmax.f32 %v14753_v20, %v1690_v29  ;;  %v7316_v10 = vpop.permute.xlu1 %7315 }
 0x2f5   : > { %v7303_v18 = vunpack.i.h.bf16 %v7301_v61  ;;  %v7302_v16 = vunpack.i.l.bf16 %v7301_v61  ;;  %v7318_v8 = vunpack.i.h.bf16 %v7316_v10  ;;  %v7317_v24 = vunpack.i.l.bf16 %v7316_v10 }
 0x2f6   : > { %v7454_v41 = vpack.i.bf16 %v12154_v5, %v12151_v11  ;;  %v7439_v34 = vpack.i.bf16 %v12170_v39, %v12167_v49  ;;  %v7449_v61 = vpack.i.bf16 %v12174_v3, %v12177_v55 }
 0x2f7   : > { %v2254_v14 = vsel %vm2172_vm3, %v7303_v18, %v7308_v22  ;;  %v2253_v28 = vsel %vm2172_vm3, %v7302_v16, %v7307_v31  ;;  %v2221_v12 = vsel %vm2172_vm3, %v7307_v31, %v7317_v24  ;;  %v2222_v9 = vsel %vm2172_vm3, %v7308_v22, %v7318_v8 }
 0x2f8   : > { %v7311_v46 = vpop.permute.xlu0 %7310  ;;  %7455 = vrot.lane.b32.xlu1 %v7454_v41, %s8413_s29  ;;  %7440 = vrot.lane.b32.xlu0 %v7439_v34, %s8413_s29  ;;  %v2366_v7 = vmax.f32 %v11564_v17, %v2253_v28  ;;  %v7326_v21 = vpop.permute.xlu1 %7325  ;;  %v2370_v51 = vmax.f32 %v11561_v48, %v2254_v14  ;;  %v2367_v31 = vmax.f32 %v11571_v56, %v2221_v12  ;;  %v14754_v12 = vld [vmem:[#allocation15_spill] sm:$0xff] }
 0x2f9   : > { %v7313_v29 = vunpack.i.h.bf16 %v7311_v46  ;;  %v7312_v47 = vunpack.i.l.bf16 %v7311_v46  ;;  %v7328_v1 = vunpack.i.h.bf16 %v7326_v21  ;;  %v2371_v22 = vmax.f32 %v11574_v57, %v2222_v9 }
 0x2fa   : > { %v2462_v41 = vpack.c.bf16 %v2370_v51, %v2366_v7  ;;  %v14755_v51 = vld [vmem:[#allocation101_spill] sm:$0xff] }
 0x2fb   : > { %v2190_v30 = vsel %vm2172_vm3, %v7318_v8, %v7313_v29  ;;  %v2189_v20 = vsel %vm2172_vm3, %v7317_v24, %v7312_v47  ;;  %v2285_v17 = vsel %vm2172_vm3, %v7312_v47, %v7302_v16  ;;  %v2286_v48 = vsel %vm2172_vm3, %v7313_v29, %v7303_v18 }
 0x2fc   : > { %v7321_v10 = vpop.permute.xlu0 %7320  ;;  %7450 = vrot.lane.b32.xlu0 %v7449_v61, %s8413_s29  ;;  %v2365_v56 = vmax.f32 %v11583_v58, %v2285_v17  ;;  %v2369_v57 = vmax.f32 %v11586_v44, %v2286_v48  ;;  %v2368_v34 = vmax.f32 %v11594_v4, %v2189_v20  ;;  %v7327_v8 = vunpack.i.l.bf16 %v7326_v21  ;;  %v7336_v24 = vpop.permute.xlu1 %7335  ;;  %2852 = vmatprep.mubr.bf16.mxu0 %v2462_v41  ;;  %s8343_s29 = sshll.u32 %s8416_s26, 4  ;;  %s8344_s29 = int_to_ptr.vmem [resolvable:$false] %s8343_s29 }
 0x2fd   : > { %v7323_v14 = vunpack.i.h.bf16 %v7321_v10  ;;  %v7322_v28 = vunpack.i.l.bf16 %v7321_v10  ;;  %v2372_v9 = vmax.f32 %v14754_v12, %v2190_v30  ;;  %v7338_v16 = vunpack.i.h.bf16 %v7336_v24  ;;  %v14756_v30 = vld [vmem:[#allocation99_spill] sm:$0xff]  ;;  %v14759_v12 = vld [vmem:[#allocation102_spill] sm:$0xff]  ;;  %s8345_s15 = scalar_lea.vmem %s8344_s29, 32768  ;;  %p8346_p8 = scmp.lt.s32.totalorder %s13731_s14, %s8344_s29 }
 0x2fe   : > { %v7337_v46 = vunpack.i.l.bf16 %v7336_v24  ;;  %v2461_v18 = vpack.c.bf16 %v2369_v57, %v2365_v56  ;;  %v2463_v44 = vpack.c.bf16 %v2371_v22, %v2367_v31  ;;  %v14757_v31 = vld [vmem:[#allocation100_spill] sm:$0xff]  ;;  %p8347_p10 = scmp.lt.s32.totalorder %s8345_s15, %s8339_s17 }
 0x2ff   : > { %v2256_v29 = vsel %vm2172_vm3, %v7323_v14, %v7328_v1  ;;  %v2255_v58 = vsel %vm2172_vm3, %v7322_v28, %v7327_v8  ;;  %v2464_v7 = vpack.c.bf16 %v2372_v9, %v2368_v34  ;;  %v2224_v47 = vsel %vm2172_vm3, %v7328_v1, %v7338_v16 }
 0x300   : > { %v2223_v4 = vsel %vm2172_vm3, %v7327_v8, %v7337_v46  ;;  %v7331_v21 = vpop.permute.xlu0 %7330  ;;  %2853 = vmatmul.mubr.bf16.gmra.mrb[32].mxu0 %v2461_v18  ;;  %v2374_v61 = vmax.f32 %v14755_v51, %v2255_v58  ;;  %v2378_v20 = vmax.f32 %v14756_v30, %v2256_v29  ;;  %v2379_v22 = vmax.f32 %v14757_v31, %v2224_v47  ;;  %v14758_v8 = vld [vmem:[#allocation103_spill] sm:$0xff]  ;;  %v14761_v29 = vld [vmem:[#allocation29_spill] sm:$0xff]  ;;  %p8348_p0 = por %p8347_p10, %p8346_p8 }
 0x301   : > { %v7333_v17 = vunpack.i.h.bf16 %v7331_v21  ;;  %v7332_v48 = vunpack.i.l.bf16 %v7331_v21  ;;  %3013 = vmatprep.mubr.bf16.mxu1 %v2464_v7  ;;  %v2375_v41 = vmax.f32 %v11630_v60, %v2223_v4  ;;  %v14760_v60 = vld [vmem:[#allocation28_spill] sm:$0xff] }
 0x302   : > { %3014 = vmatmul.mubr.bf16.gmra.mrb[32].mxu1 %v2463_v44  ;;  %v2466_v10 = vpack.c.bf16 %v2378_v20, %v2374_v61  ;;  %v7346_v44 = vpop.permute.xlu1 %7345  ;;  %p8349_p2 = pnand %p8348_p0, %p8342_p13 }
 0x303   : > { %v2192_v56 = vsel %vm2172_vm3, %v7338_v16, %v7333_v17  ;;  %v2191_v1 = vsel %vm2172_vm3, %v7337_v46, %v7332_v48  ;;  %v2287_v57 = vsel %vm2172_vm3, %v7332_v48, %v7322_v28  ;;  %v2288_v34 = vsel %vm2172_vm3, %v7333_v17, %v7323_v14 }
 0x304   : > { %2860 = vmatprep.mubr.bf16.mxu0 %v2466_v10  ;;  %v2373_v24 = vmax.f32 %v14758_v8, %v2287_v57  ;;  %v2377_v9 = vmax.f32 %v14759_v12, %v2288_v34  ;;  %v2376_v18 = vmax.f32 %v14760_v60, %v2191_v1  ;;  %v2380_v58 = vmax.f32 %v14761_v29, %v2192_v56 }
 0x305   : > { %v2467_v46 = vpack.c.bf16 %v2379_v22, %v2375_v41  ;;  %v7348_v28 = vunpack.i.h.bf16 %v7346_v44  ;;  %v7347_v4 = vunpack.i.l.bf16 %v7346_v44 }
 0x306   : > { %v2465_v7 = vpack.c.bf16 %v2377_v9, %v2373_v24  ;;  %v2468_v16 = vpack.c.bf16 %v2380_v58, %v2376_v18 }
 0x308   : > { %2861 = vmatmul.mubr.bf16.gmra.mrb[36].mxu0 %v2465_v7  ;;  %3021 = vmatprep.mubr.bf16.mxu1 %v2468_v16 }
 0x30a   : > { %3022 = vmatmul.mubr.bf16.gmra.mrb[36].mxu1 %v2467_v46 }
 0x31a   : > { %v7356_v47 = vpop.permute.xlu1 %7355 }
 0x31b   : > { %v7341_v14 = vpop.permute.xlu0 %7340  ;;  %v7358_v21 = vunpack.i.h.bf16 %v7356_v47  ;;  %v7357_v51 = vunpack.i.l.bf16 %v7356_v47 }
 0x31c   : > { %v7343_v61 = vunpack.i.h.bf16 %v7341_v14  ;;  %v7342_v30 = vunpack.i.l.bf16 %v7341_v14 }
 0x31d   : > { %v2226_v20 = vsel %vm2172_vm3, %v7348_v28, %v7358_v21  ;;  %v2225_v17 = vsel %vm2172_vm3, %v7347_v4, %v7357_v51 }
 0x31e   : > { %v2258_v48 = vsel %vm2172_vm3, %v7343_v61, %v7348_v28  ;;  %v2257_v10 = vsel %vm2172_vm3, %v7342_v30, %v7347_v4  ;;  %v2383_v34 = vmax.f32 %v11771_v63, %v2225_v17  ;;  %v2387_v8 = vmax.f32 %v11768_v59, %v2226_v20 }
 0x31f   : > { %v7351_v41 = vpop.permute.xlu0 %7350  ;;  %v2382_v31 = vmax.f32 %v11679_v6, %v2257_v10  ;;  %v2386_v22 = vmax.f32 %v11676_v19, %v2258_v48 }
 0x320   : > { %v7353_v56 = vunpack.i.h.bf16 %v7351_v41  ;;  %v7352_v1 = vunpack.i.l.bf16 %v7351_v41  ;;  %v2471_v58 = vpack.c.bf16 %v2387_v8, %v2383_v34 }
 0x321   : > { %v2470_v57 = vpack.c.bf16 %v2386_v22, %v2382_v31 }
 0x322   : > { %v2194_v24 = vsel %vm2172_vm3, %v7358_v21, %v7353_v56  ;;  %v2290_v12 = vsel %vm2172_vm3, %v7353_v56, %v7343_v61  ;;  %v2193_v9 = vsel %vm2172_vm3, %v7357_v51, %v7352_v1  ;;  %v2289_v6 = vsel %vm2172_vm3, %v7352_v1, %v7342_v30  ;;  %v3958_v51 = vld [vmem:[%s13782_s3] sm:$0xff]  ;;  %v3959_v61 = vld [vmem:[%s13782_s3 + $0x8] sm:$0xff] }
 0x323   : > { %2868 = vmatprep.mubr.bf16.mxu0 %v2470_v57  ;;  %v2381_v19 = vmax.f32 %v11793_v23, %v2289_v6  ;;  %v2385_v60 = vmax.f32 %v11787_v15, %v2290_v12  ;;  %v2384_v63 = vmax.f32 %v11796_v35, %v2193_v9  ;;  %v2388_v59 = vmax.f32 %v11790_v42, %v2194_v24 }
 0x324   : > { %v5724_v31 = vcombine.high %v3958_v51, %v3958_v51  ;;  %v5726_v1 = vcombine.high %v3959_v61, %v3959_v61  ;;  %v5723_v57 = vcombine.low %v3958_v51, %v3958_v51  ;;  %v5725_v6 = vcombine.low %v3959_v61, %v3959_v61 }
 0x325   : > { %v2469_v18 = vpack.c.bf16 %v2385_v60, %v2381_v19  ;;  %v2472_v29 = vpack.c.bf16 %v2388_v59, %v2384_v63 }
 0x326   : > { %v7366_v7 = vpop.permute.xlu1 %7365  ;;  %5727 = vmatprep.subr.msk.bf16.mxu0 %vm4041_vm4, %v5724_v31  ;;  %5744 = vmatprep.subr.msk.bf16.mxu1 %vm4041_vm4, %v5726_v1  ;;  %v4043_v9 = vsel %vm4041_vm4, %v5723_v57, 0  ;;  %v4049_v59 = vsel %vm4041_vm4, %v5725_v6, 0 }
 0x327   : > { %2869 = vmatmul.mubr.bf16.gmra.mrb[40].mxu0 %v2469_v18  ;;  %3029 = vmatprep.mubr.bf16.mxu1 %v2472_v29  ;;  %v7368_v16 = vunpack.i.h.bf16 %v7366_v7  ;;  %v7367_v46 = vunpack.i.l.bf16 %v7366_v7 }
 0x328   : > { %3030 = vmatmul.mubr.bf16.gmra.mrb[40].mxu1 %v2471_v58  ;;  %4055 = vmatpush1.bf16.msra.mxu0 %v4043_v9 }
 0x329   : > { %4248 = vmatpush1.bf16.msra.mxu1 %v4049_v59 }
 0x32a   : > { %v7376_v44 = vpop.permute.xlu1 %7375  ;;  %v7361_v28 = vpop.permute.xlu0 %7360 }
 0x32b   : > { %v7378_v4 = vunpack.i.h.bf16 %v7376_v44  ;;  %v7377_v47 = vunpack.i.l.bf16 %v7376_v44  ;;  %v7363_v23 = vunpack.i.h.bf16 %v7361_v28  ;;  %v7362_v14 = vunpack.i.l.bf16 %v7361_v28 }
 0x32d   : > { %v2227_v15 = vsel %vm2172_vm3, %v7367_v46, %v7377_v47  ;;  %v2228_v42 = vsel %vm2172_vm3, %v7368_v16, %v7378_v4  ;;  %v2260_v35 = vsel %vm2172_vm3, %v7363_v23, %v7368_v16  ;;  %v2259_v21 = vsel %vm2172_vm3, %v7362_v14, %v7367_v46 }
 0x32e   : > { %v7371_v30 = vpop.permute.xlu0 %7370  ;;  %v2390_v20 = vmax.f32 %v11840_v54, %v2259_v21  ;;  %v2394_v17 = vmax.f32 %v11837_v36, %v2260_v35  ;;  %v2391_v48 = vmax.f32 %v11847_v37, %v2227_v15  ;;  %v2395_v56 = vmax.f32 %v11850_v27, %v2228_v42 }
 0x32f   : > { %v7373_v10 = vunpack.i.h.bf16 %v7371_v30  ;;  %v7372_v41 = vunpack.i.l.bf16 %v7371_v30 }
 0x330   : > { %v2474_v22 = vpack.c.bf16 %v2394_v17, %v2390_v20  ;;  %v2475_v63 = vpack.c.bf16 %v2395_v56, %v2391_v48  ;;  %v14763_v48 = vld [vmem:[#allocation41_spill] sm:$0xff] }
 0x331   : > { %v2196_v34 = vsel %vm2172_vm3, %v7378_v4, %v7373_v10  ;;  %v2195_v8 = vsel %vm2172_vm3, %v7377_v47, %v7372_v41  ;;  %v2291_v36 = vsel %vm2172_vm3, %v7372_v41, %v7362_v14  ;;  %v2292_v54 = vsel %vm2172_vm3, %v7373_v10, %v7363_v23 }
 0x332   : > { %2876 = vmatprep.mubr.bf16.mxu0 %v2474_v22  ;;  %v2389_v37 = vmax.f32 %v11863_v52, %v2291_v36  ;;  %v2393_v27 = vmax.f32 %v11866_v26, %v2292_v54  ;;  %v2392_v24 = vmax.f32 %v11873_v53, %v2195_v8  ;;  %v2396_v12 = vmax.f32 %v11870_v38, %v2196_v34 }
 0x334   : > { %v2473_v19 = vpack.c.bf16 %v2393_v27, %v2389_v37  ;;  %v2476_v60 = vpack.c.bf16 %v2396_v12, %v2392_v24 }
 0x336   : > { %v7386_v18 = vpop.permute.xlu1 %7385  ;;  %2877 = vmatmul.mubr.bf16.gmra.mrb[44].mxu0 %v2473_v19  ;;  %3037 = vmatprep.mubr.bf16.mxu1 %v2476_v60 }
 0x337   : > { %3038 = vmatmul.mubr.bf16.gmra.mrb[44].mxu1 %v2475_v63  ;;  %v7388_v52 = vunpack.i.h.bf16 %v7386_v18  ;;  %v7387_v26 = vunpack.i.l.bf16 %v7386_v18 }
 0x33a   : > { %v7396_v53 = vpop.permute.xlu1 %7395  ;;  %v7381_v38 = vpop.permute.xlu0 %7380 }
 0x33b   : > { %v7398_v29 = vunpack.i.h.bf16 %v7396_v53  ;;  %v7397_v58 = vunpack.i.l.bf16 %v7396_v53  ;;  %v7383_v7 = vunpack.i.h.bf16 %v7381_v38  ;;  %v7382_v16 = vunpack.i.l.bf16 %v7381_v38  ;;  %v14766_v38 = vld [vmem:[#allocation32_spill] sm:$0xff] }
 0x33d   : > { %v2229_v46 = vsel %vm2172_vm3, %v7387_v26, %v7397_v58  ;;  %v2230_v44 = vsel %vm2172_vm3, %v7388_v52, %v7398_v29  ;;  %v2262_v28 = vsel %vm2172_vm3, %v7383_v7, %v7388_v52  ;;  %v2261_v4 = vsel %vm2172_vm3, %v7382_v16, %v7387_v26 }
 0x33e   : > { %v7391_v47 = vpop.permute.xlu0 %7390  ;;  %v2398_v23 = vmax.f32 %v11916_v0, %v2261_v4  ;;  %v2402_v14 = vmax.f32 %v11913_v13, %v2262_v28  ;;  %v2399_v21 = vmax.f32 %v11923_v32, %v2229_v46  ;;  %v2403_v51 = vmax.f32 %v11926_v45, %v2230_v44  ;;  %v14762_v13 = vld [vmem:[#allocation40_spill] sm:$0xff]  ;;  %v14764_v32 = vld [vmem:[#allocation33_spill] sm:$0xff]  ;;  %v14765_v45 = vld [vmem:[#allocation58_spill] sm:$0xff] }
 0x33f   : > { %v7393_v15 = vunpack.i.h.bf16 %v7391_v47  ;;  %v7392_v42 = vunpack.i.l.bf16 %v7391_v47  ;;  %v14769_v4 = vld [vmem:[#allocation85_spill] sm:$0xff] }
 0x340   : > { %v2478_v35 = vpack.c.bf16 %v2402_v14, %v2398_v23  ;;  %v2479_v1 = vpack.c.bf16 %v2403_v51, %v2399_v21  ;;  %v14770_v23 = vld [vmem:[#allocation39_spill] sm:$0xff] }
 0x341   : > { %v2198_v61 = vsel %vm2172_vm3, %v7398_v29, %v7393_v15  ;;  %v2197_v30 = vsel %vm2172_vm3, %v7397_v58, %v7392_v42  ;;  %v2293_v20 = vsel %vm2172_vm3, %v7392_v42, %v7382_v16  ;;  %v2294_v0 = vsel %vm2172_vm3, %v7393_v15, %v7383_v7  ;;  %v14767_v58 = vld [vmem:[#allocation86_spill] sm:$0xff] }
 0x342   : > { %2884 = vmatprep.mubr.bf16.mxu0 %v2478_v35  ;;  %v2397_v17 = vmax.f32 %v14762_v13, %v2293_v20  ;;  %v2401_v10 = vmax.f32 %v14763_v48, %v2294_v0  ;;  %v2400_v41 = vmax.f32 %v14764_v32, %v2197_v30  ;;  %v2404_v31 = vmax.f32 %v14765_v45, %v2198_v61  ;;  %v14771_v15 = vld [vmem:[#allocation38_spill] sm:$0xff] }
 0x344   : > { %v2477_v22 = vpack.c.bf16 %v2401_v10, %v2397_v17  ;;  %v2480_v56 = vpack.c.bf16 %v2404_v31, %v2400_v41 }
 0x346   : > { %v7406_v57 = vpop.permute.xlu1 %7405  ;;  %2885 = vmatmul.mubr.bf16.gmra.mrb[48].mxu0 %v2477_v22  ;;  %3045 = vmatprep.mubr.bf16.mxu1 %v2480_v56 }
 0x347   : > { %3046 = vmatmul.mubr.bf16.gmra.mrb[48].mxu1 %v2479_v1  ;;  %v7408_v34 = vunpack.i.h.bf16 %v7406_v57  ;;  %v7407_v8 = vunpack.i.l.bf16 %v7406_v57 }
 0x34a   : > { %v7416_v36 = vpop.permute.xlu1 %7415  ;;  %v7401_v54 = vpop.permute.xlu0 %7400 }
 0x34b   : > { %v7418_v37 = vunpack.i.h.bf16 %v7416_v36  ;;  %v7417_v27 = vunpack.i.l.bf16 %v7416_v36  ;;  %v7403_v24 = vunpack.i.h.bf16 %v7401_v54  ;;  %v7402_v12 = vunpack.i.l.bf16 %v7401_v54  ;;  %v14772_v54 = vld [vmem:[#allocation61_spill] sm:$0xff] }
 0x34d   : > { %v2231_v9 = vsel %vm2172_vm3, %v7407_v8, %v7417_v27  ;;  %v2232_v6 = vsel %vm2172_vm3, %v7408_v34, %v7418_v37  ;;  %v2264_v19 = vsel %vm2172_vm3, %v7403_v24, %v7408_v34  ;;  %v2263_v60 = vsel %vm2172_vm3, %v7402_v12, %v7407_v8 }
 0x34e   : > { %v7411_v63 = vpop.permute.xlu0 %7410  ;;  %v2406_v59 = vmax.f32 %v11992_v62, %v2263_v60  ;;  %v2410_v18 = vmax.f32 %v11989_v33, %v2264_v19  ;;  %v2407_v29 = vmax.f32 %v14766_v38, %v2231_v9  ;;  %v2411_v7 = vmax.f32 %v14767_v58, %v2232_v6  ;;  %v14768_v33 = vld [vmem:[#allocation45_spill] sm:$0xff] }
 0x34f   : > { %v7413_v52 = vunpack.i.h.bf16 %v7411_v63  ;;  %v7412_v26 = vunpack.i.l.bf16 %v7411_v63  ;;  %v14775_v60 = vld [vmem:[#allocation37_spill] sm:$0xff] }
 0x350   : > { %v2482_v53 = vpack.c.bf16 %v2410_v18, %v2406_v59  ;;  %v2483_v51 = vpack.c.bf16 %v2411_v7, %v2407_v29  ;;  %v14776_v59 = vld [vmem:[#allocation88_spill] sm:$0xff] }
 0x351   : > { %v2200_v16 = vsel %vm2172_vm3, %v7418_v37, %v7413_v52  ;;  %v2199_v46 = vsel %vm2172_vm3, %v7417_v27, %v7412_v26  ;;  %v2295_v44 = vsel %vm2172_vm3, %v7412_v26, %v7402_v12  ;;  %v2296_v62 = vsel %vm2172_vm3, %v7413_v52, %v7403_v24  ;;  %v14773_v27 = vld [vmem:[#allocation36_spill] sm:$0xff]  ;;  %v14777_v52 = vld [vmem:[#allocation87_spill] sm:$0xff] }
 0x352   : > { %2892 = vmatprep.mubr.bf16.mxu0 %v2482_v53  ;;  %v2405_v28 = vmax.f32 %v14768_v33, %v2295_v44  ;;  %v2409_v47 = vmax.f32 %v14769_v4, %v2296_v62  ;;  %v2408_v14 = vmax.f32 %v14770_v23, %v2199_v46  ;;  %v2412_v42 = vmax.f32 %v14771_v15, %v2200_v16  ;;  %v12371_v16 = vld [vmem:[%s13781_s2] ss:$0 sm:$0xff] }
 0x354   : > { %v2481_v35 = vpack.c.bf16 %v2409_v47, %v2405_v28  ;;  %v2484_v21 = vpack.c.bf16 %v2412_v42, %v2408_v14 }
 0x356   : > { %v7426_v61 = vpop.permute.xlu1 %7425  ;;  %2893 = vmatmul.mubr.bf16.gmra.mrb[52].mxu0 %v2481_v35  ;;  %3053 = vmatprep.mubr.bf16.mxu1 %v2484_v21 }
 0x357   : > { %3054 = vmatmul.mubr.bf16.gmra.mrb[52].mxu1 %v2483_v51  ;;  %v7428_v30 = vunpack.i.h.bf16 %v7426_v61  ;;  %v7427_v20 = vunpack.i.l.bf16 %v7426_v61 }
 0x35a   : > { %v7436_v0 = vpop.permute.xlu1 %7435 }
 0x35b   : > { %v7421_v13 = vpop.permute.xlu0 %7420  ;;  %v7438_v17 = vunpack.i.h.bf16 %v7436_v0  ;;  %v7437_v48 = vunpack.i.l.bf16 %v7436_v0 }
 0x35c   : > { %v7423_v10 = vunpack.i.h.bf16 %v7421_v13  ;;  %v7422_v32 = vunpack.i.l.bf16 %v7421_v13 }
 0x35d   : > { %v2233_v41 = vsel %vm2172_vm3, %v7427_v20, %v7437_v48  ;;  %v2234_v45 = vsel %vm2172_vm3, %v7428_v30, %v7438_v17 }
 0x35e   : > { %v2266_v31 = vsel %vm2172_vm3, %v7423_v10, %v7428_v30  ;;  %v2265_v22 = vsel %vm2172_vm3, %v7422_v32, %v7427_v20  ;;  %v2415_v37 = vmax.f32 %v14772_v54, %v2233_v41  ;;  %v2419_v24 = vmax.f32 %v14773_v27, %v2234_v45 }
 0x35f   : > { %v7431_v56 = vpop.permute.xlu0 %7430  ;;  %v2414_v1 = vmax.f32 %v12068_v43, %v2265_v22  ;;  %v2418_v57 = vmax.f32 %v12065_v2, %v2266_v31  ;;  %v14774_v2 = vld [vmem:[#allocation48_spill] sm:$0xff] }
 0x360   : > { %v7433_v34 = vunpack.i.h.bf16 %v7431_v56  ;;  %v7432_v8 = vunpack.i.l.bf16 %v7431_v56  ;;  %v2487_v29 = vpack.c.bf16 %v2419_v24, %v2415_v37 }
 0x361   : > { %v2486_v36 = vpack.c.bf16 %v2418_v57, %v2414_v1 }
 0x362   : > { %v2202_v12 = vsel %vm2172_vm3, %v7438_v17, %v7433_v34  ;;  %v2201_v9 = vsel %vm2172_vm3, %v7437_v48, %v7432_v8  ;;  %v2297_v6 = vsel %vm2172_vm3, %v7432_v8, %v7422_v32  ;;  %v2298_v43 = vsel %vm2172_vm3, %v7433_v34, %v7423_v10 }
 0x363   : > { %2900 = vmatprep.mubr.bf16.mxu0 %v2486_v36  ;;  %v2413_v19 = vmax.f32 %v14774_v2, %v2297_v6  ;;  %v2417_v63 = vmax.f32 %v14775_v60, %v2298_v43  ;;  %v2416_v18 = vmax.f32 %v14776_v59, %v2201_v9  ;;  %v2420_v26 = vmax.f32 %v14777_v52, %v2202_v12 }
 0x365   : > { %v2485_v53 = vpack.c.bf16 %v2417_v63, %v2413_v19  ;;  %v2488_v38 = vpack.c.bf16 %v2420_v26, %v2416_v18  ;;  %v5915_v7 = vpop.f32.mrb[0].mxu0 }
 0x366   : > { %v12366_v58 = vpop.permute.xlu1 %7445  ;;  %v5916_v46 = vpop.f32.mrb[1].mxu0 }
 0x367   : > { %2901 = vmatmul.mubr.bf16.gmra.mrb[56].mxu0 %v2485_v53  ;;  %3061 = vmatprep.mubr.bf16.mxu1 %v2488_v38  ;;  %v6027_v44 = vpop.f32.mrb[0].mxu1  ;;  %v5917_v62 = vadd.f32 %v5916_v46, %v5915_v7  ;;  %v5918_v33 = vpop.f32.mrb[2].mxu0  ;;  %v7448_v61 = vunpack.i.h.bf16 %v12366_v58  ;;  %v7447_v30 = vunpack.i.l.bf16 %v12366_v58 }
 0x368   : > { %3062 = vmatmul.mubr.bf16.gmra.mrb[56].mxu1 %v2487_v29  ;;  %v6028_v28 = vpop.f32.mrb[1].mxu1  ;;  %v5919_v15 = vpop.f32.mrb[3].mxu0 }
 0x369   : > { %v6029_v4 = vadd.f32 %v6028_v28, %v6027_v44  ;;  %v2791_v23 = vadd.f32 %v5917_v62, %v12371_v16  ;;  %v6030_v42 = vpop.f32.mrb[2].mxu1  ;;  %v5920_v21 = vadd.f32 %v5919_v15, %v5918_v33 }
 0x36a   : > { %v7441_v47 = vpop.permute.xlu0 %7440  ;;  %v6031_v51 = vpop.f32.mrb[3].mxu1 }
 0x36b   : > { %v7443_v14 = vunpack.i.h.bf16 %v7441_v47  ;;  %v7442_v35 = vunpack.i.l.bf16 %v7441_v47  ;;  %v12376_v20 = vadd.f32 %v6029_v4, %v2791_v23  ;;  %v2794_v0 = vadd.f32 %v5920_v21, %v12371_v16  ;;  %v7456_v10 = vpop.permute.xlu1 %7455 }
 0x36c   : > { %v6032_v13 = vadd.f32 %v6031_v51, %v6030_v42  ;;  %v7457_v36 = vunpack.i.l.bf16 %v7456_v10  ;;  %v7458_v2 = vunpack.i.h.bf16 %v7456_v10  ;;  %v8414_v10 = vmov 0  }
 0x36d   : > { %v12380_v48 = vmul.f32 0.70710677, %v12376_v20  ;;  %v2268_v32 = vsel %vm2172_vm3, %v7443_v14, %v7448_v61  ;;  %v2267_v41 = vsel %vm2172_vm3, %v7442_v35, %v7447_v30 }
 0x36e   : > { %v7451_v17 = vpop.permute.xlu0 %7450  ;;  %v12386_v31 = vadd.f32 %v6032_v13, %v2794_v0  ;;  %v2422_v24 = vmax.f32 %v12144_v50, %v2267_v41  ;;  %v2426_v12 = vmax.f32 %v12141_v40, %v2268_v32  ;;  %v2235_v40 = vsel %vm2172_vm3, %v7447_v30, %v7457_v36 }
 0x36f   : > { %v5921_v45 = vpop.f32.mrb[4].mxu0  ;;  %v3206_v56 = vand.u32 2147483647, %v12380_v48  ;;  %v7453_v1 = vunpack.i.h.bf16 %v7451_v17  ;;  %v7452_v57 = vunpack.i.l.bf16 %v7451_v17  ;;  %v2236_v62 = vsel %vm2172_vm3, %v7448_v61, %v7458_v2 }
 0x370   : > { %v5922_v22 = vpop.f32.mrb[5].mxu0  ;;  %v6033_v34 = vpop.f32.mrb[4].mxu1  ;;  %v12390_v54 = vmul.f32 0.70710677, %v12386_v31  ;;  %v2490_v29 = vpack.c.bf16 %v2426_v12, %v2422_v24  ;;  %v2423_v25 = vmax.f32 %v12151_v11, %v2235_v40  ;;  %v2427_v30 = vmax.f32 %v12154_v5, %v2236_v62 }
 0x371   : > { %v5924_v8 = vpop.f32.mrb[6].mxu0  ;;  %v6034_v37 = vpop.f32.mrb[5].mxu1  ;;  %v3238_v9 = vmul.f32 0.3275911, %v3206_v56  ;;  %v5923_v6 = vadd.f32 %v5922_v22, %v5921_v45  ;;  %v2299_v52 = vsel %vm2172_vm3, %v7452_v57, %v7442_v35  ;;  %v2300_v26 = vsel %vm2172_vm3, %v7453_v1, %v7443_v14 }
 0x372   : > { %v5925_v27 = vpop.f32.mrb[7].mxu0  ;;  %v6036_v43 = vpop.f32.mrb[6].mxu1  ;;  %v12395_v19 = vand.u32 2147483647, %v12390_v54  ;;  %v6035_v60 = vadd.f32 %v6034_v37, %v6033_v34  ;;  %v2203_v58 = vsel %vm2172_vm3, %v7457_v36, %v7452_v57  ;;  %2908 = vmatprep.mubr.bf16.mxu0 %v2490_v29  ;;  %v2421_v28 = vmax.f32 %v12167_v49, %v2299_v52 }
 0x373   : > { %v5926_v63 = vadd.f32 %v5925_v27, %v5924_v8  ;;  %v6037_v59 = vpop.f32.mrb[7].mxu1  ;;  %v3270_v18 = vadd.f32 1.0, %v3238_v9  ;;  %v2799_v50 = vadd.f32 %v5923_v6, %v12371_v16  ;;  %v2425_v4 = vmax.f32 %v12170_v39, %v2300_v26 }
 0x374   : > { %v3239_v53 = vmul.f32 0.3275911, %v12395_v19  ;;  %v6038_v46 = vadd.f32 %v6037_v59, %v6036_v43  ;;  %v2204_v23 = vsel %vm2172_vm3, %v7458_v2, %v7453_v1  ;;  %v3654_v35 = vsub.f32 0.0, %v3206_v56 }
 0x375   : > { %v2802_v38 = vadd.f32 %v5926_v63, %v12371_v16  ;;  %7495 = vrcp.f32 %v3270_v18  ;;  %v12408_v7 = vadd.f32 %v6035_v60, %v2799_v50  ;;  %v2489_v21 = vpack.c.bf16 %v2425_v4, %v2421_v28 }
 0x376   : > { %v3271_v33 = vadd.f32 1.0, %v3239_v53  ;;  %v2424_v51 = vmax.f32 %v12177_v55, %v2203_v58  ;;  %v2428_v0 = vmax.f32 %v12174_v3, %v2204_v23  ;;  %v3686_v55 = vmul.f32 %v3654_v35, %v3206_v56 }
 0x377   : > { %v5927_v44 = vpop.f32.mrb[8].mxu0  ;;  %v12417_v14 = vmul.f32 0.70710677, %v12408_v7  ;;  %v12419_v15 = vadd.f32 %v6038_v46, %v2802_v38  ;;  %2909 = vmatmul.mubr.bf16.gmra.mrb[60].mxu0 %v2489_v21  ;;  %v3655_v1 = vsub.f32 0.0, %v12395_v19  ;;  %v2491_v34 = vpack.c.bf16 %v2427_v30, %v2423_v25 }
 0x378   : > { %v5928_v47 = vpop.f32.mrb[9].mxu0  ;;  %7497 = vrcp.f32 %v3271_v33  ;;  %4086 = vmatprep.mubr.bf16.mxu0 %v8414_v10  ;;  %v2492_v32 = vpack.c.bf16 %v2428_v0, %v2424_v51  ;;  %v3718_v43 = vmul.f32 1.442695, %v3686_v55  ;;  %vm3142_vm5 = vcmp.lt.f32.partialorder %v12380_v48, 0.0 }
 0x379   : > { %v5930_v42 = vpop.f32.mrb[10].mxu0  ;;  %v3208_v49 = vand.u32 2147483647, %v12417_v14  ;;  %v12424_v39 = vmul.f32 0.70710677, %v12419_v15  ;;  %v5929_v41 = vadd.f32 %v5928_v47, %v5927_v44  ;;  %v3687_v2 = vmul.f32 %v3655_v1, %v12395_v19 }
 0x37a   : > { %v5931_v61 = vpop.f32.mrb[11].mxu0  ;;  %3069 = vmatprep.mubr.bf16.mxu1 %v2492_v32  ;;  %vm3143_vm6 = vcmp.lt.f32.partialorder %v12390_v54, 0.0  ;;  %v3079_v54 = vmul.f32 0.5, %v12386_v31  ;;  %vm3144_vm8 = vcmp.lt.f32.partialorder %v12417_v14, 0.0 }
 0x37b   : > { %v3240_v13 = vmul.f32 0.3275911, %v3208_v49  ;;  %v3209_v17 = vand.u32 2147483647, %v12424_v39  ;;  %v5932_v22 = vadd.f32 %v5931_v61, %v5930_v42  ;;  %v2807_v3 = vadd.f32 %v5929_v41, %v12371_v16  ;;  %3070 = vmatmul.mubr.bf16.gmra.mrb[60].mxu1 %v2491_v34 }
 0x37c   : > { %4279 = vmatprep.mubr.bf16.mxu1 %v8414_v10  ;;  %v3656_v18 = vsub.f32 0.0, %v3208_v49  ;;  %v3720_v28 = vmul.f32 1.442695, %v3687_v2  ;;  %vm3145_vm9 = vcmp.lt.f32.partialorder %v12424_v39, 0.0 }
 0x37d   : > { %v6039_v45 = vpop.f32.mrb[8].mxu1  ;;  %v3272_v57 = vadd.f32 1.0, %v3240_v13  ;;  %v3241_v11 = vmul.f32 0.3275911, %v3209_v17  ;;  %v2810_v56 = vadd.f32 %v5932_v22, %v12371_v16  ;;  %v3657_v40 = vsub.f32 0.0, %v3209_v17 }
 0x37e   : > { %v6040_v5 = vpop.f32.mrb[9].mxu1  ;;  %v3688_v23 = vmul.f32 %v3656_v18, %v3208_v49 }
 0x37f   : > { %v6041_v8 = vadd.f32 %v6040_v5, %v6039_v45  ;;  %v6042_v36 = vpop.f32.mrb[10].mxu1  ;;  %v12433_v37 = vpop.eup %7495  ;;  %7499 = vrcp.f32 %v3272_v57  ;;  %v3273_v27 = vadd.f32 1.0, %v3241_v11  ;;  %v3689_v61 = vmul.f32 %v3657_v40, %v3209_v17 }
 0x380   : > { %v6043_v24 = vpop.f32.mrb[11].mxu1  ;;  %v3366_v12 = vmul.f32 1.0614054, %v12433_v37  ;;  %v3722_v1 = vmul.f32 1.442695, %v3688_v23  ;;  %v12468_v57 = vmul.f32 0.5, %v12376_v20 }
 0x381   : > { %v12437_v9 = vadd.f32 %v6041_v8, %v2807_v3  ;;  %v6044_v6 = vadd.f32 %v6043_v24, %v6042_v36  ;;  %7501 = vrcp.f32 %v3273_v27  ;;  %v3724_v34 = vmul.f32 1.442695, %v3689_v61 }
 0x382   : > { %v12441_v63 = vpop.eup %7497  ;;  %v3398_v59 = vadd.f32 -1.4531521, %v3366_v12  ;;  %7503 = vpow2.f32 %v3718_v43  ;;  %v8415_v24 = vmov 1.0  }
 0x383   : > { %v5933_v60 = vpop.f32.mrb[12].mxu0  ;;  %v12444_v52 = vmul.f32 0.70710677, %v12437_v9  ;;  %v3367_v50 = vmul.f32 1.0614054, %v12441_v63  ;;  %v12447_v53 = vadd.f32 %v6044_v6, %v2810_v56  ;;  %7505 = vpow2.f32 %v3720_v28 }
 0x384   : > { %v5934_v26 = vpop.f32.mrb[13].mxu0  ;;  %v3430_v19 = vmul.f32 %v12433_v37, %v3398_v59  ;;  %v3174_v12 = vsel %vm3142_vm5, -1.0, %v8415_v24 }
 0x385   : > { %v5935_v38 = vadd.f32 %v5934_v26, %v5933_v60  ;;  %v6045_v29 = vpop.f32.mrb[12].mxu1  ;;  %v5936_v58 = vpop.f32.mrb[14].mxu0  ;;  %v3210_v46 = vand.u32 2147483647, %v12444_v52  ;;  %v3399_v33 = vadd.f32 -1.4531521, %v3367_v50 }
 0x386   : > { %v6046_v44 = vpop.f32.mrb[13].mxu1  ;;  %v5937_v62 = vpop.f32.mrb[15].mxu0  ;;  %v12452_v4 = vmul.f32 0.70710677, %v12447_v53  ;;  %v3462_v47 = vadd.f32 1.4214138, %v3430_v19 }
 0x387   : > { %v3242_v42 = vmul.f32 0.3275911, %v3210_v46  ;;  %v2815_v35 = vadd.f32 %v5935_v38, %v12371_v16  ;;  %v6048_v21 = vpop.f32.mrb[14].mxu1  ;;  %v3431_v51 = vmul.f32 %v12441_v63, %v3399_v33  ;;  %v6047_v30 = vadd.f32 %v6046_v44, %v6045_v29 }
 0x388   : > { %v12457_v25 = vand.u32 2147483647, %v12452_v4  ;;  %v6049_v0 = vpop.f32.mrb[15].mxu1  ;;  %v3494_v13 = vmul.f32 %v12433_v37, %v3462_v47  ;;  %v3658_v27 = vsub.f32 0.0, %v3210_v46  ;;  %v5938_v44 = vadd.f32 %v5937_v62, %v5936_v58 }
 0x389   : > { %v3274_v55 = vadd.f32 1.0, %v3242_v42  ;;  %v12461_v32 = vpop.eup %7499  ;;  %v3463_v49 = vadd.f32 1.4214138, %v3431_v51  ;;  %v12464_v45 = vadd.f32 %v6047_v30, %v2815_v35  ;;  %v6050_v33 = vadd.f32 %v6049_v0, %v6048_v21 }
 0x38a   : > { %v3243_v41 = vmul.f32 0.3275911, %v12457_v25  ;;  %v3526_v22 = vadd.f32 -0.28449672, %v3494_v13  ;;  %v3368_v17 = vmul.f32 1.0614054, %v12461_v32  ;;  %v3690_v40 = vmul.f32 %v3658_v27, %v3210_v46 }
 0x38b   : > { %7507 = vrcp.f32 %v3274_v55  ;;  %v3495_v11 = vmul.f32 %v12441_v63, %v3463_v49  ;;  %v12471_v3 = vpop.eup %7501  ;;  %v12475_v56 = vmul.f32 0.70710677, %v12464_v45  ;;  %v3659_v42 = vsub.f32 0.0, %v12457_v25 }
 0x38c   : > { %v3275_v5 = vadd.f32 1.0, %v3243_v41  ;;  %v3558_v8 = vmul.f32 %v12433_v37, %v3526_v22  ;;  %v3400_v36 = vadd.f32 -1.4531521, %v3368_v17  ;;  %v3369_v6 = vmul.f32 1.0614054, %v12471_v3  ;;  %v7504_v59 = vpop.eup %7503 }
 0x38d   : > { %v3527_v20 = vadd.f32 -0.28449672, %v3495_v11  ;;  %v12483_v60 = vand.u32 2147483647, %v12475_v56  ;;  %v7506_v61 = vpop.eup %7505  ;;  %v2818_v46 = vadd.f32 %v5938_v44, %v12371_v16  ;;  %v3726_v0 = vmul.f32 1.442695, %v3690_v40 }
 0x38e   : > { %7509 = vrcp.f32 %v3275_v5  ;;  %v3590_v43 = vadd.f32 0.2548296, %v3558_v8  ;;  %v3432_v2 = vmul.f32 %v12461_v32, %v3400_v36  ;;  %v3401_v26 = vadd.f32 -1.4531521, %v3369_v6 }
 0x38f   : > { %7511 = vpow2.f32 %v3722_v1  ;;  %v3559_v18 = vmul.f32 %v12441_v63, %v3527_v20  ;;  %v3244_v38 = vmul.f32 0.3275911, %v12483_v60  ;;  %v3691_v36 = vmul.f32 %v3659_v42, %v12457_v25 }
 0x390   : > { %7513 = vpow2.f32 %v3724_v34  ;;  %v3622_v48 = vmul.f32 %v12433_v37, %v3590_v43  ;;  %v3464_v50 = vadd.f32 1.4214138, %v3432_v2  ;;  %v3433_v19 = vmul.f32 %v12471_v3, %v3401_v26 }
 0x391   : > { %v3591_v29 = vadd.f32 0.2548296, %v3559_v18  ;;  %v3276_v35 = vadd.f32 1.0, %v3244_v38  ;;  %v3175_v43 = vsel %vm3143_vm6, -1.0, %v8415_v24  ;;  %vm3146_vm10 = vcmp.lt.f32.partialorder %v12444_v52, 0.0 }
 0x392   : > { %v3782_v47 = vmul.f32 %v7504_v59, %v3622_v48  ;;  %v3496_v23 = vmul.f32 %v12461_v32, %v3464_v50  ;;  %v3465_v30 = vadd.f32 1.4214138, %v3433_v19  ;;  %vm3147_vm11 = vcmp.lt.f32.partialorder %v12452_v4, 0.0 }
 0x393   : > { %v5939_v28 = vpop.f32.mrb[16].mxu0  ;;  %v3623_v37 = vmul.f32 %v12441_v63, %v3591_v29  ;;  %7515 = vrcp.f32 %v3276_v35  ;;  %v12500_v63 = vadd.f32 %v6050_v33, %v2818_v46  ;;  %v3082_v52 = vmul.f32 0.5, %v12437_v9 }
 0x394   : > { %v5940_v51 = vpop.f32.mrb[17].mxu0  ;;  %v3814_v62 = vsub.f32 1.0, %v3782_v47  ;;  %v3528_v21 = vadd.f32 -0.28449672, %v3496_v23  ;;  %v3497_v17 = vmul.f32 %v12471_v3, %v3465_v30  ;;  %7517 = vpow2.f32 %v3726_v0 }
 0x395   : > { %v5941_v13 = vadd.f32 %v5940_v51, %v5939_v28  ;;  %v6051_v55 = vpop.f32.mrb[16].mxu1  ;;  %v12494_v49 = vpop.f32.mrb[18].mxu0  ;;  %v3783_v22 = vmul.f32 %v7506_v61, %v3623_v37  ;;  %v12520_v44 = vmul.f32 0.70710677, %v12500_v63  ;;  %v3728_v28 = vmul.f32 1.442695, %v3691_v36 }
 0x396   : > { %v12496_v58 = vpop.eup %7507  ;;  %v6052_v41 = vpop.f32.mrb[17].mxu1  ;;  %v3846_v5 = vmul.f32 %v3814_v62, %v3174_v12  ;;  %v3560_v8 = vmul.f32 %v12461_v32, %v3528_v21  ;;  %v3529_v59 = vadd.f32 -0.28449672, %v3497_v17  ;;  %v3660_v37 = vsub.f32 0.0, %v12483_v60 }
 0x397   : > { %v3370_v1 = vmul.f32 1.0614054, %v12496_v58  ;;  %v12502_v11 = vpop.f32.mrb[19].mxu0  ;;  %v12504_v34 = vpop.f32.mrb[18].mxu1  ;;  %v2823_v27 = vadd.f32 %v5941_v13, %v12371_v16  ;;  %v3815_v2 = vsub.f32 1.0, %v3783_v22  ;;  %v6053_v25 = vadd.f32 %v6052_v41, %v6051_v55 }
 0x398   : > { %v12509_v20 = vpop.f32.mrb[19].mxu1  ;;  %v12511_v6 = vpop.eup %7509  ;;  %v3878_v12 = vadd.f32 1.0, %v3846_v5  ;;  %v3592_v48 = vadd.f32 0.2548296, %v3560_v8  ;;  %v3561_v29 = vmul.f32 %v12471_v3, %v3529_v59  ;;  %v12529_v30 = vand.u32 2147483647, %v12520_v44 }
 0x399   : > { %v3402_v18 = vadd.f32 -1.4531521, %v3370_v1  ;;  %v7512_v26 = vpop.eup %7511  ;;  %v3371_v50 = vmul.f32 1.0614054, %v12511_v6  ;;  %v3847_v38 = vmul.f32 %v3815_v2, %v3175_v43  ;;  %v12523_v47 = vadd.f32 %v6053_v25, %v2823_v27 }
 0x39a   : > { %v7514_v40 = vpop.eup %7513  ;;  %v3593_v42 = vadd.f32 0.2548296, %v3561_v29  ;;  %v3910_v51 = vmul.f32 %v3878_v12, %v12468_v57  ;;  %v3624_v31 = vmul.f32 %v12461_v32, %v3592_v48  ;;  %v3245_v21 = vmul.f32 0.3275911, %v12529_v30 }
 0x39b   : > { %v3434_v19 = vmul.f32 %v12496_v58, %v3402_v18  ;;  %v3403_v33 = vadd.f32 -1.4531521, %v3371_v50  ;;  %v3879_v23 = vadd.f32 1.0, %v3847_v38  ;;  %7519 = vpow2.f32 %v3728_v28 }
 0x39c   : > { %v3625_v13 = vmul.f32 %v12471_v3, %v3593_v42  ;;  %v3692_v3 = vmul.f32 %v3660_v37, %v12483_v60  ;;  %v3277_v1 = vadd.f32 1.0, %v3245_v21  ;;  %v3784_v5 = vmul.f32 %v7512_v26, %v3624_v31 }
 0x39d   : > { %v3466_v35 = vadd.f32 1.4214138, %v3434_v19  ;;  %v3435_v61 = vmul.f32 %v12511_v6, %v3403_v33  ;;  %v3911_v46 = vmul.f32 %v3879_v23, %v3079_v54  ;;  %v12534_v62 = vpop.eup %7515  ;;  %v12544_v27 = vmul.f32 0.70710677, %v12523_v47 }
 0x39e   : > { %v3372_v22 = vmul.f32 1.0614054, %v12534_v62  ;;  %v3785_v17 = vmul.f32 %v7514_v40, %v3625_v13  ;;  %v12549_v2 = vmul.f32 0.5, %v12408_v7  ;;  %v3176_v60 = vsel %vm3144_vm8, -1.0, %v8415_v24  ;;  %v7518_v19 = vpop.eup %7517 }
 0x39f   : > { %v3498_v55 = vmul.f32 %v12496_v58, %v3466_v35  ;;  %v3467_v57 = vadd.f32 1.4214138, %v3435_v61  ;;  %v3942_v0 = vpack.c.bf16 %v3911_v46, %v3910_v51  ;;  %7521 = vrcp.f32 %v3277_v1 }
 0x3a0   : > { %v3404_v36 = vadd.f32 -1.4531521, %v3372_v22  ;;  %v3177_v26 = vsel %vm3145_vm9, -1.0, %v8415_v24  ;;  %v3817_v14 = vsub.f32 1.0, %v3785_v17  ;;  %v3730_v40 = vmul.f32 1.442695, %v3692_v3 }
 0x3a1   : > { %v3530_v41 = vadd.f32 -0.28449672, %v3498_v55  ;;  %v3499_v32 = vmul.f32 %v12511_v6, %v3467_v57  ;;  %5728 = vmatmul.mubr.msk.bf16.vlgmr.msra.gmra.mrb[64].mxu0 %vm3992_vm7, %v3942_v0  ;;  %5745 = vmatmul.mubr.msk.bf16.vlgmr.msra.gmra.mrb[64].mxu1 %vm3992_vm7, %v3942_v0  ;;  %v3816_v54 = vsub.f32 1.0, %v3784_v5  ;;  %v3214_v28 = vand.u32 2147483647, %v12544_v27 }
 0x3a2   : > { %4096 = vmatprep.mubr.bf16.mxu0 %v8414_v10  ;;  %4289 = vmatprep.mubr.bf16.mxu1 %v8414_v10  ;;  %v3436_v7 = vmul.f32 %v12534_v62, %v3404_v36  ;;  %v5944_v35 = vadd.f32 %v12502_v11, %v12494_v49  ;;  %v6056_v51 = vadd.f32 %v12509_v20, %v12504_v34  ;;  %v3661_v13 = vsub.f32 0.0, %v12529_v30 }
 0x3a3   : > { %v3562_v8 = vmul.f32 %v12496_v58, %v3530_v41  ;;  %v5945_v43 = vpop.f32.mrb[20].mxu0  ;;  %v3531_v59 = vadd.f32 -0.28449672, %v3499_v32  ;;  %v3246_v55 = vmul.f32 0.3275911, %v3214_v28  ;;  %v3848_v49 = vmul.f32 %v3816_v54, %v3176_v60 }
 0x3a4   : > { %v5946_v18 = vpop.f32.mrb[21].mxu0  ;;  %v3468_v33 = vadd.f32 1.4214138, %v3436_v7  ;;  %v2826_v21 = vadd.f32 %v5944_v35, %v12371_v16  ;;  %v3081_v1 = vmul.f32 0.5, %v12419_v15  ;;  %v3693_v5 = vmul.f32 %v3661_v13, %v12529_v30 }
 0x3a5   : > { %v3594_v12 = vadd.f32 0.2548296, %v3562_v8  ;;  %v6057_v48 = vpop.f32.mrb[20].mxu1  ;;  %v5948_v50 = vpop.f32.mrb[22].mxu0  ;;  %v3563_v25 = vmul.f32 %v12511_v6, %v3531_v59  ;;  %v5947_v61 = vadd.f32 %v5946_v18, %v5945_v43  ;;  %v3278_v22 = vadd.f32 1.0, %v3246_v55 }
 0x3a6   : > { %v6058_v38 = vpop.f32.mrb[21].mxu1  ;;  %v5949_v29 = vpop.f32.mrb[23].mxu0  ;;  %v3500_v31 = vmul.f32 %v12534_v62, %v3468_v33  ;;  %v12574_v32 = vadd.f32 %v6056_v51, %v2826_v21  ;;  %v3178_v43 = vsel %vm3146_vm10, -1.0, %v8415_v24  ;;  %v3179_v15 = vsel %vm3147_vm11, -1.0, %v8415_v24 }
 0x3a7   : > { %v3626_v39 = vmul.f32 %v12496_v58, %v3594_v12  ;;  %v6060_v23 = vpop.f32.mrb[22].mxu1  ;;  %v3595_v42 = vadd.f32 0.2548296, %v3563_v25  ;;  %v3849_v58 = vmul.f32 %v3817_v14, %v3177_v26  ;;  %v2831_v0 = vadd.f32 %v5947_v61, %v12371_v16  ;;  %v7520_v41 = vpop.eup %7519 }
 0x3a8   : > { %v6061_v37 = vpop.f32.mrb[23].mxu1  ;;  %v3532_v11 = vadd.f32 -0.28449672, %v3500_v31  ;;  %v6059_v34 = vadd.f32 %v6058_v38, %v6057_v48  ;;  %v5950_v3 = vadd.f32 %v5949_v29, %v5948_v50  ;;  %7523 = vrcp.f32 %v3278_v22 }
 0x3a9   : > { %v3786_v46 = vmul.f32 %v7518_v19, %v3626_v39  ;;  %v3627_v57 = vmul.f32 %v12511_v6, %v3595_v42  ;;  %v12580_v8 = vpop.eup %7521  ;;  %v3881_v36 = vadd.f32 1.0, %v3849_v58  ;;  %v12586_v59 = vmul.f32 0.70710677, %v12574_v32 }
 0x3aa   : > { %v12578_v6 = vadd.f32 %v6059_v34, %v2831_v0  ;;  %v3564_v30 = vmul.f32 %v12534_v62, %v3532_v11  ;;  %7525 = vpow2.f32 %v3730_v40  ;;  %v3373_v18 = vmul.f32 1.0614054, %v12580_v8 }
 0x3ab   : > { %v3818_v20 = vsub.f32 1.0, %v3786_v46  ;;  %v3787_v17 = vmul.f32 %v7520_v41, %v3627_v57  ;;  %v3880_v26 = vadd.f32 1.0, %v3848_v49  ;;  %v12594_v48 = vand.u32 2147483647, %v12586_v59 }
 0x3ac   : > { %v3405_v50 = vadd.f32 -1.4531521, %v3373_v18  ;;  %v3732_v14 = vmul.f32 1.442695, %v3693_v5  ;;  %v3662_v25 = vsub.f32 0.0, %v3214_v28  ;;  %v3913_v38 = vmul.f32 %v3881_v36, %v3081_v1 }
 0x3ad   : > { %v3819_v60 = vsub.f32 1.0, %v3787_v17  ;;  %v3850_v12 = vmul.f32 %v3818_v20, %v3178_v43  ;;  %v3247_v4 = vmul.f32 0.3275911, %v12594_v48  ;;  %v12599_v19 = vmul.f32 0.70710677, %v12578_v6 }
 0x3ae   : > { %v3596_v40 = vadd.f32 0.2548296, %v3564_v30  ;;  %v3437_v54 = vmul.f32 %v12580_v8, %v3405_v50  ;;  %v2834_v39 = vadd.f32 %v5950_v3, %v12371_v16  ;;  %v6062_v33 = vadd.f32 %v6061_v37, %v6060_v23 }
 0x3af   : > { %v3851_v7 = vmul.f32 %v3819_v60, %v3179_v15  ;;  %v3912_v35 = vmul.f32 %v3880_v26, %v12549_v2  ;;  %v3882_v9 = vadd.f32 1.0, %v3850_v12  ;;  %v3083_v51 = vmul.f32 0.5, %v12447_v53 }
 0x3b0   : > { %v3279_v61 = vadd.f32 1.0, %v3247_v4  ;;  %v3469_v31 = vadd.f32 1.4214138, %v3437_v54  ;;  %7527 = vpow2.f32 %v3732_v14  ;;  %v3694_v13 = vmul.f32 %v3662_v25, %v3214_v28 }
 0x3b1   : > { %v3883_v29 = vadd.f32 1.0, %v3851_v7  ;;  %v12606_v55 = vand.u32 2147483647, %v12599_v19  ;;  %v12608_v57 = vadd.f32 %v6062_v33, %v2834_v39  ;;  %v3943_v21 = vpack.c.bf16 %v3913_v38, %v3912_v35 }
 0x3b2   : > { %7529 = vrcp.f32 %v3279_v61  ;;  %v12610_v0 = vpop.eup %7523  ;;  %v12613_v2 = vmul.f32 0.5, %v12464_v45  ;;  %v3628_v53 = vmul.f32 %v12534_v62, %v3596_v40  ;;  %v3501_v41 = vmul.f32 %v12580_v8, %v3469_v31 }
 0x3b3   : > { %v5951_v42 = vpop.f32.mrb[24].mxu0  ;;  %v3915_v58 = vmul.f32 %v3883_v29, %v3083_v51  ;;  %v3248_v28 = vmul.f32 0.3275911, %v12606_v55  ;;  %v3914_v22 = vmul.f32 %v3882_v9, %v3082_v52  ;;  %vm3148_vm12 = vcmp.lt.f32.partialorder %v12475_v56, 0.0  ;;  %5729 = vmatmul.mubr.msk.bf16.gmra.mrb[68].mxu0 %vm3992_vm7, %v3943_v21  ;;  %5746 = vmatmul.mubr.msk.bf16.gmra.mrb[68].mxu1 %vm3992_vm7, %v3943_v21 }
 0x3b4   : > { %v5952_v46 = vpop.f32.mrb[25].mxu0  ;;  %v3374_v34 = vmul.f32 1.0614054, %v12610_v0  ;;  %v12621_v20 = vmul.f32 0.70710677, %v12608_v57  ;;  %v7526_v62 = vpop.eup %7525  ;;  %4106 = vmatprep.mubr.bf16.mxu0 %v8414_v10  ;;  %4299 = vmatprep.mubr.bf16.mxu1 %v8414_v10  ;;  %v3663_v43 = vsub.f32 0.0, %v12594_v48 }
 0x3b5   : > { %v6063_v23 = vpop.f32.mrb[24].mxu1  ;;  %v5954_v37 = vpop.f32.mrb[26].mxu0  ;;  %v3533_v17 = vadd.f32 -0.28449672, %v3501_v41  ;;  %v3734_v3 = vmul.f32 1.442695, %v3694_v13  ;;  %v3944_v15 = vpack.c.bf16 %v3915_v58, %v3914_v22  ;;  %v3788_v18 = vmul.f32 %v7526_v62, %v3628_v53 }
 0x3b6   : > { %v6064_v49 = vpop.f32.mrb[25].mxu1  ;;  %v5955_v11 = vpop.f32.mrb[27].mxu0  ;;  %v3280_v1 = vadd.f32 1.0, %v3248_v28  ;;  %v3406_v36 = vadd.f32 -1.4531521, %v3374_v34  ;;  %v3180_v30 = vsel %vm3148_vm12, -1.0, %v8415_v24  ;;  %v5953_v14 = vadd.f32 %v5952_v46, %v5951_v42 }
 0x3b7   : > { %v6066_v45 = vpop.f32.mrb[26].mxu1  ;;  %v12629_v60 = vand.u32 2147483647, %v12621_v20  ;;  %v3565_v26 = vmul.f32 %v12580_v8, %v3533_v17  ;;  %v12636_v12 = vmul.f32 0.5, %v12500_v63  ;;  %vm3149_vm13 = vcmp.lt.f32.partialorder %v12520_v44, 0.0 }
 0x3b8   : > { %v6067_v5 = vpop.f32.mrb[27].mxu1  ;;  %7531 = vrcp.f32 %v3280_v1  ;;  %v3438_v7 = vmul.f32 %v12610_v0, %v3406_v36  ;;  %v6065_v25 = vadd.f32 %v6064_v49, %v6063_v23  ;;  %v3695_v56 = vmul.f32 %v3663_v43, %v12594_v48 }
 0x3b9   : > { %v3249_v52 = vmul.f32 0.3275911, %v12629_v60  ;;  %v3597_v50 = vadd.f32 0.2548296, %v3565_v26  ;;  %7533 = vpow2.f32 %v3734_v3  ;;  %v5956_v4 = vadd.f32 %v5955_v11, %v5954_v37 }
 0x3ba   : > { %v3470_v38 = vadd.f32 1.4214138, %v3438_v7  ;;  %v7528_v40 = vpop.eup %7527  ;;  %v3820_v54 = vsub.f32 1.0, %v3788_v18  ;;  %v2839_v39 = vadd.f32 %v5953_v14, %v12371_v16  ;;  %v6068_v33 = vadd.f32 %v6067_v5, %v6066_v45 }
 0x3bb   : > { %v3281_v29 = vadd.f32 1.0, %v3249_v52  ;;  %v3629_v63 = vmul.f32 %v12580_v8, %v3597_v50  ;;  %v3181_v9 = vsel %vm3149_vm13, -1.0, %v8415_v24  ;;  %5730 = vmatmul.mubr.msk.bf16.gmra.mrb[72].mxu0 %vm3992_vm7, %v3944_v15  ;;  %5747 = vmatmul.mubr.msk.bf16.gmra.mrb[72].mxu1 %vm3992_vm7, %v3944_v15  ;;  %v2842_v48 = vadd.f32 %v5956_v4, %v12371_v16 }
 0x3bc   : > { %v12644_v35 = vpop.eup %7529  ;;  %v3502_v42 = vmul.f32 %v12610_v0, %v3470_v38  ;;  %v3664_v61 = vsub.f32 0.0, %v12606_v55  ;;  %v12655_v46 = vadd.f32 %v6065_v25, %v2839_v39  ;;  %4116 = vmatprep.mubr.bf16.mxu0 %v8414_v10  ;;  %4309 = vmatprep.mubr.bf16.mxu1 %v8414_v10  ;;  %vm3150_vm14 = vcmp.lt.f32.partialorder %v12544_v27, 0.0 }
 0x3bd   : > { %7535 = vrcp.f32 %v3281_v29  ;;  %v3789_v51 = vmul.f32 %v7528_v40, %v3629_v63  ;;  %v3375_v8 = vmul.f32 1.0614054, %v12644_v35  ;;  %v3736_v31 = vmul.f32 1.442695, %v3695_v56 }
 0x3be   : > { %v3534_v44 = vadd.f32 -0.28449672, %v3502_v42  ;;  %v12660_v13 = vadd.f32 %v6068_v33, %v2842_v48  ;;  %v3852_v58 = vmul.f32 %v3820_v54, %v3180_v30  ;;  %v12663_v37 = vmul.f32 0.70710677, %v12655_v46 }
 0x3bf   : > { %v3821_v21 = vsub.f32 1.0, %v3789_v51  ;;  %v3407_v23 = vadd.f32 -1.4531521, %v3375_v8  ;;  %v12666_v53 = vmul.f32 0.5, %v12523_v47  ;;  %v3665_v28 = vsub.f32 0.0, %v12629_v60 }
 0x3c0   : > { %v3566_v41 = vmul.f32 %v12610_v0, %v3534_v44  ;;  %v12671_v49 = vmul.f32 0.70710677, %v12660_v13  ;;  %v3696_v62 = vmul.f32 %v3664_v61, %v12606_v55  ;;  %v12678_v17 = vand.u32 2147483647, %v12663_v37 }
 0x3c1   : > { %v3853_v34 = vmul.f32 %v3821_v21, %v3181_v9  ;;  %v3439_v45 = vmul.f32 %v12644_v35, %v3407_v23  ;;  %v12683_v1 = vsel %vm3150_vm14, -1.0, %v8415_v24  ;;  %7537 = vpow2.f32 %v3736_v31 }
 0x3c2   : > { %v12673_v22 = vpop.eup %7531  ;;  %v3598_v5 = vadd.f32 0.2548296, %v3566_v41  ;;  %v3884_v15 = vadd.f32 1.0, %v3852_v58  ;;  %v3250_v55 = vmul.f32 0.3275911, %v12678_v17  ;;  %v3697_v52 = vmul.f32 %v3665_v28, %v12629_v60 }
 0x3c3   : > { %v5957_v11 = vpop.f32.mrb[28].mxu0  ;;  %v3376_v36 = vmul.f32 1.0614054, %v12673_v22  ;;  %v7534_v43 = vpop.eup %7533  ;;  %v3885_v30 = vadd.f32 1.0, %v3853_v34  ;;  %v3471_v18 = vadd.f32 1.4214138, %v3439_v45 }
 0x3c4   : > { %v5958_v47 = vpop.f32.mrb[29].mxu0  ;;  %v3630_v26 = vmul.f32 %v12610_v0, %v3598_v5  ;;  %v12690_v50 = vand.u32 2147483647, %v12671_v49  ;;  %v3738_v38 = vmul.f32 1.442695, %v3696_v62  ;;  %v3282_v56 = vadd.f32 1.0, %v3250_v55 }
 0x3c5   : > { %v6069_v3 = vpop.f32.mrb[28].mxu1  ;;  %v3408_v7 = vadd.f32 -1.4531521, %v3376_v36  ;;  %v5960_v27 = vpop.f32.mrb[30].mxu0  ;;  %v3917_v14 = vmul.f32 %v3885_v30, %v12636_v12  ;;  %v3503_v25 = vmul.f32 %v12644_v35, %v3471_v18  ;;  %vm3151_vm15 = vcmp.lt.f32.partialorder %v12586_v59, 0.0 }
 0x3c6   : > { %v6070_v29 = vpop.f32.mrb[29].mxu1  ;;  %v5961_v4 = vpop.f32.mrb[31].mxu0  ;;  %v3790_v54 = vmul.f32 %v7534_v43, %v3630_v26  ;;  %v3251_v60 = vmul.f32 0.3275911, %v12690_v50  ;;  %v3916_v39 = vmul.f32 %v3884_v15, %v12613_v2  ;;  %7539 = vrcp.f32 %v3282_v56 }
 0x3c7   : > { %v12694_v40 = vpop.eup %7535  ;;  %v3440_v0 = vmul.f32 %v12673_v22, %v3408_v7  ;;  %v6072_v63 = vpop.f32.mrb[30].mxu1  ;;  %v3535_v33 = vadd.f32 -0.28449672, %v3503_v25  ;;  %v3740_v42 = vmul.f32 1.442695, %v3697_v52  ;;  %7541 = vpow2.f32 %v3738_v38 }
 0x3c8   : > { %v3377_v12 = vmul.f32 1.0614054, %v12694_v40  ;;  %v3283_v48 = vadd.f32 1.0, %v3251_v60  ;;  %v6073_v51 = vpop.f32.mrb[31].mxu1  ;;  %v3945_v44 = vpack.c.bf16 %v3917_v14, %v3916_v39  ;;  %v3822_v31 = vsub.f32 1.0, %v3790_v54 }
 0x3c9   : > { %v3472_v9 = vadd.f32 1.4214138, %v3440_v0  ;;  %v3567_v8 = vmul.f32 %v12644_v35, %v3535_v33  ;;  %v3666_v21 = vsub.f32 0.0, %v12678_v17  ;;  %v5959_v41 = vadd.f32 %v5958_v47, %v5957_v11 }
 0x3ca   : > { %v3409_v61 = vadd.f32 -1.4531521, %v3377_v12  ;;  %7543 = vrcp.f32 %v3283_v48  ;;  %5731 = vmatmul.mubr.msk.bf16.gmra.mrb[76].mxu0 %vm3992_vm7, %v3945_v44  ;;  %5748 = vmatmul.mubr.msk.bf16.gmra.mrb[76].mxu1 %vm3992_vm7, %v3945_v44  ;;  %v6071_v28 = vadd.f32 %v6070_v29, %v6069_v3  ;;  %vm3152_vm0 = vcmp.lt.f32.partialorder %v12599_v19, 0.0 }
 0x3cb   : > { %v3504_v58 = vmul.f32 %v12673_v22, %v3472_v9  ;;  %v3599_v2 = vadd.f32 0.2548296, %v3567_v8  ;;  %v7538_v34 = vpop.eup %7537  ;;  %7545 = vpow2.f32 %v3740_v42  ;;  %v5962_v62 = vadd.f32 %v5961_v4, %v5960_v27  ;;  %4126 = vmatprep.mubr.bf16.mxu0 %v8414_v10  ;;  %4319 = vmatprep.mubr.bf16.mxu1 %v8414_v10 }
 0x3cc   : > { %v3441_v23 = vmul.f32 %v12694_v40, %v3409_v61  ;;  %v2847_v43 = vadd.f32 %v5959_v41, %v12371_v16  ;;  %v6074_v15 = vadd.f32 %v6073_v51, %v6072_v63  ;;  %v3698_v11 = vmul.f32 %v3666_v21, %v12678_v17 }
 0x3cd   : > { %v3536_v45 = vadd.f32 -0.28449672, %v3504_v58  ;;  %v3631_v5 = vmul.f32 %v12644_v35, %v3599_v2  ;;  %v3667_v47 = vsub.f32 0.0, %v12690_v50  ;;  %v2850_v3 = vadd.f32 %v5962_v62, %v12371_v16 }
 0x3ce   : > { %v3473_v36 = vadd.f32 1.4214138, %v3441_v23  ;;  %v3854_v18 = vmul.f32 %v3822_v31, %v12683_v1  ;;  %v12718_v7 = vadd.f32 %v6071_v28, %v2847_v43  ;;  %v3087_v52 = vmul.f32 0.5, %v12574_v32 }
 0x3cf   : > { %v3568_v30 = vmul.f32 %v12673_v22, %v3536_v45  ;;  %v3791_v55 = vmul.f32 %v7538_v34, %v3631_v5  ;;  %v3183_v27 = vsel %vm3151_vm15, -1.0, %v8415_v24  ;;  %v12726_v14 = vadd.f32 %v6074_v15, %v2850_v3 }
 0x3d0   : > { %v3505_v26 = vmul.f32 %v12694_v40, %v3473_v36  ;;  %v12730_v16 = vpop.eup %7539  ;;  %v3184_v38 = vsel %vm3152_vm0, -1.0, %v8415_v24  ;;  %v12736_v29 = vmul.f32 0.70710677, %v12718_v7  ;;  %v3742_v4 = vmul.f32 1.442695, %v3698_v11 }
 0x3d1   : > { %v3600_v17 = vadd.f32 0.2548296, %v3568_v30  ;;  %v3823_v1 = vsub.f32 1.0, %v3791_v55  ;;  %v3378_v59 = vmul.f32 1.0614054, %v12730_v16  ;;  %v3699_v54 = vmul.f32 %v3667_v47, %v12690_v50  ;;  %v7542_v60 = vpop.eup %7541 }
 0x3d2   : > { %v3537_v56 = vadd.f32 -0.28449672, %v3505_v26  ;;  %v3886_v63 = vadd.f32 1.0, %v3854_v18  ;;  %v12745_v19 = vand.u32 2147483647, %v12736_v29  ;;  %vm3153_vm1 = vcmp.lt.f32.partialorder %v12621_v20, 0.0 }
 0x3d3   : > { %v12720_v35 = vpop.f32.mrb[32].mxu0  ;;  %v3632_v32 = vmul.f32 %v12673_v22, %v3600_v17  ;;  %v3855_v39 = vmul.f32 %v3823_v1, %v3183_v27  ;;  %v3410_v48 = vadd.f32 -1.4531521, %v3378_v59  ;;  %v12750_v51 = vmul.f32 0.70710677, %v12726_v14 }
 0x3d4   : > { %v12728_v25 = vpop.f32.mrb[33].mxu0  ;;  %v3569_v33 = vmul.f32 %v12694_v40, %v3537_v56  ;;  %v12747_v42 = vpop.eup %7543  ;;  %v3744_v23 = vmul.f32 1.442695, %v3699_v54  ;;  %v3252_v41 = vmul.f32 0.3275911, %v12745_v19  ;;  %v3918_v34 = vmul.f32 %v3886_v63, %v12666_v53 }
 0x3d5   : > { %v12741_v0 = vpop.f32.mrb[32].mxu1  ;;  %v5966_v12 = vpop.f32.mrb[34].mxu0  ;;  %v3792_v22 = vmul.f32 %v7542_v60, %v3632_v32  ;;  %v3887_v61 = vadd.f32 1.0, %v3855_v39  ;;  %v3379_v31 = vmul.f32 1.0614054, %v12747_v42  ;;  %v3442_v2 = vmul.f32 %v12730_v16, %v3410_v48 }
 0x3d6   : > { %v6076_v9 = vpop.f32.mrb[33].mxu1  ;;  %v5967_v50 = vpop.f32.mrb[35].mxu0  ;;  %v3601_v44 = vadd.f32 0.2548296, %v3569_v33  ;;  %7547 = vpow2.f32 %v3742_v4  ;;  %v3284_v15 = vadd.f32 1.0, %v3252_v41  ;;  %v3088_v53 = vmul.f32 0.5, %v12578_v6 }
 0x3d7   : > { %v6078_v8 = vpop.f32.mrb[34].mxu1  ;;  %v7546_v58 = vpop.eup %7545  ;;  %v3824_v21 = vsub.f32 1.0, %v3792_v22  ;;  %v3919_v45 = vmul.f32 %v3887_v61, %v3087_v52  ;;  %v3411_v5 = vadd.f32 -1.4531521, %v3379_v31  ;;  %v3474_v43 = vadd.f32 1.4214138, %v3442_v2 }
 0x3d8   : > { %v6079_v28 = vpop.f32.mrb[35].mxu1  ;;  %v3633_v62 = vmul.f32 %v12694_v40, %v3601_v44  ;;  %v12759_v30 = vand.u32 2147483647, %v12750_v51  ;;  %7549 = vrcp.f32 %v3284_v15  ;;  %v3089_v56 = vmul.f32 0.5, %v12608_v57  ;;  %v12785_v48 = vld [vmem:[%s13781_s2] ss:$0 sm:$0xff] }
 0x3d9   : > { %v3856_v47 = vmul.f32 %v3824_v21, %v3184_v38  ;;  %v3443_v18 = vmul.f32 %v12747_v42, %v3411_v5  ;;  %v3946_v55 = vpack.c.bf16 %v3919_v45, %v3918_v34  ;;  %v3506_v40 = vmul.f32 %v12730_v16, %v3474_v43 }
 0x3da   : > { %v3793_v3 = vmul.f32 %v7546_v58, %v3633_v62  ;;  %v3253_v52 = vmul.f32 0.3275911, %v12759_v30  ;;  %v3185_v38 = vsel %vm3153_vm1, -1.0, %v8415_v24  ;;  %7551 = vpow2.f32 %v3744_v23 }
 0x3db   : > { %v5969_v36 = vpop.f32.mrb[36].mxu0  ;;  %v3475_v59 = vadd.f32 1.4214138, %v3443_v18  ;;  %5732 = vmatmul.mubr.msk.bf16.gmra.mrb[80].mxu0 %vm3992_vm7, %v3946_v55  ;;  %5749 = vmatmul.mubr.msk.bf16.gmra.mrb[80].mxu1 %vm3992_vm7, %v3946_v55  ;;  %v3538_v4 = vadd.f32 -0.28449672, %v3506_v40  ;;  %v5965_v60 = vadd.f32 %v12728_v25, %v12720_v35  ;;  %v3888_v20 = vadd.f32 1.0, %v3856_v47 }
 0x3dc   : > { %v5970_v11 = vpop.f32.mrb[37].mxu0  ;;  %v3825_v32 = vsub.f32 1.0, %v3793_v3  ;;  %v3285_v54 = vadd.f32 1.0, %v3253_v52  ;;  %4136 = vmatprep.mubr.bf16.mxu0 %v8414_v10  ;;  %4329 = vmatprep.mubr.bf16.mxu1 %v8414_v10  ;;  %v6077_v33 = vadd.f32 %v6076_v9, %v12741_v0  ;;  %v5968_v25 = vadd.f32 %v5967_v50, %v5966_v12 }
 0x3dd   : > { %v6081_v26 = vpop.f32.mrb[36].mxu1  ;;  %v5972_v27 = vpop.f32.mrb[38].mxu0  ;;  %v3507_v39 = vmul.f32 %v12747_v42, %v3475_v59  ;;  %v3570_v22 = vmul.f32 %v12730_v16, %v3538_v4  ;;  %v2855_v35 = vadd.f32 %v12785_v48, %v5965_v60  ;;  %v3668_v31 = vsub.f32 0.0, %v12745_v19 }
 0x3de   : > { %v6082_v17 = vpop.f32.mrb[37].mxu1  ;;  %v5973_v1 = vpop.f32.mrb[39].mxu0  ;;  %v3857_v63 = vmul.f32 %v3825_v32, %v3185_v38  ;;  %7553 = vrcp.f32 %v3285_v54  ;;  %v6080_v58 = vadd.f32 %v6079_v28, %v6078_v8  ;;  %v2858_v0 = vadd.f32 %v12785_v48, %v5968_v25 }
 0x3df   : > { %v12771_v6 = vpop.f32.mrb[38].mxu1  ;;  %v3539_v44 = vadd.f32 -0.28449672, %v3507_v39  ;;  %v3602_v21 = vadd.f32 0.2548296, %v3570_v22  ;;  %v12789_v2 = vadd.f32 %v6077_v33, %v2855_v35  ;;  %v5971_v9 = vadd.f32 %v5970_v11, %v5969_v36 }
 0x3e0   : > { %v12777_v57 = vpop.f32.mrb[39].mxu1  ;;  %v3889_v61 = vadd.f32 1.0, %v3857_v63  ;;  %v3920_v23 = vmul.f32 %v3888_v20, %v3088_v53  ;;  %v6083_v45 = vadd.f32 %v6082_v17, %v6081_v26  ;;  %v7548_v62 = vpop.eup %7547  ;;  %vm3154_vm2 = vcmp.lt.f32.partialorder %v12663_v37, 0.0 }
 0x3e1   : > { %v3571_v34 = vmul.f32 %v12747_v42, %v3539_v44  ;;  %v3634_v12 = vmul.f32 %v12730_v16, %v3602_v21  ;;  %v12796_v50 = vmul.f32 0.70710677, %v12789_v2  ;;  %v12798_v8 = vadd.f32 %v6080_v58, %v2858_v0 }
 0x3e2   : > { %v3921_v41 = vmul.f32 %v3889_v61, %v3089_v56  ;;  %v2863_v5 = vadd.f32 %v12785_v48, %v5971_v9  ;;  %v5974_v43 = vadd.f32 %v5973_v1, %v5972_v27  ;;  %v12801_v15 = vpop.eup %7549  ;;  %v3700_v47 = vmul.f32 %v3668_v31, %v12745_v19 }
 0x3e3   : > { %v3603_v28 = vadd.f32 0.2548296, %v3571_v34  ;;  %v3794_v11 = vmul.f32 %v7548_v62, %v3634_v12  ;;  %v3669_v3 = vsub.f32 0.0, %v12759_v30  ;;  %v3222_v18 = vand.u32 2147483647, %v12796_v50 }
 0x3e4   : > { %v3947_v36 = vpack.c.bf16 %v3921_v41, %v3920_v23  ;;  %v3380_v55 = vmul.f32 1.0614054, %v12801_v15  ;;  %v12809_v26 = vmul.f32 0.70710677, %v12798_v8  ;;  %v7552_v27 = vpop.eup %7551  ;;  %v3186_v19 = vsel %vm3154_vm2, -1.0, %v8415_v24 }
 0x3e5   : > { %v3635_v16 = vmul.f32 %v12747_v42, %v3603_v28  ;;  %v3826_v53 = vsub.f32 1.0, %v3794_v11  ;;  %v3254_v40 = vmul.f32 0.3275911, %v3222_v18  ;;  %v12816_v52 = vadd.f32 %v6083_v45, %v2863_v5 }
 0x3e6   : > { %5733 = vmatmul.mubr.msk.bf16.gmra.mrb[84].mxu0 %vm3992_vm7, %v3947_v36  ;;  %5750 = vmatmul.mubr.msk.bf16.gmra.mrb[84].mxu1 %vm3992_vm7, %v3947_v36  ;;  %vm3155_vm3 = vcmp.lt.f32.partialorder %v12671_v49, 0.0  ;;  %v3412_v17 = vadd.f32 -1.4531521, %v3380_v55  ;;  %v12822_v1 = vand.u32 2147483647, %v12809_v26  ;;  %v3701_v32 = vmul.f32 %v3669_v3, %v12759_v30 }
 0x3e7   : > { %4146 = vmatprep.mubr.bf16.mxu0 %v8414_v10  ;;  %4339 = vmatprep.mubr.bf16.mxu1 %v8414_v10  ;;  %v3795_v42 = vmul.f32 %v7552_v27, %v3635_v16  ;;  %v3858_v38 = vmul.f32 %v3826_v53, %v3186_v19  ;;  %v3746_v37 = vmul.f32 1.442695, %v3700_v47  ;;  %v3286_v59 = vadd.f32 1.0, %v3254_v40 }
 0x3e8   : > { %v12824_v56 = vpop.eup %7553  ;;  %v3444_v54 = vmul.f32 %v12801_v15, %v3412_v17  ;;  %v3255_v20 = vmul.f32 0.3275911, %v12822_v1  ;;  %v3090_v49 = vmul.f32 0.5, %v12655_v46  ;;  %v3187_v39 = vsel %vm3155_vm3, -1.0, %v8415_v24 }
 0x3e9   : > { %v3827_v4 = vsub.f32 1.0, %v3795_v42  ;;  %v3381_v60 = vmul.f32 1.0614054, %v12824_v56  ;;  %v3890_v63 = vadd.f32 1.0, %v3858_v38  ;;  %7555 = vrcp.f32 %v3286_v59 }
 0x3ea   : > { %v3476_v22 = vadd.f32 1.4214138, %v3444_v54  ;;  %v3287_v25 = vadd.f32 1.0, %v3255_v20  ;;  %v3091_v30 = vmul.f32 0.5, %v12660_v13  ;;  %7557 = vpow2.f32 %v3746_v37 }
 0x3eb   : > { %v3859_v33 = vmul.f32 %v3827_v4, %v3187_v39  ;;  %v3413_v35 = vadd.f32 -1.4531521, %v3381_v60  ;;  %v3748_v61 = vmul.f32 1.442695, %v3701_v32  ;;  %v3670_v44 = vsub.f32 0.0, %v3222_v18 }
 0x3ec   : > { %v3508_v58 = vmul.f32 %v12801_v15, %v3476_v22  ;;  %7559 = vrcp.f32 %v3287_v25  ;;  %v12836_v46 = vmul.f32 0.70710677, %v12816_v52  ;;  %v2866_v0 = vadd.f32 %v12785_v48, %v5974_v43 }
 0x3ed   : > { %v3891_v31 = vadd.f32 1.0, %v3859_v33  ;;  %v3445_v21 = vmul.f32 %v12824_v56, %v3413_v35  ;;  %v6086_v9 = vadd.f32 %v12777_v57, %v12771_v6  ;;  %v3922_v23 = vmul.f32 %v3890_v63, %v3090_v49 }
 0x3ee   : > { %v3540_v13 = vadd.f32 -0.28449672, %v3508_v58  ;;  %7561 = vpow2.f32 %v3748_v61  ;;  %v12842_v45 = vand.u32 2147483647, %v12836_v46  ;;  %v3702_v5 = vmul.f32 %v3670_v44, %v3222_v18 }
 0x3ef   : > { %v3923_v41 = vmul.f32 %v3891_v31, %v3091_v30  ;;  %v3477_v34 = vadd.f32 1.4214138, %v3445_v21  ;;  %v12844_v62 = vadd.f32 %v6086_v9, %v2866_v0  ;;  %v3671_v43 = vsub.f32 0.0, %v12822_v1 }
 0x3f0   : > { %v3572_v12 = vmul.f32 %v12801_v15, %v3540_v13  ;;  %v3256_v6 = vmul.f32 0.3275911, %v12842_v45  ;;  %v12854_v11 = vmul.f32 0.5, %v12718_v7  ;;  %vm3156_vm4 = vcmp.lt.f32.partialorder %v12736_v29, 0.0 }
 0x3f1   : > { %v3509_v28 = vmul.f32 %v12824_v56, %v3477_v34  ;;  %v3948_v36 = vpack.c.bf16 %v3923_v41, %v3922_v23  ;;  %v12851_v57 = vmul.f32 0.70710677, %v12844_v62  ;;  %v12862_v16 = vmul.f32 0.5, %v12726_v14 }
 0x3f2   : > { %v3604_v47 = vadd.f32 0.2548296, %v3572_v12  ;;  %vm3157_vm5 = vcmp.lt.f32.partialorder %v12750_v51, 0.0  ;;  %v3288_v55 = vadd.f32 1.0, %v3256_v6  ;;  %v3750_v40 = vmul.f32 1.442695, %v3702_v5 }
 0x3f3   : > { %v3541_v3 = vadd.f32 -0.28449672, %v3509_v28  ;;  %5734 = vmatmul.mubr.msk.bf16.gmra.mrb[88].mxu0 %vm3992_vm7, %v3948_v36  ;;  %5751 = vmatmul.mubr.msk.bf16.gmra.mrb[88].mxu1 %vm3992_vm7, %v3948_v36  ;;  %v12859_v18 = vpop.eup %7555  ;;  %v12866_v27 = vand.u32 2147483647, %v12851_v57  ;;  %v3188_v17 = vsel %vm3156_vm4, -1.0, %v8415_v24  ;;  %v3703_v38 = vmul.f32 %v3671_v43, %v12822_v1 }
 0x3f4   : > { %4156 = vmatprep.mubr.bf16.mxu0 %v8414_v10  ;;  %4349 = vmatprep.mubr.bf16.mxu1 %v8414_v10  ;;  %v3636_v7 = vmul.f32 %v12801_v15, %v3604_v47  ;;  %v3382_v53 = vmul.f32 1.0614054, %v12859_v18  ;;  %v7558_v14 = vpop.eup %7557  ;;  %7563 = vrcp.f32 %v3288_v55  ;;  %v3189_v63 = vsel %vm3157_vm5, -1.0, %v8415_v24 }
 0x3f5   : > { %v3573_v19 = vmul.f32 %v12824_v56, %v3541_v3  ;;  %v3257_v37 = vmul.f32 0.3275911, %v12866_v27  ;;  %7565 = vpow2.f32 %v3750_v40  ;;  %v3752_v9 = vmul.f32 1.442695, %v3703_v38 }
 0x3f6   : > { %v12878_v59 = vpop.eup %7559  ;;  %v3796_v15 = vmul.f32 %v7558_v14, %v3636_v7  ;;  %v3414_v54 = vadd.f32 -1.4531521, %v3382_v53  ;;  %vm3158_vm6 = vcmp.lt.f32.partialorder %v12796_v50, 0.0  ;;  %v3673_v6 = vsub.f32 0.0, %v12866_v27 }
 0x3f7   : > { %v3605_v4 = vadd.f32 0.2548296, %v3573_v19  ;;  %v3383_v29 = vmul.f32 1.0614054, %v12878_v59  ;;  %v3289_v39 = vadd.f32 1.0, %v3257_v37  ;;  %v3190_v50 = vsel %vm3158_vm6, -1.0, %v8415_v24 }
 0x3f8   : > { %v3446_v35 = vmul.f32 %v12859_v18, %v3414_v54  ;;  %v7562_v61 = vpop.eup %7561  ;;  %v3828_v44 = vsub.f32 1.0, %v3796_v15  ;;  %vm3159_vm8 = vcmp.lt.f32.partialorder %v12809_v26, 0.0  ;;  %v3705_v15 = vmul.f32 %v3673_v6, %v12866_v27 }
 0x3f9   : > { %v3637_v22 = vmul.f32 %v12824_v56, %v3605_v4  ;;  %v3415_v31 = vadd.f32 -1.4531521, %v3383_v29  ;;  %7567 = vrcp.f32 %v3289_v39  ;;  %v3672_v56 = vsub.f32 0.0, %v12842_v45 }
 0x3fa   : > { %v5975_v42 = vpop.f32.mrb[40].mxu0  ;;  %v3478_v0 = vadd.f32 1.4214138, %v3446_v35  ;;  %v3860_v36 = vmul.f32 %v3828_v44, %v3188_v17  ;;  %7569 = vpow2.f32 %v3752_v9  ;;  %v3191_v27 = vsel %vm3159_vm8, -1.0, %v8415_v24 }
 0x3fb   : > { %v5976_v32 = vpop.f32.mrb[41].mxu0  ;;  %v6087_v20 = vpop.f32.mrb[40].mxu1  ;;  %v3797_v21 = vmul.f32 %v7562_v61, %v3637_v22  ;;  %v3447_v41 = vmul.f32 %v12878_v59, %v3415_v31  ;;  %v3704_v40 = vmul.f32 %v3672_v56, %v12842_v45  ;;  %v3756_v44 = vmul.f32 1.442695, %v3705_v15 }
 0x3fc   : > { %v5977_v60 = vadd.f32 %v5976_v32, %v5975_v42  ;;  %v5978_v49 = vpop.f32.mrb[42].mxu0  ;;  %v6088_v1 = vpop.f32.mrb[41].mxu1  ;;  %v3510_v28 = vmul.f32 %v12859_v18, %v3478_v0  ;;  %v3892_v37 = vadd.f32 1.0, %v3860_v36  ;;  %vm3160_vm9 = vcmp.lt.f32.partialorder %v12836_v46, 0.0 }
 0x3fd   : > { %v5979_v33 = vpop.f32.mrb[43].mxu0  ;;  %v6090_v30 = vpop.f32.mrb[42].mxu1  ;;  %v6089_v58 = vadd.f32 %v6088_v1, %v6087_v20  ;;  %v3829_v12 = vsub.f32 1.0, %v3797_v21  ;;  %v3479_v43 = vadd.f32 1.4214138, %v3447_v41  ;;  %vm3161_vm10 = vcmp.lt.f32.partialorder %v12851_v57, 0.0 }
 0x3fe   : > { %v2871_v25 = vadd.f32 %v12785_v48, %v5977_v60  ;;  %v6091_v51 = vpop.f32.mrb[43].mxu1  ;;  %v5980_v23 = vadd.f32 %v5979_v33, %v5978_v49  ;;  %v3542_v55 = vadd.f32 -0.28449672, %v3510_v28  ;;  %v12900_v19 = vpop.eup %7563  ;;  %v3754_v39 = vmul.f32 1.442695, %v3704_v40 }
 0x3ff   : > { %v6092_v34 = vadd.f32 %v6091_v51, %v6090_v30  ;;  %v3861_v3 = vmul.f32 %v3829_v12, %v3189_v63  ;;  %v3511_v53 = vmul.f32 %v12878_v59, %v3479_v43  ;;  %v3384_v38 = vmul.f32 1.0614054, %v12900_v19  ;;  %v7566_v54 = vpop.eup %7565 }
 0x400   : > { %v12889_v13 = vadd.f32 %v6089_v58, %v2871_v25  ;;  %v2874_v5 = vadd.f32 %v12785_v48, %v5980_v23  ;;  %v3574_v17 = vmul.f32 %v12859_v18, %v3542_v55  ;;  %v3924_v30 = vmul.f32 %v3892_v37, %v12854_v11 }
 0x401   : > { %v3893_v14 = vadd.f32 1.0, %v3861_v3  ;;  %v3543_v32 = vadd.f32 -0.28449672, %v3511_v53  ;;  %v3416_v20 = vadd.f32 -1.4531521, %v3384_v38 }
 0x402   : > { %v12896_v47 = vmul.f32 0.70710677, %v12889_v13  ;;  %v12898_v7 = vadd.f32 %v6092_v34, %v2874_v5  ;;  %v3606_v60 = vadd.f32 0.2548296, %v3574_v17 }
 0x403   : > { %v12916_v49 = vpop.eup %7567  ;;  %v3925_v63 = vmul.f32 %v3893_v14, %v12862_v16  ;;  %v3575_v29 = vmul.f32 %v12878_v59, %v3543_v32  ;;  %v3448_v22 = vmul.f32 %v12900_v19, %v3416_v20 }
 0x404   : > { %v12906_v42 = vand.u32 2147483647, %v12896_v47  ;;  %v12914_v45 = vmul.f32 0.70710677, %v12898_v7  ;;  %v3638_v33 = vmul.f32 %v12859_v18, %v3606_v60  ;;  %v3385_v35 = vmul.f32 1.0614054, %v12916_v49  ;;  %v7570_v41 = vpop.eup %7569 }
 0x405   : > { %v3607_v61 = vadd.f32 0.2548296, %v3575_v29  ;;  %v3480_v58 = vadd.f32 1.4214138, %v3448_v22  ;;  %v3949_v26 = vpack.c.bf16 %v3925_v63, %v3924_v30  ;;  %v3095_v29 = vmul.f32 0.5, %v12798_v8 }
 0x406   : > { %v3258_v4 = vmul.f32 0.3275911, %v12906_v42  ;;  %v3798_v31 = vmul.f32 %v7566_v54, %v3638_v33  ;;  %v3417_v51 = vadd.f32 -1.4531521, %v3385_v35  ;;  %v3227_v18 = vand.u32 2147483647, %v12914_v45 }
 0x407   : > { %v3639_v21 = vmul.f32 %v12878_v59, %v3607_v61  ;;  %v3512_v11 = vmul.f32 %v12900_v19, %v3480_v58  ;;  %5735 = vmatmul.mubr.msk.bf16.gmra.mrb[92].mxu0 %vm3992_vm7, %v3949_v26  ;;  %5752 = vmatmul.mubr.msk.bf16.gmra.mrb[92].mxu1 %vm3992_vm7, %v3949_v26  ;;  %v3674_v38 = vsub.f32 0.0, %v12906_v42  ;;  %v3094_v54 = vmul.f32 0.5, %v12789_v2 }
 0x408   : > { %v3290_v1 = vadd.f32 1.0, %v3258_v4  ;;  %v3830_v56 = vsub.f32 1.0, %v3798_v31  ;;  %v3449_v34 = vmul.f32 %v12916_v49, %v3417_v51  ;;  %v3259_v12 = vmul.f32 0.3275911, %v3227_v18  ;;  %4166 = vmatprep.mubr.bf16.mxu0 %v8414_v10  ;;  %4359 = vmatprep.mubr.bf16.mxu1 %v8414_v10 }
 0x409   : > { %v5981_v25 = vpop.f32.mrb[44].mxu0  ;;  %v3799_v36 = vmul.f32 %v7570_v41, %v3639_v21  ;;  %v3544_v55 = vadd.f32 -0.28449672, %v3512_v11  ;;  %v3706_v35 = vmul.f32 %v3674_v38, %v12906_v42  ;;  %v3097_v38 = vmul.f32 0.5, %v12844_v62 }
 0x40a   : > { %7571 = vrcp.f32 %v3290_v1  ;;  %v5982_v16 = vpop.f32.mrb[45].mxu0  ;;  %v6093_v9 = vpop.f32.mrb[44].mxu1  ;;  %v3862_v3 = vmul.f32 %v3830_v56, %v3190_v50  ;;  %v3481_v53 = vadd.f32 1.4214138, %v3449_v34  ;;  %v3291_v40 = vadd.f32 1.0, %v3259_v12 }
 0x40b   : > { %7573 = vpow2.f32 %v3754_v39  ;;  %v5983_v0 = vadd.f32 %v5982_v16, %v5981_v25  ;;  %v5984_v23 = vpop.f32.mrb[46].mxu0  ;;  %v6094_v28 = vpop.f32.mrb[45].mxu1  ;;  %v3831_v17 = vsub.f32 1.0, %v3799_v36  ;;  %v3576_v15 = vmul.f32 %v12900_v19, %v3544_v55 }
 0x40c   : > { %v5985_v5 = vpop.f32.mrb[47].mxu0  ;;  %7575 = vpow2.f32 %v3756_v44  ;;  %v6095_v43 = vadd.f32 %v6094_v28, %v6093_v9  ;;  %v6096_v6 = vpop.f32.mrb[46].mxu1  ;;  %v3513_v4 = vmul.f32 %v12916_v49, %v3481_v53  ;;  %v3675_v50 = vsub.f32 0.0, %v3227_v18 }
 0x40d   : > { %v2879_v59 = vadd.f32 %v12785_v48, %v5983_v0  ;;  %v6097_v14 = vpop.f32.mrb[47].mxu1  ;;  %v5986_v32 = vadd.f32 %v5985_v5, %v5984_v23  ;;  %7577 = vrcp.f32 %v3291_v40  ;;  %v3894_v60 = vadd.f32 1.0, %v3862_v3 }
 0x40e   : > { %v3863_v20 = vmul.f32 %v3831_v17, %v3191_v27  ;;  %v3608_v39 = vadd.f32 0.2548296, %v3576_v15  ;;  %v3545_v1 = vadd.f32 -0.28449672, %v3513_v4  ;;  %v3707_v61 = vmul.f32 %v3675_v50, %v3227_v18 }
 0x40f   : > { %v12937_v37 = vadd.f32 %v6095_v43, %v2879_v59  ;;  %v2882_v2 = vadd.f32 %v12785_v48, %v5986_v32  ;;  %v3926_v16 = vmul.f32 %v3894_v60, %v3094_v54  ;;  %v6098_v51 = vadd.f32 %v6097_v14, %v6096_v6 }
 0x410   : > { %v3895_v22 = vadd.f32 1.0, %v3863_v20  ;;  %v3640_v27 = vmul.f32 %v12900_v19, %v3608_v39  ;;  %v3577_v30 = vmul.f32 %v12916_v49, %v3545_v1  ;;  %v3758_v9 = vmul.f32 1.442695, %v3706_v35 }
 0x411   : > { %v12943_v63 = vmul.f32 0.70710677, %v12937_v37  ;;  %v12958_v41 = vadd.f32 %v6098_v51, %v2882_v2  ;;  %v3192_v56 = vsel %vm3160_vm9, -1.0, %v8415_v24  ;;  %v3760_v28 = vmul.f32 1.442695, %v3707_v61 }
 0x412   : > { %v3927_v31 = vmul.f32 %v3895_v22, %v3095_v29  ;;  %v3609_v42 = vadd.f32 0.2548296, %v3577_v30  ;;  %v3096_v53 = vmul.f32 0.5, %v12816_v52  ;;  %v3193_v32 = vsel %vm3161_vm10, -1.0, %v8415_v24 }
 0x413   : > { %v12951_v25 = vand.u32 2147483647, %v12943_v63  ;;  %v12967_v5 = vmul.f32 0.70710677, %v12958_v41  ;;  %vm3162_vm11 = vcmp.lt.f32.partialorder %v12896_v47, 0.0  ;;  %vm3163_vm12 = vcmp.lt.f32.partialorder %v12914_v45, 0.0 }
 0x414   : > { %v12947_v33 = vpop.eup %7571  ;;  %v3950_v19 = vpack.c.bf16 %v3927_v31, %v3926_v16  ;;  %v3641_v11 = vmul.f32 %v12916_v49, %v3609_v42  ;;  %vm3164_vm13 = vcmp.lt.f32.partialorder %v12943_v63, 0.0 }
 0x415   : > { %v3386_v8 = vmul.f32 1.0614054, %v12947_v33  ;;  %v7574_v44 = vpop.eup %7573  ;;  %v3260_v58 = vmul.f32 0.3275911, %v12951_v25  ;;  %v12978_v14 = vand.u32 2147483647, %v12967_v5 }
 0x416   : > { %v3800_v21 = vmul.f32 %v7574_v44, %v3640_v27  ;;  %v7576_v0 = vpop.eup %7575  ;;  %5736 = vmatmul.mubr.msk.bf16.gmra.mrb[96].mxu0 %vm3992_vm7, %v3950_v19  ;;  %5753 = vmatmul.mubr.msk.bf16.gmra.mrb[96].mxu1 %vm3992_vm7, %v3950_v19  ;;  %v3676_v52 = vsub.f32 0.0, %v12951_v25  ;;  %vm3165_vm14 = vcmp.lt.f32.partialorder %v12967_v5, 0.0 }
 0x417   : > { %v3418_v26 = vadd.f32 -1.4531521, %v3386_v8  ;;  %v3292_v23 = vadd.f32 1.0, %v3260_v58  ;;  %v12971_v46 = vpop.eup %7577  ;;  %v3801_v43 = vmul.f32 %v7576_v0, %v3641_v11  ;;  %4176 = vmatprep.mubr.bf16.mxu0 %v8414_v10  ;;  %4369 = vmatprep.mubr.bf16.mxu1 %v8414_v10  ;;  %v3261_v20 = vmul.f32 0.3275911, %v12978_v14 }
 0x418   : > { %v3832_v18 = vsub.f32 1.0, %v3800_v21  ;;  %v3387_v40 = vmul.f32 1.0614054, %v12971_v46  ;;  %v3708_v31 = vmul.f32 %v3676_v52, %v12951_v25 }
 0x419   : > { %v3450_v34 = vmul.f32 %v12947_v33, %v3418_v26  ;;  %v5987_v12 = vpop.f32.mrb[48].mxu0  ;;  %7579 = vrcp.f32 %v3292_v23  ;;  %v3833_v15 = vsub.f32 1.0, %v3801_v43  ;;  %v3293_v2 = vadd.f32 1.0, %v3261_v20 }
 0x41a   : > { %v5988_v36 = vpop.f32.mrb[49].mxu0  ;;  %v3864_v59 = vmul.f32 %v3832_v18, %v3192_v56  ;;  %v6099_v3 = vpop.f32.mrb[48].mxu1  ;;  %7581 = vpow2.f32 %v3758_v9  ;;  %v3419_v60 = vadd.f32 -1.4531521, %v3387_v40  ;;  %v3194_v20 = vsel %vm3162_vm11, -1.0, %v8415_v24 }
 0x41b   : > { %v3482_v49 = vadd.f32 1.4214138, %v3450_v34  ;;  %v5989_v6 = vadd.f32 %v5988_v36, %v5987_v12  ;;  %v5990_v55 = vpop.f32.mrb[50].mxu0  ;;  %v6100_v17 = vpop.f32.mrb[49].mxu1  ;;  %v3865_v22 = vmul.f32 %v3833_v15, %v3193_v32  ;;  %7583 = vpow2.f32 %v3760_v28 }
 0x41c   : > { %v5991_v50 = vpop.f32.mrb[51].mxu0  ;;  %v6102_v54 = vpop.f32.mrb[50].mxu1  ;;  %v3896_v1 = vadd.f32 1.0, %v3864_v59  ;;  %v6101_v35 = vadd.f32 %v6100_v17, %v6099_v3  ;;  %v3451_v57 = vmul.f32 %v12971_v46, %v3419_v60  ;;  %7585 = vrcp.f32 %v3293_v2 }
 0x41d   : > { %v3514_v4 = vmul.f32 %v12947_v33, %v3482_v49  ;;  %v2887_v29 = vadd.f32 %v12785_v48, %v5989_v6  ;;  %v6103_v39 = vpop.f32.mrb[51].mxu1  ;;  %v5992_v27 = vadd.f32 %v5991_v50, %v5990_v55  ;;  %v3897_v30 = vadd.f32 1.0, %v3865_v22 }
 0x41e   : > { %v6104_v44 = vadd.f32 %v6103_v39, %v6102_v54  ;;  %v3483_v16 = vadd.f32 1.4214138, %v3451_v57  ;;  %v3928_v51 = vmul.f32 %v3896_v1, %v3096_v53  ;;  %v3762_v34 = vmul.f32 1.442695, %v3708_v31 }
 0x41f   : > { %v3546_v62 = vadd.f32 -0.28449672, %v3514_v4  ;;  %v12990_v61 = vadd.f32 %v6101_v35, %v2887_v29  ;;  %v2890_v58 = vadd.f32 %v12785_v48, %v5992_v27  ;;  %v3929_v21 = vmul.f32 %v3897_v30, %v3097_v38 }
 0x420   : > { %v3515_v9 = vmul.f32 %v12971_v46, %v3483_v16  ;;  %v3677_v59 = vsub.f32 0.0, %v12978_v14  ;;  %7587 = vpow2.f32 %v3762_v34  ;;  %v3098_v2 = vmul.f32 0.5, %v12889_v13 }
 0x421   : > { %v3578_v8 = vmul.f32 %v12947_v33, %v3546_v62  ;;  %v12995_v26 = vmul.f32 0.70710677, %v12990_v61  ;;  %v13000_v23 = vadd.f32 %v6104_v44, %v2890_v58  ;;  %v3951_v25 = vpack.c.bf16 %v3929_v21, %v3928_v51 }
 0x422   : > { %v3547_v11 = vadd.f32 -0.28449672, %v3515_v9  ;;  %v3709_v50 = vmul.f32 %v3677_v59, %v12978_v14  ;;  %v3195_v31 = vsel %vm3163_vm12, -1.0, %v8415_v24 }
 0x423   : > { %v3610_v42 = vadd.f32 0.2548296, %v3578_v8  ;;  %v12997_v0 = vpop.eup %7579  ;;  %v13005_v12 = vand.u32 2147483647, %v12995_v26  ;;  %5737 = vmatmul.mubr.msk.bf16.gmra.mrb[100].mxu0 %vm3992_vm7, %v3951_v25  ;;  %5754 = vmatmul.mubr.msk.bf16.gmra.mrb[100].mxu1 %vm3992_vm7, %v3951_v25  ;;  %v13011_v43 = vmul.f32 0.70710677, %v13000_v23 }
 0x424   : > { %v3388_v56 = vmul.f32 1.0614054, %v12997_v0  ;;  %v7582_v18 = vpop.eup %7581  ;;  %4186 = vmatprep.mubr.bf16.mxu0 %v8414_v10  ;;  %4379 = vmatprep.mubr.bf16.mxu1 %v8414_v10  ;;  %v3764_v16 = vmul.f32 1.442695, %v3709_v50  ;;  %vm3166_vm15 = vcmp.lt.f32.partialorder %v12995_v26, 0.0 }
 0x425   : > { %v3642_v19 = vmul.f32 %v12947_v33, %v3610_v42  ;;  %v3579_v33 = vmul.f32 %v12971_v46, %v3547_v11  ;;  %v3262_v49 = vmul.f32 0.3275911, %v13005_v12  ;;  %v13020_v3 = vand.u32 2147483647, %v13011_v43  ;;  %v7584_v53 = vpop.eup %7583 }
 0x426   : > { %v3420_v36 = vadd.f32 -1.4531521, %v3388_v56  ;;  %v13024_v52 = vpop.eup %7585  ;;  %v3678_v13 = vsub.f32 0.0, %v13005_v12  ;;  %v3099_v11 = vmul.f32 0.5, %v12898_v7  ;;  %vm3167_vm0 = vcmp.lt.f32.partialorder %v13011_v43, 0.0 }
 0x427   : > { %v3802_v28 = vmul.f32 %v7582_v18, %v3642_v19  ;;  %v3611_v17 = vadd.f32 0.2548296, %v3579_v33  ;;  %v3294_v38 = vadd.f32 1.0, %v3262_v49  ;;  %v3263_v54 = vmul.f32 0.3275911, %v13020_v3 }
 0x428   : > { %v3452_v6 = vmul.f32 %v12997_v0, %v3420_v36  ;;  %v3389_v14 = vmul.f32 1.0614054, %v13024_v52  ;;  %v3679_v59 = vsub.f32 0.0, %v13020_v3 }
 0x429   : > { %v5993_v55 = vpop.f32.mrb[52].mxu0  ;;  %v3834_v40 = vsub.f32 1.0, %v3802_v28  ;;  %v3643_v29 = vmul.f32 %v12971_v46, %v3611_v17  ;;  %7589 = vrcp.f32 %v3294_v38  ;;  %v3295_v35 = vadd.f32 1.0, %v3263_v54 }
 0x42a   : > { %v5994_v32 = vpop.f32.mrb[53].mxu0  ;;  %v6105_v15 = vpop.f32.mrb[52].mxu1  ;;  %v3484_v4 = vadd.f32 1.4214138, %v3452_v6  ;;  %v3421_v44 = vadd.f32 -1.4531521, %v3389_v14  ;;  %v3711_v54 = vmul.f32 %v3679_v59, %v13020_v3 }
 0x42b   : > { %v5996_v60 = vpop.f32.mrb[54].mxu0  ;;  %v5995_v39 = vadd.f32 %v5994_v32, %v5993_v55  ;;  %v6106_v1 = vpop.f32.mrb[53].mxu1  ;;  %v3866_v27 = vmul.f32 %v3834_v40, %v3194_v20  ;;  %v3803_v30 = vmul.f32 %v7584_v53, %v3643_v29  ;;  %7591 = vrcp.f32 %v3295_v35 }
 0x42c   : > { %v5997_v22 = vpop.f32.mrb[55].mxu0  ;;  %v3516_v62 = vmul.f32 %v12997_v0, %v3484_v4  ;;  %v6108_v57 = vpop.f32.mrb[54].mxu1  ;;  %v6107_v58 = vadd.f32 %v6106_v1, %v6105_v15  ;;  %v3453_v42 = vmul.f32 %v13024_v52, %v3421_v44  ;;  %7593 = vpow2.f32 %v3764_v16 }
 0x42d   : > { %v2895_v47 = vadd.f32 %v12785_v48, %v5995_v39  ;;  %v6109_v8 = vpop.f32.mrb[55].mxu1  ;;  %v3835_v45 = vsub.f32 1.0, %v3803_v30  ;;  %v5998_v51 = vadd.f32 %v5997_v22, %v5996_v60  ;;  %v3898_v19 = vadd.f32 1.0, %v3866_v27  ;;  %v7588_v6 = vpop.eup %7587 }
 0x42e   : > { %v3548_v46 = vadd.f32 -0.28449672, %v3516_v62  ;;  %v6110_v9 = vadd.f32 %v6109_v8, %v6108_v57  ;;  %v3485_v28 = vadd.f32 1.4214138, %v3453_v42  ;;  %v3710_v40 = vmul.f32 %v3678_v13, %v13005_v12 }
 0x42f   : > { %v3867_v56 = vmul.f32 %v3835_v45, %v3195_v31  ;;  %v13039_v25 = vadd.f32 %v6107_v58, %v2895_v47  ;;  %v2898_v18 = vadd.f32 %v12785_v48, %v5998_v51  ;;  %v3930_v7 = vmul.f32 %v3898_v19, %v3098_v2 }
 0x430   : > { %v3580_v21 = vmul.f32 %v12997_v0, %v3548_v46  ;;  %v3517_v53 = vmul.f32 %v13024_v52, %v3485_v28  ;;  %v3766_v1 = vmul.f32 1.442695, %v3710_v40  ;;  %v3768_v46 = vmul.f32 1.442695, %v3711_v54 }
 0x431   : > { %v3899_v36 = vadd.f32 1.0, %v3867_v56  ;;  %v13045_v33 = vmul.f32 0.70710677, %v13039_v25  ;;  %v13047_v49 = vadd.f32 %v6110_v9, %v2898_v18  ;;  %v3196_v31 = vsel %vm3164_vm13, -1.0, %v8415_v24 }
 0x432   : > { %v3612_v34 = vadd.f32 0.2548296, %v3580_v21  ;;  %v3549_v4 = vadd.f32 -0.28449672, %v3517_v53  ;;  %v3197_v13 = vsel %vm3165_vm14, -1.0, %v8415_v24  ;;  %v3100_v54 = vmul.f32 0.5, %v12937_v37 }
 0x433   : > { %v13052_v17 = vpop.eup %7589  ;;  %v3931_v38 = vmul.f32 %v3899_v36, %v3099_v11  ;;  %v13055_v32 = vand.u32 2147483647, %v13045_v33  ;;  %vm3168_vm1 = vcmp.lt.f32.partialorder %v13045_v33, 0.0 }
 0x434   : > { %v3644_v55 = vmul.f32 %v12997_v0, %v3612_v34  ;;  %v3390_v50 = vmul.f32 1.0614054, %v13052_v17  ;;  %v13061_v0 = vmul.f32 0.70710677, %v13047_v49  ;;  %v3581_v29 = vmul.f32 %v13024_v52, %v3549_v4 }
 0x435   : > { %v3264_v60 = vmul.f32 0.3275911, %v13055_v32  ;;  %v3952_v20 = vpack.c.bf16 %v3931_v38, %v3930_v7  ;;  %v13063_v12 = vpop.eup %7591  ;;  %v3680_v40 = vsub.f32 0.0, %v13055_v32 }
 0x436   : > { %v3804_v15 = vmul.f32 %v7588_v6, %v3644_v55  ;;  %v3422_v39 = vadd.f32 -1.4531521, %v3390_v50  ;;  %v3391_v62 = vmul.f32 1.0614054, %v13063_v12  ;;  %v3613_v2 = vadd.f32 0.2548296, %v3581_v29  ;;  %v7594_v16 = vpop.eup %7593 }
 0x437   : > { %v3296_v14 = vadd.f32 1.0, %v3264_v60  ;;  %5738 = vmatmul.mubr.msk.bf16.gmra.mrb[104].mxu0 %vm3992_vm7, %v3952_v20  ;;  %5755 = vmatmul.mubr.msk.bf16.gmra.mrb[104].mxu1 %vm3992_vm7, %v3952_v20  ;;  %v13075_v44 = vand.u32 2147483647, %v13061_v0  ;;  %v3101_v29 = vmul.f32 0.5, %v12958_v41  ;;  %vm3169_vm2 = vcmp.lt.f32.partialorder %v13061_v0, 0.0 }
 0x438   : > { %v3836_v57 = vsub.f32 1.0, %v3804_v15  ;;  %v3454_v27 = vmul.f32 %v13052_v17, %v3422_v39  ;;  %4196 = vmatprep.mubr.bf16.mxu0 %v8414_v10  ;;  %4389 = vmatprep.mubr.bf16.mxu1 %v8414_v10  ;;  %v3423_v8 = vadd.f32 -1.4531521, %v3391_v62  ;;  %v3645_v45 = vmul.f32 %v13024_v52, %v3613_v2 }
 0x439   : > { %7595 = vrcp.f32 %v3296_v14  ;;  %v3265_v19 = vmul.f32 0.3275911, %v13075_v44 }
 0x43a   : > { %v5999_v22 = vpop.f32.mrb[56].mxu0  ;;  %v3486_v58 = vadd.f32 1.4214138, %v3454_v27  ;;  %7597 = vpow2.f32 %v3766_v1  ;;  %v3455_v9 = vmul.f32 %v13063_v12, %v3423_v8  ;;  %v3868_v18 = vmul.f32 %v3836_v57, %v3196_v31 }
 0x43b   : > { %v6000_v3 = vpop.f32.mrb[57].mxu0  ;;  %v6111_v35 = vpop.f32.mrb[56].mxu1  ;;  %v3805_v11 = vmul.f32 %v7594_v16, %v3645_v45  ;;  %7599 = vpow2.f32 %v3768_v46  ;;  %v3297_v28 = vadd.f32 1.0, %v3265_v19 }
 0x43c   : > { %v6002_v30 = vpop.f32.mrb[58].mxu0  ;;  %v6112_v47 = vpop.f32.mrb[57].mxu1  ;;  %v6001_v51 = vadd.f32 %v6000_v3, %v5999_v22  ;;  %v3518_v63 = vmul.f32 %v13052_v17, %v3486_v58  ;;  %v3487_v34 = vadd.f32 1.4214138, %v3455_v9  ;;  %v3900_v38 = vadd.f32 1.0, %v3868_v18 }
 0x43d   : > { %v6003_v21 = vpop.f32.mrb[59].mxu0  ;;  %v6114_v42 = vpop.f32.mrb[58].mxu1  ;;  %v6113_v36 = vadd.f32 %v6112_v47, %v6111_v35  ;;  %v3837_v59 = vsub.f32 1.0, %v3805_v11  ;;  %7601 = vrcp.f32 %v3297_v28  ;;  %v3712_v3 = vmul.f32 %v3680_v40, %v13055_v32 }
 0x43e   : > { %v6115_v56 = vpop.f32.mrb[59].mxu1  ;;  %v2903_v52 = vadd.f32 %v12785_v48, %v6001_v51  ;;  %v3550_v6 = vadd.f32 -0.28449672, %v3518_v63  ;;  %v6004_v5 = vadd.f32 %v6003_v21, %v6002_v30  ;;  %v3519_v53 = vmul.f32 %v13063_v12, %v3487_v34 }
 0x43f   : > { %v6116_v55 = vadd.f32 %v6115_v56, %v6114_v42  ;;  %v3869_v15 = vmul.f32 %v3837_v59, %v3197_v13  ;;  %v3932_v37 = vmul.f32 %v3900_v38, %v3100_v54  ;;  %v3681_v30 = vsub.f32 0.0, %v13075_v44 }
 0x440   : > { %v13090_v7 = vadd.f32 %v6113_v36, %v2903_v52  ;;  %v3582_v4 = vmul.f32 %v13052_v17, %v3550_v6  ;;  %v2906_v50 = vadd.f32 %v12785_v48, %v6004_v5  ;;  %v3551_v60 = vadd.f32 -0.28449672, %v3519_v53 }
 0x441   : > { %v3901_v39 = vadd.f32 1.0, %v3869_v15  ;;  %v3198_v51 = vsel %vm3166_vm15, -1.0, %v8415_v24  ;;  %v3199_v52 = vsel %vm3167_vm0, -1.0, %v8415_v24  ;;  %v3103_v15 = vmul.f32 0.5, %v13000_v23 }
 0x442   : > { %v13096_v20 = vmul.f32 0.70710677, %v13090_v7  ;;  %v3614_v1 = vadd.f32 0.2548296, %v3582_v4  ;;  %v13099_v22 = vadd.f32 %v6116_v55, %v2906_v50  ;;  %v3583_v14 = vmul.f32 %v13063_v12, %v3551_v60 }
 0x443   : > { %v13101_v62 = vpop.eup %7595  ;;  %v3933_v35 = vmul.f32 %v3901_v39, %v3101_v29  ;;  %v3102_v55 = vmul.f32 0.5, %v12990_v61  ;;  %v8180_v61 = vld [vmem:[%s13781_s2] ss:$0 sm:$0xff] }
 0x444   : > { %v13106_v48 = vand.u32 2147483647, %v13096_v20  ;;  %v3646_v57 = vmul.f32 %v13052_v17, %v3614_v1  ;;  %v3392_v2 = vmul.f32 1.0614054, %v13101_v62  ;;  %v7598_v41 = vpop.eup %7597  ;;  %v3615_v27 = vadd.f32 0.2548296, %v3583_v14 }
 0x445   : > { %v13114_v32 = vmul.f32 0.70710677, %v13099_v22  ;;  %v3953_v16 = vpack.c.bf16 %v3933_v35, %v3932_v37  ;;  %v7600_v31 = vpop.eup %7599  ;;  %v3770_v17 = vmul.f32 1.442695, %v3712_v3  ;;  %vm3170_vm3 = vcmp.lt.f32.partialorder %v13096_v20, 0.0 }
 0x446   : > { %v3266_v47 = vmul.f32 0.3275911, %v13106_v48  ;;  %v3806_v8 = vmul.f32 %v7598_v41, %v3646_v57  ;;  %v3424_v46 = vadd.f32 -1.4531521, %v3392_v2  ;;  %v3647_v45 = vmul.f32 %v13063_v12, %v3615_v27 }
 0x447   : > { %v13120_v42 = vand.u32 2147483647, %v13114_v32  ;;  %5739 = vmatmul.mubr.msk.bf16.gmra.mrb[108].mxu0 %vm3992_vm7, %v3953_v16  ;;  %5756 = vmatmul.mubr.msk.bf16.gmra.mrb[108].mxu1 %vm3992_vm7, %v3953_v16  ;;  %v13124_v13 = vpop.eup %7601  ;;  %v3713_v12 = vmul.f32 %v3681_v30, %v13075_v44  ;;  %v3682_v50 = vsub.f32 0.0, %v13106_v48  ;;  %v3202_v20 = vsel %vm3170_vm3, -1.0, %v8415_v24 }
 0x448   : > { %v3298_v58 = vadd.f32 1.0, %v3266_v47  ;;  %v3838_v21 = vsub.f32 1.0, %v3806_v8  ;;  %v3456_v26 = vmul.f32 %v13101_v62, %v3424_v46  ;;  %v3807_v9 = vmul.f32 %v7600_v31, %v3647_v45  ;;  %4206 = vmatprep.mubr.bf16.mxu0 %v8414_v10  ;;  %4399 = vmatprep.mubr.bf16.mxu1 %v8414_v10 }
 0x449   : > { %v3393_v18 = vmul.f32 1.0614054, %v13124_v13  ;;  %v3267_v11 = vmul.f32 0.3275911, %v13120_v42  ;;  %v3772_v6 = vmul.f32 1.442695, %v3713_v12  ;;  %v3714_v30 = vmul.f32 %v3682_v50, %v13106_v48 }
 0x44a   : > { %7603 = vrcp.f32 %v3298_v58  ;;  %v3870_v19 = vmul.f32 %v3838_v21, %v3198_v51  ;;  %v3488_v56 = vadd.f32 1.4214138, %v3456_v26  ;;  %v3839_v63 = vsub.f32 1.0, %v3807_v9  ;;  %v6005_v44 = vpop.f32.mrb[60].mxu0 }
 0x44b   : > { %7605 = vpow2.f32 %v3770_v17  ;;  %v3425_v34 = vadd.f32 -1.4531521, %v3393_v18  ;;  %v3299_v28 = vadd.f32 1.0, %v3267_v11  ;;  %v6006_v5 = vpop.f32.mrb[61].mxu0  ;;  %v3683_v2 = vsub.f32 0.0, %v13120_v42 }
 0x44c   : > { %v3520_v43 = vmul.f32 %v13101_v62, %v3488_v56  ;;  %v3902_v36 = vadd.f32 1.0, %v3870_v19  ;;  %v3871_v59 = vmul.f32 %v3839_v63, %v3199_v52  ;;  %v6008_v38 = vpop.f32.mrb[62].mxu0  ;;  %v6007_v54 = vadd.f32 %v6006_v5, %v6005_v44 }
 0x44d   : > { %v3457_v40 = vmul.f32 %v13124_v13, %v3425_v34  ;;  %7607 = vrcp.f32 %v3299_v28  ;;  %v6009_v60 = vpop.f32.mrb[63].mxu0  ;;  %v3715_v19 = vmul.f32 %v3683_v2, %v13120_v42  ;;  %v3200_v28 = vsel %vm3168_vm1, -1.0, %v8415_v24 }
 0x44e   : > { %v3552_v53 = vadd.f32 -0.28449672, %v3520_v43  ;;  %v3903_v4 = vadd.f32 1.0, %v3871_v59  ;;  %v6010_v1 = vadd.f32 %v6009_v60, %v6008_v38  ;;  %v3934_v14 = vmul.f32 %v3902_v36, %v3102_v55  ;;  %v6117_v35 = vpop.f32.mrb[60].mxu1 }
 0x44f   : > { %v3489_v39 = vadd.f32 1.4214138, %v3457_v40  ;;  %7609 = vpow2.f32 %v3772_v6  ;;  %v2911_v37 = vadd.f32 %v8180_v61, %v6007_v54  ;;  %v6118_v41 = vpop.f32.mrb[61].mxu1  ;;  %v3776_v33 = vmul.f32 1.442695, %v3715_v19 }
 0x450   : > { %v3584_v29 = vmul.f32 %v13101_v62, %v3552_v53  ;;  %v3935_v3 = vmul.f32 %v3903_v4, %v3103_v15  ;;  %v6119_v47 = vadd.f32 %v6118_v41, %v6117_v35  ;;  %v2914_v8 = vadd.f32 %v8180_v61, %v6010_v1  ;;  %v6120_v46 = vpop.f32.mrb[62].mxu1 }
 0x451   : > { %v3521_v23 = vmul.f32 %v13124_v13, %v3489_v39  ;;  %v6121_v58 = vpop.f32.mrb[63].mxu1  ;;  %v3105_v61 = vmul.f32 0.5, %v13047_v49  ;;  %vm3171_vm4 = vcmp.lt.f32.partialorder %v13114_v32, 0.0 }
 0x452   : > { %v3616_v57 = vadd.f32 0.2548296, %v3584_v29  ;;  %v3954_v16 = vpack.c.bf16 %v3935_v3, %v3934_v14  ;;  %v13149_v21 = vadd.f32 %v6119_v47, %v2911_v37  ;;  %v6122_v26 = vadd.f32 %v6121_v58, %v6120_v46 }
 0x453   : > { %v3553_v45 = vadd.f32 -0.28449672, %v3521_v23  ;;  %v3104_v14 = vmul.f32 0.5, %v13039_v25 }
 0x454   : > { %v13144_v27 = vpop.eup %7603  ;;  %v3648_v31 = vmul.f32 %v13101_v62, %v3616_v57  ;;  %5740 = vmatmul.mubr.msk.bf16.gmra.mrb[112].mxu0 %vm3992_vm7, %v3954_v16  ;;  %5757 = vmatmul.mubr.msk.bf16.gmra.mrb[112].mxu1 %vm3992_vm7, %v3954_v16  ;;  %v3774_v62 = vmul.f32 1.442695, %v3714_v30  ;;  %v13159_v56 = vmul.f32 0.70710677, %v13149_v21  ;;  %v13161_v18 = vadd.f32 %v6122_v26, %v2914_v8 }
 0x455   : > { %v3394_v17 = vmul.f32 1.0614054, %v13144_v27  ;;  %v7606_v51 = vpop.eup %7605  ;;  %v3585_v48 = vmul.f32 %v13124_v13, %v3553_v45  ;;  %4216 = vmatprep.mubr.bf16.mxu0 %v8414_v10  ;;  %4409 = vmatprep.mubr.bf16.mxu1 %v8414_v10 }
 0x456   : > { %v3808_v9 = vmul.f32 %v7606_v51, %v3648_v31  ;;  %v3236_v42 = vand.u32 2147483647, %v13159_v56  ;;  %7611 = vpow2.f32 %v3774_v62  ;;  %v13170_v38 = vmul.f32 0.70710677, %v13161_v18 }
 0x457   : > { %v3426_v12 = vadd.f32 -1.4531521, %v3394_v17  ;;  %v7608_v11 = vpop.eup %7607  ;;  %v3617_v52 = vadd.f32 0.2548296, %v3585_v48  ;;  %7613 = vpow2.f32 %v3776_v33  ;;  %v14778_v31 = vlaneseq }
 0x458   : > { %v3840_v63 = vsub.f32 1.0, %v3808_v9  ;;  %v3395_v34 = vmul.f32 1.0614054, %v7608_v11  ;;  %v3268_v5 = vmul.f32 0.3275911, %v3236_v42  ;;  %v3684_v16 = vsub.f32 0.0, %v3236_v42 }
 0x459   : > { %v3458_v43 = vmul.f32 %v13144_v27, %v3426_v12  ;;  %v3649_v44 = vmul.f32 %v13124_v13, %v3617_v52  ;;  %v7610_v59 = vpop.eup %7609  ;;  %v3201_v13 = vsel %vm3169_vm2, -1.0, %v8415_v24  ;;  %v3237_v1 = vand.u32 2147483647, %v13170_v38 }
 0x45a   : > { %v3427_v6 = vadd.f32 -1.4531521, %v3395_v34  ;;  %v3872_v55 = vmul.f32 %v3840_v63, %v3200_v28  ;;  %v3300_v4 = vadd.f32 1.0, %v3268_v5  ;;  %v3963_v45 = vshrl.u32 %v14778_v31, 7 }
 0x45b   : > { %v3490_v36 = vadd.f32 1.4214138, %v3458_v43  ;;  %v3809_v53 = vmul.f32 %v7610_v59, %v3649_v44  ;;  %v3269_v57 = vmul.f32 0.3275911, %v3237_v1  ;;  %v3685_v26 = vsub.f32 0.0, %v3237_v1 }
 0x45c   : > { %v3459_v15 = vmul.f32 %v7608_v11, %v3427_v6  ;;  %7615 = vrcp.f32 %v3300_v4  ;;  %v3904_v0 = vadd.f32 1.0, %v3872_v55  ;;  %v3716_v48 = vmul.f32 %v3684_v16, %v3236_v42 }
 0x45d   : > { %v3522_v40 = vmul.f32 %v13144_v27, %v3490_v36  ;;  %v3841_v50 = vsub.f32 1.0, %v3809_v53  ;;  %v3301_v47 = vadd.f32 1.0, %v3269_v57  ;;  %v3964_v12 = vsub.s32 0, %v3963_v45 }
 0x45e   : > { %v3491_v60 = vadd.f32 1.4214138, %v3459_v15  ;;  %v3936_v2 = vmul.f32 %v3904_v0, %v3104_v14  ;;  %v3968_v19 = vsub.s32 1, %v3963_v45  ;;  %v3972_v63 = vsub.s32 2, %v3963_v45 }
 0x45f   : > { %v3554_v54 = vadd.f32 -0.28449672, %v3522_v40  ;;  %v3873_v29 = vmul.f32 %v3841_v50, %v3201_v13  ;;  %7617 = vrcp.f32 %v3301_v47  ;;  %v3976_v34 = vsub.s32 3, %v3963_v45 }
 0x460   : > { %v3523_v3 = vmul.f32 %v7608_v11, %v3491_v60  ;;  %v7612_v8 = vpop.eup %7611  ;;  %v3717_v28 = vmul.f32 %v3685_v26, %v3237_v1  ;;  %v3778_v36 = vmul.f32 1.442695, %v3716_v48  ;;  %v3203_v33 = vsel %vm3171_vm4, -1.0, %v8415_v24 }
 0x461   : > { %v3586_v39 = vmul.f32 %v13144_v27, %v3554_v54  ;;  %v3905_v37 = vadd.f32 1.0, %v3873_v29  ;;  %v7614_v58 = vpop.eup %7613  ;;  %v3106_v15 = vmul.f32 0.5, %v13090_v7  ;;  %v3107_v13 = vmul.f32 0.5, %v13099_v22 }
 0x462   : > { %v3555_v23 = vadd.f32 -0.28449672, %v3523_v3  ;;  %v3780_v50 = vmul.f32 1.442695, %v3717_v28  ;;  %7619 = vpow2.f32 %v3778_v36  ;;  %vm3172_vm5 = vcmp.lt.f32.partialorder %v13159_v56, 0.0 }
 0x463   : > { %v3618_v35 = vadd.f32 0.2548296, %v3586_v39  ;;  %v3937_v41 = vmul.f32 %v3905_v37, %v3105_v61  ;;  %v3204_v36 = vsel %vm3172_vm5, -1.0, %v8415_v24  ;;  %vm3173_vm6 = vcmp.lt.f32.partialorder %v13170_v38, 0.0 }
 0x464   : > { %v3587_v46 = vmul.f32 %v7608_v11, %v3555_v23  ;;  %7621 = vpow2.f32 %v3780_v50 }
 0x465   : > { %v3650_v30 = vmul.f32 %v13144_v27, %v3618_v35  ;;  %v3955_v25 = vpack.c.bf16 %v3937_v41, %v3936_v2 }
 0x466   : > { %v3619_v49 = vadd.f32 0.2548296, %v3587_v46  ;;  %v13182_v27 = vpop.eup %7615 }
 0x467   : > { %v3810_v17 = vmul.f32 %v7612_v8, %v3650_v30  ;;  %5741 = vmatmul.mubr.msk.bf16.gmra.mrb[116].mxu0 %vm3992_vm7, %v3955_v25  ;;  %5758 = vmatmul.mubr.msk.bf16.gmra.mrb[116].mxu1 %vm3992_vm7, %v3955_v25  ;;  %v3396_v62 = vmul.f32 1.0614054, %v13182_v27 }
 0x468   : > { %v3651_v9 = vmul.f32 %v7608_v11, %v3619_v49  ;;  %4226 = vmatprep.mubr.bf16.mxu0 %v8414_v10  ;;  %4419 = vmatprep.mubr.bf16.mxu1 %v8414_v10  ;;  %v3960_v11 = vld [vmem:[%s13783_s4] sm:$0xf] }
 0x469   : > { %v3842_v51 = vsub.f32 1.0, %v3810_v17  ;;  %v3428_v42 = vadd.f32 -1.4531521, %v3396_v62  ;;  %v13194_v6 = vrot.slane %v3960_v11, %v3964_v12  ;;  %v13196_v53 = vrot.slane %v3960_v11, %v3972_v63  ;;  %v13200_v40 = vpop.eup %7617 }
 0x46a   : > { %v3811_v43 = vmul.f32 %v7614_v58, %v3651_v9  ;;  %v13198_v32 = vrot.slane %v3960_v11, %v3968_v19  ;;  %v13203_v54 = vrot.slane %v3960_v11, %v3976_v34  ;;  %v3397_v0 = vmul.f32 1.0614054, %v13200_v40 }
 0x46b   : > { %v3874_v52 = vmul.f32 %v3842_v51, %v3202_v20  ;;  %v3460_v59 = vmul.f32 %v13182_v27, %v3428_v42 }
 0x46c   : > { %v3843_v44 = vsub.f32 1.0, %v3811_v43  ;;  %v3429_v14 = vadd.f32 -1.4531521, %v3397_v0  ;;  %v7620_v43 = vpop.eup %7619 }
 0x46d   : > { %v3906_v5 = vadd.f32 1.0, %v3874_v52  ;;  %v3492_v4 = vadd.f32 1.4214138, %v3460_v59 }
 0x46e   : > { %v3875_v55 = vmul.f32 %v3843_v44, %v3203_v33  ;;  %v3461_v22 = vmul.f32 %v13200_v40, %v3429_v14  ;;  %v7622_v28 = vpop.eup %7621  ;;  %v3205_v14 = vsel %vm3173_vm6, -1.0, %v8415_v24 }
 0x46f   : > { %v3524_v29 = vmul.f32 %v13182_v27, %v3492_v4  ;;  %v3938_v39 = vmul.f32 %v3906_v5, %v3106_v15 }
 0x470   : > { %v3907_v60 = vadd.f32 1.0, %v3875_v55  ;;  %v3493_v49 = vadd.f32 1.4214138, %v3461_v22 }
 0x471   : > { %v3556_v37 = vadd.f32 -0.28449672, %v3524_v29 }
 0x472   : > { %v3939_v1 = vmul.f32 %v3907_v60, %v3107_v13  ;;  %v3525_v19 = vmul.f32 %v13200_v40, %v3493_v49 }
 0x473   : > { %v3588_v46 = vmul.f32 %v13182_v27, %v3556_v37 }
 0x474   : > { %v4088_v3 = vpop.f32.mrb[64].mxu0  ;;  %v4281_v61 = vpop.f32.mrb[64].mxu1  ;;  %v3956_v2 = vpack.c.bf16 %v3939_v1, %v3938_v39  ;;  %v3557_v11 = vadd.f32 -0.28449672, %v3525_v19  ;;  %v3108_v1 = vmul.f32 0.5, %v13149_v21 }
 0x475   : > { %v4089_v7 = vadd.f32 %v4088_v3, %v13194_v6  ;;  %v4282_v35 = vadd.f32 %v4281_v61, %v13196_v53  ;;  %v4090_v57 = vpop.f32.mrb[65].mxu0  ;;  %v4283_v23 = vpop.f32.mrb[65].mxu1  ;;  %v3620_v9 = vadd.f32 0.2548296, %v3588_v46 }
 0x476   : > { %v4091_v41 = vadd.f32 %v4090_v57, %v13198_v32  ;;  %v4284_v30 = vadd.f32 %v4283_v23, %v13203_v54  ;;  %v4092_v47 = vpop.f32.mrb[66].mxu0  ;;  %v4285_v8 = vpop.f32.mrb[66].mxu1  ;;  %5742 = vmatmul.mubr.msk.bf16.gmra.mrb[120].mxu0 %vm3992_vm7, %v3956_v2  ;;  %5759 = vmatmul.mubr.msk.bf16.gmra.mrb[120].mxu1 %vm3992_vm7, %v3956_v2 }
 0x477   : > { %v5761_v16 = vmul.f32 -1.442695, %v4089_v7  ;;  %v5763_v31 = vmul.f32 -1.442695, %v4282_v35  ;;  %v4093_v45 = vadd.f32 %v4092_v47, %v13194_v6  ;;  %v4094_v17 = vpop.f32.mrb[67].mxu0  ;;  %v4287_v25 = vpop.f32.mrb[67].mxu1  ;;  %v4286_v26 = vadd.f32 %v4285_v8, %v13196_v53  ;;  %4236 = vmatprep.mubr.bf16.mxu0 %v8414_v10  ;;  %4429 = vmatprep.mubr.bf16.mxu1 %v8414_v10 }
 0x478   : > { %v5762_v58 = vmul.f32 -1.442695, %v4091_v41  ;;  %v5764_v51 = vmul.f32 -1.442695, %v4284_v30  ;;  %v4095_v12 = vadd.f32 %v4094_v17, %v13198_v32  ;;  %v4288_v62 = vadd.f32 %v4287_v25, %v13203_v54 }
 0x479   : > { %7623 = vpow2.f32 %v5761_v16  ;;  %v5765_v48 = vmul.f32 -1.442695, %v4093_v45  ;;  %v5767_v20 = vmul.f32 -1.442695, %v4286_v26  ;;  %v3652_v63 = vmul.f32 %v13182_v27, %v3620_v9 }
 0x47a   : > { %7625 = vpow2.f32 %v5763_v31  ;;  %v5766_v52 = vmul.f32 -1.442695, %v4095_v12  ;;  %v5768_v34 = vmul.f32 -1.442695, %v4288_v62  ;;  %v3589_v10 = vmul.f32 %v13200_v40, %v3557_v11 }
 0x47b   : > { %7627 = vpow2.f32 %v5762_v58  ;;  %v3812_v42 = vmul.f32 %v7620_v43, %v3652_v63  ;;  %v3109_v35 = vmul.f32 0.5, %v13161_v18 }
 0x47c   : > { %7629 = vpow2.f32 %v5764_v51  ;;  %v3621_v33 = vadd.f32 0.2548296, %v3589_v10 }
 0x47d   : > { %7631 = vpow2.f32 %v5765_v48  ;;  %v3844_v44 = vsub.f32 1.0, %v3812_v42 }
 0x47e   : > { %7633 = vpow2.f32 %v5767_v20  ;;  %v3653_v59 = vmul.f32 %v13200_v40, %v3621_v33 }
 0x47f   : > { %7635 = vpow2.f32 %v5766_v52  ;;  %v3876_v27 = vmul.f32 %v3844_v44, %v3204_v36 }
 0x480   : > { %7637 = vpow2.f32 %v5768_v34  ;;  %v3813_v56 = vmul.f32 %v7622_v28, %v3653_v59 }
 0x481   : > { %v3908_v50 = vadd.f32 1.0, %v3876_v27 }
 0x482   : > { %v3845_v0 = vsub.f32 1.0, %v3813_v56 }
 0x483   : > { %v7624_v5 = vpop.eup %7623  ;;  %v3940_v7 = vmul.f32 %v3908_v50, %v3108_v1 }
 0x484   : > { %v7626_v55 = vpop.eup %7625  ;;  %v4824_v15 = vadd.f32 1.0, %v7624_v5  ;;  %v3877_v61 = vmul.f32 %v3845_v0, %v3205_v14 }
 0x485   : > { %v7628_v4 = vpop.eup %7627  ;;  %v4826_v13 = vadd.f32 1.0, %v7626_v55 }
 0x486   : > { %v7630_v60 = vpop.eup %7629  ;;  %7639 = vrcp.f32 %v4824_v15  ;;  %v4825_v29 = vadd.f32 1.0, %v7628_v4  ;;  %v4098_v23 = vpop.f32.mrb[68].mxu0  ;;  %v3909_v41 = vadd.f32 1.0, %v3877_v61  ;;  %v8181_v15 = vld [vmem:[%s8559_s28] sm:$0xff] }
 0x487   : > { %v7632_v39 = vpop.eup %7631  ;;  %7641 = vrcp.f32 %v4826_v13  ;;  %v4827_v40 = vadd.f32 1.0, %v7630_v60  ;;  %v4291_v22 = vpop.f32.mrb[68].mxu1  ;;  %v4099_v24 = vadd.f32 %v4098_v23, %v13194_v6 }
 0x488   : > { %v7634_v3 = vpop.eup %7633  ;;  %7643 = vrcp.f32 %v4825_v29  ;;  %v4828_v38 = vadd.f32 1.0, %v7632_v39  ;;  %v4100_v30 = vpop.f32.mrb[69].mxu0  ;;  %v4292_v46 = vadd.f32 %v4291_v22, %v13196_v53  ;;  %v3941_v45 = vmul.f32 %v3909_v41, %v3109_v35  ;;  %v8182_v39 = vld [vmem:[%s8559_s28 + $0x10] sm:$0xff]  ;;  %v8184_v22 = vld [vmem:[%s8559_s28 + $0x18] sm:$0xff] }
 0x489   : > { %v7636_v37 = vpop.eup %7635  ;;  %7645 = vrcp.f32 %v4827_v40  ;;  %v4830_v57 = vadd.f32 1.0, %v7634_v3  ;;  %v4293_v47 = vpop.f32.mrb[69].mxu1  ;;  %v4101_v16 = vadd.f32 %v4100_v30, %v13198_v32  ;;  %v5769_v17 = vmul.f32 -1.442695, %v4099_v24  ;;  %v8185_v30 = vld [vmem:[%s8559_s28 + $0x20] sm:$0xff] }
 0x48a   : > { %v7638_v2 = vpop.eup %7637  ;;  %7647 = vrcp.f32 %v4828_v38  ;;  %v4829_v21 = vadd.f32 1.0, %v7636_v37  ;;  %v4102_v31 = vpop.f32.mrb[70].mxu0  ;;  %v4294_v25 = vadd.f32 %v4293_v47, %v13203_v54  ;;  %v5771_v51 = vmul.f32 -1.442695, %v4292_v46  ;;  %v8183_v37 = vld [vmem:[%s8559_s28 + $0x8] sm:$0xff] }
 0x48b   : > { %7649 = vrcp.f32 %v4830_v57  ;;  %v4831_v8 = vadd.f32 1.0, %v7638_v2  ;;  %v4295_v18 = vpop.f32.mrb[70].mxu1  ;;  %v4104_v49 = vpop.f32.mrb[71].mxu0  ;;  %v5770_v26 = vmul.f32 -1.442695, %v4101_v16  ;;  %v4103_v9 = vadd.f32 %v4102_v31, %v13194_v6  ;;  %v8186_v16 = vld [vmem:[%s8559_s28 + $0x30] sm:$0xff] }
 0x48c   : > { %7651 = vrcp.f32 %v4829_v21  ;;  %v4297_v58 = vpop.f32.mrb[71].mxu1  ;;  %v5772_v48 = vmul.f32 -1.442695, %v4294_v25  ;;  %v4296_v12 = vadd.f32 %v4295_v18, %v13196_v53  ;;  %v4105_v19 = vadd.f32 %v4104_v49, %v13198_v32 }
 0x48d   : > { %7653 = vrcp.f32 %v4831_v8  ;;  %v5773_v20 = vmul.f32 -1.442695, %v4103_v9  ;;  %v4298_v62 = vadd.f32 %v4297_v58, %v13203_v54  ;;  %v3957_v63 = vpack.c.bf16 %v3941_v45, %v3940_v7 }
 0x48e   : > { %7655 = vpow2.f32 %v5769_v17  ;;  %v5775_v43 = vmul.f32 -1.442695, %v4296_v12  ;;  %v5774_v11 = vmul.f32 -1.442695, %v4105_v19  ;;  %v4108_v28 = vpop.f32.mrb[72].mxu0  ;;  %v4301_v44 = vpop.f32.mrb[72].mxu1 }
 0x48f   : > { %7657 = vpow2.f32 %v5771_v51  ;;  %v5776_v10 = vmul.f32 -1.442695, %v4298_v62  ;;  %5743 = vmatmul.mubr.msk.bf16.gmra.mrb[124].mxu0 %vm3992_vm7, %v3957_v63  ;;  %5760 = vmatmul.mubr.msk.bf16.gmra.mrb[124].mxu1 %vm3992_vm7, %v3957_v63  ;;  %v4109_v27 = vadd.f32 %v4108_v28, %v13194_v6  ;;  %v4302_v59 = vadd.f32 %v4301_v44, %v13196_v53  ;;  %v4110_v5 = vpop.f32.mrb[73].mxu0  ;;  %v4303_v55 = vpop.f32.mrb[73].mxu1  ;;  %v8187_v17 = vld [vmem:[%s8559_s28 + $0x28] sm:$0xff]  ;;  %v8188_v51 = vld [vmem:[%s8559_s28 + $0x38] sm:$0xff] }
 0x490   : > { %v7640_v52 = vpop.eup %7639  ;;  %7659 = vpow2.f32 %v5770_v26  ;;  %v4111_v13 = vadd.f32 %v4110_v5, %v13198_v32  ;;  %v13246_v60 = vpop.f32.mrb[74].mxu0  ;;  %v4304_v19 = vadd.f32 %v4303_v55, %v13203_v54 }
 0x491   : > { %v7642_v34 = vpop.eup %7641  ;;  %v5208_v42 = vadd.f32 1.0, %v7640_v52  ;;  %7661 = vpow2.f32 %v5772_v48  ;;  %v13248_v0 = vpop.f32.mrb[74].mxu1  ;;  %v5777_v40 = vmul.f32 -1.442695, %v4109_v27  ;;  %v5779_v57 = vmul.f32 -1.442695, %v4302_v59 }
 0x492   : > { %v7644_v36 = vpop.eup %7643  ;;  %v5210_v33 = vadd.f32 1.0, %v7642_v34  ;;  %7663 = vpow2.f32 %v5773_v20  ;;  %v13251_v3 = vpop.f32.mrb[75].mxu0  ;;  %v5778_v21 = vmul.f32 -1.442695, %v4111_v13  ;;  %v4113_v28 = vadd.f32 %v13246_v60, %v13194_v6 }
 0x493   : > { %v7646_v56 = vpop.eup %7645  ;;  %v5336_v4 = vmul.f32 %v8181_v15, %v5208_v42  ;;  %v5209_v50 = vadd.f32 1.0, %v7644_v36  ;;  %7665 = vpow2.f32 %v5775_v43  ;;  %v13253_v61 = vpop.f32.mrb[75].mxu1  ;;  %v4115_v27 = vadd.f32 %v13251_v3, %v13198_v32 }
 0x494   : > { %v7648_v29 = vpop.eup %7647  ;;  %v5338_v1 = vmul.f32 %v8182_v39, %v5210_v33  ;;  %v5211_v14 = vadd.f32 1.0, %v7646_v56  ;;  %7667 = vpow2.f32 %v5774_v11  ;;  %v4306_v33 = vadd.f32 %v13248_v0, %v13196_v53 }
 0x495   : > { %v7650_v38 = vpop.eup %7649  ;;  %5464 = vst [vmem:[%s13257_s12] sm:$0xff] %v5336_v4  ;;  %v5337_v7 = vmul.f32 %v8183_v37, %v5209_v50  ;;  %v5212_v35 = vadd.f32 1.0, %v7648_v29  ;;  %7669 = vpow2.f32 %v5776_v10  ;;  %v5780_v10 = vmul.f32 -1.442695, %v4304_v19 }
 0x496   : > { %v7652_v23 = vpop.eup %7651  ;;  %5466 = vst [vmem:[%s13257_s12 + $0x10] sm:$0xff] %v5338_v1  ;;  %v5339_v2 = vmul.f32 %v8184_v22, %v5211_v14  ;;  %v5214_v41 = vadd.f32 1.0, %v7650_v38  ;;  %7671 = vpow2.f32 %v5777_v40  ;;  %v4308_v15 = vadd.f32 %v13253_v61, %v13203_v54 }
 0x497   : > { %v7654_v24 = vpop.eup %7653  ;;  %5465 = vst [vmem:[%s13257_s12 + $0x8] sm:$0xff] %v5337_v7  ;;  %v5340_v47 = vmul.f32 %v8185_v30, %v5212_v35  ;;  %v5213_v8 = vadd.f32 1.0, %v7652_v23  ;;  %7673 = vpow2.f32 %v5779_v57  ;;  %v5781_v3 = vmul.f32 -1.442695, %v4113_v28 }
 0x498   : > { %v7656_v46 = vpop.eup %7655  ;;  %5467 = vst [vmem:[%s13257_s12 + $0x18] sm:$0xff] %v5339_v2  ;;  %v5342_v31 = vmul.f32 %v8186_v16, %v5214_v41  ;;  %v5215_v18 = vadd.f32 1.0, %v7654_v24  ;;  %7675 = vpow2.f32 %v5778_v21  ;;  %v5783_v61 = vmul.f32 -1.442695, %v4306_v33  ;;  %v8194_v33 = vld [vmem:[%s8559_s28 + $0x70] sm:$0xff] }
 0x499   : > { %v7658_v45 = vpop.eup %7657  ;;  %5468 = vst [vmem:[%s13257_s12 + $0x20] sm:$0xff] %v5340_v47  ;;  %v5341_v25 = vmul.f32 %v8187_v17, %v5213_v8  ;;  %v4832_v49 = vadd.f32 1.0, %v7656_v46  ;;  %v5782_v57 = vmul.f32 -1.442695, %v4115_v27  ;;  %v5784_v23 = vmul.f32 -1.442695, %v4308_v15 }
 0x49a   : > { %v7660_v58 = vpop.eup %7659  ;;  %5470 = vst [vmem:[%s13257_s12 + $0x30] sm:$0xff] %v5342_v31  ;;  %v5343_v26 = vmul.f32 %v8188_v51, %v5215_v18  ;;  %v4834_v9 = vadd.f32 1.0, %v7658_v45  ;;  %v8189_v31 = vld [vmem:[%s8559_s28 + $0x40] sm:$0xff] }
 0x49b   : > { %v7662_v48 = vpop.eup %7661  ;;  %5469 = vst [vmem:[%s13257_s12 + $0x28] sm:$0xff] %v5341_v25  ;;  %7677 = vrcp.f32 %v4832_v49  ;;  %v4833_v12 = vadd.f32 1.0, %v7660_v58  ;;  %v8190_v49 = vld [vmem:[%s8559_s28 + $0x50] sm:$0xff] }
 0x49c   : > { %v7664_v20 = vpop.eup %7663  ;;  %5471 = vst [vmem:[%s13257_s12 + $0x38] sm:$0xff] %v5343_v26  ;;  %7679 = vrcp.f32 %v4834_v9  ;;  %v4835_v62 = vadd.f32 1.0, %v7662_v48  ;;  %v8191_v48 = vld [vmem:[%s8559_s28 + $0x48] sm:$0xff] }
 0x49d   : > { %v7666_v63 = vpop.eup %7665  ;;  %7681 = vrcp.f32 %v4833_v12  ;;  %v4836_v52 = vadd.f32 1.0, %v7664_v20  ;;  %v4118_v59 = vpop.f32.mrb[76].mxu0 }
 0x49e   : > { %v7668_v43 = vpop.eup %7667  ;;  %7683 = vrcp.f32 %v4835_v62  ;;  %v4838_v11 = vadd.f32 1.0, %v7666_v63  ;;  %v4311_v5 = vpop.f32.mrb[76].mxu1  ;;  %v4119_v4 = vadd.f32 %v4118_v59, %v13194_v6  ;;  %v8192_v63 = vld [vmem:[%s8559_s28 + $0x58] sm:$0xff] }
 0x49f   : > { %v7670_v34 = vpop.eup %7669  ;;  %7685 = vrcp.f32 %v4836_v52  ;;  %v4837_v42 = vadd.f32 1.0, %v7668_v43  ;;  %v4120_v50 = vpop.f32.mrb[77].mxu0  ;;  %v4312_v0 = vadd.f32 %v4311_v5, %v13196_v53 }
 0x4a0   : > { %v7672_v44 = vpop.eup %7671  ;;  %7687 = vrcp.f32 %v4838_v11  ;;  %v4839_v36 = vadd.f32 1.0, %v7670_v34  ;;  %v4313_v13 = vpop.f32.mrb[77].mxu1  ;;  %v4121_v39 = vadd.f32 %v4120_v50, %v13198_v32  ;;  %v5785_v22 = vmul.f32 -1.442695, %v4119_v4 }
 0x4a1   : > { %v7674_v55 = vpop.eup %7673  ;;  %7689 = vrcp.f32 %v4837_v42  ;;  %v4840_v56 = vadd.f32 1.0, %v7672_v44  ;;  %v4122_v1 = vpop.f32.mrb[78].mxu0  ;;  %v4314_v38 = vadd.f32 %v4313_v13, %v13203_v54  ;;  %v5787_v21 = vmul.f32 -1.442695, %v4312_v0  ;;  %v8193_v42 = vld [vmem:[%s8559_s28 + $0x60] sm:$0xff] }
 0x4a2   : > { %v7676_v60 = vpop.eup %7675  ;;  %7691 = vrcp.f32 %v4839_v36  ;;  %v4842_v29 = vadd.f32 1.0, %v7674_v55  ;;  %v4315_v14 = vpop.f32.mrb[78].mxu1  ;;  %v5786_v24 = vmul.f32 -1.442695, %v4121_v39  ;;  %v4123_v46 = vadd.f32 %v4122_v1, %v13194_v6  ;;  %v8197_v1 = vld [vmem:[%s8559_s28 + $0x80] sm:$0xff] }
 0x4a3   : > { %7693 = vrcp.f32 %v4840_v56  ;;  %v4841_v40 = vadd.f32 1.0, %v7676_v60  ;;  %v4124_v37 = vpop.f32.mrb[79].mxu0  ;;  %v4317_v7 = vpop.f32.mrb[79].mxu1  ;;  %v5788_v8 = vmul.f32 -1.442695, %v4314_v38  ;;  %v4316_v17 = vadd.f32 %v4315_v14, %v13196_v53  ;;  %v8195_v56 = vld [vmem:[%s8559_s28 + $0x68] sm:$0xff] }
 0x4a4   : > { %7695 = vrcp.f32 %v4842_v29  ;;  %v4125_v26 = vadd.f32 %v4124_v37, %v13198_v32  ;;  %v4318_v20 = vadd.f32 %v4317_v7, %v13203_v54  ;;  %v5789_v11 = vmul.f32 -1.442695, %v4123_v46  ;;  %v8196_v60 = vld [vmem:[%s8559_s28 + $0x78] sm:$0xff] }
 0x4a5   : > { %v7678_v35 = vpop.eup %7677  ;;  %7697 = vrcp.f32 %v4841_v40  ;;  %v5791_v44 = vmul.f32 -1.442695, %v4316_v17 }
 0x4a6   : > { %v7680_v2 = vpop.eup %7679  ;;  %v5216_v41 = vadd.f32 1.0, %v7678_v35  ;;  %7699 = vpow2.f32 %v5780_v10  ;;  %v5790_v5 = vmul.f32 -1.442695, %v4125_v26  ;;  %v5792_v50 = vmul.f32 -1.442695, %v4318_v20 }
 0x4a7   : > { %v7682_v30 = vpop.eup %7681  ;;  %v5218_v47 = vadd.f32 1.0, %v7680_v2  ;;  %7701 = vpow2.f32 %v5781_v3  ;;  %v8199_v2 = vld [vmem:[%s8559_s28 + $0x88] sm:$0xff] }
 0x4a8   : > { %v7684_v16 = vpop.eup %7683  ;;  %v5344_v18 = vmul.f32 %v8189_v31, %v5216_v41  ;;  %v5217_v45 = vadd.f32 1.0, %v7682_v30  ;;  %7703 = vpow2.f32 %v5783_v61  ;;  %v8198_v61 = vld [vmem:[%s8559_s28 + $0x90] sm:$0xff] }
 0x4a9   : > { %v7686_v25 = vpop.eup %7685  ;;  %v5346_v58 = vmul.f32 %v8190_v49, %v5218_v47  ;;  %v5219_v51 = vadd.f32 1.0, %v7684_v16  ;;  %7705 = vpow2.f32 %v5782_v57 }
 0x4aa   : > { %v7688_v9 = vpop.eup %7687  ;;  %5472 = vst [vmem:[%s13257_s12 + $0x40] sm:$0xff] %v5344_v18  ;;  %v5345_v12 = vmul.f32 %v8191_v48, %v5217_v45  ;;  %v5220_v19 = vadd.f32 1.0, %v7686_v25  ;;  %7707 = vpow2.f32 %v5784_v23 }
 0x4ab   : > { %v7690_v62 = vpop.eup %7689  ;;  %5474 = vst [vmem:[%s13257_s12 + $0x50] sm:$0xff] %v5346_v58  ;;  %v5347_v52 = vmul.f32 %v8192_v63, %v5219_v51  ;;  %v5222_v43 = vadd.f32 1.0, %v7688_v9  ;;  %7709 = vpow2.f32 %v5785_v22 }
 0x4ac   : > { %v7692_v34 = vpop.eup %7691  ;;  %5473 = vst [vmem:[%s13257_s12 + $0x48] sm:$0xff] %v5345_v12  ;;  %v5348_v10 = vmul.f32 %v8193_v42, %v5220_v19  ;;  %v5221_v28 = vadd.f32 1.0, %v7690_v62  ;;  %7711 = vpow2.f32 %v5787_v21 }
 0x4ad   : > { %v7694_v36 = vpop.eup %7693  ;;  %5475 = vst [vmem:[%s13257_s12 + $0x58] sm:$0xff] %v5347_v52  ;;  %v5350_v27 = vmul.f32 %v8194_v33, %v5222_v43  ;;  %v5223_v59 = vadd.f32 1.0, %v7692_v34  ;;  %7713 = vpow2.f32 %v5786_v24 }
 0x4ae   : > { %v7696_v55 = vpop.eup %7695  ;;  %5476 = vst [vmem:[%s13257_s12 + $0x60] sm:$0xff] %v5348_v10  ;;  %v5349_v15 = vmul.f32 %v8195_v56, %v5221_v28  ;;  %v5224_v4 = vadd.f32 1.0, %v7694_v36  ;;  %7715 = vpow2.f32 %v5788_v8  ;;  %v4128_v3 = vpop.f32.mrb[80].mxu0 }
 0x4af   : > { %v7698_v13 = vpop.eup %7697  ;;  %5478 = vst [vmem:[%s13257_s12 + $0x70] sm:$0xff] %v5350_v27  ;;  %v5351_v29 = vmul.f32 %v8196_v60, %v5223_v59  ;;  %v5226_v0 = vadd.f32 1.0, %v7696_v55  ;;  %7717 = vpow2.f32 %v5789_v11  ;;  %v4321_v38 = vpop.f32.mrb[80].mxu1  ;;  %v4129_v45 = vadd.f32 %v4128_v3, %v13194_v6 }
 0x4b0   : > { %v7700_v39 = vpop.eup %7699  ;;  %5477 = vst [vmem:[%s13257_s12 + $0x68] sm:$0xff] %v5349_v15  ;;  %v5352_v14 = vmul.f32 %v8197_v1, %v5224_v4  ;;  %v5225_v40 = vadd.f32 1.0, %v7698_v13  ;;  %7719 = vpow2.f32 %v5791_v44  ;;  %v4130_v57 = vpop.f32.mrb[81].mxu0  ;;  %v4322_v9 = vadd.f32 %v4321_v38, %v13196_v53 }
 0x4b1   : > { %v7702_v37 = vpop.eup %7701  ;;  %5479 = vst [vmem:[%s13257_s12 + $0x78] sm:$0xff] %v5351_v29  ;;  %v5354_v7 = vmul.f32 %v8198_v61, %v5226_v0  ;;  %v4843_v35 = vadd.f32 1.0, %v7700_v39  ;;  %7721 = vpow2.f32 %v5790_v5  ;;  %v4323_v23 = vpop.f32.mrb[81].mxu1  ;;  %v5793_v19 = vmul.f32 -1.442695, %v4129_v45 }
 0x4b2   : > { %v7704_v22 = vpop.eup %7703  ;;  %5480 = vst [vmem:[%s13257_s12 + $0x80] sm:$0xff] %v5352_v14  ;;  %v5353_v41 = vmul.f32 %v8199_v2, %v5225_v40  ;;  %v4844_v21 = vadd.f32 1.0, %v7702_v37  ;;  %7723 = vpow2.f32 %v5792_v50  ;;  %v4132_v24 = vpop.f32.mrb[82].mxu0  ;;  %v4131_v20 = vadd.f32 %v4130_v57, %v13198_v32 }
 0x4b3   : > { %v4325_v30 = vpop.f32.mrb[82].mxu1  ;;  %v7706_v47 = vpop.eup %7705  ;;  %5482 = vst [vmem:[%s13257_s12 + $0x90] sm:$0xff] %v5354_v7  ;;  %7725 = vrcp.f32 %v4843_v35  ;;  %v4846_v8 = vadd.f32 1.0, %v7704_v22  ;;  %v4324_v52 = vadd.f32 %v4323_v23, %v13203_v54  ;;  %v4133_v43 = vadd.f32 %v4132_v24, %v13194_v6  ;;  %v8200_v22 = vld [vmem:[%s8559_s28 + $0x98] sm:$0xff] }
 0x4b4   : > { %v4134_v46 = vpop.f32.mrb[83].mxu0  ;;  %v4327_v16 = vpop.f32.mrb[83].mxu1  ;;  %5481 = vst [vmem:[%s13257_s12 + $0x88] sm:$0xff] %v5353_v41  ;;  %7727 = vrcp.f32 %v4844_v21  ;;  %v4845_v18 = vadd.f32 1.0, %v7706_v47  ;;  %v4326_v42 = vadd.f32 %v4325_v30, %v13196_v53  ;;  %v5795_v27 = vmul.f32 -1.442695, %v4322_v9 }
 0x4b5   : > { %v7708_v31 = vpop.eup %7707  ;;  %7729 = vrcp.f32 %v4846_v8  ;;  %v4135_v10 = vadd.f32 %v4134_v46, %v13198_v32  ;;  %v4328_v59 = vadd.f32 %v4327_v16, %v13203_v54  ;;  %v5794_v4 = vmul.f32 -1.442695, %v4131_v20  ;;  %v8201_v30 = vld [vmem:[%s8559_s28 + $0xa0] sm:$0xff] }
 0x4b6   : > { %v7710_v17 = vpop.eup %7709  ;;  %v4847_v25 = vadd.f32 1.0, %v7708_v31  ;;  %7731 = vrcp.f32 %v4845_v18  ;;  %v5796_v0 = vmul.f32 -1.442695, %v4324_v52  ;;  %v5797_v39 = vmul.f32 -1.442695, %v4133_v43  ;;  %v8202_v31 = vld [vmem:[%s8559_s28 + $0xb0] sm:$0xff] }
 0x4b7   : > { %v7712_v49 = vpop.eup %7711  ;;  %v4848_v58 = vadd.f32 1.0, %v7710_v17  ;;  %v5799_v3 = vmul.f32 -1.442695, %v4326_v42  ;;  %v5798_v38 = vmul.f32 -1.442695, %v4135_v10  ;;  %v8206_v42 = vld [vmem:[%s8559_s28 + $0xd0] sm:$0xff] }
 0x4b8   : > { %v7714_v51 = vpop.eup %7713  ;;  %7733 = vrcp.f32 %v4847_v25  ;;  %v4850_v26 = vadd.f32 1.0, %v7712_v49  ;;  %v5800_v35 = vmul.f32 -1.442695, %v4328_v59  ;;  %v8203_v49 = vld [vmem:[%s8559_s28 + $0xa8] sm:$0xff] }
 0x4b9   : > { %v7716_v48 = vpop.eup %7715  ;;  %7735 = vrcp.f32 %v4848_v58  ;;  %v4849_v12 = vadd.f32 1.0, %v7714_v51  ;;  %v4138_v28 = vpop.f32.mrb[84].mxu0 }
 0x4ba   : > { %v7718_v62 = vpop.eup %7717  ;;  %7737 = vrcp.f32 %v4850_v26  ;;  %v4851_v63 = vadd.f32 1.0, %v7716_v48  ;;  %v4331_v44 = vpop.f32.mrb[84].mxu1  ;;  %v4139_v57 = vadd.f32 %v4138_v28, %v13194_v6  ;;  %v8204_v48 = vld [vmem:[%s8559_s28 + $0xb8] sm:$0xff] }
 0x4bb   : > { %v7720_v11 = vpop.eup %7719  ;;  %7739 = vrcp.f32 %v4849_v12  ;;  %v4852_v34 = vadd.f32 1.0, %v7718_v62  ;;  %v4140_v5 = vpop.f32.mrb[85].mxu0  ;;  %v4332_v21 = vadd.f32 %v4331_v44, %v13196_v53 }
 0x4bc   : > { %v7722_v36 = vpop.eup %7721  ;;  %7741 = vrcp.f32 %v4851_v63  ;;  %v4854_v33 = vadd.f32 1.0, %v7720_v11  ;;  %v4333_v55 = vpop.f32.mrb[85].mxu1  ;;  %v4141_v46 = vadd.f32 %v4140_v5, %v13198_v32  ;;  %v5801_v26 = vmul.f32 -1.442695, %v4139_v57  ;;  %v8205_v63 = vld [vmem:[%s8559_s28 + $0xc0] sm:$0xff] }
 0x4bd   : > { %v7724_v56 = vpop.eup %7723  ;;  %7743 = vrcp.f32 %v4852_v34  ;;  %v4853_v15 = vadd.f32 1.0, %v7722_v36  ;;  %v4142_v50 = vpop.f32.mrb[86].mxu0  ;;  %v4334_v17 = vadd.f32 %v4333_v55, %v13203_v54  ;;  %v5803_v11 = vmul.f32 -1.442695, %v4332_v21 }
 0x4be   : > { %v13320_v13 = vpop.f32.mrb[86].mxu1  ;;  %v7726_v60 = vpop.eup %7725  ;;  %7745 = vrcp.f32 %v4854_v33  ;;  %v4855_v29 = vadd.f32 1.0, %v7724_v56  ;;  %v4143_v20 = vadd.f32 %v4142_v50, %v13194_v6  ;;  %v5802_v44 = vmul.f32 -1.442695, %v4141_v46  ;;  %v8207_v33 = vld [vmem:[%s8559_s28 + $0xc8] sm:$0xff]  ;;  %v8208_v56 = vld [vmem:[%s8559_s28 + $0xd8] sm:$0xff] }
 0x4bf   : > { %v13322_v1 = vpop.f32.mrb[87].mxu0  ;;  %v7728_v14 = vpop.eup %7727  ;;  %v5227_v40 = vadd.f32 1.0, %v7726_v60  ;;  %7747 = vrcp.f32 %v4853_v15  ;;  %v5804_v5 = vmul.f32 -1.442695, %v4334_v17  ;;  %v8212_v46 = vld [vmem:[%s8559_s28 + $0xf8] sm:$0xff] }
 0x4c0   : > { %v13324_v37 = vpop.f32.mrb[87].mxu1  ;;  %v7730_v61 = vpop.eup %7729  ;;  %v5228_v7 = vadd.f32 1.0, %v7728_v14  ;;  %7749 = vrcp.f32 %v4855_v29  ;;  %v5805_v50 = vmul.f32 -1.442695, %v4143_v20 }
 0x4c1   : > { %v7732_v23 = vpop.eup %7731  ;;  %v5355_v2 = vmul.f32 %v8200_v22, %v5227_v40  ;;  %v5230_v41 = vadd.f32 1.0, %v7730_v61  ;;  %7751 = vpow2.f32 %v5793_v19 }
 0x4c2   : > { %v7734_v24 = vpop.eup %7733  ;;  %v5356_v47 = vmul.f32 %v8201_v30, %v5228_v7  ;;  %v5229_v8 = vadd.f32 1.0, %v7732_v23  ;;  %7753 = vpow2.f32 %v5795_v27  ;;  %v8210_v7 = vld [vmem:[%s8559_s28 + $0xf0] sm:$0xff] }
 0x4c3   : > { %v7736_v16 = vpop.eup %7735  ;;  %5483 = vst [vmem:[%s13257_s12 + $0x98] sm:$0xff] %v5355_v2  ;;  %v5358_v18 = vmul.f32 %v8202_v31, %v5230_v41  ;;  %v5231_v45 = vadd.f32 1.0, %v7734_v24  ;;  %7755 = vpow2.f32 %v5794_v4  ;;  %v8211_v41 = vld [vmem:[%s8559_s28 + $0xe8] sm:$0xff] }
 0x4c4   : > { %v7738_v25 = vpop.eup %7737  ;;  %5484 = vst [vmem:[%s13257_s12 + $0xa0] sm:$0xff] %v5356_v47  ;;  %v5357_v58 = vmul.f32 %v8203_v49, %v5229_v8  ;;  %v5232_v51 = vadd.f32 1.0, %v7736_v16  ;;  %7757 = vpow2.f32 %v5796_v0 }
 0x4c5   : > { %v7740_v9 = vpop.eup %7739  ;;  %5486 = vst [vmem:[%s13257_s12 + $0xb0] sm:$0xff] %v5358_v18  ;;  %v5359_v12 = vmul.f32 %v8204_v48, %v5231_v45  ;;  %v5234_v19 = vadd.f32 1.0, %v7738_v25  ;;  %7759 = vpow2.f32 %v5797_v39  ;;  %v8209_v39 = vld [vmem:[%s8559_s28 + $0xe0] sm:$0xff] }
 0x4c6   : > { %v7742_v62 = vpop.eup %7741  ;;  %5485 = vst [vmem:[%s13257_s12 + $0xa8] sm:$0xff] %v5357_v58  ;;  %v5360_v52 = vmul.f32 %v8205_v63, %v5232_v51  ;;  %v5233_v43 = vadd.f32 1.0, %v7740_v9  ;;  %7761 = vpow2.f32 %v5799_v3  ;;  %v4148_v60 = vpop.f32.mrb[88].mxu0  ;;  %v4336_v9 = vadd.f32 %v13320_v13, %v13196_v53 }
 0x4c7   : > { %v7744_v34 = vpop.eup %7743  ;;  %5487 = vst [vmem:[%s13257_s12 + $0xb8] sm:$0xff] %v5359_v12  ;;  %v5362_v10 = vmul.f32 %v8206_v42, %v5234_v19  ;;  %v5235_v28 = vadd.f32 1.0, %v7742_v62  ;;  %7763 = vpow2.f32 %v5798_v38  ;;  %v4341_v29 = vpop.f32.mrb[88].mxu1  ;;  %v4145_v62 = vadd.f32 %v13322_v1, %v13198_v32 }
 0x4c8   : > { %v7746_v36 = vpop.eup %7745  ;;  %5488 = vst [vmem:[%s13257_s12 + $0xc0] sm:$0xff] %v5360_v52  ;;  %v5361_v27 = vmul.f32 %v8207_v33, %v5233_v43  ;;  %v5236_v59 = vadd.f32 1.0, %v7744_v34  ;;  %7765 = vpow2.f32 %v5800_v35  ;;  %v4150_v3 = vpop.f32.mrb[89].mxu0  ;;  %v4338_v63 = vadd.f32 %v13324_v37, %v13203_v54 }
 0x4c9   : > { %v7748_v55 = vpop.eup %7747  ;;  %5490 = vst [vmem:[%s13257_s12 + $0xd0] sm:$0xff] %v5362_v10  ;;  %v5363_v15 = vmul.f32 %v8208_v56, %v5235_v28  ;;  %v5238_v4 = vadd.f32 1.0, %v7746_v36  ;;  %7767 = vpow2.f32 %v5801_v26  ;;  %v4343_v38 = vpop.f32.mrb[89].mxu1  ;;  %v4342_v34 = vadd.f32 %v4341_v29, %v13196_v53 }
 0x4ca   : > { %v7750_v0 = vpop.eup %7749  ;;  %5489 = vst [vmem:[%s13257_s12 + $0xc8] sm:$0xff] %v5361_v27  ;;  %v5364_v14 = vmul.f32 %v8209_v39, %v5236_v59  ;;  %v5237_v40 = vadd.f32 1.0, %v7748_v55  ;;  %7769 = vpow2.f32 %v5803_v11  ;;  %v13351_v23 = vpop.f32.mrb[90].mxu0  ;;  %v4149_v11 = vadd.f32 %v4148_v60, %v13194_v6 }
 0x4cb   : > { %v7752_v61 = vpop.eup %7751  ;;  %5491 = vst [vmem:[%s13257_s12 + $0xd8] sm:$0xff] %v5363_v15  ;;  %v5366_v35 = vmul.f32 %v8210_v7, %v5238_v4  ;;  %v5239_v57 = vadd.f32 1.0, %v7750_v0  ;;  %7771 = vpow2.f32 %v5802_v44  ;;  %v13353_v22 = vpop.f32.mrb[90].mxu1  ;;  %v5807_v10 = vmul.f32 -1.442695, %v4336_v9  ;;  %v8218_v9 = vld [vmem:[%s8559_s28 + $0x130] sm:$0xff] }
 0x4cc   : > { %v7754_v2 = vpop.eup %7753  ;;  %5492 = vst [vmem:[%s13257_s12 + $0xe0] sm:$0xff] %v5364_v14  ;;  %v5365_v21 = vmul.f32 %v8211_v41, %v5237_v40  ;;  %v4856_v24 = vadd.f32 1.0, %v7752_v61  ;;  %7773 = vpow2.f32 %v5804_v5  ;;  %v13357_v30 = vpop.f32.mrb[91].mxu0  ;;  %v4151_v36 = vadd.f32 %v4150_v3, %v13198_v32 }
 0x4cd   : > { %v13359_v47 = vpop.f32.mrb[91].mxu1  ;;  %v7756_v8 = vpop.eup %7755  ;;  %5494 = vst [vmem:[%s13257_s12 + $0xf0] sm:$0xff] %v5366_v35  ;;  %v5367_v16 = vmul.f32 %v8212_v46, %v5239_v57  ;;  %v4858_v31 = vadd.f32 1.0, %v7754_v2  ;;  %7775 = vpow2.f32 %v5805_v50  ;;  %v4344_v1 = vadd.f32 %v4343_v38, %v13203_v54  ;;  %v8213_v38 = vld [vmem:[%s8559_s28 + $0x100] sm:$0xff] }
 0x4ce   : > { %v7758_v18 = vpop.eup %7757  ;;  %5493 = vst [vmem:[%s13257_s12 + $0xe8] sm:$0xff] %v5365_v21  ;;  %7777 = vrcp.f32 %v4856_v24  ;;  %v4857_v45 = vadd.f32 1.0, %v7756_v8  ;;  %v5806_v27 = vmul.f32 -1.442695, %v4145_v62  ;;  %v5808_v59 = vmul.f32 -1.442695, %v4338_v63 }
 0x4cf   : > { %v7760_v17 = vpop.eup %7759  ;;  %5495 = vst [vmem:[%s13257_s12 + $0xf8] sm:$0xff] %v5367_v16  ;;  %7779 = vrcp.f32 %v4858_v31  ;;  %v4859_v25 = vadd.f32 1.0, %v7758_v18  ;;  %v5809_v56 = vmul.f32 -1.442695, %v4149_v11  ;;  %v5811_v15 = vmul.f32 -1.442695, %v4342_v34 }
 0x4d0   : > { %v7762_v49 = vpop.eup %7761  ;;  %7781 = vrcp.f32 %v4857_v45  ;;  %v4860_v58 = vadd.f32 1.0, %v7760_v17  ;;  %v4153_v60 = vadd.f32 %v13351_v23, %v13194_v6  ;;  %v4346_v29 = vadd.f32 %v13353_v22, %v13196_v53  ;;  %v8214_v23 = vld [vmem:[%s8559_s28 + $0x110] sm:$0xff]  ;;  %v8215_v24 = vld [vmem:[%s8559_s28 + $0x108] sm:$0xff]  ;;  %v8216_v31 = vld [vmem:[%s8559_s28 + $0x118] sm:$0xff] }
 0x4d1   : > { %v7764_v51 = vpop.eup %7763  ;;  %7783 = vrcp.f32 %v4859_v25  ;;  %v4862_v26 = vadd.f32 1.0, %v7762_v49  ;;  %v5810_v14 = vmul.f32 -1.442695, %v4151_v36  ;;  %v5812_v40 = vmul.f32 -1.442695, %v4344_v1 }
 0x4d2   : > { %v7766_v48 = vpop.eup %7765  ;;  %7785 = vrcp.f32 %v4860_v58  ;;  %v4861_v12 = vadd.f32 1.0, %v7764_v51  ;;  %v4155_v35 = vadd.f32 %v13357_v30, %v13198_v32  ;;  %v4348_v41 = vadd.f32 %v13359_v47, %v13203_v54  ;;  %v8217_v47 = vld [vmem:[%s8559_s28 + $0x120] sm:$0xff] }
 0x4d3   : > { %v7768_v19 = vpop.eup %7767  ;;  %7787 = vrcp.f32 %v4862_v26  ;;  %v4863_v20 = vadd.f32 1.0, %v7766_v48  ;;  %v5813_v16 = vmul.f32 -1.442695, %v4153_v60  ;;  %v5815_v17 = vmul.f32 -1.442695, %v4346_v29  ;;  %v8222_v60 = vld [vmem:[%s8559_s28 + $0x150] sm:$0xff] }
 0x4d4   : > { %v7770_v52 = vpop.eup %7769  ;;  %7789 = vrcp.f32 %v4861_v12  ;;  %v4864_v43 = vadd.f32 1.0, %v7768_v19  ;;  %v5814_v51 = vmul.f32 -1.442695, %v4155_v35  ;;  %v5816_v19 = vmul.f32 -1.442695, %v4348_v41 }
 0x4d5   : > { %v7772_v13 = vpop.eup %7771  ;;  %7791 = vrcp.f32 %v4863_v20  ;;  %v4866_v42 = vadd.f32 1.0, %v7770_v52  ;;  %v8219_v52 = vld [vmem:[%s8559_s28 + $0x128] sm:$0xff] }
 0x4d6   : > { %v7774_v28 = vpop.eup %7773  ;;  %7793 = vrcp.f32 %v4864_v43  ;;  %v4865_v44 = vadd.f32 1.0, %v7772_v13 }
 0x4d7   : > { %v7776_v33 = vpop.eup %7775  ;;  %7795 = vrcp.f32 %v4866_v42  ;;  %v4867_v37 = vadd.f32 1.0, %v7774_v28  ;;  %v8220_v28 = vld [vmem:[%s8559_s28 + $0x138] sm:$0xff] }
 0x4d8   : > { %v7778_v5 = vpop.eup %7777  ;;  %7797 = vrcp.f32 %v4865_v44  ;;  %v4868_v55 = vadd.f32 1.0, %v7776_v33 }
 0x4d9   : > { %v7780_v4 = vpop.eup %7779  ;;  %v5240_v50 = vadd.f32 1.0, %v7778_v5  ;;  %7799 = vrcp.f32 %v4867_v37 }
 0x4da   : > { %v7782_v0 = vpop.eup %7781  ;;  %v5242_v39 = vadd.f32 1.0, %v7780_v4  ;;  %7801 = vrcp.f32 %v4868_v55  ;;  %v4158_v20 = vpop.f32.mrb[92].mxu0 }
 0x4db   : > { %v7784_v3 = vpop.eup %7783  ;;  %v5368_v61 = vmul.f32 %v8213_v38, %v5240_v50  ;;  %v5241_v7 = vadd.f32 1.0, %v7782_v0  ;;  %7803 = vpow2.f32 %v5807_v10  ;;  %v4351_v62 = vpop.f32.mrb[92].mxu1  ;;  %v4159_v34 = vadd.f32 %v4158_v20, %v13194_v6 }
 0x4dc   : > { %v7786_v57 = vpop.eup %7785  ;;  %v5370_v22 = vmul.f32 %v8214_v23, %v5242_v39  ;;  %v5243_v2 = vadd.f32 1.0, %v7784_v3  ;;  %7805 = vpow2.f32 %v5806_v27  ;;  %v4160_v13 = vpop.f32.mrb[93].mxu0  ;;  %v4352_v1 = vadd.f32 %v4351_v62, %v13196_v53 }
 0x4dd   : > { %v7788_v21 = vpop.eup %7787  ;;  %5496 = vst [vmem:[%s13257_s12 + $0x100] sm:$0xff] %v5368_v61  ;;  %v5369_v8 = vmul.f32 %v8215_v24, %v5241_v7  ;;  %v5244_v46 = vadd.f32 1.0, %v7786_v57  ;;  %7807 = vpow2.f32 %v5808_v59  ;;  %v4353_v42 = vpop.f32.mrb[93].mxu1  ;;  %v8221_v59 = vld [vmem:[%s8559_s28 + $0x140] sm:$0xff]  ;;  %v8224_v7 = vld [vmem:[%s8559_s28 + $0x158] sm:$0xff] }
 0x4de   : > { %v7790_v30 = vpop.eup %7789  ;;  %5498 = vst [vmem:[%s13257_s12 + $0x110] sm:$0xff] %v5370_v22  ;;  %v5371_v18 = vmul.f32 %v8216_v31, %v5243_v2  ;;  %v5246_v45 = vadd.f32 1.0, %v7788_v21  ;;  %7809 = vpow2.f32 %v5809_v56  ;;  %v4162_v33 = vpop.f32.mrb[94].mxu0  ;;  %v5817_v56 = vmul.f32 -1.442695, %v4159_v34  ;;  %v8225_v22 = vld [vmem:[%s8559_s28 + $0x160] sm:$0xff] }
 0x4df   : > { %v7792_v25 = vpop.eup %7791  ;;  %5497 = vst [vmem:[%s13257_s12 + $0x108] sm:$0xff] %v5369_v8  ;;  %v5372_v49 = vmul.f32 %v8217_v47, %v5244_v46  ;;  %v5245_v58 = vadd.f32 1.0, %v7790_v30  ;;  %7811 = vpow2.f32 %v5811_v15  ;;  %v13399_v37 = vpop.f32.mrb[94].mxu1  ;;  %v5819_v39 = vmul.f32 -1.442695, %v4352_v1 }
 0x4e0   : > { %v7794_v26 = vpop.eup %7793  ;;  %5499 = vst [vmem:[%s13257_s12 + $0x118] sm:$0xff] %v5371_v18  ;;  %v5374_v48 = vmul.f32 %v8218_v9, %v5246_v45  ;;  %v5247_v12 = vadd.f32 1.0, %v7792_v25  ;;  %7813 = vpow2.f32 %v5810_v14  ;;  %v13403_v15 = vpop.f32.mrb[95].mxu0  ;;  %v4161_v31 = vadd.f32 %v4160_v13, %v13198_v32 }
 0x4e1   : > { %v7796_v63 = vpop.eup %7795  ;;  %5500 = vst [vmem:[%s13257_s12 + $0x120] sm:$0xff] %v5372_v49  ;;  %v5373_v43 = vmul.f32 %v8219_v52, %v5245_v58  ;;  %v5248_v11 = vadd.f32 1.0, %v7794_v26  ;;  %7815 = vpow2.f32 %v5812_v40  ;;  %v13405_v4 = vpop.f32.mrb[95].mxu1  ;;  %v8223_v40 = vld [vmem:[%s8559_s28 + $0x148] sm:$0xff]  ;;  %v4354_v47 = vadd.f32 %v4353_v42, %v13203_v54 }
 0x4e2   : > { %v7798_v10 = vpop.eup %7797  ;;  %5502 = vst [vmem:[%s13257_s12 + $0x130] sm:$0xff] %v5374_v48  ;;  %v5375_v44 = vmul.f32 %v8220_v28, %v5247_v12  ;;  %v5250_v36 = vadd.f32 1.0, %v7796_v63  ;;  %7817 = vpow2.f32 %v5813_v16  ;;  %v4163_v9 = vadd.f32 %v4162_v33, %v13194_v6 }
 0x4e3   : > { %v7800_v27 = vpop.eup %7799  ;;  %5501 = vst [vmem:[%s13257_s12 + $0x128] sm:$0xff] %v5373_v43  ;;  %v5376_v5 = vmul.f32 %v8221_v59, %v5248_v11  ;;  %v5249_v55 = vadd.f32 1.0, %v7798_v10  ;;  %7819 = vpow2.f32 %v5815_v17  ;;  %v5818_v62 = vmul.f32 -1.442695, %v4161_v31 }
 0x4e4   : > { %v7802_v50 = vpop.eup %7801  ;;  %5503 = vst [vmem:[%s13257_s12 + $0x138] sm:$0xff] %v5375_v44  ;;  %v5378_v29 = vmul.f32 %v8222_v60, %v5250_v36  ;;  %v5251_v0 = vadd.f32 1.0, %v7800_v27  ;;  %7821 = vpow2.f32 %v5814_v51  ;;  %v4356_v63 = vadd.f32 %v13399_v37, %v13196_v53 }
 0x4e5   : > { %v7804_v14 = vpop.eup %7803  ;;  %5504 = vst [vmem:[%s13257_s12 + $0x140] sm:$0xff] %v5376_v5  ;;  %v5377_v3 = vmul.f32 %v8223_v40, %v5249_v55  ;;  %v5252_v38 = vadd.f32 1.0, %v7802_v50  ;;  %7823 = vpow2.f32 %v5816_v19  ;;  %v4165_v13 = vadd.f32 %v13403_v15, %v13198_v32 }
 0x4e6   : > { %v7806_v61 = vpop.eup %7805  ;;  %5506 = vst [vmem:[%s13257_s12 + $0x150] sm:$0xff] %v5378_v29  ;;  %v5379_v35 = vmul.f32 %v8224_v7, %v5251_v0  ;;  %v4870_v57 = vadd.f32 1.0, %v7804_v14  ;;  %7825 = vpow2.f32 %v5817_v56  ;;  %v4358_v42 = vadd.f32 %v13405_v4, %v13203_v54 }
 0x4e7   : > { %v7808_v23 = vpop.eup %7807  ;;  %5505 = vst [vmem:[%s13257_s12 + $0x148] sm:$0xff] %v5377_v3  ;;  %v5380_v2 = vmul.f32 %v8225_v22, %v5252_v38  ;;  %v4869_v41 = vadd.f32 1.0, %v7806_v61  ;;  %7827 = vpow2.f32 %v5819_v39  ;;  %v5820_v36 = vmul.f32 -1.442695, %v4354_v47  ;;  %v8226_v61 = vld [vmem:[%s8559_s28 + $0x170] sm:$0xff]  ;;  %v8227_v22 = vld [vmem:[%s8559_s28 + $0x168] sm:$0xff] }
 0x4e8   : > { %v7810_v21 = vpop.eup %7809  ;;  %5507 = vst [vmem:[%s13257_s12 + $0x158] sm:$0xff] %v5379_v35  ;;  %7829 = vrcp.f32 %v4870_v57  ;;  %v4871_v24 = vadd.f32 1.0, %v7808_v23  ;;  %v5821_v59 = vmul.f32 -1.442695, %v4163_v9  ;;  %v5823_v15 = vmul.f32 -1.442695, %v4356_v63 }
 0x4e9   : > { %v7812_v8 = vpop.eup %7811  ;;  %5508 = vst [vmem:[%s13257_s12 + $0x160] sm:$0xff] %v5380_v2  ;;  %7831 = vrcp.f32 %v4869_v41  ;;  %v4872_v46 = vadd.f32 1.0, %v7810_v21  ;;  %v4168_v49 = vpop.f32.mrb[96].mxu0  ;;  %v5822_v29 = vmul.f32 -1.442695, %v4165_v13 }
 0x4ea   : > { %v7814_v16 = vpop.eup %7813  ;;  %7833 = vrcp.f32 %v4871_v24  ;;  %v4874_v30 = vadd.f32 1.0, %v7812_v8  ;;  %v4361_v58 = vpop.f32.mrb[96].mxu1  ;;  %v4169_v1 = vadd.f32 %v4168_v49, %v13194_v6  ;;  %v5824_v0 = vmul.f32 -1.442695, %v4358_v42  ;;  %v8228_v8 = vld [vmem:[%s8559_s28 + $0x178] sm:$0xff]  ;;  %v8230_v49 = vld [vmem:[%s8559_s28 + $0x190] sm:$0xff] }
 0x4eb   : > { %v7816_v18 = vpop.eup %7815  ;;  %7835 = vrcp.f32 %v4872_v46  ;;  %v4873_v45 = vadd.f32 1.0, %v7814_v16  ;;  %v4170_v48 = vpop.f32.mrb[97].mxu0  ;;  %v4362_v5 = vadd.f32 %v4361_v58, %v13196_v53 }
 0x4ec   : > { %v7818_v17 = vpop.eup %7817  ;;  %7837 = vrcp.f32 %v4874_v30  ;;  %v4875_v25 = vadd.f32 1.0, %v7816_v18  ;;  %v4363_v12 = vpop.f32.mrb[97].mxu1  ;;  %v4171_v4 = vadd.f32 %v4170_v48, %v13198_v32  ;;  %v5825_v40 = vmul.f32 -1.442695, %v4169_v1  ;;  %v8229_v18 = vld [vmem:[%s8559_s28 + $0x180] sm:$0xff] }
 0x4ed   : > { %v7820_v51 = vpop.eup %7819  ;;  %7839 = vrcp.f32 %v4873_v45  ;;  %v4876_v26 = vadd.f32 1.0, %v7818_v17  ;;  %v4172_v52 = vpop.f32.mrb[98].mxu0  ;;  %v4364_v3 = vadd.f32 %v4363_v12, %v13203_v54  ;;  %v5827_v57 = vmul.f32 -1.442695, %v4362_v5  ;;  %v8233_v1 = vld [vmem:[%s8559_s28 + $0x1a0] sm:$0xff] }
 0x4ee   : > { %v7822_v19 = vpop.eup %7821  ;;  %7841 = vrcp.f32 %v4875_v25  ;;  %v4878_v20 = vadd.f32 1.0, %v7820_v51  ;;  %v4365_v43 = vpop.f32.mrb[98].mxu1  ;;  %v5826_v21 = vmul.f32 -1.442695, %v4171_v4  ;;  %v4173_v30 = vadd.f32 %v4172_v52, %v13194_v6 }
 0x4ef   : > { %v7824_v11 = vpop.eup %7823  ;;  %7843 = vrcp.f32 %v4876_v26  ;;  %v4877_v34 = vadd.f32 1.0, %v7822_v19  ;;  %v4174_v10 = vpop.f32.mrb[99].mxu0  ;;  %v4366_v25 = vadd.f32 %v4365_v43, %v13196_v53  ;;  %v8231_v19 = vld [vmem:[%s8559_s28 + $0x188] sm:$0xff]  ;;  %v5828_v63 = vmul.f32 -1.442695, %v4364_v3  ;;  %v8236_v3 = vld [vmem:[%s8559_s28 + $0x1b8] sm:$0xff] }
 0x4f0   : > { %v7826_v28 = vpop.eup %7825  ;;  %7845 = vrcp.f32 %v4878_v20  ;;  %v4879_v44 = vadd.f32 1.0, %v7824_v11  ;;  %v13427_v33 = vpop.f32.mrb[99].mxu1  ;;  %v4175_v26 = vadd.f32 %v4174_v10, %v13198_v32  ;;  %v5829_v10 = vmul.f32 -1.442695, %v4173_v30 }
 0x4f1   : > { %v7828_v37 = vpop.eup %7827  ;;  %7847 = vrcp.f32 %v4877_v34  ;;  %v4880_v27 = vadd.f32 1.0, %v7826_v28  ;;  %v8232_v34 = vld [vmem:[%s8559_s28 + $0x198] sm:$0xff]  ;;  %v4368_v30 = vadd.f32 %v13427_v33, %v13203_v54 }
 0x4f2   : > { %v7830_v55 = vpop.eup %7829  ;;  %7849 = vrcp.f32 %v4879_v44  ;;  %v4882_v56 = vadd.f32 1.0, %v7828_v37 }
 0x4f3   : > { %v7832_v50 = vpop.eup %7831  ;;  %v5254_v60 = vadd.f32 1.0, %v7830_v55  ;;  %7851 = vrcp.f32 %v4880_v27 }
 0x4f4   : > { %v7834_v39 = vpop.eup %7833  ;;  %v5253_v14 = vadd.f32 1.0, %v7832_v50  ;;  %7853 = vrcp.f32 %v4882_v56 }
 0x4f5   : > { %v7836_v38 = vpop.eup %7835  ;;  %v5382_v7 = vmul.f32 %v8226_v61, %v5254_v60  ;;  %v5255_v35 = vadd.f32 1.0, %v7834_v39  ;;  %7855 = vpow2.f32 %v5818_v62  ;;  %v5830_v60 = vmul.f32 -1.442695, %v4175_v26 }
 0x4f6   : > { %v7838_v23 = vpop.eup %7837  ;;  %v5381_v2 = vmul.f32 %v8227_v22, %v5253_v14  ;;  %v5256_v41 = vadd.f32 1.0, %v7836_v38  ;;  %7857 = vpow2.f32 %v5820_v36  ;;  %v13443_v9 = vpop.f32.mrb[100].mxu0 }
 0x4f7   : > { %v7840_v24 = vpop.eup %7839  ;;  %5510 = vst [vmem:[%s13257_s12 + $0x170] sm:$0xff] %v5382_v7  ;;  %v5383_v46 = vmul.f32 %v8228_v8, %v5255_v35  ;;  %v5258_v16 = vadd.f32 1.0, %v7838_v23  ;;  %7859 = vpow2.f32 %v5821_v59  ;;  %v13445_v48 = vpop.f32.mrb[100].mxu1  ;;  %v5831_v59 = vmul.f32 -1.442695, %v4366_v25  ;;  %v8237_v35 = vld [vmem:[%s8559_s28 + $0x1c0] sm:$0xff] }
 0x4f8   : > { %v7842_v31 = vpop.eup %7841  ;;  %5509 = vst [vmem:[%s13257_s12 + $0x168] sm:$0xff] %v5381_v2  ;;  %v5384_v45 = vmul.f32 %v8229_v18, %v5256_v41  ;;  %v5257_v17 = vadd.f32 1.0, %v7840_v24  ;;  %7861 = vpow2.f32 %v5823_v15  ;;  %v13449_v52 = vpop.f32.mrb[101].mxu0  ;;  %v8234_v15 = vld [vmem:[%s8559_s28 + $0x1b0] sm:$0xff] }
 0x4f9   : > { %v7844_v47 = vpop.eup %7843  ;;  %5511 = vst [vmem:[%s13257_s12 + $0x178] sm:$0xff] %v5383_v46  ;;  %v5386_v58 = vmul.f32 %v8230_v49, %v5258_v16  ;;  %v5259_v51 = vadd.f32 1.0, %v7842_v31  ;;  %7863 = vpow2.f32 %v5822_v29  ;;  %v13451_v43 = vpop.f32.mrb[101].mxu1  ;;  %v8238_v2 = vld [vmem:[%s8559_s28 + $0x1d0] sm:$0xff] }
 0x4fa   : > { %v7846_v12 = vpop.eup %7845  ;;  %5512 = vst [vmem:[%s13257_s12 + $0x180] sm:$0xff] %v5384_v45  ;;  %v5385_v20 = vmul.f32 %v8231_v19, %v5257_v17  ;;  %v5260_v62 = vadd.f32 1.0, %v7844_v47  ;;  %7865 = vpow2.f32 %v5824_v0  ;;  %v13455_v28 = vpop.f32.mrb[102].mxu0  ;;  %v8235_v0 = vld [vmem:[%s8559_s28 + $0x1a8] sm:$0xff]  ;;  %v4179_v45 = vadd.f32 %v13443_v9, %v13194_v6 }
 0x4fb   : > { %v7848_v11 = vpop.eup %7847  ;;  %5514 = vst [vmem:[%s13257_s12 + $0x190] sm:$0xff] %v5386_v58  ;;  %v5387_v13 = vmul.f32 %v8232_v34, %v5259_v51  ;;  %v5262_v42 = vadd.f32 1.0, %v7846_v12  ;;  %7867 = vpow2.f32 %v5825_v40  ;;  %v13457_v44 = vpop.f32.mrb[102].mxu1  ;;  %v4372_v47 = vadd.f32 %v13445_v48, %v13196_v53 }
 0x4fc   : > { %v7850_v36 = vpop.eup %7849  ;;  %5513 = vst [vmem:[%s13257_s12 + $0x188] sm:$0xff] %v5385_v20  ;;  %v5388_v37 = vmul.f32 %v8233_v1, %v5260_v62  ;;  %v5261_v27 = vadd.f32 1.0, %v7848_v11  ;;  %7869 = vpow2.f32 %v5827_v57  ;;  %v13461_v5 = vpop.f32.mrb[103].mxu0  ;;  %v4181_v51 = vadd.f32 %v13449_v52, %v13198_v32 }
 0x4fd   : > { %v13463_v55 = vpop.f32.mrb[103].mxu1  ;;  %v7852_v56 = vpop.eup %7851  ;;  %5515 = vst [vmem:[%s13257_s12 + $0x198] sm:$0xff] %v5387_v13  ;;  %v5390_v4 = vmul.f32 %v8234_v15, %v5262_v42  ;;  %v5263_v50 = vadd.f32 1.0, %v7850_v36  ;;  %7871 = vpow2.f32 %v5826_v21  ;;  %v5832_v12 = vmul.f32 -1.442695, %v4368_v30 }
 0x4fe   : > { %v7854_v29 = vpop.eup %7853  ;;  %5516 = vst [vmem:[%s13257_s12 + $0x1a0] sm:$0xff] %v5388_v37  ;;  %v5389_v39 = vmul.f32 %v8235_v0, %v5261_v27  ;;  %v5264_v14 = vadd.f32 1.0, %v7852_v56  ;;  %7873 = vpow2.f32 %v5828_v63  ;;  %v4374_v19 = vadd.f32 %v13451_v43, %v13203_v54 }
 0x4ff   : > { %v7856_v40 = vpop.eup %7855  ;;  %5518 = vst [vmem:[%s13257_s12 + $0x1b0] sm:$0xff] %v5390_v4  ;;  %v5391_v38 = vmul.f32 %v8236_v3, %v5263_v50  ;;  %v5266_v61 = vadd.f32 1.0, %v7854_v29  ;;  %7875 = vpow2.f32 %v5829_v10  ;;  %v5833_v62 = vmul.f32 -1.442695, %v4179_v45  ;;  %v8242_v45 = vld [vmem:[%s8559_s28 + $0x1f0] sm:$0xff] }
 0x500   : > { %v7858_v7 = vpop.eup %7857  ;;  %5517 = vst [vmem:[%s13257_s12 + $0x1a8] sm:$0xff] %v5389_v39  ;;  %v5392_v57 = vmul.f32 %v8237_v35, %v5264_v14  ;;  %v4881_v23 = vadd.f32 1.0, %v7856_v40  ;;  %7877 = vpow2.f32 %v5831_v59  ;;  %v4183_v48 = vadd.f32 %v13455_v28, %v13194_v6 }
 0x501   : > { %v7860_v22 = vpop.eup %7859  ;;  %5519 = vst [vmem:[%s13257_s12 + $0x1b8] sm:$0xff] %v5391_v38  ;;  %v5394_v41 = vmul.f32 %v8238_v2, %v5266_v61  ;;  %v4883_v21 = vadd.f32 1.0, %v7858_v7  ;;  %7879 = vpow2.f32 %v5830_v60  ;;  %v5835_v34 = vmul.f32 -1.442695, %v4372_v47  ;;  %v8239_v38 = vld [vmem:[%s8559_s28 + $0x1c8] sm:$0xff]  ;;  %v8240_v2 = vld [vmem:[%s8559_s28 + $0x1d8] sm:$0xff] }
 0x502   : > { %v7862_v24 = vpop.eup %7861  ;;  %5520 = vst [vmem:[%s13257_s12 + $0x1c0] sm:$0xff] %v5392_v57  ;;  %7881 = vrcp.f32 %v4881_v23  ;;  %v4884_v8 = vadd.f32 1.0, %v7860_v22  ;;  %v4376_v52 = vadd.f32 %v13457_v44, %v13196_v53  ;;  %v5834_v10 = vmul.f32 -1.442695, %v4181_v51 }
 0x503   : > { %v7864_v46 = vpop.eup %7863  ;;  %5522 = vst [vmem:[%s13257_s12 + $0x1d0] sm:$0xff] %v5394_v41  ;;  %7883 = vrcp.f32 %v4883_v21  ;;  %v4886_v16 = vadd.f32 1.0, %v7862_v24  ;;  %v4185_v43 = vadd.f32 %v13461_v5, %v13198_v32  ;;  %v5836_v37 = vmul.f32 -1.442695, %v4374_v19  ;;  %v8244_v19 = vld [vmem:[%s8559_s28 + $0x1f8] sm:$0xff] }
 0x504   : > { %v7866_v31 = vpop.eup %7865  ;;  %7885 = vrcp.f32 %v4884_v8  ;;  %v4885_v18 = vadd.f32 1.0, %v7864_v46  ;;  %v4378_v28 = vadd.f32 %v13463_v55, %v13203_v54  ;;  %v5837_v56 = vmul.f32 -1.442695, %v4183_v48  ;;  %v8241_v46 = vld [vmem:[%s8559_s28 + $0x1e0] sm:$0xff] }
 0x505   : > { %v7868_v17 = vpop.eup %7867  ;;  %7887 = vrcp.f32 %v4886_v16  ;;  %v4887_v25 = vadd.f32 1.0, %v7866_v31  ;;  %v5839_v60 = vmul.f32 -1.442695, %v4376_v52  ;;  %v5838_v14 = vmul.f32 -1.442695, %v4185_v43 }
 0x506   : > { %v7870_v49 = vpop.eup %7869  ;;  %7889 = vrcp.f32 %v4885_v18  ;;  %v4888_v58 = vadd.f32 1.0, %v7868_v17  ;;  %v5840_v35 = vmul.f32 -1.442695, %v4378_v28 }
 0x507   : > { %v7872_v26 = vpop.eup %7871  ;;  %7891 = vrcp.f32 %v4887_v25  ;;  %v4890_v33 = vadd.f32 1.0, %v7870_v49 }
 0x508   : > { %v7874_v9 = vpop.eup %7873  ;;  %7893 = vrcp.f32 %v4888_v58  ;;  %v4889_v20 = vadd.f32 1.0, %v7872_v26  ;;  %v8243_v58 = vld [vmem:[%s8559_s28 + $0x1e8] sm:$0xff] }
 0x509   : > { %v7876_v63 = vpop.eup %7875  ;;  %7895 = vrcp.f32 %v4890_v33  ;;  %v4891_v11 = vadd.f32 1.0, %v7874_v9 }
 0x50a   : > { %v7878_v13 = vpop.eup %7877  ;;  %7897 = vrcp.f32 %v4889_v20  ;;  %v4892_v42 = vadd.f32 1.0, %v7876_v63  ;;  %v4188_v44 = vpop.f32.mrb[104].mxu0  ;;  %v8245_v63 = vld [vmem:[%s8559_s28 + $0x200] sm:$0xff] }
 0x50b   : > { %v7880_v36 = vpop.eup %7879  ;;  %7899 = vrcp.f32 %v4891_v11  ;;  %v4894_v1 = vadd.f32 1.0, %v7878_v13  ;;  %v4381_v15 = vpop.f32.mrb[104].mxu1  ;;  %v4189_v24 = vadd.f32 %v4188_v44, %v13194_v6  ;;  %v8248_v44 = vld [vmem:[%s8559_s28 + $0x218] sm:$0xff] }
 0x50c   : > { %v7882_v27 = vpop.eup %7881  ;;  %7901 = vrcp.f32 %v4892_v42  ;;  %v4893_v59 = vadd.f32 1.0, %v7880_v36  ;;  %v4190_v29 = vpop.f32.mrb[105].mxu0  ;;  %v4382_v31 = vadd.f32 %v4381_v15, %v13196_v53  ;;  %v8246_v42 = vld [vmem:[%s8559_s28 + $0x210] sm:$0xff] }
 0x50d   : > { %v7884_v4 = vpop.eup %7883  ;;  %v5265_v50 = vadd.f32 1.0, %v7882_v27  ;;  %7903 = vrcp.f32 %v4894_v1  ;;  %v4383_v5 = vpop.f32.mrb[105].mxu1  ;;  %v4191_v47 = vadd.f32 %v4190_v29, %v13198_v32 }
 0x50e   : > { %v7886_v0 = vpop.eup %7885  ;;  %v5267_v39 = vadd.f32 1.0, %v7884_v4  ;;  %7905 = vrcp.f32 %v4893_v59  ;;  %v13495_v40 = vpop.f32.mrb[106].mxu0  ;;  %v4384_v33 = vadd.f32 %v4383_v5, %v13203_v54  ;;  %v5843_v52 = vmul.f32 -1.442695, %v4382_v31 }
 0x50f   : > { %v13497_v55 = vpop.f32.mrb[106].mxu1  ;;  %v7888_v3 = vpop.eup %7887  ;;  %v5393_v61 = vmul.f32 %v8239_v38, %v5265_v50  ;;  %v5268_v7 = vadd.f32 1.0, %v7886_v0  ;;  %7907 = vpow2.f32 %v5832_v12  ;;  %v5842_v36 = vmul.f32 -1.442695, %v4191_v47 }
 0x510   : > { %v13500_v57 = vpop.f32.mrb[107].mxu0  ;;  %v13502_v23 = vpop.f32.mrb[107].mxu1  ;;  %v5395_v41 = vmul.f32 %v8240_v2, %v5267_v39  ;;  %v5270_v21 = vadd.f32 1.0, %v7888_v3  ;;  %7909 = vpow2.f32 %v5833_v62  ;;  %v5841_v62 = vmul.f32 -1.442695, %v4189_v24  ;;  %v8250_v39 = vld [vmem:[%s8559_s28 + $0x230] sm:$0xff] }
 0x511   : > { %v7890_v22 = vpop.eup %7889  ;;  %5521 = vst [vmem:[%s13257_s12 + $0x1c8] sm:$0xff] %v5393_v61  ;;  %v5396_v16 = vmul.f32 %v8241_v46, %v5268_v7  ;;  %7911 = vpow2.f32 %v5835_v34  ;;  %v5844_v59 = vmul.f32 -1.442695, %v4384_v33  ;;  %v8251_v61 = vld [vmem:[%s8559_s28 + $0x228] sm:$0xff] }
 0x512   : > { %v7892_v8 = vpop.eup %7891  ;;  %v5269_v30 = vadd.f32 1.0, %v7890_v22  ;;  %5523 = vst [vmem:[%s13257_s12 + $0x1d8] sm:$0xff] %v5395_v41  ;;  %v5398_v17 = vmul.f32 %v8242_v45, %v5270_v21  ;;  %7913 = vpow2.f32 %v5834_v10 }
 0x513   : > { %v7894_v18 = vpop.eup %7893  ;;  %v5271_v25 = vadd.f32 1.0, %v7892_v8  ;;  %5524 = vst [vmem:[%s13257_s12 + $0x1e0] sm:$0xff] %v5396_v16  ;;  %7915 = vpow2.f32 %v5836_v37  ;;  %v8247_v37 = vld [vmem:[%s8559_s28 + $0x208] sm:$0xff] }
 0x514   : > { %v7896_v49 = vpop.eup %7895  ;;  %v5397_v51 = vmul.f32 %v8243_v58, %v5269_v30  ;;  %v5272_v26 = vadd.f32 1.0, %v7894_v18  ;;  %5526 = vst [vmem:[%s13257_s12 + $0x1f0] sm:$0xff] %v5398_v17  ;;  %7917 = vpow2.f32 %v5837_v56  ;;  %v4193_v58 = vadd.f32 %v13495_v40, %v13194_v6 }
 0x515   : > { %v7898_v12 = vpop.eup %7897  ;;  %v5399_v9 = vmul.f32 %v8244_v19, %v5271_v25  ;;  %v5274_v20 = vadd.f32 1.0, %v7896_v49  ;;  %7919 = vpow2.f32 %v5839_v60  ;;  %v8249_v60 = vld [vmem:[%s8559_s28 + $0x220] sm:$0xff]  ;;  %v4195_v19 = vadd.f32 %v13500_v57, %v13198_v32 }
 0x516   : > { %v7900_v48 = vpop.eup %7899  ;;  %5525 = vst [vmem:[%s13257_s12 + $0x1e8] sm:$0xff] %v5397_v51  ;;  %v5400_v11 = vmul.f32 %v8245_v63, %v5272_v26  ;;  %v5273_v34 = vadd.f32 1.0, %v7898_v12  ;;  %7921 = vpow2.f32 %v5838_v14  ;;  %v4386_v12 = vadd.f32 %v13497_v55, %v13196_v53 }
 0x517   : > { %v7902_v13 = vpop.eup %7901  ;;  %5527 = vst [vmem:[%s13257_s12 + $0x1f8] sm:$0xff] %v5399_v9  ;;  %v5402_v10 = vmul.f32 %v8246_v42, %v5274_v20  ;;  %v5275_v43 = vadd.f32 1.0, %v7900_v48  ;;  %7923 = vpow2.f32 %v5840_v35  ;;  %v4388_v48 = vadd.f32 %v13502_v23, %v13203_v54 }
 0x518   : > { %v7904_v1 = vpop.eup %7903  ;;  %5528 = vst [vmem:[%s13257_s12 + $0x200] sm:$0xff] %v5400_v11  ;;  %v5401_v28 = vmul.f32 %v8247_v37, %v5273_v34  ;;  %v5276_v27 = vadd.f32 1.0, %v7902_v13  ;;  %7925 = vpow2.f32 %v5841_v62  ;;  %v5845_v57 = vmul.f32 -1.442695, %v4193_v58 }
 0x519   : > { %v7906_v56 = vpop.eup %7905  ;;  %5530 = vst [vmem:[%s13257_s12 + $0x210] sm:$0xff] %v5402_v10  ;;  %v5403_v15 = vmul.f32 %v8248_v44, %v5275_v43  ;;  %v5278_v4 = vadd.f32 1.0, %v7904_v1  ;;  %7927 = vpow2.f32 %v5843_v52  ;;  %v5846_v23 = vmul.f32 -1.442695, %v4195_v19 }
 0x51a   : > { %v7908_v50 = vpop.eup %7907  ;;  %5529 = vst [vmem:[%s13257_s12 + $0x208] sm:$0xff] %v5401_v28  ;;  %v5404_v29 = vmul.f32 %v8249_v60, %v5276_v27  ;;  %v5277_v5 = vadd.f32 1.0, %v7906_v56  ;;  %7929 = vpow2.f32 %v5842_v36  ;;  %v4198_v24 = vpop.f32.mrb[108].mxu0  ;;  %v5847_v36 = vmul.f32 -1.442695, %v4386_v12 }
 0x51b   : > { %v7910_v0 = vpop.eup %7909  ;;  %5531 = vst [vmem:[%s13257_s12 + $0x218] sm:$0xff] %v5403_v15  ;;  %v5406_v14 = vmul.f32 %v8250_v39, %v5278_v4  ;;  %v4895_v3 = vadd.f32 1.0, %v7908_v50  ;;  %7931 = vpow2.f32 %v5844_v59  ;;  %v4391_v8 = vpop.f32.mrb[108].mxu1  ;;  %v4199_v63 = vadd.f32 %v4198_v24, %v13194_v6  ;;  %v8254_v24 = vld [vmem:[%s8559_s28 + $0x250] sm:$0xff] }
 0x51c   : > { %v7912_v38 = vpop.eup %7911  ;;  %5532 = vst [vmem:[%s13257_s12 + $0x220] sm:$0xff] %v5404_v29  ;;  %v5405_v7 = vmul.f32 %v8251_v61, %v5277_v5  ;;  %v4896_v35 = vadd.f32 1.0, %v7910_v0  ;;  %v4200_v30 = vpop.f32.mrb[109].mxu0  ;;  %v4392_v34 = vadd.f32 %v4391_v8, %v13196_v53  ;;  %v5848_v28 = vmul.f32 -1.442695, %v4388_v48  ;;  %v8252_v0 = vld [vmem:[%s8559_s28 + $0x238] sm:$0xff] }
 0x51d   : > { %v7914_v22 = vpop.eup %7913  ;;  %5534 = vst [vmem:[%s13257_s12 + $0x230] sm:$0xff] %v5406_v14  ;;  %7933 = vrcp.f32 %v4895_v3  ;;  %v4898_v2 = vadd.f32 1.0, %v7912_v38  ;;  %v4393_v31 = vpop.f32.mrb[109].mxu1  ;;  %v4201_v52 = vadd.f32 %v4200_v30, %v13198_v32  ;;  %v5849_v27 = vmul.f32 -1.442695, %v4199_v63  ;;  %v8253_v61 = vld [vmem:[%s8559_s28 + $0x240] sm:$0xff] }
 0x51e   : > { %v7916_v41 = vpop.eup %7915  ;;  %5533 = vst [vmem:[%s13257_s12 + $0x228] sm:$0xff] %v5405_v7  ;;  %7935 = vrcp.f32 %v4896_v35  ;;  %v4897_v21 = vadd.f32 1.0, %v7914_v22  ;;  %v4202_v17 = vpop.f32.mrb[110].mxu0  ;;  %v4394_v42 = vadd.f32 %v4393_v31, %v13203_v54  ;;  %v5851_v44 = vmul.f32 -1.442695, %v4392_v34  ;;  %v8257_v48 = vld [vmem:[%s8559_s28 + $0x260] sm:$0xff] }
 0x51f   : > { %v7918_v46 = vpop.eup %7917  ;;  %7937 = vrcp.f32 %v4898_v2  ;;  %v4899_v16 = vadd.f32 1.0, %v7916_v41  ;;  %v4395_v25 = vpop.f32.mrb[110].mxu1  ;;  %v5850_v15 = vmul.f32 -1.442695, %v4201_v52  ;;  %v4203_v29 = vadd.f32 %v4202_v17, %v13194_v6  ;;  %v8258_v52 = vld [vmem:[%s8559_s28 + $0x270] sm:$0xff] }
 0x520   : > { %v7920_v18 = vpop.eup %7919  ;;  %7939 = vrcp.f32 %v4897_v21  ;;  %v4900_v45 = vadd.f32 1.0, %v7918_v46  ;;  %v4204_v51 = vpop.f32.mrb[111].mxu0  ;;  %v5852_v60 = vmul.f32 -1.442695, %v4394_v42  ;;  %v4396_v3 = vadd.f32 %v4395_v25, %v13196_v53 }
 0x521   : > { %v7922_v47 = vpop.eup %7921  ;;  %7941 = vrcp.f32 %v4899_v16  ;;  %v4902_v49 = vadd.f32 1.0, %v7920_v18  ;;  %v4397_v9 = vpop.f32.mrb[111].mxu1  ;;  %v4205_v22 = vadd.f32 %v4204_v51, %v13198_v32 }
 0x522   : > { %v7924_v26 = vpop.eup %7923  ;;  %7943 = vrcp.f32 %v4900_v45  ;;  %v4901_v33 = vadd.f32 1.0, %v7922_v47  ;;  %v4398_v16 = vadd.f32 %v4397_v9, %v13203_v54  ;;  %v8255_v45 = vld [vmem:[%s8559_s28 + $0x248] sm:$0xff]  ;;  %v5853_v47 = vmul.f32 -1.442695, %v4203_v29 }
 0x523   : > { %v7926_v20 = vpop.eup %7925  ;;  %7945 = vrcp.f32 %v4902_v49  ;;  %v4903_v62 = vadd.f32 1.0, %v7924_v26  ;;  %v8256_v26 = vld [vmem:[%s8559_s28 + $0x258] sm:$0xff] }
 0x524   : > { %v7928_v40 = vpop.eup %7927  ;;  %7947 = vrcp.f32 %v4901_v33  ;;  %v4904_v11 = vadd.f32 1.0, %v7926_v20 }
 0x525   : > { %v7930_v55 = vpop.eup %7929  ;;  %7949 = vrcp.f32 %v4903_v62  ;;  %v4906_v13 = vadd.f32 1.0, %v7928_v40 }
 0x526   : > { %v7932_v10 = vpop.eup %7931  ;;  %7951 = vrcp.f32 %v4904_v11  ;;  %v4905_v43 = vadd.f32 1.0, %v7930_v55  ;;  %v5855_v11 = vmul.f32 -1.442695, %v4396_v3 }
 0x527   : > { %v7934_v1 = vpop.eup %7933  ;;  %7953 = vrcp.f32 %v4906_v13  ;;  %v4907_v37 = vadd.f32 1.0, %v7932_v10  ;;  %v4208_v2 = vpop.f32.mrb[112].mxu0  ;;  %v8259_v10 = vld [vmem:[%s8559_s28 + $0x268] sm:$0xff] }
 0x528   : > { %v7936_v59 = vpop.eup %7935  ;;  %v5279_v56 = vadd.f32 1.0, %v7934_v1  ;;  %7955 = vrcp.f32 %v4905_v43  ;;  %v13550_v41 = vpop.f32.mrb[112].mxu1  ;;  %v4209_v19 = vadd.f32 %v4208_v2, %v13194_v6 }
 0x529   : > { %v7938_v4 = vpop.eup %7937  ;;  %v5280_v50 = vadd.f32 1.0, %v7936_v59  ;;  %7957 = vrcp.f32 %v4907_v37  ;;  %v13555_v30 = vpop.f32.mrb[113].mxu0  ;;  %v8260_v37 = vld [vmem:[%s8559_s28 + $0x278] sm:$0xff] }
 0x52a   : > { %v7940_v5 = vpop.eup %7939  ;;  %v5407_v39 = vmul.f32 %v8252_v0, %v5279_v56  ;;  %v5282_v14 = vadd.f32 1.0, %v7938_v4  ;;  %7959 = vpow2.f32 %v5845_v57  ;;  %v13557_v31 = vpop.f32.mrb[113].mxu1  ;;  %v5854_v57 = vmul.f32 -1.442695, %v4205_v22 }
 0x52b   : > { %v7942_v38 = vpop.eup %7941  ;;  %v5408_v7 = vmul.f32 %v8253_v61, %v5280_v50  ;;  %v5281_v35 = vadd.f32 1.0, %v7940_v5  ;;  %7961 = vpow2.f32 %v5847_v36  ;;  %v13561_v49 = vpop.f32.mrb[114].mxu0  ;;  %v5857_v59 = vmul.f32 -1.442695, %v4209_v19  ;;  %v8264_v61 = vld [vmem:[%s8559_s28 + $0x298] sm:$0xff] }
 0x52c   : > { %v7944_v21 = vpop.eup %7943  ;;  %5535 = vst [vmem:[%s13257_s12 + $0x238] sm:$0xff] %v5407_v39  ;;  %v5410_v8 = vmul.f32 %v8254_v24, %v5282_v14  ;;  %v5283_v46 = vadd.f32 1.0, %v7942_v38  ;;  %7963 = vpow2.f32 %v5846_v23  ;;  %v13563_v58 = vpop.f32.mrb[114].mxu1  ;;  %v5856_v23 = vmul.f32 -1.442695, %v4398_v16  ;;  %v8263_v39 = vld [vmem:[%s8559_s28 + $0x288] sm:$0xff] }
 0x52d   : > { %v7946_v18 = vpop.eup %7945  ;;  %5536 = vst [vmem:[%s13257_s12 + $0x240] sm:$0xff] %v5408_v7  ;;  %v5409_v17 = vmul.f32 %v8255_v45, %v5281_v35  ;;  %v5284_v25 = vadd.f32 1.0, %v7944_v21  ;;  %7965 = vpow2.f32 %v5848_v28  ;;  %v13568_v9 = vpop.f32.mrb[115].mxu0  ;;  %v4402_v16 = vadd.f32 %v13550_v41, %v13196_v53 }
 0x52e   : > { %v7948_v51 = vpop.eup %7947  ;;  %5538 = vst [vmem:[%s13257_s12 + $0x250] sm:$0xff] %v5410_v8  ;;  %v5411_v33 = vmul.f32 %v8256_v26, %v5283_v46  ;;  %v5286_v12 = vadd.f32 1.0, %v7946_v18  ;;  %7967 = vpow2.f32 %v5849_v27  ;;  %v13570_v20 = vpop.f32.mrb[115].mxu1 }
 0x52f   : > { %v7950_v62 = vpop.eup %7949  ;;  %5537 = vst [vmem:[%s13257_s12 + $0x248] sm:$0xff] %v5409_v17  ;;  %v5412_v63 = vmul.f32 %v8257_v48, %v5284_v25  ;;  %v5285_v40 = vadd.f32 1.0, %v7948_v51  ;;  %7969 = vpow2.f32 %v5851_v44  ;;  %v8261_v44 = vld [vmem:[%s8559_s28 + $0x280] sm:$0xff]  ;;  %v4211_v17 = vadd.f32 %v13555_v30, %v13198_v32 }
 0x530   : > { %v7952_v34 = vpop.eup %7951  ;;  %5539 = vst [vmem:[%s13257_s12 + $0x258] sm:$0xff] %v5411_v33  ;;  %v5414_v55 = vmul.f32 %v8258_v52, %v5286_v12  ;;  %v5287_v13 = vadd.f32 1.0, %v7950_v62  ;;  %7971 = vpow2.f32 %v5850_v15  ;;  %v4404_v51 = vadd.f32 %v13557_v31, %v13203_v54 }
 0x531   : > { %v7954_v42 = vpop.eup %7953  ;;  %5540 = vst [vmem:[%s13257_s12 + $0x260] sm:$0xff] %v5412_v63  ;;  %v5413_v43 = vmul.f32 %v8259_v10, %v5285_v40  ;;  %v5288_v36 = vadd.f32 1.0, %v7952_v34  ;;  %7973 = vpow2.f32 %v5852_v60  ;;  %v8262_v60 = vld [vmem:[%s8559_s28 + $0x290] sm:$0xff]  ;;  %v4213_v12 = vadd.f32 %v13561_v49, %v13194_v6 }
 0x532   : > { %v7956_v1 = vpop.eup %7955  ;;  %5542 = vst [vmem:[%s13257_s12 + $0x270] sm:$0xff] %v5414_v55  ;;  %v5415_v28 = vmul.f32 %v8260_v37, %v5287_v13  ;;  %v5290_v27 = vadd.f32 1.0, %v7954_v42  ;;  %7975 = vpow2.f32 %v5853_v47  ;;  %v5859_v62 = vmul.f32 -1.442695, %v4402_v16 }
 0x533   : > { %v7958_v56 = vpop.eup %7957  ;;  %5541 = vst [vmem:[%s13257_s12 + $0x268] sm:$0xff] %v5413_v43  ;;  %v5416_v15 = vmul.f32 %v8261_v44, %v5288_v36  ;;  %v5289_v4 = vadd.f32 1.0, %v7956_v1  ;;  %7977 = vpow2.f32 %v5855_v11  ;;  %v4406_v48 = vadd.f32 %v13563_v58, %v13196_v53 }
 0x534   : > { %v7960_v50 = vpop.eup %7959  ;;  %5543 = vst [vmem:[%s13257_s12 + $0x278] sm:$0xff] %v5415_v28  ;;  %v5418_v29 = vmul.f32 %v8262_v60, %v5290_v27  ;;  %v5291_v5 = vadd.f32 1.0, %v7958_v56  ;;  %7979 = vpow2.f32 %v5854_v57  ;;  %v5858_v40 = vmul.f32 -1.442695, %v4211_v17 }
 0x535   : > { %v7962_v0 = vpop.eup %7961  ;;  %5544 = vst [vmem:[%s13257_s12 + $0x280] sm:$0xff] %v5416_v15  ;;  %v5417_v14 = vmul.f32 %v8263_v39, %v5289_v4  ;;  %v4908_v3 = vadd.f32 1.0, %v7960_v50  ;;  %7981 = vpow2.f32 %v5856_v23  ;;  %v4215_v31 = vadd.f32 %v13568_v9, %v13198_v32 }
 0x536   : > { %v7964_v38 = vpop.eup %7963  ;;  %5546 = vst [vmem:[%s13257_s12 + $0x290] sm:$0xff] %v5418_v29  ;;  %v5419_v7 = vmul.f32 %v8264_v61, %v5291_v5  ;;  %v4910_v35 = vadd.f32 1.0, %v7962_v0  ;;  %7983 = vpow2.f32 %v5857_v59  ;;  %v5860_v49 = vmul.f32 -1.442695, %v4404_v51  ;;  %v8265_v0 = vld [vmem:[%s8559_s28 + $0x2a0] sm:$0xff]  ;;  %v8266_v61 = vld [vmem:[%s8559_s28 + $0x2b0] sm:$0xff] }
 0x537   : > { %v7966_v22 = vpop.eup %7965  ;;  %5545 = vst [vmem:[%s13257_s12 + $0x288] sm:$0xff] %v5417_v14  ;;  %7985 = vrcp.f32 %v4908_v3  ;;  %v4909_v2 = vadd.f32 1.0, %v7964_v38  ;;  %v4408_v13 = vadd.f32 %v13570_v20, %v13203_v54  ;;  %v5861_v43 = vmul.f32 -1.442695, %v4213_v12  ;;  %v8269_v51 = vld [vmem:[%s8559_s28 + $0x2c0] sm:$0xff] }
 0x538   : > { %v7968_v21 = vpop.eup %7967  ;;  %5547 = vst [vmem:[%s13257_s12 + $0x298] sm:$0xff] %v5419_v7  ;;  %7987 = vrcp.f32 %v4910_v35  ;;  %v4911_v24 = vadd.f32 1.0, %v7966_v22  ;;  %v5863_v37 = vmul.f32 -1.442695, %v4406_v48  ;;  %v5862_v20 = vmul.f32 -1.442695, %v4215_v31 }
 0x539   : > { %v7970_v8 = vpop.eup %7969  ;;  %7989 = vrcp.f32 %v4909_v2  ;;  %v4912_v46 = vadd.f32 1.0, %v7968_v21  ;;  %v5864_v60 = vmul.f32 -1.442695, %v4408_v13  ;;  %v8267_v21 = vld [vmem:[%s8559_s28 + $0x2a8] sm:$0xff] }
 0x53a   : > { %v7972_v18 = vpop.eup %7971  ;;  %7991 = vrcp.f32 %v4911_v24  ;;  %v4914_v45 = vadd.f32 1.0, %v7970_v8  ;;  %v4218_v11 = vpop.f32.mrb[116].mxu0 }
 0x53b   : > { %v7974_v25 = vpop.eup %7973  ;;  %7993 = vrcp.f32 %v4912_v46  ;;  %v4913_v47 = vadd.f32 1.0, %v7972_v18  ;;  %v4411_v34 = vpop.f32.mrb[116].mxu1  ;;  %v4219_v28 = vadd.f32 %v4218_v11, %v13194_v6  ;;  %v8268_v18 = vld [vmem:[%s8559_s28 + $0x2b8] sm:$0xff] }
 0x53c   : > { %v7976_v26 = vpop.eup %7975  ;;  %7995 = vrcp.f32 %v4914_v45  ;;  %v4915_v33 = vadd.f32 1.0, %v7974_v25  ;;  %v4220_v57 = vpop.f32.mrb[117].mxu0  ;;  %v4412_v44 = vadd.f32 %v4411_v34, %v13196_v53 }
 0x53d   : > { %v7978_v19 = vpop.eup %7977  ;;  %7997 = vrcp.f32 %v4913_v47  ;;  %v4916_v41 = vadd.f32 1.0, %v7976_v26  ;;  %v4413_v42 = vpop.f32.mrb[117].mxu1  ;;  %v4221_v29 = vadd.f32 %v4220_v57, %v13198_v32  ;;  %v5865_v22 = vmul.f32 -1.442695, %v4219_v28 }
 0x53e   : > { %v7980_v30 = vpop.eup %7979  ;;  %7999 = vrcp.f32 %v4915_v33  ;;  %v4918_v63 = vadd.f32 1.0, %v7978_v19  ;;  %v4222_v36 = vpop.f32.mrb[118].mxu0  ;;  %v4414_v3 = vadd.f32 %v4413_v42, %v13203_v54  ;;  %v5867_v46 = vmul.f32 -1.442695, %v4412_v44 }
 0x53f   : > { %v7982_v52 = vpop.eup %7981  ;;  %8001 = vrcp.f32 %v4916_v41  ;;  %v4917_v55 = vadd.f32 1.0, %v7980_v30  ;;  %v4415_v23 = vpop.f32.mrb[118].mxu1  ;;  %v4223_v25 = vadd.f32 %v4222_v36, %v13194_v6  ;;  %v8270_v41 = vld [vmem:[%s8559_s28 + $0x2d0] sm:$0xff]  ;;  %v5866_v30 = vmul.f32 -1.442695, %v4221_v29 }
 0x540   : > { %v7984_v10 = vpop.eup %7983  ;;  %8003 = vrcp.f32 %v4918_v63  ;;  %v4919_v58 = vadd.f32 1.0, %v7982_v52  ;;  %v13605_v27 = vpop.f32.mrb[119].mxu0  ;;  %v4416_v12 = vadd.f32 %v4415_v23, %v13196_v53  ;;  %v5868_v34 = vmul.f32 -1.442695, %v4414_v3 }
 0x541   : > { %v7986_v1 = vpop.eup %7985  ;;  %8005 = vrcp.f32 %v4917_v55  ;;  %v4920_v9 = vadd.f32 1.0, %v7984_v10  ;;  %v13608_v15 = vpop.f32.mrb[119].mxu1  ;;  %v8272_v55 = vld [vmem:[%s8559_s28 + $0x2d8] sm:$0xff]  ;;  %v5869_v57 = vmul.f32 -1.442695, %v4223_v25  ;;  %v8273_v10 = vld [vmem:[%s8559_s28 + $0x2e0] sm:$0xff] }
 0x542   : > { %v7988_v59 = vpop.eup %7987  ;;  %v5292_v56 = vadd.f32 1.0, %v7986_v1  ;;  %8007 = vrcp.f32 %v4919_v58  ;;  %v5871_v36 = vmul.f32 -1.442695, %v4416_v12  ;;  %v8274_v1 = vld [vmem:[%s8559_s28 + $0x2f0] sm:$0xff]  ;;  %v4418_v12 = vadd.f32 %v13608_v15, %v13203_v54 }
 0x543   : > { %v7990_v4 = vpop.eup %7989  ;;  %v5294_v50 = vadd.f32 1.0, %v7988_v59  ;;  %8009 = vrcp.f32 %v4920_v9 }
 0x544   : > { %v7992_v5 = vpop.eup %7991  ;;  %v5420_v39 = vmul.f32 %v8265_v0, %v5292_v56  ;;  %v5293_v14 = vadd.f32 1.0, %v7990_v4  ;;  %8011 = vpow2.f32 %v5859_v62 }
 0x545   : > { %v7994_v38 = vpop.eup %7993  ;;  %v5422_v7 = vmul.f32 %v8266_v61, %v5294_v50  ;;  %v5295_v35 = vadd.f32 1.0, %v7992_v5  ;;  %8013 = vpow2.f32 %v5858_v40  ;;  %v8271_v40 = vld [vmem:[%s8559_s28 + $0x2c8] sm:$0xff]  ;;  %v8276_v5 = vld [vmem:[%s8559_s28 + $0x2f8] sm:$0xff]  ;;  %v8277_v61 = vld [vmem:[%s8559_s28 + $0x300] sm:$0xff] }
 0x546   : > { %v7996_v2 = vpop.eup %7995  ;;  %5548 = vst [vmem:[%s13257_s12 + $0x2a0] sm:$0xff] %v5420_v39  ;;  %v5421_v24 = vmul.f32 %v8267_v21, %v5293_v14  ;;  %v5296_v8 = vadd.f32 1.0, %v7994_v38  ;;  %8015 = vpow2.f32 %v5860_v49 }
 0x547   : > { %v7998_v16 = vpop.eup %7997  ;;  %5550 = vst [vmem:[%s13257_s12 + $0x2b0] sm:$0xff] %v5422_v7  ;;  %v5423_v45 = vmul.f32 %v8268_v18, %v5295_v35  ;;  %v5298_v17 = vadd.f32 1.0, %v7996_v2  ;;  %8017 = vpow2.f32 %v5861_v43 }
 0x548   : > { %v8000_v47 = vpop.eup %7999  ;;  %5549 = vst [vmem:[%s13257_s12 + $0x2a8] sm:$0xff] %v5421_v24  ;;  %v5424_v26 = vmul.f32 %v8269_v51, %v5296_v8  ;;  %v5297_v33 = vadd.f32 1.0, %v7998_v16  ;;  %8019 = vpow2.f32 %v5863_v37 }
 0x549   : > { %v8002_v19 = vpop.eup %8001  ;;  %5551 = vst [vmem:[%s13257_s12 + $0x2b8] sm:$0xff] %v5423_v45  ;;  %v5426_v62 = vmul.f32 %v8270_v41, %v5298_v17  ;;  %v5299_v48 = vadd.f32 1.0, %v8000_v47  ;;  %8021 = vpow2.f32 %v5862_v20  ;;  %v4228_v28 = vpop.f32.mrb[120].mxu0  ;;  %v8275_v20 = vld [vmem:[%s8559_s28 + $0x2e8] sm:$0xff] }
 0x54a   : > { %v8004_v63 = vpop.eup %8003  ;;  %5552 = vst [vmem:[%s13257_s12 + $0x2c0] sm:$0xff] %v5424_v26  ;;  %v5425_v31 = vmul.f32 %v8271_v40, %v5297_v33  ;;  %v5300_v11 = vadd.f32 1.0, %v8002_v19  ;;  %8023 = vpow2.f32 %v5864_v60  ;;  %v4421_v59 = vpop.f32.mrb[120].mxu1  ;;  %v4225_v33 = vadd.f32 %v13605_v27, %v13198_v32 }
 0x54b   : > { %v8006_v52 = vpop.eup %8005  ;;  %5554 = vst [vmem:[%s13257_s12 + $0x2d0] sm:$0xff] %v5426_v62  ;;  %v5427_v49 = vmul.f32 %v8272_v55, %v5299_v48  ;;  %v5302_v13 = vadd.f32 1.0, %v8004_v63  ;;  %8025 = vpow2.f32 %v5865_v22  ;;  %v4230_v50 = vpop.f32.mrb[121].mxu0  ;;  %v4229_v62 = vadd.f32 %v4228_v28, %v13194_v6 }
 0x54c   : > { %v8008_v42 = vpop.eup %8007  ;;  %5553 = vst [vmem:[%s13257_s12 + $0x2c8] sm:$0xff] %v5425_v31  ;;  %v5428_v58 = vmul.f32 %v8273_v10, %v5300_v11  ;;  %v5301_v43 = vadd.f32 1.0, %v8006_v52  ;;  %8027 = vpow2.f32 %v5867_v46  ;;  %v4423_v60 = vpop.f32.mrb[121].mxu1  ;;  %v4422_v48 = vadd.f32 %v4421_v59, %v13196_v53  ;;  %v8278_v59 = vld [vmem:[%s8559_s28 + $0x310] sm:$0xff] }
 0x54d   : > { %v8010_v23 = vpop.eup %8009  ;;  %5555 = vst [vmem:[%s13257_s12 + $0x2d8] sm:$0xff] %v5427_v49  ;;  %v5430_v9 = vmul.f32 %v8274_v1, %v5302_v13  ;;  %v5303_v37 = vadd.f32 1.0, %v8008_v42  ;;  %8029 = vpow2.f32 %v5866_v30  ;;  %v4232_v14 = vpop.f32.mrb[122].mxu0  ;;  %v4231_v40 = vadd.f32 %v4230_v50, %v13198_v32  ;;  %v8279_v50 = vld [vmem:[%s8559_s28 + $0x308] sm:$0xff] }
 0x54e   : > { %v8012_v56 = vpop.eup %8011  ;;  %5556 = vst [vmem:[%s13257_s12 + $0x2e0] sm:$0xff] %v5428_v58  ;;  %v5429_v44 = vmul.f32 %v8275_v20, %v5301_v43  ;;  %v5304_v4 = vadd.f32 1.0, %v8010_v23  ;;  %8031 = vpow2.f32 %v5868_v34  ;;  %v13636_v3 = vpop.f32.mrb[122].mxu1  ;;  %v4424_v27 = vadd.f32 %v4423_v60, %v13203_v54 }
 0x54f   : > { %v8014_v29 = vpop.eup %8013  ;;  %5558 = vst [vmem:[%s13257_s12 + $0x2f0] sm:$0xff] %v5430_v9  ;;  %v5431_v0 = vmul.f32 %v8276_v5, %v5303_v37  ;;  %v4922_v39 = vadd.f32 1.0, %v8012_v56  ;;  %8033 = vpow2.f32 %v5869_v57  ;;  %v4234_v22 = vpop.f32.mrb[123].mxu0  ;;  %v5870_v52 = vmul.f32 -1.442695, %v4225_v33 }
 0x550   : > { %v8016_v38 = vpop.eup %8015  ;;  %5557 = vst [vmem:[%s13257_s12 + $0x2e8] sm:$0xff] %v5429_v44  ;;  %v5432_v7 = vmul.f32 %v8277_v61, %v5304_v4  ;;  %v4921_v35 = vadd.f32 1.0, %v8014_v29  ;;  %8035 = vpow2.f32 %v5871_v36  ;;  %v13640_v2 = vpop.f32.mrb[123].mxu1  ;;  %v5872_v55 = vmul.f32 -1.442695, %v4418_v12 }
 0x551   : > { %v8018_v21 = vpop.eup %8017  ;;  %5559 = vst [vmem:[%s13257_s12 + $0x2f8] sm:$0xff] %v5431_v0  ;;  %8037 = vrcp.f32 %v4922_v39  ;;  %v4923_v24 = vadd.f32 1.0, %v8016_v38  ;;  %v5873_v57 = vmul.f32 -1.442695, %v4229_v62  ;;  %v5875_v42 = vmul.f32 -1.442695, %v4422_v48 }
 0x552   : > { %v8020_v8 = vpop.eup %8019  ;;  %5560 = vst [vmem:[%s13257_s12 + $0x300] sm:$0xff] %v5432_v7  ;;  %8039 = vrcp.f32 %v4921_v35  ;;  %v4924_v46 = vadd.f32 1.0, %v8018_v21  ;;  %v5874_v43 = vmul.f32 -1.442695, %v4231_v40  ;;  %v4233_v36 = vadd.f32 %v4232_v14, %v13194_v6  ;;  %v8280_v39 = vld [vmem:[%s8559_s28 + $0x318] sm:$0xff]  ;;  %v8281_v7 = vld [vmem:[%s8559_s28 + $0x320] sm:$0xff] }
 0x553   : > { %v8022_v16 = vpop.eup %8021  ;;  %8041 = vrcp.f32 %v4923_v24  ;;  %v4926_v18 = vadd.f32 1.0, %v8020_v8  ;;  %v5876_v9 = vmul.f32 -1.442695, %v4424_v27  ;;  %v4426_v37 = vadd.f32 %v13636_v3, %v13196_v53  ;;  %v8282_v24 = vld [vmem:[%s8559_s28 + $0x330] sm:$0xff] }
 0x554   : > { %v8024_v45 = vpop.eup %8023  ;;  %8043 = vrcp.f32 %v4924_v46  ;;  %v4925_v17 = vadd.f32 1.0, %v8022_v16  ;;  %v4235_v44 = vadd.f32 %v4234_v22, %v13198_v32  ;;  %v4428_v5 = vadd.f32 %v13640_v2, %v13203_v54 }
 0x555   : > { %v8026_v25 = vpop.eup %8025  ;;  %8045 = vrcp.f32 %v4926_v18  ;;  %v4927_v47 = vadd.f32 1.0, %v8024_v45  ;;  %v5877_v38 = vmul.f32 -1.442695, %v4233_v36  ;;  %v5879_v21 = vmul.f32 -1.442695, %v4426_v37  ;;  %v8283_v45 = vld [vmem:[%s8559_s28 + $0x328] sm:$0xff] }
 0x556   : > { %v8028_v51 = vpop.eup %8027  ;;  %8047 = vrcp.f32 %v4925_v17  ;;  %v4928_v26 = vadd.f32 1.0, %v8026_v25  ;;  %v5878_v16 = vmul.f32 -1.442695, %v4235_v44 }
 0x557   : > { %v8030_v19 = vpop.eup %8029  ;;  %8049 = vrcp.f32 %v4927_v47  ;;  %v4930_v41 = vadd.f32 1.0, %v8028_v51  ;;  %v5880_v47 = vmul.f32 -1.442695, %v4428_v5 }
 0x558   : > { %v8032_v30 = vpop.eup %8031  ;;  %8051 = vrcp.f32 %v4928_v26  ;;  %v4929_v63 = vadd.f32 1.0, %v8030_v19  ;;  %v8284_v26 = vld [vmem:[%s8559_s28 + $0x338] sm:$0xff] }
 0x559   : > { %v8034_v31 = vpop.eup %8033  ;;  %8053 = vrcp.f32 %v4930_v41  ;;  %v4931_v11 = vadd.f32 1.0, %v8032_v30  ;;  %v8285_v41 = vld [vmem:[%s8559_s28 + $0x340] sm:$0xff] }
 0x55a   : > { %v8036_v34 = vpop.eup %8035  ;;  %8055 = vrcp.f32 %v4929_v63  ;;  %v4932_v15 = vadd.f32 1.0, %v8034_v31  ;;  %v8286_v63 = vld [vmem:[%s8559_s28 + $0x350] sm:$0xff] }
 0x55b   : > { %v8038_v49 = vpop.eup %8037  ;;  %8057 = vrcp.f32 %v4931_v11  ;;  %v4934_v13 = vadd.f32 1.0, %v8036_v34 }
 0x55c   : > { %v8040_v10 = vpop.eup %8039  ;;  %v5306_v58 = vadd.f32 1.0, %v8038_v49  ;;  %8059 = vrcp.f32 %v4932_v15  ;;  %v8287_v15 = vld [vmem:[%s8559_s28 + $0x348] sm:$0xff] }
 0x55d   : > { %v8042_v23 = vpop.eup %8041  ;;  %v5305_v1 = vadd.f32 1.0, %v8040_v10  ;;  %8061 = vrcp.f32 %v4934_v13 }
 0x55e   : > { %v8044_v28 = vpop.eup %8043  ;;  %v5434_v56 = vmul.f32 %v8278_v59, %v5306_v58  ;;  %v5307_v20 = vadd.f32 1.0, %v8042_v23  ;;  %8063 = vpow2.f32 %v5870_v52 }
 0x55f   : > { %v8046_v4 = vpop.eup %8045  ;;  %v5433_v60 = vmul.f32 %v8279_v50, %v5305_v1  ;;  %v5308_v29 = vadd.f32 1.0, %v8044_v28  ;;  %8065 = vpow2.f32 %v5872_v55  ;;  %v8289_v1 = vld [vmem:[%s8559_s28 + $0x360] sm:$0xff] }
 0x560   : > { %v8048_v0 = vpop.eup %8047  ;;  %5562 = vst [vmem:[%s13257_s12 + $0x310] sm:$0xff] %v5434_v56  ;;  %v5435_v14 = vmul.f32 %v8280_v39, %v5307_v20  ;;  %v5310_v3 = vadd.f32 1.0, %v8046_v4  ;;  %8067 = vpow2.f32 %v5873_v57  ;;  %v8290_v20 = vld [vmem:[%s8559_s28 + $0x370] sm:$0xff] }
 0x561   : > { %v8050_v61 = vpop.eup %8049  ;;  %5561 = vst [vmem:[%s13257_s12 + $0x308] sm:$0xff] %v5433_v60  ;;  %v5436_v35 = vmul.f32 %v8281_v7, %v5308_v29  ;;  %v5309_v22 = vadd.f32 1.0, %v8048_v0  ;;  %8069 = vpow2.f32 %v5875_v42  ;;  %v8288_v42 = vld [vmem:[%s8559_s28 + $0x358] sm:$0xff] }
 0x562   : > { %v8052_v2 = vpop.eup %8051  ;;  %5563 = vst [vmem:[%s13257_s12 + $0x318] sm:$0xff] %v5435_v14  ;;  %v5438_v8 = vmul.f32 %v8282_v24, %v5310_v3  ;;  %v5311_v46 = vadd.f32 1.0, %v8050_v61  ;;  %8071 = vpow2.f32 %v5874_v43  ;;  %v4238_v11 = vpop.f32.mrb[124].mxu0 }
 0x563   : > { %v8054_v18 = vpop.eup %8053  ;;  %5564 = vst [vmem:[%s13257_s12 + $0x320] sm:$0xff] %v5436_v35  ;;  %v5437_v17 = vmul.f32 %v8283_v45, %v5309_v22  ;;  %v5312_v25 = vadd.f32 1.0, %v8052_v2  ;;  %8073 = vpow2.f32 %v5876_v9  ;;  %v4431_v27 = vpop.f32.mrb[124].mxu1  ;;  %v4239_v14 = vadd.f32 %v4238_v11, %v13194_v6 }
 0x564   : > { %v8056_v51 = vpop.eup %8055  ;;  %5566 = vst [vmem:[%s13257_s12 + $0x330] sm:$0xff] %v5438_v8  ;;  %v5439_v33 = vmul.f32 %v8284_v26, %v5311_v46  ;;  %v5314_v12 = vadd.f32 1.0, %v8054_v18  ;;  %8075 = vpow2.f32 %v5877_v38  ;;  %v4240_v49 = vpop.f32.mrb[125].mxu0  ;;  %v4432_v61 = vadd.f32 %v4431_v27, %v13196_v53  ;;  %v8292_v27 = vld [vmem:[%s8559_s28 + $0x378] sm:$0xff] }
 0x565   : > { %v8058_v19 = vpop.eup %8057  ;;  %5565 = vst [vmem:[%s13257_s12 + $0x328] sm:$0xff] %v5437_v17  ;;  %v5440_v62 = vmul.f32 %v8285_v41, %v5312_v25  ;;  %v5313_v48 = vadd.f32 1.0, %v8056_v51  ;;  %8077 = vpow2.f32 %v5879_v21  ;;  %v4433_v13 = vpop.f32.mrb[125].mxu1  ;;  %v4241_v22 = vadd.f32 %v4240_v49, %v13198_v32 }
 0x566   : > { %v8060_v30 = vpop.eup %8059  ;;  %5567 = vst [vmem:[%s13257_s12 + $0x338] sm:$0xff] %v5439_v33  ;;  %v5442_v40 = vmul.f32 %v8286_v63, %v5314_v12  ;;  %v5315_v31 = vadd.f32 1.0, %v8058_v19  ;;  %8079 = vpow2.f32 %v5878_v16  ;;  %v4242_v43 = vpop.f32.mrb[126].mxu0  ;;  %v4434_v24 = vadd.f32 %v4433_v13, %v13203_v54  ;;  %v8291_v63 = vld [vmem:[%s8559_s28 + $0x368] sm:$0xff] }
 0x567   : > { %v8062_v34 = vpop.eup %8061  ;;  %5568 = vst [vmem:[%s13257_s12 + $0x340] sm:$0xff] %v5440_v62  ;;  %v5441_v52 = vmul.f32 %v8287_v15, %v5313_v48  ;;  %v5316_v55 = vadd.f32 1.0, %v8060_v30  ;;  %8081 = vpow2.f32 %v5880_v47  ;;  %v4435_v36 = vpop.f32.mrb[126].mxu1  ;;  %v5881_v16 = vmul.f32 -1.442695, %v4239_v14 }
 0x568   : > { %v8064_v57 = vpop.eup %8063  ;;  %5570 = vst [vmem:[%s13257_s12 + $0x350] sm:$0xff] %v5442_v40  ;;  %v5443_v10 = vmul.f32 %v8288_v42, %v5315_v31  ;;  %v5318_v58 = vadd.f32 1.0, %v8062_v34  ;;  %v4244_v28 = vpop.f32.mrb[127].mxu0  ;;  %v4243_v18 = vadd.f32 %v4242_v43, %v13194_v6  ;;  %v5883_v17 = vmul.f32 -1.442695, %v4432_v61  ;;  %v8294_v42 = vld [vmem:[%s8559_s28 + $0x390] sm:$0xff] }
 0x569   : > { %v8066_v23 = vpop.eup %8065  ;;  %5569 = vst [vmem:[%s13257_s12 + $0x348] sm:$0xff] %v5441_v52  ;;  %v5444_v9 = vmul.f32 %v8289_v1, %v5316_v55  ;;  %v4933_v37 = vadd.f32 1.0, %v8064_v57  ;;  %v4437_v59 = vpop.f32.mrb[127].mxu1  ;;  %v4436_v25 = vadd.f32 %v4435_v36, %v13196_v53  ;;  %v5882_v47 = vmul.f32 -1.442695, %v4241_v22  ;;  %v8293_v55 = vld [vmem:[%s8559_s28 + $0x380] sm:$0xff] }
 0x56a   : > { %v8068_v56 = vpop.eup %8067  ;;  %5571 = vst [vmem:[%s13257_s12 + $0x358] sm:$0xff] %v5443_v10  ;;  %v5446_v44 = vmul.f32 %v8290_v20, %v5318_v58  ;;  %v4935_v4 = vadd.f32 1.0, %v8066_v23  ;;  %v4245_v51 = vadd.f32 %v4244_v28, %v13198_v32  ;;  %v5884_v26 = vmul.f32 -1.442695, %v4434_v24  ;;  %v8295_v36 = vld [vmem:[%s8559_s28 + $0x388] sm:$0xff]  ;;  %v8297_v20 = vld [vmem:[%s8559_s28 + $0x3a0] sm:$0xff] }
 0x56b   : > { %v8070_v50 = vpop.eup %8069  ;;  %5572 = vst [vmem:[%s13257_s12 + $0x360] sm:$0xff] %v5444_v9  ;;  %8083 = vrcp.f32 %v4933_v37  ;;  %v4936_v60 = vadd.f32 1.0, %v8068_v56  ;;  %v4438_v33 = vadd.f32 %v4437_v59, %v13203_v54  ;;  %v5885_v19 = vmul.f32 -1.442695, %v4243_v18  ;;  %v8296_v37 = vld [vmem:[%s8559_s28 + $0x398] sm:$0xff] }
 0x56c   : > { %v8072_v29 = vpop.eup %8071  ;;  %5574 = vst [vmem:[%s13257_s12 + $0x370] sm:$0xff] %v5446_v44  ;;  %8085 = vrcp.f32 %v4935_v4  ;;  %v4938_v5 = vadd.f32 1.0, %v8070_v50  ;;  %v5887_v62 = vmul.f32 -1.442695, %v4436_v25  ;;  %v5886_v30 = vmul.f32 -1.442695, %v4245_v51 }
 0x56d   : > { %v8074_v0 = vpop.eup %8073  ;;  %8087 = vrcp.f32 %v4936_v60  ;;  %v4937_v39 = vadd.f32 1.0, %v8072_v29  ;;  %v5888_v54 = vmul.f32 -1.442695, %v4438_v33  ;;  %v8298_v60 = vld [vmem:[%s8559_s28 + $0x3b0] sm:$0xff]  ;;  %v8300_v61 = vld [vmem:[%s8559_s28 + $0x3b8] sm:$0xff] }
 0x56e   : > { %v8076_v3 = vpop.eup %8075  ;;  %8089 = vrcp.f32 %v4938_v5  ;;  %v4939_v38 = vadd.f32 1.0, %v8074_v0 }
 0x56f   : > { %v8078_v7 = vpop.eup %8077  ;;  %8091 = vrcp.f32 %v4937_v39  ;;  %v4940_v35 = vadd.f32 1.0, %v8076_v3  ;;  %v8299_v39 = vld [vmem:[%s8559_s28 + $0x3a8] sm:$0xff] }
 0x570   : > { %v8080_v21 = vpop.eup %8079  ;;  %8093 = vrcp.f32 %v4939_v38  ;;  %v4942_v2 = vadd.f32 1.0, %v8078_v7 }
 0x571   : > { %v8082_v8 = vpop.eup %8081  ;;  %8095 = vrcp.f32 %v4940_v35  ;;  %v4941_v46 = vadd.f32 1.0, %v8080_v21 }
 0x572   : > { %8097 = vrcp.f32 %v4942_v2  ;;  %v4943_v45 = vadd.f32 1.0, %v8082_v8 }
 0x573   : > { %8099 = vrcp.f32 %v4941_v46 }
 0x574   : > { %8101 = vrcp.f32 %v4943_v45 }
 0x575   : > { %v8084_v12 = vpop.eup %8083  ;;  %8103 = vpow2.f32 %v5881_v16 }
 0x576   : > { %v8086_v41 = vpop.eup %8085  ;;  %v5317_v6 = vadd.f32 1.0, %v8084_v12  ;;  %8105 = vpow2.f32 %v5883_v17 }
 0x577   : > { %v8088_v48 = vpop.eup %8087  ;;  %v5319_v53 = vadd.f32 1.0, %v8086_v41  ;;  %8107 = vpow2.f32 %v5882_v47  ;;  %v8301_v41 = vld [vmem:[%s8559_s28 + $0x3c0] sm:$0xff] }
 0x578   : > { %v8090_v32 = vpop.eup %8089  ;;  %v5445_v40 = vmul.f32 %v8291_v63, %v5317_v6  ;;  %v5320_v31 = vadd.f32 1.0, %v8088_v48  ;;  %8109 = vpow2.f32 %v5884_v26 }
 0x579   : > { %v8092_v11 = vpop.eup %8091  ;;  %v5447_v34 = vmul.f32 %v8292_v27, %v5319_v53  ;;  %v5322_v15 = vadd.f32 1.0, %v8090_v32  ;;  %8111 = vpow2.f32 %v5885_v19  ;;  %v8302_v53 = vld [vmem:[%s8559_s28 + $0x3d0] sm:$0xff]  ;;  %v8304_v27 = vld [vmem:[%s8559_s28 + $0x3d8] sm:$0xff] }
 0x57a   : > { %v8094_v52 = vpop.eup %8093  ;;  %5573 = vst [vmem:[%s13257_s12 + $0x368] sm:$0xff] %v5445_v40  ;;  %v5448_v49 = vmul.f32 %v8293_v55, %v5320_v31  ;;  %v5321_v13 = vadd.f32 1.0, %v8092_v11  ;;  %8113 = vpow2.f32 %v5887_v62  ;;  %v8303_v40 = vld [vmem:[%s8559_s28 + $0x3c8] sm:$0xff]  ;;  %v8305_v55 = vld [vmem:[%s8559_s28 + $0x3e0] sm:$0xff] }
 0x57b   : > { %v8096_v57 = vpop.eup %8095  ;;  %5575 = vst [vmem:[%s13257_s12 + $0x378] sm:$0xff] %v5447_v34  ;;  %v5450_v10 = vmul.f32 %v8294_v42, %v5322_v15  ;;  %v5323_v58 = vadd.f32 1.0, %v8094_v52  ;;  %8115 = vpow2.f32 %v5886_v30 }
 0x57c   : > { %v8098_v43 = vpop.eup %8097  ;;  %5576 = vst [vmem:[%s13257_s12 + $0x380] sm:$0xff] %v5448_v49  ;;  %v5449_v23 = vmul.f32 %v8295_v36, %v5321_v13  ;;  %v5324_v1 = vadd.f32 1.0, %v8096_v57  ;;  %8117 = vpow2.f32 %v5888_v54  ;;  %v8306_v57 = vld [vmem:[%s8559_s28 + $0x3f0] sm:$0xff]  ;;  %v8308_v36 = vld [vmem:[%s8559_s28 + $0x3f8] sm:$0xff] }
 0x57d   : > { %v8100_v9 = vpop.eup %8099  ;;  %5578 = vst [vmem:[%s13257_s12 + $0x390] sm:$0xff] %v5450_v10  ;;  %v5451_v28 = vmul.f32 %v8296_v37, %v5323_v58  ;;  %v5326_v59 = vadd.f32 1.0, %v8098_v43  ;;  %v8307_v58 = vld [vmem:[%s8559_s28 + $0x3e8] sm:$0xff] }
 0x57e   : > { %v8102_v56 = vpop.eup %8101  ;;  %5577 = vst [vmem:[%s13257_s12 + $0x388] sm:$0xff] %v5449_v23  ;;  %v5452_v44 = vmul.f32 %v8297_v20, %v5324_v1  ;;  %v5325_v4 = vadd.f32 1.0, %v8100_v9 }
 0x57f   : > { %v8104_v50 = vpop.eup %8103  ;;  %5579 = vst [vmem:[%s13257_s12 + $0x398] sm:$0xff] %v5451_v28  ;;  %v5454_v29 = vmul.f32 %v8298_v60, %v5326_v59  ;;  %v5327_v5 = vadd.f32 1.0, %v8102_v56 }
 0x580   : > { %v8106_v0 = vpop.eup %8105  ;;  %5580 = vst [vmem:[%s13257_s12 + $0x3a0] sm:$0xff] %v5452_v44  ;;  %v5453_v14 = vmul.f32 %v8299_v39, %v5325_v4  ;;  %v4944_v3 = vadd.f32 1.0, %v8104_v50 }
 0x581   : > { %v8108_v38 = vpop.eup %8107  ;;  %5582 = vst [vmem:[%s13257_s12 + $0x3b0] sm:$0xff] %v5454_v29  ;;  %v5455_v7 = vmul.f32 %v8300_v61, %v5327_v5  ;;  %v4946_v35 = vadd.f32 1.0, %v8106_v0 }
 0x582   : > { %v8110_v22 = vpop.eup %8109  ;;  %5581 = vst [vmem:[%s13257_s12 + $0x3a8] sm:$0xff] %v5453_v14  ;;  %8119 = vrcp.f32 %v4944_v3  ;;  %v4945_v21 = vadd.f32 1.0, %v8108_v38 }
 0x583   : > { %v8112_v2 = vpop.eup %8111  ;;  %5583 = vst [vmem:[%s13257_s12 + $0x3b8] sm:$0xff] %v5455_v7  ;;  %8121 = vrcp.f32 %v4946_v35  ;;  %v4947_v24 = vadd.f32 1.0, %v8110_v22 }
 0x584   : > { %v8114_v8 = vpop.eup %8113  ;;  %8123 = vrcp.f32 %v4945_v21  ;;  %v4948_v46 = vadd.f32 1.0, %v8112_v2 }
 0x585   : > { %v8116_v16 = vpop.eup %8115  ;;  %8125 = vrcp.f32 %v4947_v24  ;;  %v4950_v18 = vadd.f32 1.0, %v8114_v8 }
 0x586   : > { %v8118_v45 = vpop.eup %8117  ;;  %8127 = vrcp.f32 %v4948_v46  ;;  %v4949_v17 = vadd.f32 1.0, %v8116_v16 }
 0x587   : > { %8129 = vrcp.f32 %v4950_v18  ;;  %v4951_v25 = vadd.f32 1.0, %v8118_v45 }
 0x588   : > { %8131 = vrcp.f32 %v4949_v17 }
 0x589   : > { %8133 = vrcp.f32 %v4951_v25 }
 0x58c   : > { %v8120_v47 = vpop.eup %8119 }
 0x58d   : > { %v8122_v51 = vpop.eup %8121  ;;  %v5328_v26 = vadd.f32 1.0, %v8120_v47 }
 0x58e   : > { %v8124_v33 = vpop.eup %8123  ;;  %v5330_v12 = vadd.f32 1.0, %v8122_v51 }
 0x58f   : > { %v8126_v19 = vpop.eup %8125  ;;  %v5456_v6 = vmul.f32 %v8301_v41, %v5328_v26  ;;  %v5329_v62 = vadd.f32 1.0, %v8124_v33 }
 0x590   : > { %v8128_v48 = vpop.eup %8127  ;;  %v5458_v30 = vmul.f32 %v8302_v53, %v5330_v12  ;;  %v5331_v32 = vadd.f32 1.0, %v8126_v19 }
 0x591   : > { %v8130_v63 = vpop.eup %8129  ;;  %5584 = vst [vmem:[%s13257_s12 + $0x3c0] sm:$0xff] %v5456_v6  ;;  %v5457_v31 = vmul.f32 %v8303_v40, %v5329_v62  ;;  %v5332_v54 = vadd.f32 1.0, %v8128_v48 }
 0x592   : > { %v8132_v11 = vpop.eup %8131  ;;  %5586 = vst [vmem:[%s13257_s12 + $0x3d0] sm:$0xff] %v5458_v30  ;;  %v5459_v34 = vmul.f32 %v8304_v27, %v5331_v32  ;;  %v5334_v15 = vadd.f32 1.0, %v8130_v63 }
 0x593   : > { %v8134_v52 = vpop.eup %8133  ;;  %5585 = vst [vmem:[%s13257_s12 + $0x3c8] sm:$0xff] %v5457_v31  ;;  %v5460_v49 = vmul.f32 %v8305_v55, %v5332_v54  ;;  %v5333_v13 = vadd.f32 1.0, %v8132_v11 }
 0x594   : > { %5587 = vst [vmem:[%s13257_s12 + $0x3d8] sm:$0xff] %v5459_v34  ;;  %v5462_v42 = vmul.f32 %v8306_v57, %v5334_v15  ;;  %v5335_v10 = vadd.f32 1.0, %v8134_v52 }
 0x595   : > { %5588 = vst [vmem:[%s13257_s12 + $0x3e0] sm:$0xff] %v5460_v49  ;;  %v5461_v43 = vmul.f32 %v8307_v58, %v5333_v13 }
 0x596   : > { %5590 = vst [vmem:[%s13257_s12 + $0x3f0] sm:$0xff] %v5462_v42  ;;  %v5463_v23 = vmul.f32 %v8308_v36, %v5335_v10 }
 0x597   : > { %5589 = vst [vmem:[%s13257_s12 + $0x3e8] sm:$0xff] %v5461_v43 }
 0x598   : > { %5591 = vst [vmem:[%s13257_s12 + $0x3f8] sm:$0xff] %v5463_v23 }
 0x599   : > { %8352 = shalt.err (!%p8349_p2)
}
 0x59a   : > { %s8353_s28 = scalar_lea.hbm %s13729_s11, 16384  ;;  %s8357_s7 = scalar_lea.hbm %s13784_s5, 32768 }
 0x59b   : > { %p8354_p4 = scmp.ne.s32.totalorder %s13729_s11, %s8353_s28  ;;  %p8358_p9 = scmp.lt.u32.totalorder %s13729_s11, %s13784_s5 }
 0x59c   : > { %p8359_p1 = scmp.lt.u32.totalorder %s8357_s7, %s8353_s28  ;;  %p8361_p6 = scmp.lt.u32.totalorder %s8353_s28, %s13729_s11 }
 0x59d   : > { %p8355_p5 = pnand %p8354_p4, %p14779_p11 }
 0x59e   : > { %p8360_p3 = por %p8359_p1, %p8358_p9 }
 0x59f   : > { %p8356_p7 = pneg %p8355_p5 }
 0x5a0   : > { %p8362_p12 = por %p8361_p6, %p8360_p3 }
 0x5a2   : > { %p8363_p13 = pnand %p8362_p12, %p8356_p7 }
 0x5a4   : > { %8366 = shalt.err (!%p8363_p13)
}
 0x5a5   : > { %s8417_s25 = smov 512   ;;  %s8418_s22 = smov 32  }
 0x5a6   : > { %6125 = dma.vmem_to_hbm [thread:$0]  (%p14779_p11), %s13731_s14, 16384, %s13729_s11, %s5593_s13, %s8417_s25, %s8417_s25, %s8418_s22  }
 0x5a7 PF: > { %s5622_s10 = sand.u32 1, %s8393_s18   ;;  %p14780_p8 = scmp.ne.s32.totalorder %s14114_s6, 0 }
 0x5a8   : > { %p14781_p10 = scmp.ge.s32.totalorder %s8405_s21, 2  ;;  %s5623_s17 = scalar_lea.sflag [#allocation4], %s5622_s10 }
 0x5aa   : > { %p6132_p0 = pnand %p14781_p10, %p14780_p8 }
 0x5ac   : > { %8388 = dma.done.wait (!%p6132_p0), %s5623_s17, 16384  }
 0x5ad   : > { %8390 = vsyncadd (!%p6132_p0), %s5623_s17, 4294950912  ;;  %p18_p2 = scmp.ge.s32.totalorder %s8474_s24, 4   ;;  %s14782_s18 = smov %s8397_s19 }
 0x5ae   : > { %s14783_s19 = smov %s8401_s20  ;;  %s14784_s20 = smov %s8486_s27 }
 0x5af   : > { %s14785_s21 = smov %s8474_s24  ;;  %20 = sbr.rel (!%p18_p2) target bundleno = 5 (0x5), region = 85 }
 0x5b6   :  { %5628 = vsyncpa [#allocation3], 1 }
 0x5b7   :  { %5630 = vsyncpa [#allocation3 + $0x1], 1 }
 0x5b8   :  { %5631 = vsyncpa [#allocation4], 1 }
 0x5b9   :  { %5633 = vsyncpa [#allocation4 + $0x1], 1 }

</bundles_post_ra>
